<compile_context>
chip_gen: v7x
topology: tpu7x:2x2x1
jax: 0.10.0
libtpu: 0.0.40
codegen_flags: <defaults>
</compile_context>

<pallas_src>
import functools

import jax
import jax.numpy as jnp
from jax.experimental import pallas as pl
from jax.experimental.pallas import tpu as pltpu

LANE = 128


def _round_up(x, m):
    return (x + m - 1) // m * m


def _num_tensorcores():
    """Generation-aware TC count: v7x / v4 megacore chips can occupy 2 cores
    via a 'parallel' grid axis; v5e / v6e have a single TensorCore."""
    try:
        kind = jax.devices()[0].device_kind.lower()
    except Exception:
        return 1
    if "v7" in kind or "v4" in kind:
        return 2
    return 1


NUM_TC = _num_tensorcores()


def _choose_tm(m, force_single):
    """Full-M single block on 1-TC chips (grid steps are pure overhead there);
    split large-M layers into exactly NUM_TC row chunks on megacore parts."""
    # TODO(synk): if batch grows, replace force_single for the BN layers with a
    # partial-stats grid (colsum/colsq accumulated in VMEM scratch) so they are
    # not pinned to one TensorCore on v7x.
    if force_single or NUM_TC <= 1 or m < 256:
        return m
    tm = m // NUM_TC
    if tm * NUM_TC == m and tm % 8 == 0:
        return tm
    return m


# ---------------------------------------------------------------------------
# Fused matmul Pallas kernel:  out = act( BN( A @ W + bias ) )
# ---------------------------------------------------------------------------
def _fused_mm_kernel(*refs, act, has_bias, bn_groups):
    it = iter(refs)
    a_ref = next(it)
    w_ref = next(it)
    bias_ref = next(it) if has_bias else None
    gamma_ref = next(it) if bn_groups else None
    beta_ref = next(it) if bn_groups else None
    o_ref = next(it)

    acc = jnp.dot(a_ref[...], w_ref[...], preferred_element_type=jnp.float32)
    if has_bias:
        acc = acc + bias_ref[...]

    if bn_groups:
        # Training-mode batch-norm over all rows of this (single) block.
        # Columns are `bn_groups` sub-pixel phase groups sharing per-channel
        # stats; pooling + broadcast is done with circular lane rolls (XLU)
        # since npad == bn_groups * group_width.
        m, npad = acc.shape
        cg = npad // bn_groups
        colsum = jnp.sum(acc, axis=0, keepdims=True)          # (1, N)
        colsq = jnp.sum(acc * acc, axis=0, keepdims=True)     # (1, N)
        s, q = colsum, colsq
        for g in range(1, bn_groups):
            s = s + pltpu.roll(colsum, g * cg, 1)
            q = q + pltpu.roll(colsq, g * cg, 1)
        inv_cnt = 1.0 / float(m * bn_groups)
        mean = s * inv_cnt
        var = q * inv_cnt - mean * mean                        # biased (torch)
        acc = (acc - mean) * jax.lax.rsqrt(var + 1e-5) * gamma_ref[...] + beta_ref[...]

    if act == "relu":
        acc = jnp.maximum(acc, 0.0)
    elif act == "tanh":
        acc = jnp.tanh(acc)
    o_ref[...] = acc.astype(o_ref.dtype)


def fused_matmul(a, w_packed, *, bias=None, gamma=None, beta=None,
                 act="none", bn_groups=0, out_dtype=jnp.bfloat16):
    """A:(M,K) @ W:(Kp,Npad) (pre-packed bf16, K/N padded) -> (M,Npad).

    Fused epilogue: +bias, training-mode BatchNorm (stats pooled across
    `bn_groups` phase column groups), relu / tanh.  Caller slices valid cols.
    """
    m, k = a.shape
    kp, npad = w_packed.shape
    if k < kp:
        a = jnp.pad(a, ((0, 0), (0, kp - k)))
    a = a.astype(jnp.bfloat16)                       # no-op when already bf16
    if bn_groups:
        assert gamma is not None and beta is not None and npad % bn_groups == 0

    tm = _choose_tm(m, force_single=bn_groups > 0)
    grid_m = m // tm
    assert grid_m * tm == m

    kernel = functools.partial(_fused_mm_kernel, act=act,
                               has_bias=bias is not None, bn_groups=bn_groups)

    in_specs = [pl.BlockSpec((tm, kp), lambda i: (i, 0)),
                pl.BlockSpec((kp, npad), lambda i: (0, 0))]
    args = [a, w_packed]
    if bias is not None:
        in_specs.append(pl.BlockSpec((1, npad), lambda i: (0, 0)))
        args.append(bias.reshape(1, npad).astype(jnp.float32))
    if bn_groups:
        for v in (gamma, beta):
            in_specs.append(pl.BlockSpec((1, npad), lambda i: (0, 0)))
            args.append(v.reshape(1, npad).astype(jnp.float32))

    return pl.pallas_call(
        kernel,
        out_shape=jax.ShapeDtypeStruct((m, npad), out_dtype),
        grid_spec=pltpu.PrefetchScalarGridSpec(
            num_scalar_prefetch=0,
            grid=(grid_m,),
            in_specs=in_specs,
            out_specs=pl.BlockSpec((tm, npad), lambda i: (i, 0)),
        ),
        compiler_params=pltpu.CompilerParams(
            dimension_semantics=("parallel",)),
    )(*args)


# ---------------------------------------------------------------------------
# Fully-fused ResBlock kernel: relu(conv2(relu(conv1(x)))) + res_conv(x)
# in ONE pallas_call (conv1 + 1x1 shortcut share a 256-wide matmul, conv2 is
# 9 per-tap dots over a spatially padded VMEM copy of h1).
# ---------------------------------------------------------------------------
def _resblock_kernel(cols_ref, w1_ref, b1_ref, w2_ref, b2_ref, o_ref, hpad_ref,
                     *, n, h, w):
    m = n * h * w
    # matmul 1: lanes 0..127 = conv1 pre-act, lanes 128..255 = 1x1 shortcut
    acc1 = jnp.dot(cols_ref[...], w1_ref[...],
                   preferred_element_type=jnp.float32) + b1_ref[...]
    h1 = jnp.maximum(acc1[:, :LANE], 0.0)            # relu(conv1(x))
    shortcut = acc1[:, LANE:]                        # res_conv(x) (no act)

    # zero-padded h1 plane kept in VMEM scratch (in-kernel im2col for conv2)
    hpad_ref[...] = jnp.zeros_like(hpad_ref)
    hpad_ref[:, 1:h + 1, 1:w + 1, :] = h1.reshape(n, h, w, LANE)

    # conv2 as 9 shifted-window dots accumulated in f32
    c2 = b2_ref[...]
    for dy in range(3):
        for dx in range(3):
            tap = hpad_ref[:, dy:dy + h, dx:dx + w, :].reshape(m, LANE)
            c2 = c2 + jnp.dot(tap.astype(jnp.bfloat16), w2_ref[dy * 3 + dx],
                              preferred_element_type=jnp.float32)

    out = jnp.maximum(c2, 0.0) + shortcut            # Block(x) + res_conv(x)
    o_ref[...] = out.astype(o_ref.dtype)


def resblock(x, blk):
    n, h, w, cin = x.shape
    cout = blk["cout"]
    m = n * h * w
    cols, _ = _im2col(x, 3, 3, 1, 1)                 # (M, 9*cin)
    k1p = blk["w1"].shape[0]
    if cols.shape[1] < k1p:
        cols = jnp.pad(cols, ((0, 0), (0, k1p - cols.shape[1])))
    kernel = functools.partial(_resblock_kernel, n=n, h=h, w=w)
    out = pl.pallas_call(
        kernel,
        out_shape=jax.ShapeDtypeStruct((m, LANE), jnp.bfloat16),
        grid_spec=pltpu.PrefetchScalarGridSpec(
            num_scalar_prefetch=0,
            grid=(1,),
            in_specs=[
                pl.BlockSpec((m, k1p), lambda i: (0, 0)),
                pl.BlockSpec((k1p, 2 * LANE), lambda i: (0, 0)),
                pl.BlockSpec((1, 2 * LANE), lambda i: (0, 0)),
                pl.BlockSpec((9, LANE, LANE), lambda i: (0, 0, 0)),
                pl.BlockSpec((1, LANE), lambda i: (0, 0)),
            ],
            out_specs=pl.BlockSpec((m, LANE), lambda i: (0, 0)),
            scratch_shapes=[pltpu.VMEM((n, h + 2, w + 2, LANE), jnp.float32)],
        ),
        compiler_params=pltpu.CompilerParams(
            dimension_semantics=("arbitrary",)),
    )(cols.astype(jnp.bfloat16), blk["w1"], blk["b1"], blk["w2"], blk["b2"])
    return out[:, :cout].reshape(n, h, w, cout)


# ---------------------------------------------------------------------------
# im2col / layer wrappers (plain-XLA glue around the fused kernels)
# ---------------------------------------------------------------------------
def _im2col(x, kh, kw, stride, pad):
    """x: (N, H, W, C) -> (N*OH*OW, KH*KW*C), tap-major / channel-minor."""
    # TODO(synk): conv1/d4's im2col is still materialized by XLA; fold it into
    # the kernel via per-tap shifted reads if HBM glue shows up in traces.
    if pad:
        x = jnp.pad(x, ((0, 0), (pad, pad), (pad, pad), (0, 0)))
    n, h, w, c = x.shape
    oh = (h - kh) // stride + 1
    ow = (w - kw) // stride + 1
    taps = []
    for i in range(kh):
        for j in range(kw):
            taps.append(x[:, i:i + stride * oh:stride, j:j + stride * ow:stride, :])
    patches = jnp.stack(taps, axis=3)                # (N, OH, OW, KH*KW, C)
    return patches.reshape(n * oh * ow, kh * kw * c), (n, oh, ow)


def conv2d(x, layer, *, stride=1, pad=0, act="none", out_dtype=jnp.bfloat16):
    cols, dims = _im2col(x, layer["kh"], layer["kw"], stride, pad)
    out = fused_matmul(cols, layer["w"], bias=layer["b"], act=act,
                       out_dtype=out_dtype)
    return out, dims


def deconv_subpixel(x, layer, *, act, fuse_bn, out_dtype=jnp.bfloat16):
    """ConvTranspose2d(k=5, s=2, p=2, out_pad=1) via sub-pixel decomposition:
    one 3x3 stride-1 matmul producing 4 phase banks, interleaved afterwards."""
    n, h, w, _ = x.shape
    oc, ocp = layer["oc"], layer["ocp"]
    cols, _ = _im2col(x, 3, 3, 1, 1)
    out = fused_matmul(cols, layer["w"], bias=layer.get("b"),
                       gamma=layer.get("g"), beta=layer.get("beta"),
                       act=act, bn_groups=4 if fuse_bn else 0,
                       out_dtype=out_dtype)
    out = out.reshape(n, h, w, 2, 2, ocp)[..., :oc]   # (..., r, s, C)
    out = out.transpose(0, 1, 3, 2, 4, 5).reshape(n, 2 * h, 2 * w, oc)
    return out


def maxpool2x2(x):
    # Tiny tensors: one XLA reshape+max fuses with the neighbouring glue.
    n, h, w, c = x.shape
    return x.reshape(n, h // 2, 2, w // 2, 2, c).max(axis=(2, 4))


# ---------------------------------------------------------------------------
# Parameter init (deterministic synthetic) and one-time weight packing
# ---------------------------------------------------------------------------
def pack_conv(w, b):
    """torch Conv2d weight (OC, IC, KH, KW) -> im2col weight (Kp, Npad) bf16."""
    oc, ic, kh, kw = w.shape
    k = kh * kw * ic
    kp = _round_up(k, 16)
    npad = _round_up(oc, LANE)
    w2d = jnp.transpose(w, (2, 3, 1, 0)).reshape(k, oc)
    w2d = jnp.pad(w2d, ((0, kp - k), (0, npad - oc)))
    return {"w": w2d.astype(jnp.bfloat16),
            "b": jnp.pad(b, (0, npad - oc)).astype(jnp.float32),
            "kh": kh, "kw": kw, "oc": oc}


def pack_resblock(w1, b1, w2, b2, wrc, brc):
    """Pack ResBlock: conv1 + 1x1 shortcut share one (Kp, 256) weight
    (shortcut lives on the centre-tap rows of lanes 128..255); conv2 is packed
    as 9 per-tap (128, 128) banks with zero-padded input-channel rows."""
    cin = w1.shape[0]
    cout = w2.shape[0]
    k1 = 9 * cin
    k1p = _round_up(k1, 16)

    w1_2d = jnp.transpose(w1, (2, 3, 1, 0)).reshape(k1, cin)   # tap-major rows
    bank0 = jnp.pad(w1_2d, ((0, k1p - k1), (0, LANE - cin)))
    rc2d = wrc.reshape(cout, cin).T                            # (cin, cout)
    bank1 = jnp.zeros((k1p, LANE), jnp.float32)
    bank1 = bank1.at[4 * cin:5 * cin, :cout].set(rc2d)         # centre tap
    w1p = jnp.concatenate([bank0, bank1], axis=1).astype(jnp.bfloat16)
    b1p = jnp.concatenate([jnp.pad(b1, (0, LANE - cin)),
                           jnp.pad(brc, (0, LANE - cout))]).astype(jnp.float32)

    w2_t = jnp.transpose(w2, (2, 3, 1, 0)).reshape(9, cin, cout)
    w2p = jnp.zeros((9, LANE, LANE), jnp.float32)
    w2p = w2p.at[:, :cin, :cout].set(w2_t)
    b2p = jnp.pad(b2, (0, LANE - cout)).astype(jnp.float32)

    return {"w1": w1p, "b1": b1p.reshape(1, 2 * LANE),
            "w2": w2p.astype(jnp.bfloat16), "b2": b2p.reshape(1, LANE),
            "cout": cout}


def pack_linear(w, gamma, beta, perm=None):
    """torch Linear weight (OUT, IN) -> (IN, Npad) bf16; optional output-column
    permutation applied at pack time (so the matmul emits NHWC directly)."""
    out_dim, _ = w.shape
    npad = _round_up(out_dim, LANE)
    wt = w.T
    if perm is not None:
        wt = wt[:, perm]
        gamma = gamma[perm]
        beta = beta[perm]
    pad = (0, npad - out_dim)
    return {"w": jnp.pad(wt, ((0, 0), pad)).astype(jnp.bfloat16),
            "g": jnp.pad(gamma, pad).astype(jnp.float32),
            "beta": jnp.pad(beta, pad).astype(jnp.float32),
            "oc": out_dim}


def pack_deconv(w, b=None, gamma=None, beta=None):
    """torch ConvTranspose2d weight (IC, OC, 5, 5) -> sub-pixel weight
    (Kp, 4*OCp) bf16 where OCp = (4*OC rounded to 128)/4 per-phase channels.

    Phase (r, s) of the stride-2 output reads a 3x3 window of the 1-padded
    input; tap (a, b) uses original kernel index k_h = r + 4 - 2a (if valid).
    """
    ic, oc, kh, kw = w.shape
    assert (kh, kw) == (5, 5)
    npad = _round_up(4 * oc, LANE)
    ocp = npad // 4
    k = 9 * ic
    kp = _round_up(k, 16)
    w_sub = jnp.zeros((3, 3, ic, 4, ocp), jnp.float32)
    for r in range(2):
        for s_ in range(2):
            p = 2 * r + s_
            for a in range(3):
                k_h = r + 4 - 2 * a
                if not 0 <= k_h < 5:
                    continue
                for bb in range(3):
                    k_w = s_ + 4 - 2 * bb
                    if not 0 <= k_w < 5:
                        continue
                    w_sub = w_sub.at[a, bb, :, p, :oc].set(w[:, :, k_h, k_w])
    w2d = jnp.pad(w_sub.reshape(k, 4 * ocp), ((0, kp - k), (0, 0)))
    out = {"w": w2d.astype(jnp.bfloat16), "oc": oc, "ocp": ocp}

    def tile4(v):
        return jnp.tile(jnp.pad(v, (0, ocp - oc)), 4).astype(jnp.float32)

    if b is not None:
        out["b"] = tile4(b)
    if gamma is not None:
        out["g"] = tile4(gamma)
        out["beta"] = tile4(beta)
    return out


def init_params(key, dim=8):
    keys = iter(jax.random.split(key, 64))

    def nrm(shape, scale=0.05):
        return jax.random.normal(next(keys), shape, jnp.float32) * scale

    p = {}
    # encoder: Conv2d(3, dim, 7, stride=2, padding=1)
    p["e_conv1"] = pack_conv(nrm((dim, 3, 7, 7)), nrm((dim,)))

    def rb(cin, cout):
        return pack_resblock(nrm((cin, cin, 3, 3)), nrm((cin,)),
                             nrm((cout, cin, 3, 3)), nrm((cout,)),
                             nrm((cout, cin, 1, 1)), nrm((cout,)))

    p["rb1"] = rb(dim, dim * 2)
    p["rb2"] = rb(dim * 2, dim * 4)
    p["rb3"] = rb(dim * 4, dim * 8)

    in_dim = dim * 8                     # encoder flattens to this (1x1 spatial)
    hid = dim * 8 * 4 * 4
    # column permutation: (c, h, w) torch order -> (h, w, c) NHWC order
    perm = (jnp.arange(16)[:, None] + jnp.arange(dim * 8)[None, :] * 16).reshape(-1)
    p["l1"] = pack_linear(nrm((hid, in_dim)), 1.0 + nrm((hid,)), nrm((hid,)),
                          perm=perm)

    p["d1"] = pack_deconv(nrm((dim * 8, dim * 4, 5, 5)),
                          gamma=1.0 + nrm((dim * 4,)), beta=nrm((dim * 4,)))
    p["d2"] = pack_deconv(nrm((dim * 4, dim * 2, 5, 5)),
                          gamma=1.0 + nrm((dim * 2,)), beta=nrm((dim * 2,)))
    p["d3"] = pack_deconv(nrm((dim * 2, dim, 5, 5)),
                          gamma=1.0 + nrm((dim,)), beta=nrm((dim,)))
    p["d4"] = pack_deconv(nrm((dim, 3, 5, 5)), b=nrm((3,)))
    return p


# ---------------------------------------------------------------------------
# Forward pass
# ---------------------------------------------------------------------------
def poison_generator_forward(pp, x_nchw, dim=8):
    x = jnp.transpose(x_nchw, (0, 2, 3, 1)).astype(jnp.float32)   # NHWC

    # ---- encoder ----
    h, (n, oh, ow) = conv2d(x, pp["e_conv1"], stride=2, pad=1, act="relu")
    h = h[:, :pp["e_conv1"]["oc"]].reshape(n, oh, ow, -1)
    h = maxpool2x2(h)
    for name in ("rb1", "rb2", "rb3"):
        h = resblock(h, pp[name])          # one pallas_call per ResBlock
        h = maxpool2x2(h)                  # final: (N, 1, 1, 8*dim)

    n = h.shape[0]
    flat = h.reshape(n, -1)

    # ---- l1: Linear(no bias) + BatchNorm1d + ReLU in one kernel, NHWC out ----
    y = fused_matmul(flat, pp["l1"]["w"], gamma=pp["l1"]["g"],
                     beta=pp["l1"]["beta"], act="relu", bn_groups=1,
                     out_dtype=jnp.bfloat16)
    y = y[:, :pp["l1"]["oc"]].reshape(n, 4, 4, dim * 8)

    # ---- l2_5: 3x (deconv + BN + ReLU fused) + deconv + Tanh ----
    for name in ("d1", "d2", "d3"):
        y = deconv_subpixel(y, pp[name], act="relu", fuse_bn=True)
    y = deconv_subpixel(y, pp["d4"], act="tanh", fuse_bn=False,
                        out_dtype=jnp.float32)

    return jnp.transpose(y, (0, 3, 1, 2))  # back to NCHW


if __name__ == "__main__":
    dim = 8
    key = jax.random.PRNGKey(0)
    k_params, k_x = jax.random.split(key)
    params = init_params(k_params, dim=dim)   # weights packed once, outside jit
    # 36x36 input -> encoder collapses to 1x1 spatially (flatten == dim*8 = in_dim)
    x = jax.random.normal(k_x, (2, 3, 36, 36), jnp.float32)

    fwd = jax.jit(functools.partial(poison_generator_forward, params, dim=dim))
    out = jax.block_until_ready(fwd(x))
    assert out.shape == (2, 3, 64, 64), out.shape
    assert bool(jnp.all(jnp.isfinite(out)))
    print("KERNEL_OK")
</pallas_src>

<mosaic_0001>
module attributes {stable_mosaic.version = 11 : i64} {
  func.func @_fused_mm_kernel(%arg0: i32, %arg1: memref<512x160xbf16, #tpu.memory_space<vmem>>, %arg2: memref<160x128xbf16, #tpu.memory_space<vmem>>, %arg3: memref<1x128xf32, #tpu.memory_space<vmem>>, %arg4: memref<512x128xbf16, #tpu.memory_space<vmem>>) attributes {dimension_semantics = [#tpu.dimension_semantics<parallel>], iteration_bounds = array<i64: 1>, scalar_prefetch = 0 : i64, scratch_operands = 0 : i64, tpu.core_type = #tpu.core_type<tc>, window_params = [{transform_indices = @transform_0, window_bounds = array<i64: 512, 160>}, {pipeline_mode = #tpu.pipeline_mode<synchronous>, transform_indices = @transform_1, window_bounds = array<i64: 160, 128>}, {pipeline_mode = #tpu.pipeline_mode<synchronous>, transform_indices = @transform_2, window_bounds = array<i64: 1, 128>}, {transform_indices = @transform_3, window_bounds = array<i64: 512, 128>}]} {
    %c0 = arith.constant 0 : index
    %c0_0 = arith.constant 0 : index
    %0 = vector.load %arg1[%c0, %c0_0] : memref<512x160xbf16, #tpu.memory_space<vmem>>, vector<512x160xbf16>
    %c0_1 = arith.constant 0 : index
    %c0_2 = arith.constant 0 : index
    %1 = vector.load %arg2[%c0_1, %c0_2] : memref<160x128xbf16, #tpu.memory_space<vmem>>, vector<160x128xbf16>
    %cst = arith.constant dense<0.000000e+00> : vector<512x128xf32>
    %2 = tpu.matmul %0, %1, %cst {dimension_numbers = #tpu.dot_dimension_numbers<[1], [0], [0], [1], [0, 0, 1, 1], [], []>} : vector<512x160xbf16>, vector<160x128xbf16>, vector<512x128xf32> -> vector<512x128xf32>
    %c0_3 = arith.constant 0 : index
    %c0_4 = arith.constant 0 : index
    %3 = vector.load %arg3[%c0_3, %c0_4] : memref<1x128xf32, #tpu.memory_space<vmem>>, vector<1x128xf32>
    %4 = vector.broadcast %3 : vector<1x128xf32> to vector<512x128xf32>
    %5 = arith.addf %2, %4 : vector<512x128xf32>
    %cst_5 = arith.constant 0.000000e+00 : f32
    %6 = vector.broadcast %cst_5 : f32 to vector<512x128xf32>
    %7 = arith.maximumf %5, %6 : vector<512x128xf32>
    %8 = arith.truncf %7 : vector<512x128xf32> to vector<512x128xbf16>
    %c0_6 = arith.constant 0 : index
    %c0_7 = arith.constant 0 : index
    %9 = vector.load %arg4[%c0_6, %c0_7] : memref<512x128xbf16, #tpu.memory_space<vmem>>, vector<512x128xbf16>
    tpu.vector_store %arg4[%c0_6, %c0_7], %8 {strides = array<i32>} : memref<512x128xbf16, #tpu.memory_space<vmem>>, vector<512x128xbf16>,
    return
  }
  func.func @transform_0(%arg0: i32) -> (i32, i32) {
    %c0_i32 = arith.constant 0 : i32
    %c0_i32_0 = arith.constant 0 : i32
    return %arg0, %c0_i32 : i32, i32
  }
  func.func @transform_1(%arg0: i32) -> (i32, i32) {
    %c0_i32 = arith.constant 0 : i32
    %c0_i32_0 = arith.constant 0 : i32
    %c0_i32_1 = arith.constant 0 : i32
    return %c0_i32, %c0_i32_0 : i32, i32
  }
  func.func @transform_2(%arg0: i32) -> (i32, i32) {
    %c0_i32 = arith.constant 0 : i32
    %c0_i32_0 = arith.constant 0 : i32
    %c0_i32_1 = arith.constant 0 : i32
    return %c0_i32, %c0_i32_0 : i32, i32
  }
  func.func @transform_3(%arg0: i32) -> (i32, i32) {
    %c0_i32 = arith.constant 0 : i32
    %c0_i32_0 = arith.constant 0 : i32
    return %arg0, %c0_i32 : i32, i32
  }
}

module attributes {stable_mosaic.version = 11 : i64} {
  func.func @_resblock_kernel(%arg0: i32, %arg1: memref<128x80xbf16, #tpu.memory_space<vmem>>, %arg2: memref<80x256xbf16, #tpu.memory_space<vmem>>, %arg3: memref<1x256xf32, #tpu.memory_space<vmem>>, %arg4: memref<9x128x128xbf16, #tpu.memory_space<vmem>>, %arg5: memref<1x128xf32, #tpu.memory_space<vmem>>, %arg6: memref<128x128xbf16, #tpu.memory_space<vmem>>, %arg7: memref<2x10x10x128xf32, #tpu.memory_space<vmem>>) attributes {dimension_semantics = [#tpu.dimension_semantics<arbitrary>], iteration_bounds = array<i64: 1>, scalar_prefetch = 0 : i64, scratch_operands = 1 : i64, tpu.core_type = #tpu.core_type<tc>, window_params = [{pipeline_mode = #tpu.pipeline_mode<synchronous>, transform_indices = @transform_0, window_bounds = array<i64: 128, 80>}, {pipeline_mode = #tpu.pipeline_mode<synchronous>, transform_indices = @transform_1, window_bounds = array<i64: 80, 256>}, {pipeline_mode = #tpu.pipeline_mode<synchronous>, transform_indices = @transform_2, window_bounds = array<i64: 1, 256>}, {pipeline_mode = #tpu.pipeline_mode<synchronous>, transform_indices = @transform_3, window_bounds = array<i64: 9, 128, 128>}, {pipeline_mode = #tpu.pipeline_mode<synchronous>, transform_indices = @transform_4, window_bounds = array<i64: 1, 128>}, {pipeline_mode = #tpu.pipeline_mode<synchronous>, transform_indices = @transform_5, window_bounds = array<i64: 128, 128>}]} {
    %c0 = arith.constant 0 : index
    %c0_0 = arith.constant 0 : index
    %0 = vector.load %arg1[%c0, %c0_0] : memref<128x80xbf16, #tpu.memory_space<vmem>>, vector<128x80xbf16>
    %c0_1 = arith.constant 0 : index
    %c0_2 = arith.constant 0 : index
    %1 = vector.load %arg2[%c0_1, %c0_2] : memref<80x256xbf16, #tpu.memory_space<vmem>>, vector<80x256xbf16>
    %cst = arith.constant dense<0.000000e+00> : vector<128x256xf32>
    %2 = tpu.matmul %0, %1, %cst {dimension_numbers = #tpu.dot_dimension_numbers<[1], [0], [0], [1], [0, 0, 1, 1], [], []>} : vector<128x80xbf16>, vector<80x256xbf16>, vector<128x256xf32> -> vector<128x256xf32>
    %c0_3 = arith.constant 0 : index
    %c0_4 = arith.constant 0 : index
    %3 = vector.load %arg3[%c0_3, %c0_4] : memref<1x256xf32, #tpu.memory_space<vmem>>, vector<1x256xf32>
    %4 = vector.broadcast %3 : vector<1x256xf32> to vector<128x256xf32>
    %5 = arith.addf %2, %4 : vector<128x256xf32>
    %6 = vector.extract_strided_slice %5 {offsets = [0, 0], sizes = [128, 128], strides = [1, 1]} : vector<128x256xf32> to vector<128x128xf32>
    %cst_5 = arith.constant 0.000000e+00 : f32
    %7 = vector.broadcast %cst_5 : f32 to vector<128x128xf32>
    %8 = arith.maximumf %6, %7 : vector<128x128xf32>
    %9 = vector.extract_strided_slice %5 {offsets = [0, 128], sizes = [128, 128], strides = [1, 1]} : vector<128x256xf32> to vector<128x128xf32>
    %cst_6 = arith.constant 0.000000e+00 : f32
    %10 = vector.broadcast %cst_6 : f32 to vector<2x10x10x128xf32>
    %c0_7 = arith.constant 0 : index
    %c0_8 = arith.constant 0 : index
    %c0_9 = arith.constant 0 : index
    %c0_10 = arith.constant 0 : index
    %11 = vector.load %arg7[%c0_7, %c0_8, %c0_9, %c0_10] : memref<2x10x10x128xf32, #tpu.memory_space<vmem>>, vector<2x10x10x128xf32>
    tpu.vector_store %arg7[%c0_7, %c0_8, %c0_9, %c0_10], %10 {strides = array<i32>} : memref<2x10x10x128xf32, #tpu.memory_space<vmem>>, vector<2x10x10x128xf32>,
    %12 = vector.shape_cast %8 : vector<128x128xf32> to vector<2x8x8x128xf32>
    %c0_11 = arith.constant 0 : index
    %c1 = arith.constant 1 : index
    %c1_12 = arith.constant 1 : index
    %c0_13 = arith.constant 0 : index
    %13 = vector.load %arg7[%c0_11, %c1, %c1_12, %c0_13] : memref<2x10x10x128xf32, #tpu.memory_space<vmem>>, vector<2x8x8x128xf32>
    tpu.vector_store %arg7[%c0_11, %c1, %c1_12, %c0_13], %12 {strides = array<i32>} : memref<2x10x10x128xf32, #tpu.memory_space<vmem>>, vector<2x8x8x128xf32>,
    %c0_14 = arith.constant 0 : index
    %c0_15 = arith.constant 0 : index
    %14 = vector.load %arg5[%c0_14, %c0_15] : memref<1x128xf32, #tpu.memory_space<vmem>>, vector<1x128xf32>
    %c0_16 = arith.constant 0 : index
    %c0_17 = arith.constant 0 : index
    %c0_18 = arith.constant 0 : index
    %c0_19 = arith.constant 0 : index
    %15 = vector.load %arg7[%c0_16, %c0_17, %c0_18, %c0_19] : memref<2x10x10x128xf32, #tpu.memory_space<vmem>>, vector<2x8x8x128xf32>
    %16 = vector.shape_cast %15 : vector<2x8x8x128xf32> to vector<128x128xf32>
    %17 = arith.truncf %16 : vector<128x128xf32> to vector<128x128xbf16>
    %c0_20 = arith.constant 0 : index
    %c0_21 = arith.constant 0 : index
    %c0_22 = arith.constant 0 : index
    %18 = vector.load %arg4[%c0_20, %c0_21, %c0_22] : memref<9x128x128xbf16, #tpu.memory_space<vmem>>, vector<1x128x128xbf16>
    %19 = vector.shape_cast %18 : vector<1x128x128xbf16> to vector<128x128xbf16>
    %cst_23 = arith.constant dense<0.000000e+00> : vector<128x128xf32>
    %20 = tpu.matmul %17, %19, %cst_23 {dimension_numbers = #tpu.dot_dimension_numbers<[1], [0], [0], [1], [0, 0, 1, 1], [], []>} : vector<128x128xbf16>, vector<128x128xbf16>, vector<128x128xf32> -> vector<128x128xf32>
    %21 = vector.broadcast %14 : vector<1x128xf32> to vector<128x128xf32>
    %22 = arith.addf %21, %20 : vector<128x128xf32>
    %c0_24 = arith.constant 0 : index
    %c0_25 = arith.constant 0 : index
    %c1_26 = arith.constant 1 : index
    %c0_27 = arith.constant 0 : index
    %23 = vector.load %arg7[%c0_24, %c0_25, %c1_26, %c0_27] : memref<2x10x10x128xf32, #tpu.memory_space<vmem>>, vector<2x8x8x128xf32>
    %24 = vector.shape_cast %23 : vector<2x8x8x128xf32> to vector<128x128xf32>
    %25 = arith.truncf %24 : vector<128x128xf32> to vector<128x128xbf16>
    %c1_28 = arith.constant 1 : index
    %c0_29 = arith.constant 0 : index
    %c0_30 = arith.constant 0 : index
    %26 = vector.load %arg4[%c1_28, %c0_29, %c0_30] : memref<9x128x128xbf16, #tpu.memory_space<vmem>>, vector<1x128x128xbf16>
    %27 = vector.shape_cast %26 : vector<1x128x128xbf16> to vector<128x128xbf16>
    %cst_31 = arith.constant dense<0.000000e+00> : vector<128x128xf32>
    %28 = tpu.matmul %25, %27, %cst_31 {dimension_numbers = #tpu.dot_dimension_numbers<[1], [0], [0], [1], [0, 0, 1, 1], [], []>} : vector<128x128xbf16>, vector<128x128xbf16>, vector<128x128xf32> -> vector<128x128xf32>
    %29 = arith.addf %22, %28 : vector<128x128xf32>
    %c0_32 = arith.constant 0 : index
    %c0_33 = arith.constant 0 : index
    %c2 = arith.constant 2 : index
    %c0_34 = arith.constant 0 : index
    %30 = vector.load %arg7[%c0_32, %c0_33, %c2, %c0_34] : memref<2x10x10x128xf32, #tpu.memory_space<vmem>>, vector<2x8x8x128xf32>
    %31 = vector.shape_cast %30 : vector<2x8x8x128xf32> to vector<128x128xf32>
    %32 = arith.truncf %31 : vector<128x128xf32> to vector<128x128xbf16>
    %c2_35 = arith.constant 2 : index
    %c0_36 = arith.constant 0 : index
    %c0_37 = arith.constant 0 : index
    %33 = vector.load %arg4[%c2_35, %c0_36, %c0_37] : memref<9x128x128xbf16, #tpu.memory_space<vmem>>, vector<1x128x128xbf16>
    %34 = vector.shape_cast %33 : vector<1x128x128xbf16> to vector<128x128xbf16>
    %cst_38 = arith.constant dense<0.000000e+00> : vector<128x128xf32>
    %35 = tpu.matmul %32, %34, %cst_38 {dimension_numbers = #tpu.dot_dimension_numbers<[1], [0], [0], [1], [0, 0, 1, 1], [], []>} : vector<128x128xbf16>, vector<128x128xbf16>, vector<128x128xf32> -> vector<128x128xf32>
    %36 = arith.addf %29, %35 : vector<128x128xf32>
    %c0_39 = arith.constant 0 : index
    %c1_40 = arith.constant 1 : index
    %c0_41 = arith.constant 0 : index
    %c0_42 = arith.constant 0 : index
    %37 = vector.load %arg7[%c0_39, %c1_40, %c0_41, %c0_42] : memref<2x10x10x128xf32, #tpu.memory_space<vmem>>, vector<2x8x8x128xf32>
    %38 = vector.shape_cast %37 : vector<2x8x8x128xf32> to vector<128x128xf32>
    %39 = arith.truncf %38 : vector<128x128xf32> to vector<128x128xbf16>
    %c3 = arith.constant 3 : index
    %c0_43 = arith.constant 0 : index
    %c0_44 = arith.constant 0 : index
    %40 = vector.load %arg4[%c3, %c0_43, %c0_44] : memref<9x128x128xbf16, #tpu.memory_space<vmem>>, vector<1x128x128xbf16>
    %41 = vector.shape_cast %40 : vector<1x128x128xbf16> to vector<128x128xbf16>
    %cst_45 = arith.constant dense<0.000000e+00> : vector<128x128xf32>
    %42 = tpu.matmul %39, %41, %cst_45 {dimension_numbers = #tpu.dot_dimension_numbers<[1], [0], [0], [1], [0, 0, 1, 1], [], []>} : vector<128x128xbf16>, vector<128x128xbf16>, vector<128x128xf32> -> vector<128x128xf32>
    %43 = arith.addf %36, %42 : vector<128x128xf32>
    %c0_46 = arith.constant 0 : index
    %c1_47 = arith.constant 1 : index
    %c1_48 = arith.constant 1 : index
    %c0_49 = arith.constant 0 : index
    %44 = vector.load %arg7[%c0_46, %c1_47, %c1_48, %c0_49] : memref<2x10x10x128xf32, #tpu.memory_space<vmem>>, vector<2x8x8x128xf32>
    %45 = vector.shape_cast %44 : vector<2x8x8x128xf32> to vector<128x128xf32>
    %46 = arith.truncf %45 : vector<128x128xf32> to vector<128x128xbf16>
    %c4 = arith.constant 4 : index
    %c0_50 = arith.constant 0 : index
    %c0_51 = arith.constant 0 : index
    %47 = vector.load %arg4[%c4, %c0_50, %c0_51] : memref<9x128x128xbf16, #tpu.memory_space<vmem>>, vector<1x128x128xbf16>
    %48 = vector.shape_cast %47 : vector<1x128x128xbf16> to vector<128x128xbf16>
    %cst_52 = arith.constant dense<0.000000e+00> : vector<128x128xf32>
    %49 = tpu.matmul %46, %48, %cst_52 {dimension_numbers = #tpu.dot_dimension_numbers<[1], [0], [0], [1], [0, 0, 1, 1], [], []>} : vector<128x128xbf16>, vector<128x128xbf16>, vector<128x128xf32> -> vector<128x128xf32>
    %50 = arith.addf %43, %49 : vector<128x128xf32>
    %c0_53 = arith.constant 0 : index
    %c1_54 = arith.constant 1 : index
    %c2_55 = arith.constant 2 : index
    %c0_56 = arith.constant 0 : index
    %51 = vector.load %arg7[%c0_53, %c1_54, %c2_55, %c0_56] : memref<2x10x10x128xf32, #tpu.memory_space<vmem>>, vector<2x8x8x128xf32>
    %52 = vector.shape_cast %51 : vector<2x8x8x128xf32> to vector<128x128xf32>
    %53 = arith.truncf %52 : vector<128x128xf32> to vector<128x128xbf16>
    %c5 = arith.constant 5 : index
    %c0_57 = arith.constant 0 : index
    %c0_58 = arith.constant 0 : index
    %54 = vector.load %arg4[%c5, %c0_57, %c0_58] : memref<9x128x128xbf16, #tpu.memory_space<vmem>>, vector<1x128x128xbf16>
    %55 = vector.shape_cast %54 : vector<1x128x128xbf16> to vector<128x128xbf16>
    %cst_59 = arith.constant dense<0.000000e+00> : vector<128x128xf32>
    %56 = tpu.matmul %53, %55, %cst_59 {dimension_numbers = #tpu.dot_dimension_numbers<[1], [0], [0], [1], [0, 0, 1, 1], [], []>} : vector<128x128xbf16>, vector<128x128xbf16>, vector<128x128xf32> -> vector<128x128xf32>
    %57 = arith.addf %50, %56 : vector<128x128xf32>
    %c0_60 = arith.constant 0 : index
    %c2_61 = arith.constant 2 : index
    %c0_62 = arith.constant 0 : index
    %c0_63 = arith.constant 0 : index
    %58 = vector.load %arg7[%c0_60, %c2_61, %c0_62, %c0_63] : memref<2x10x10x128xf32, #tpu.memory_space<vmem>>, vector<2x8x8x128xf32>
    %59 = vector.shape_cast %58 : vector<2x8x8x128xf32> to vector<128x128xf32>
    %60 = arith.truncf %59 : vector<128x128xf32> to vector<128x128xbf16>
    %c6 = arith.constant 6 : index
    %c0_64 = arith.constant 0 : index
    %c0_65 = arith.constant 0 : index
    %61 = vector.load %arg4[%c6, %c0_64, %c0_65] : memref<9x128x128xbf16, #tpu.memory_space<vmem>>, vector<1x128x128xbf16>
    %62 = vector.shape_cast %61 : vector<1x128x128xbf16> to vector<128x128xbf16>
    %cst_66 = arith.constant dense<0.000000e+00> : vector<128x128xf32>
    %63 = tpu.matmul %60, %62, %cst_66 {dimension_numbers = #tpu.dot_dimension_numbers<[1], [0], [0], [1], [0, 0, 1, 1], [], []>} : vector<128x128xbf16>, vector<128x128xbf16>, vector<128x128xf32> -> vector<128x128xf32>
    %64 = arith.addf %57, %63 : vector<128x128xf32>
    %c0_67 = arith.constant 0 : index
    %c2_68 = arith.constant 2 : index
    %c1_69 = arith.constant 1 : index
    %c0_70 = arith.constant 0 : index
    %65 = vector.load %arg7[%c0_67, %c2_68, %c1_69, %c0_70] : memref<2x10x10x128xf32, #tpu.memory_space<vmem>>, vector<2x8x8x128xf32>
    %66 = vector.shape_cast %65 : vector<2x8x8x128xf32> to vector<128x128xf32>
    %67 = arith.truncf %66 : vector<128x128xf32> to vector<128x128xbf16>
    %c7 = arith.constant 7 : index
    %c0_71 = arith.constant 0 : index
    %c0_72 = arith.constant 0 : index
    %68 = vector.load %arg4[%c7, %c0_71, %c0_72] : memref<9x128x128xbf16, #tpu.memory_space<vmem>>, vector<1x128x128xbf16>
    %69 = vector.shape_cast %68 : vector<1x128x128xbf16> to vector<128x128xbf16>
    %cst_73 = arith.constant dense<0.000000e+00> : vector<128x128xf32>
    %70 = tpu.matmul %67, %69, %cst_73 {dimension_numbers = #tpu.dot_dimension_numbers<[1], [0], [0], [1], [0, 0, 1, 1], [], []>} : vector<128x128xbf16>, vector<128x128xbf16>, vector<128x128xf32> -> vector<128x128xf32>
    %71 = arith.addf %64, %70 : vector<128x128xf32>
    %c0_74 = arith.constant 0 : index
    %c2_75 = arith.constant 2 : index
    %c2_76 = arith.constant 2 : index
    %c0_77 = arith.constant 0 : index
    %72 = vector.load %arg7[%c0_74, %c2_75, %c2_76, %c0_77] : memref<2x10x10x128xf32, #tpu.memory_space<vmem>>, vector<2x8x8x128xf32>
    %73 = vector.shape_cast %72 : vector<2x8x8x128xf32> to vector<128x128xf32>
    %74 = arith.truncf %73 : vector<128x128xf32> to vector<128x128xbf16>
    %c8 = arith.constant 8 : index
    %c0_78 = arith.constant 0 : index
    %c0_79 = arith.constant 0 : index
    %75 = vector.load %arg4[%c8, %c0_78, %c0_79] : memref<9x128x128xbf16, #tpu.memory_space<vmem>>, vector<1x128x128xbf16>
    %76 = vector.shape_cast %75 : vector<1x128x128xbf16> to vector<128x128xbf16>
    %cst_80 = arith.constant dense<0.000000e+00> : vector<128x128xf32>
    %77 = tpu.matmul %74, %76, %cst_80 {dimension_numbers = #tpu.dot_dimension_numbers<[1], [0], [0], [1], [0, 0, 1, 1], [], []>} : vector<128x128xbf16>, vector<128x128xbf16>, vector<128x128xf32> -> vector<128x128xf32>
    %78 = arith.addf %71, %77 : vector<128x128xf32>
    %cst_81 = arith.constant 0.000000e+00 : f32
    %79 = vector.broadcast %cst_81 : f32 to vector<128x128xf32>
    %80 = arith.maximumf %78, %79 : vector<128x128xf32>
    %81 = arith.addf %80, %9 : vector<128x128xf32>
    %82 = arith.truncf %81 : vector<128x128xf32> to vector<128x128xbf16>
    %c0_82 = arith.constant 0 : index
    %c0_83 = arith.constant 0 : index
    %83 = vector.load %arg6[%c0_82, %c0_83] : memref<128x128xbf16, #tpu.memory_space<vmem>>, vector<128x128xbf16>
    tpu.vector_store %arg6[%c0_82, %c0_83], %82 {strides = array<i32>} : memref<128x128xbf16, #tpu.memory_space<vmem>>, vector<128x128xbf16>,
    return
  }
  func.func @transform_0(%arg0: i32) -> (i32, i32) {
    %c0_i32 = arith.constant 0 : i32
    %c0_i32_0 = arith.constant 0 : i32
    %c0_i32_1 = arith.constant 0 : i32
    return %c0_i32, %c0_i32_0 : i32, i32
  }
  func.func @transform_1(%arg0: i32) -> (i32, i32) {
    %c0_i32 = arith.constant 0 : i32
    %c0_i32_0 = arith.constant 0 : i32
    %c0_i32_1 = arith.constant 0 : i32
    return %c0_i32, %c0_i32_0 : i32, i32
  }
  func.func @transform_2(%arg0: i32) -> (i32, i32) {
    %c0_i32 = arith.constant 0 : i32
    %c0_i32_0 = arith.constant 0 : i32
    %c0_i32_1 = arith.constant 0 : i32
    return %c0_i32, %c0_i32_0 : i32, i32
  }
  func.func @transform_3(%arg0: i32) -> (i32, i32, i32) {
    %c0_i32 = arith.constant 0 : i32
    %c0_i32_0 = arith.constant 0 : i32
    %c0_i32_1 = arith.constant 0 : i32
    %c0_i32_2 = arith.constant 0 : i32
    return %c0_i32, %c0_i32_0, %c0_i32_1 : i32, i32, i32
  }
  func.func @transform_4(%arg0: i32) -> (i32, i32) {
    %c0_i32 = arith.constant 0 : i32
    %c0_i32_0 = arith.constant 0 : i32
    %c0_i32_1 = arith.constant 0 : i32
    return %c0_i32, %c0_i32_0 : i32, i32
  }
  func.func @transform_5(%arg0: i32) -> (i32, i32) {
    %c0_i32 = arith.constant 0 : i32
    %c0_i32_0 = arith.constant 0 : i32
    %c0_i32_1 = arith.constant 0 : i32
    return %c0_i32, %c0_i32_0 : i32, i32
  }
}

module attributes {stable_mosaic.version = 11 : i64} {
  func.func @_resblock_kernel(%arg0: i32, %arg1: memref<32x144xbf16, #tpu.memory_space<vmem>>, %arg2: memref<144x256xbf16, #tpu.memory_space<vmem>>, %arg3: memref<1x256xf32, #tpu.memory_space<vmem>>, %arg4: memref<9x128x128xbf16, #tpu.memory_space<vmem>>, %arg5: memref<1x128xf32, #tpu.memory_space<vmem>>, %arg6: memref<32x128xbf16, #tpu.memory_space<vmem>>, %arg7: memref<2x6x6x128xf32, #tpu.memory_space<vmem>>) attributes {dimension_semantics = [#tpu.dimension_semantics<arbitrary>], iteration_bounds = array<i64: 1>, scalar_prefetch = 0 : i64, scratch_operands = 1 : i64, tpu.core_type = #tpu.core_type<tc>, window_params = [{pipeline_mode = #tpu.pipeline_mode<synchronous>, transform_indices = @transform_0, window_bounds = array<i64: 32, 144>}, {pipeline_mode = #tpu.pipeline_mode<synchronous>, transform_indices = @transform_1, window_bounds = array<i64: 144, 256>}, {pipeline_mode = #tpu.pipeline_mode<synchronous>, transform_indices = @transform_2, window_bounds = array<i64: 1, 256>}, {pipeline_mode = #tpu.pipeline_mode<synchronous>, transform_indices = @transform_3, window_bounds = array<i64: 9, 128, 128>}, {pipeline_mode = #tpu.pipeline_mode<synchronous>, transform_indices = @transform_4, window_bounds = array<i64: 1, 128>}, {pipeline_mode = #tpu.pipeline_mode<synchronous>, transform_indices = @transform_5, window_bounds = array<i64: 32, 128>}]} {
    %c0 = arith.constant 0 : index
    %c0_0 = arith.constant 0 : index
    %0 = vector.load %arg1[%c0, %c0_0] : memref<32x144xbf16, #tpu.memory_space<vmem>>, vector<32x144xbf16>
    %c0_1 = arith.constant 0 : index
    %c0_2 = arith.constant 0 : index
    %1 = vector.load %arg2[%c0_1, %c0_2] : memref<144x256xbf16, #tpu.memory_space<vmem>>, vector<144x256xbf16>
    %cst = arith.constant dense<0.000000e+00> : vector<32x256xf32>
    %2 = tpu.matmul %0, %1, %cst {dimension_numbers = #tpu.dot_dimension_numbers<[1], [0], [0], [1], [0, 0, 1, 1], [], []>} : vector<32x144xbf16>, vector<144x256xbf16>, vector<32x256xf32> -> vector<32x256xf32>
    %c0_3 = arith.constant 0 : index
    %c0_4 = arith.constant 0 : index
    %3 = vector.load %arg3[%c0_3, %c0_4] : memref<1x256xf32, #tpu.memory_space<vmem>>, vector<1x256xf32>
    %4 = vector.broadcast %3 : vector<1x256xf32> to vector<32x256xf32>
    %5 = arith.addf %2, %4 : vector<32x256xf32>
    %6 = vector.extract_strided_slice %5 {offsets = [0, 0], sizes = [32, 128], strides = [1, 1]} : vector<32x256xf32> to vector<32x128xf32>
    %cst_5 = arith.constant 0.000000e+00 : f32
    %7 = vector.broadcast %cst_5 : f32 to vector<32x128xf32>
    %8 = arith.maximumf %6, %7 : vector<32x128xf32>
    %9 = vector.extract_strided_slice %5 {offsets = [0, 128], sizes = [32, 128], strides = [1, 1]} : vector<32x256xf32> to vector<32x128xf32>
    %cst_6 = arith.constant 0.000000e+00 : f32
    %10 = vector.broadcast %cst_6 : f32 to vector<2x6x6x128xf32>
    %c0_7 = arith.constant 0 : index
    %c0_8 = arith.constant 0 : index
    %c0_9 = arith.constant 0 : index
    %c0_10 = arith.constant 0 : index
    %11 = vector.load %arg7[%c0_7, %c0_8, %c0_9, %c0_10] : memref<2x6x6x128xf32, #tpu.memory_space<vmem>>, vector<2x6x6x128xf32>
    tpu.vector_store %arg7[%c0_7, %c0_8, %c0_9, %c0_10], %10 {strides = array<i32>} : memref<2x6x6x128xf32, #tpu.memory_space<vmem>>, vector<2x6x6x128xf32>,
    %12 = vector.shape_cast %8 : vector<32x128xf32> to vector<2x4x4x128xf32>
    %c0_11 = arith.constant 0 : index
    %c1 = arith.constant 1 : index
    %c1_12 = arith.constant 1 : index
    %c0_13 = arith.constant 0 : index
    %13 = vector.load %arg7[%c0_11, %c1, %c1_12, %c0_13] : memref<2x6x6x128xf32, #tpu.memory_space<vmem>>, vector<2x4x4x128xf32>
    tpu.vector_store %arg7[%c0_11, %c1, %c1_12, %c0_13], %12 {strides = array<i32>} : memref<2x6x6x128xf32, #tpu.memory_space<vmem>>, vector<2x4x4x128xf32>,
    %c0_14 = arith.constant 0 : index
    %c0_15 = arith.constant 0 : index
    %14 = vector.load %arg5[%c0_14, %c0_15] : memref<1x128xf32, #tpu.memory_space<vmem>>, vector<1x128xf32>
    %c0_16 = arith.constant 0 : index
    %c0_17 = arith.constant 0 : index
    %c0_18 = arith.constant 0 : index
    %c0_19 = arith.constant 0 : index
    %15 = vector.load %arg7[%c0_16, %c0_17, %c0_18, %c0_19] : memref<2x6x6x128xf32, #tpu.memory_space<vmem>>, vector<2x4x4x128xf32>
    %16 = vector.shape_cast %15 : vector<2x4x4x128xf32> to vector<32x128xf32>
    %17 = arith.truncf %16 : vector<32x128xf32> to vector<32x128xbf16>
    %c0_20 = arith.constant 0 : index
    %c0_21 = arith.constant 0 : index
    %c0_22 = arith.constant 0 : index
    %18 = vector.load %arg4[%c0_20, %c0_21, %c0_22] : memref<9x128x128xbf16, #tpu.memory_space<vmem>>, vector<1x128x128xbf16>
    %19 = vector.shape_cast %18 : vector<1x128x128xbf16> to vector<128x128xbf16>
    %cst_23 = arith.constant dense<0.000000e+00> : vector<32x128xf32>
    %20 = tpu.matmul %17, %19, %cst_23 {dimension_numbers = #tpu.dot_dimension_numbers<[1], [0], [0], [1], [0, 0, 1, 1], [], []>} : vector<32x128xbf16>, vector<128x128xbf16>, vector<32x128xf32> -> vector<32x128xf32>
    %21 = vector.broadcast %14 : vector<1x128xf32> to vector<32x128xf32>
    %22 = arith.addf %21, %20 : vector<32x128xf32>
    %c0_24 = arith.constant 0 : index
    %c0_25 = arith.constant 0 : index
    %c1_26 = arith.constant 1 : index
    %c0_27 = arith.constant 0 : index
    %23 = vector.load %arg7[%c0_24, %c0_25, %c1_26, %c0_27] : memref<2x6x6x128xf32, #tpu.memory_space<vmem>>, vector<2x4x4x128xf32>
    %24 = vector.shape_cast %23 : vector<2x4x4x128xf32> to vector<32x128xf32>
    %25 = arith.truncf %24 : vector<32x128xf32> to vector<32x128xbf16>
    %c1_28 = arith.constant 1 : index
    %c0_29 = arith.constant 0 : index
    %c0_30 = arith.constant 0 : index
    %26 = vector.load %arg4[%c1_28, %c0_29, %c0_30] : memref<9x128x128xbf16, #tpu.memory_space<vmem>>, vector<1x128x128xbf16>
    %27 = vector.shape_cast %26 : vector<1x128x128xbf16> to vector<128x128xbf16>
    %cst_31 = arith.constant dense<0.000000e+00> : vector<32x128xf32>
    %28 = tpu.matmul %25, %27, %cst_31 {dimension_numbers = #tpu.dot_dimension_numbers<[1], [0], [0], [1], [0, 0, 1, 1], [], []>} : vector<32x128xbf16>, vector<128x128xbf16>, vector<32x128xf32> -> vector<32x128xf32>
    %29 = arith.addf %22, %28 : vector<32x128xf32>
    %c0_32 = arith.constant 0 : index
    %c0_33 = arith.constant 0 : index
    %c2 = arith.constant 2 : index
    %c0_34 = arith.constant 0 : index
    %30 = vector.load %arg7[%c0_32, %c0_33, %c2, %c0_34] : memref<2x6x6x128xf32, #tpu.memory_space<vmem>>, vector<2x4x4x128xf32>
    %31 = vector.shape_cast %30 : vector<2x4x4x128xf32> to vector<32x128xf32>
    %32 = arith.truncf %31 : vector<32x128xf32> to vector<32x128xbf16>
    %c2_35 = arith.constant 2 : index
    %c0_36 = arith.constant 0 : index
    %c0_37 = arith.constant 0 : index
    %33 = vector.load %arg4[%c2_35, %c0_36, %c0_37] : memref<9x128x128xbf16, #tpu.memory_space<vmem>>, vector<1x128x128xbf16>
    %34 = vector.shape_cast %33 : vector<1x128x128xbf16> to vector<128x128xbf16>
    %cst_38 = arith.constant dense<0.000000e+00> : vector<32x128xf32>
    %35 = tpu.matmul %32, %34, %cst_38 {dimension_numbers = #tpu.dot_dimension_numbers<[1], [0], [0], [1], [0, 0, 1, 1], [], []>} : vector<32x128xbf16>, vector<128x128xbf16>, vector<32x128xf32> -> vector<32x128xf32>
    %36 = arith.addf %29, %35 : vector<32x128xf32>
    %c0_39 = arith.constant 0 : index
    %c1_40 = arith.constant 1 : index
    %c0_41 = arith.constant 0 : index
    %c0_42 = arith.constant 0 : index
    %37 = vector.load %arg7[%c0_39, %c1_40, %c0_41, %c0_42] : memref<2x6x6x128xf32, #tpu.memory_space<vmem>>, vector<2x4x4x128xf32>
    %38 = vector.shape_cast %37 : vector<2x4x4x128xf32> to vector<32x128xf32>
    %39 = arith.truncf %38 : vector<32x128xf32> to vector<32x128xbf16>
    %c3 = arith.constant 3 : index
    %c0_43 = arith.constant 0 : index
    %c0_44 = arith.constant 0 : index
    %40 = vector.load %arg4[%c3, %c0_43, %c0_44] : memref<9x128x128xbf16, #tpu.memory_space<vmem>>, vector<1x128x128xbf16>
    %41 = vector.shape_cast %40 : vector<1x128x128xbf16> to vector<128x128xbf16>
    %cst_45 = arith.constant dense<0.000000e+00> : vector<32x128xf32>
    %42 = tpu.matmul %39, %41, %cst_45 {dimension_numbers = #tpu.dot_dimension_numbers<[1], [0], [0], [1], [0, 0, 1, 1], [], []>} : vector<32x128xbf16>, vector<128x128xbf16>, vector<32x128xf32> -> vector<32x128xf32>
    %43 = arith.addf %36, %42 : vector<32x128xf32>
    %c0_46 = arith.constant 0 : index
    %c1_47 = arith.constant 1 : index
    %c1_48 = arith.constant 1 : index
    %c0_49 = arith.constant 0 : index
    %44 = vector.load %arg7[%c0_46, %c1_47, %c1_48, %c0_49] : memref<2x6x6x128xf32, #tpu.memory_space<vmem>>, vector<2x4x4x128xf32>
    %45 = vector.shape_cast %44 : vector<2x4x4x128xf32> to vector<32x128xf32>
    %46 = arith.truncf %45 : vector<32x128xf32> to vector<32x128xbf16>
    %c4 = arith.constant 4 : index
    %c0_50 = arith.constant 0 : index
    %c0_51 = arith.constant 0 : index
    %47 = vector.load %arg4[%c4, %c0_50, %c0_51] : memref<9x128x128xbf16, #tpu.memory_space<vmem>>, vector<1x128x128xbf16>
    %48 = vector.shape_cast %47 : vector<1x128x128xbf16> to vector<128x128xbf16>
    %cst_52 = arith.constant dense<0.000000e+00> : vector<32x128xf32>
    %49 = tpu.matmul %46, %48, %cst_52 {dimension_numbers = #tpu.dot_dimension_numbers<[1], [0], [0], [1], [0, 0, 1, 1], [], []>} : vector<32x128xbf16>, vector<128x128xbf16>, vector<32x128xf32> -> vector<32x128xf32>
    %50 = arith.addf %43, %49 : vector<32x128xf32>
    %c0_53 = arith.constant 0 : index
    %c1_54 = arith.constant 1 : index
    %c2_55 = arith.constant 2 : index
    %c0_56 = arith.constant 0 : index
    %51 = vector.load %arg7[%c0_53, %c1_54, %c2_55, %c0_56] : memref<2x6x6x128xf32, #tpu.memory_space<vmem>>, vector<2x4x4x128xf32>
    %52 = vector.shape_cast %51 : vector<2x4x4x128xf32> to vector<32x128xf32>
    %53 = arith.truncf %52 : vector<32x128xf32> to vector<32x128xbf16>
    %c5 = arith.constant 5 : index
    %c0_57 = arith.constant 0 : index
    %c0_58 = arith.constant 0 : index
    %54 = vector.load %arg4[%c5, %c0_57, %c0_58] : memref<9x128x128xbf16, #tpu.memory_space<vmem>>, vector<1x128x128xbf16>
    %55 = vector.shape_cast %54 : vector<1x128x128xbf16> to vector<128x128xbf16>
    %cst_59 = arith.constant dense<0.000000e+00> : vector<32x128xf32>
    %56 = tpu.matmul %53, %55, %cst_59 {dimension_numbers = #tpu.dot_dimension_numbers<[1], [0], [0], [1], [0, 0, 1, 1], [], []>} : vector<32x128xbf16>, vector<128x128xbf16>, vector<32x128xf32> -> vector<32x128xf32>
    %57 = arith.addf %50, %56 : vector<32x128xf32>
    %c0_60 = arith.constant 0 : index
    %c2_61 = arith.constant 2 : index
    %c0_62 = arith.constant 0 : index
    %c0_63 = arith.constant 0 : index
    %58 = vector.load %arg7[%c0_60, %c2_61, %c0_62, %c0_63] : memref<2x6x6x128xf32, #tpu.memory_space<vmem>>, vector<2x4x4x128xf32>
    %59 = vector.shape_cast %58 : vector<2x4x4x128xf32> to vector<32x128xf32>
    %60 = arith.truncf %59 : vector<32x128xf32> to vector<32x128xbf16>
    %c6 = arith.constant 6 : index
    %c0_64 = arith.constant 0 : index
    %c0_65 = arith.constant 0 : index
    %61 = vector.load %arg4[%c6, %c0_64, %c0_65] : memref<9x128x128xbf16, #tpu.memory_space<vmem>>, vector<1x128x128xbf16>
    %62 = vector.shape_cast %61 : vector<1x128x128xbf16> to vector<128x128xbf16>
    %cst_66 = arith.constant dense<0.000000e+00> : vector<32x128xf32>
    %63 = tpu.matmul %60, %62, %cst_66 {dimension_numbers = #tpu.dot_dimension_numbers<[1], [0], [0], [1], [0, 0, 1, 1], [], []>} : vector<32x128xbf16>, vector<128x128xbf16>, vector<32x128xf32> -> vector<32x128xf32>
    %64 = arith.addf %57, %63 : vector<32x128xf32>
    %c0_67 = arith.constant 0 : index
    %c2_68 = arith.constant 2 : index
    %c1_69 = arith.constant 1 : index
    %c0_70 = arith.constant 0 : index
    %65 = vector.load %arg7[%c0_67, %c2_68, %c1_69, %c0_70] : memref<2x6x6x128xf32, #tpu.memory_space<vmem>>, vector<2x4x4x128xf32>
    %66 = vector.shape_cast %65 : vector<2x4x4x128xf32> to vector<32x128xf32>
    %67 = arith.truncf %66 : vector<32x128xf32> to vector<32x128xbf16>
    %c7 = arith.constant 7 : index
    %c0_71 = arith.constant 0 : index
    %c0_72 = arith.constant 0 : index
    %68 = vector.load %arg4[%c7, %c0_71, %c0_72] : memref<9x128x128xbf16, #tpu.memory_space<vmem>>, vector<1x128x128xbf16>
    %69 = vector.shape_cast %68 : vector<1x128x128xbf16> to vector<128x128xbf16>
    %cst_73 = arith.constant dense<0.000000e+00> : vector<32x128xf32>
    %70 = tpu.matmul %67, %69, %cst_73 {dimension_numbers = #tpu.dot_dimension_numbers<[1], [0], [0], [1], [0, 0, 1, 1], [], []>} : vector<32x128xbf16>, vector<128x128xbf16>, vector<32x128xf32> -> vector<32x128xf32>
    %71 = arith.addf %64, %70 : vector<32x128xf32>
    %c0_74 = arith.constant 0 : index
    %c2_75 = arith.constant 2 : index
    %c2_76 = arith.constant 2 : index
    %c0_77 = arith.constant 0 : index
    %72 = vector.load %arg7[%c0_74, %c2_75, %c2_76, %c0_77] : memref<2x6x6x128xf32, #tpu.memory_space<vmem>>, vector<2x4x4x128xf32>
    %73 = vector.shape_cast %72 : vector<2x4x4x128xf32> to vector<32x128xf32>
    %74 = arith.truncf %73 : vector<32x128xf32> to vector<32x128xbf16>
    %c8 = arith.constant 8 : index
    %c0_78 = arith.constant 0 : index
    %c0_79 = arith.constant 0 : index
    %75 = vector.load %arg4[%c8, %c0_78, %c0_79] : memref<9x128x128xbf16, #tpu.memory_space<vmem>>, vector<1x128x128xbf16>
    %76 = vector.shape_cast %75 : vector<1x128x128xbf16> to vector<128x128xbf16>
    %cst_80 = arith.constant dense<0.000000e+00> : vector<32x128xf32>
    %77 = tpu.matmul %74, %76, %cst_80 {dimension_numbers = #tpu.dot_dimension_numbers<[1], [0], [0], [1], [0, 0, 1, 1], [], []>} : vector<32x128xbf16>, vector<128x128xbf16>, vector<32x128xf32> -> vector<32x128xf32>
    %78 = arith.addf %71, %77 : vector<32x128xf32>
    %cst_81 = arith.constant 0.000000e+00 : f32
    %79 = vector.broadcast %cst_81 : f32 to vector<32x128xf32>
    %80 = arith.maximumf %78, %79 : vector<32x128xf32>
    %81 = arith.addf %80, %9 : vector<32x128xf32>
    %82 = arith.truncf %81 : vector<32x128xf32> to vector<32x128xbf16>
    %c0_82 = arith.constant 0 : index
    %c0_83 = arith.constant 0 : index
    %83 = vector.load %arg6[%c0_82, %c0_83] : memref<32x128xbf16, #tpu.memory_space<vmem>>, vector<32x128xbf16>
    tpu.vector_store %arg6[%c0_82, %c0_83], %82 {strides = array<i32>} : memref<32x128xbf16, #tpu.memory_space<vmem>>, vector<32x128xbf16>,
    return
  }
  func.func @transform_0(%arg0: i32) -> (i32, i32) {
    %c0_i32 = arith.constant 0 : i32
    %c0_i32_0 = arith.constant 0 : i32
    %c0_i32_1 = arith.constant 0 : i32
    return %c0_i32, %c0_i32_0 : i32, i32
  }
  func.func @transform_1(%arg0: i32) -> (i32, i32) {
    %c0_i32 = arith.constant 0 : i32
    %c0_i32_0 = arith.constant 0 : i32
    %c0_i32_1 = arith.constant 0 : i32
    return %c0_i32, %c0_i32_0 : i32, i32
  }
  func.func @transform_2(%arg0: i32) -> (i32, i32) {
    %c0_i32 = arith.constant 0 : i32
    %c0_i32_0 = arith.constant 0 : i32
    %c0_i32_1 = arith.constant 0 : i32
    return %c0_i32, %c0_i32_0 : i32, i32
  }
  func.func @transform_3(%arg0: i32) -> (i32, i32, i32) {
    %c0_i32 = arith.constant 0 : i32
    %c0_i32_0 = arith.constant 0 : i32
    %c0_i32_1 = arith.constant 0 : i32
    %c0_i32_2 = arith.constant 0 : i32
    return %c0_i32, %c0_i32_0, %c0_i32_1 : i32, i32, i32
  }
  func.func @transform_4(%arg0: i32) -> (i32, i32) {
    %c0_i32 = arith.constant 0 : i32
    %c0_i32_0 = arith.constant 0 : i32
    %c0_i32_1 = arith.constant 0 : i32
    return %c0_i32, %c0_i32_0 : i32, i32
  }
  func.func @transform_5(%arg0: i32) -> (i32, i32) {
    %c0_i32 = arith.constant 0 : i32
    %c0_i32_0 = arith.constant 0 : i32
    %c0_i32_1 = arith.constant 0 : i32
    return %c0_i32, %c0_i32_0 : i32, i32
  }
}

module attributes {stable_mosaic.version = 11 : i64} {
  func.func @_resblock_kernel(%arg0: i32, %arg1: memref<8x288xbf16, #tpu.memory_space<vmem>>, %arg2: memref<288x256xbf16, #tpu.memory_space<vmem>>, %arg3: memref<1x256xf32, #tpu.memory_space<vmem>>, %arg4: memref<9x128x128xbf16, #tpu.memory_space<vmem>>, %arg5: memref<1x128xf32, #tpu.memory_space<vmem>>, %arg6: memref<8x128xbf16, #tpu.memory_space<vmem>>, %arg7: memref<2x4x4x128xf32, #tpu.memory_space<vmem>>) attributes {dimension_semantics = [#tpu.dimension_semantics<arbitrary>], iteration_bounds = array<i64: 1>, scalar_prefetch = 0 : i64, scratch_operands = 1 : i64, tpu.core_type = #tpu.core_type<tc>, window_params = [{pipeline_mode = #tpu.pipeline_mode<synchronous>, transform_indices = @transform_0, window_bounds = array<i64: 8, 288>}, {pipeline_mode = #tpu.pipeline_mode<synchronous>, transform_indices = @transform_1, window_bounds = array<i64: 288, 256>}, {pipeline_mode = #tpu.pipeline_mode<synchronous>, transform_indices = @transform_2, window_bounds = array<i64: 1, 256>}, {pipeline_mode = #tpu.pipeline_mode<synchronous>, transform_indices = @transform_3, window_bounds = array<i64: 9, 128, 128>}, {pipeline_mode = #tpu.pipeline_mode<synchronous>, transform_indices = @transform_4, window_bounds = array<i64: 1, 128>}, {pipeline_mode = #tpu.pipeline_mode<synchronous>, transform_indices = @transform_5, window_bounds = array<i64: 8, 128>}]} {
    %c0 = arith.constant 0 : index
    %c0_0 = arith.constant 0 : index
    %0 = vector.load %arg1[%c0, %c0_0] : memref<8x288xbf16, #tpu.memory_space<vmem>>, vector<8x288xbf16>
    %c0_1 = arith.constant 0 : index
    %c0_2 = arith.constant 0 : index
    %1 = vector.load %arg2[%c0_1, %c0_2] : memref<288x256xbf16, #tpu.memory_space<vmem>>, vector<288x256xbf16>
    %cst = arith.constant dense<0.000000e+00> : vector<8x256xf32>
    %2 = tpu.matmul %0, %1, %cst {dimension_numbers = #tpu.dot_dimension_numbers<[1], [0], [0], [1], [0, 0, 1, 1], [], []>} : vector<8x288xbf16>, vector<288x256xbf16>, vector<8x256xf32> -> vector<8x256xf32>
    %c0_3 = arith.constant 0 : index
    %c0_4 = arith.constant 0 : index
    %3 = vector.load %arg3[%c0_3, %c0_4] : memref<1x256xf32, #tpu.memory_space<vmem>>, vector<1x256xf32>
    %4 = vector.broadcast %3 : vector<1x256xf32> to vector<8x256xf32>
    %5 = arith.addf %2, %4 : vector<8x256xf32>
    %6 = vector.extract_strided_slice %5 {offsets = [0, 0], sizes = [8, 128], strides = [1, 1]} : vector<8x256xf32> to vector<8x128xf32>
    %cst_5 = arith.constant 0.000000e+00 : f32
    %7 = vector.broadcast %cst_5 : f32 to vector<8x128xf32>
    %8 = arith.maximumf %6, %7 : vector<8x128xf32>
    %9 = vector.extract_strided_slice %5 {offsets = [0, 128], sizes = [8, 128], strides = [1, 1]} : vector<8x256xf32> to vector<8x128xf32>
    %cst_6 = arith.constant 0.000000e+00 : f32
    %10 = vector.broadcast %cst_6 : f32 to vector<2x4x4x128xf32>
    %c0_7 = arith.constant 0 : index
    %c0_8 = arith.constant 0 : index
    %c0_9 = arith.constant 0 : index
    %c0_10 = arith.constant 0 : index
    %11 = vector.load %arg7[%c0_7, %c0_8, %c0_9, %c0_10] : memref<2x4x4x128xf32, #tpu.memory_space<vmem>>, vector<2x4x4x128xf32>
    tpu.vector_store %arg7[%c0_7, %c0_8, %c0_9, %c0_10], %10 {strides = array<i32>} : memref<2x4x4x128xf32, #tpu.memory_space<vmem>>, vector<2x4x4x128xf32>,
    %12 = vector.shape_cast %8 : vector<8x128xf32> to vector<2x2x2x128xf32>
    %c0_11 = arith.constant 0 : index
    %c1 = arith.constant 1 : index
    %c1_12 = arith.constant 1 : index
    %c0_13 = arith.constant 0 : index
    %13 = vector.load %arg7[%c0_11, %c1, %c1_12, %c0_13] : memref<2x4x4x128xf32, #tpu.memory_space<vmem>>, vector<2x2x2x128xf32>
    tpu.vector_store %arg7[%c0_11, %c1, %c1_12, %c0_13], %12 {strides = array<i32>} : memref<2x4x4x128xf32, #tpu.memory_space<vmem>>, vector<2x2x2x128xf32>,
    %c0_14 = arith.constant 0 : index
    %c0_15 = arith.constant 0 : index
    %14 = vector.load %arg5[%c0_14, %c0_15] : memref<1x128xf32, #tpu.memory_space<vmem>>, vector<1x128xf32>
    %c0_16 = arith.constant 0 : index
    %c0_17 = arith.constant 0 : index
    %c0_18 = arith.constant 0 : index
    %c0_19 = arith.constant 0 : index
    %15 = vector.load %arg7[%c0_16, %c0_17, %c0_18, %c0_19] : memref<2x4x4x128xf32, #tpu.memory_space<vmem>>, vector<2x2x2x128xf32>
    %16 = vector.shape_cast %15 : vector<2x2x2x128xf32> to vector<8x128xf32>
    %17 = arith.truncf %16 : vector<8x128xf32> to vector<8x128xbf16>
    %c0_20 = arith.constant 0 : index
    %c0_21 = arith.constant 0 : index
    %c0_22 = arith.constant 0 : index
    %18 = vector.load %arg4[%c0_20, %c0_21, %c0_22] : memref<9x128x128xbf16, #tpu.memory_space<vmem>>, vector<1x128x128xbf16>
    %19 = vector.shape_cast %18 : vector<1x128x128xbf16> to vector<128x128xbf16>
    %cst_23 = arith.constant dense<0.000000e+00> : vector<8x128xf32>
    %20 = tpu.matmul %17, %19, %cst_23 {dimension_numbers = #tpu.dot_dimension_numbers<[1], [0], [0], [1], [0, 0, 1, 1], [], []>} : vector<8x128xbf16>, vector<128x128xbf16>, vector<8x128xf32> -> vector<8x128xf32>
    %21 = vector.broadcast %14 : vector<1x128xf32> to vector<8x128xf32>
    %22 = arith.addf %21, %20 : vector<8x128xf32>
    %c0_24 = arith.constant 0 : index
    %c0_25 = arith.constant 0 : index
    %c1_26 = arith.constant 1 : index
    %c0_27 = arith.constant 0 : index
    %23 = vector.load %arg7[%c0_24, %c0_25, %c1_26, %c0_27] : memref<2x4x4x128xf32, #tpu.memory_space<vmem>>, vector<2x2x2x128xf32>
    %24 = vector.shape_cast %23 : vector<2x2x2x128xf32> to vector<8x128xf32>
    %25 = arith.truncf %24 : vector<8x128xf32> to vector<8x128xbf16>
    %c1_28 = arith.constant 1 : index
    %c0_29 = arith.constant 0 : index
    %c0_30 = arith.constant 0 : index
    %26 = vector.load %arg4[%c1_28, %c0_29, %c0_30] : memref<9x128x128xbf16, #tpu.memory_space<vmem>>, vector<1x128x128xbf16>
    %27 = vector.shape_cast %26 : vector<1x128x128xbf16> to vector<128x128xbf16>
    %cst_31 = arith.constant dense<0.000000e+00> : vector<8x128xf32>
    %28 = tpu.matmul %25, %27, %cst_31 {dimension_numbers = #tpu.dot_dimension_numbers<[1], [0], [0], [1], [0, 0, 1, 1], [], []>} : vector<8x128xbf16>, vector<128x128xbf16>, vector<8x128xf32> -> vector<8x128xf32>
    %29 = arith.addf %22, %28 : vector<8x128xf32>
    %c0_32 = arith.constant 0 : index
    %c0_33 = arith.constant 0 : index
    %c2 = arith.constant 2 : index
    %c0_34 = arith.constant 0 : index
    %30 = vector.load %arg7[%c0_32, %c0_33, %c2, %c0_34] : memref<2x4x4x128xf32, #tpu.memory_space<vmem>>, vector<2x2x2x128xf32>
    %31 = vector.shape_cast %30 : vector<2x2x2x128xf32> to vector<8x128xf32>
    %32 = arith.truncf %31 : vector<8x128xf32> to vector<8x128xbf16>
    %c2_35 = arith.constant 2 : index
    %c0_36 = arith.constant 0 : index
    %c0_37 = arith.constant 0 : index
    %33 = vector.load %arg4[%c2_35, %c0_36, %c0_37] : memref<9x128x128xbf16, #tpu.memory_space<vmem>>, vector<1x128x128xbf16>
    %34 = vector.shape_cast %33 : vector<1x128x128xbf16> to vector<128x128xbf16>
    %cst_38 = arith.constant dense<0.000000e+00> : vector<8x128xf32>
    %35 = tpu.matmul %32, %34, %cst_38 {dimension_numbers = #tpu.dot_dimension_numbers<[1], [0], [0], [1], [0, 0, 1, 1], [], []>} : vector<8x128xbf16>, vector<128x128xbf16>, vector<8x128xf32> -> vector<8x128xf32>
    %36 = arith.addf %29, %35 : vector<8x128xf32>
    %c0_39 = arith.constant 0 : index
    %c1_40 = arith.constant 1 : index
    %c0_41 = arith.constant 0 : index
    %c0_42 = arith.constant 0 : index
    %37 = vector.load %arg7[%c0_39, %c1_40, %c0_41, %c0_42] : memref<2x4x4x128xf32, #tpu.memory_space<vmem>>, vector<2x2x2x128xf32>
    %38 = vector.shape_cast %37 : vector<2x2x2x128xf32> to vector<8x128xf32>
    %39 = arith.truncf %38 : vector<8x128xf32> to vector<8x128xbf16>
    %c3 = arith.constant 3 : index
    %c0_43 = arith.constant 0 : index
    %c0_44 = arith.constant 0 : index
    %40 = vector.load %arg4[%c3, %c0_43, %c0_44] : memref<9x128x128xbf16, #tpu.memory_space<vmem>>, vector<1x128x128xbf16>
    %41 = vector.shape_cast %40 : vector<1x128x128xbf16> to vector<128x128xbf16>
    %cst_45 = arith.constant dense<0.000000e+00> : vector<8x128xf32>
    %42 = tpu.matmul %39, %41, %cst_45 {dimension_numbers = #tpu.dot_dimension_numbers<[1], [0], [0], [1], [0, 0, 1, 1], [], []>} : vector<8x128xbf16>, vector<128x128xbf16>, vector<8x128xf32> -> vector<8x128xf32>
    %43 = arith.addf %36, %42 : vector<8x128xf32>
    %c0_46 = arith.constant 0 : index
    %c1_47 = arith.constant 1 : index
    %c1_48 = arith.constant 1 : index
    %c0_49 = arith.constant 0 : index
    %44 = vector.load %arg7[%c0_46, %c1_47, %c1_48, %c0_49] : memref<2x4x4x128xf32, #tpu.memory_space<vmem>>, vector<2x2x2x128xf32>
    %45 = vector.shape_cast %44 : vector<2x2x2x128xf32> to vector<8x128xf32>
    %46 = arith.truncf %45 : vector<8x128xf32> to vector<8x128xbf16>
    %c4 = arith.constant 4 : index
    %c0_50 = arith.constant 0 : index
    %c0_51 = arith.constant 0 : index
    %47 = vector.load %arg4[%c4, %c0_50, %c0_51] : memref<9x128x128xbf16, #tpu.memory_space<vmem>>, vector<1x128x128xbf16>
    %48 = vector.shape_cast %47 : vector<1x128x128xbf16> to vector<128x128xbf16>
    %cst_52 = arith.constant dense<0.000000e+00> : vector<8x128xf32>
    %49 = tpu.matmul %46, %48, %cst_52 {dimension_numbers = #tpu.dot_dimension_numbers<[1], [0], [0], [1], [0, 0, 1, 1], [], []>} : vector<8x128xbf16>, vector<128x128xbf16>, vector<8x128xf32> -> vector<8x128xf32>
    %50 = arith.addf %43, %49 : vector<8x128xf32>
    %c0_53 = arith.constant 0 : index
    %c1_54 = arith.constant 1 : index
    %c2_55 = arith.constant 2 : index
    %c0_56 = arith.constant 0 : index
    %51 = vector.load %arg7[%c0_53, %c1_54, %c2_55, %c0_56] : memref<2x4x4x128xf32, #tpu.memory_space<vmem>>, vector<2x2x2x128xf32>
    %52 = vector.shape_cast %51 : vector<2x2x2x128xf32> to vector<8x128xf32>
    %53 = arith.truncf %52 : vector<8x128xf32> to vector<8x128xbf16>
    %c5 = arith.constant 5 : index
    %c0_57 = arith.constant 0 : index
    %c0_58 = arith.constant 0 : index
    %54 = vector.load %arg4[%c5, %c0_57, %c0_58] : memref<9x128x128xbf16, #tpu.memory_space<vmem>>, vector<1x128x128xbf16>
    %55 = vector.shape_cast %54 : vector<1x128x128xbf16> to vector<128x128xbf16>
    %cst_59 = arith.constant dense<0.000000e+00> : vector<8x128xf32>
    %56 = tpu.matmul %53, %55, %cst_59 {dimension_numbers = #tpu.dot_dimension_numbers<[1], [0], [0], [1], [0, 0, 1, 1], [], []>} : vector<8x128xbf16>, vector<128x128xbf16>, vector<8x128xf32> -> vector<8x128xf32>
    %57 = arith.addf %50, %56 : vector<8x128xf32>
    %c0_60 = arith.constant 0 : index
    %c2_61 = arith.constant 2 : index
    %c0_62 = arith.constant 0 : index
    %c0_63 = arith.constant 0 : index
    %58 = vector.load %arg7[%c0_60, %c2_61, %c0_62, %c0_63] : memref<2x4x4x128xf32, #tpu.memory_space<vmem>>, vector<2x2x2x128xf32>
    %59 = vector.shape_cast %58 : vector<2x2x2x128xf32> to vector<8x128xf32>
    %60 = arith.truncf %59 : vector<8x128xf32> to vector<8x128xbf16>
    %c6 = arith.constant 6 : index
    %c0_64 = arith.constant 0 : index
    %c0_65 = arith.constant 0 : index
    %61 = vector.load %arg4[%c6, %c0_64, %c0_65] : memref<9x128x128xbf16, #tpu.memory_space<vmem>>, vector<1x128x128xbf16>
    %62 = vector.shape_cast %61 : vector<1x128x128xbf16> to vector<128x128xbf16>
    %cst_66 = arith.constant dense<0.000000e+00> : vector<8x128xf32>
    %63 = tpu.matmul %60, %62, %cst_66 {dimension_numbers = #tpu.dot_dimension_numbers<[1], [0], [0], [1], [0, 0, 1, 1], [], []>} : vector<8x128xbf16>, vector<128x128xbf16>, vector<8x128xf32> -> vector<8x128xf32>
    %64 = arith.addf %57, %63 : vector<8x128xf32>
    %c0_67 = arith.constant 0 : index
    %c2_68 = arith.constant 2 : index
    %c1_69 = arith.constant 1 : index
    %c0_70 = arith.constant 0 : index
    %65 = vector.load %arg7[%c0_67, %c2_68, %c1_69, %c0_70] : memref<2x4x4x128xf32, #tpu.memory_space<vmem>>, vector<2x2x2x128xf32>
    %66 = vector.shape_cast %65 : vector<2x2x2x128xf32> to vector<8x128xf32>
    %67 = arith.truncf %66 : vector<8x128xf32> to vector<8x128xbf16>
    %c7 = arith.constant 7 : index
    %c0_71 = arith.constant 0 : index
    %c0_72 = arith.constant 0 : index
    %68 = vector.load %arg4[%c7, %c0_71, %c0_72] : memref<9x128x128xbf16, #tpu.memory_space<vmem>>, vector<1x128x128xbf16>
    %69 = vector.shape_cast %68 : vector<1x128x128xbf16> to vector<128x128xbf16>
    %cst_73 = arith.constant dense<0.000000e+00> : vector<8x128xf32>
    %70 = tpu.matmul %67, %69, %cst_73 {dimension_numbers = #tpu.dot_dimension_numbers<[1], [0], [0], [1], [0, 0, 1, 1], [], []>} : vector<8x128xbf16>, vector<128x128xbf16>, vector<8x128xf32> -> vector<8x128xf32>
    %71 = arith.addf %64, %70 : vector<8x128xf32>
    %c0_74 = arith.constant 0 : index
    %c2_75 = arith.constant 2 : index
    %c2_76 = arith.constant 2 : index
    %c0_77 = arith.constant 0 : index
    %72 = vector.load %arg7[%c0_74, %c2_75, %c2_76, %c0_77] : memref<2x4x4x128xf32, #tpu.memory_space<vmem>>, vector<2x2x2x128xf32>
    %73 = vector.shape_cast %72 : vector<2x2x2x128xf32> to vector<8x128xf32>
    %74 = arith.truncf %73 : vector<8x128xf32> to vector<8x128xbf16>
    %c8 = arith.constant 8 : index
    %c0_78 = arith.constant 0 : index
    %c0_79 = arith.constant 0 : index
    %75 = vector.load %arg4[%c8, %c0_78, %c0_79] : memref<9x128x128xbf16, #tpu.memory_space<vmem>>, vector<1x128x128xbf16>
    %76 = vector.shape_cast %75 : vector<1x128x128xbf16> to vector<128x128xbf16>
    %cst_80 = arith.constant dense<0.000000e+00> : vector<8x128xf32>
    %77 = tpu.matmul %74, %76, %cst_80 {dimension_numbers = #tpu.dot_dimension_numbers<[1], [0], [0], [1], [0, 0, 1, 1], [], []>} : vector<8x128xbf16>, vector<128x128xbf16>, vector<8x128xf32> -> vector<8x128xf32>
    %78 = arith.addf %71, %77 : vector<8x128xf32>
    %cst_81 = arith.constant 0.000000e+00 : f32
    %79 = vector.broadcast %cst_81 : f32 to vector<8x128xf32>
    %80 = arith.maximumf %78, %79 : vector<8x128xf32>
    %81 = arith.addf %80, %9 : vector<8x128xf32>
    %82 = arith.truncf %81 : vector<8x128xf32> to vector<8x128xbf16>
    %c0_82 = arith.constant 0 : index
    %c0_83 = arith.constant 0 : index
    %83 = vector.load %arg6[%c0_82, %c0_83] : memref<8x128xbf16, #tpu.memory_space<vmem>>, vector<8x128xbf16>
    tpu.vector_store %arg6[%c0_82, %c0_83], %82 {strides = array<i32>} : memref<8x128xbf16, #tpu.memory_space<vmem>>, vector<8x128xbf16>,
    return
  }
  func.func @transform_0(%arg0: i32) -> (i32, i32) {
    %c0_i32 = arith.constant 0 : i32
    %c0_i32_0 = arith.constant 0 : i32
    %c0_i32_1 = arith.constant 0 : i32
    return %c0_i32, %c0_i32_0 : i32, i32
  }
  func.func @transform_1(%arg0: i32) -> (i32, i32) {
    %c0_i32 = arith.constant 0 : i32
    %c0_i32_0 = arith.constant 0 : i32
    %c0_i32_1 = arith.constant 0 : i32
    return %c0_i32, %c0_i32_0 : i32, i32
  }
  func.func @transform_2(%arg0: i32) -> (i32, i32) {
    %c0_i32 = arith.constant 0 : i32
    %c0_i32_0 = arith.constant 0 : i32
    %c0_i32_1 = arith.constant 0 : i32
    return %c0_i32, %c0_i32_0 : i32, i32
  }
  func.func @transform_3(%arg0: i32) -> (i32, i32, i32) {
    %c0_i32 = arith.constant 0 : i32
    %c0_i32_0 = arith.constant 0 : i32
    %c0_i32_1 = arith.constant 0 : i32
    %c0_i32_2 = arith.constant 0 : i32
    return %c0_i32, %c0_i32_0, %c0_i32_1 : i32, i32, i32
  }
  func.func @transform_4(%arg0: i32) -> (i32, i32) {
    %c0_i32 = arith.constant 0 : i32
    %c0_i32_0 = arith.constant 0 : i32
    %c0_i32_1 = arith.constant 0 : i32
    return %c0_i32, %c0_i32_0 : i32, i32
  }
  func.func @transform_5(%arg0: i32) -> (i32, i32) {
    %c0_i32 = arith.constant 0 : i32
    %c0_i32_0 = arith.constant 0 : i32
    %c0_i32_1 = arith.constant 0 : i32
    return %c0_i32, %c0_i32_0 : i32, i32
  }
}

module attributes {stable_mosaic.version = 11 : i64} {
  func.func @_fused_mm_kernel(%arg0: i32, %arg1: memref<2x64xbf16, #tpu.memory_space<vmem>>, %arg2: memref<64x1024xbf16, #tpu.memory_space<vmem>>, %arg3: memref<1x1024xf32, #tpu.memory_space<vmem>>, %arg4: memref<1x1024xf32, #tpu.memory_space<vmem>>, %arg5: memref<2x1024xbf16, #tpu.memory_space<vmem>>) attributes {dimension_semantics = [#tpu.dimension_semantics<parallel>], iteration_bounds = array<i64: 1>, scalar_prefetch = 0 : i64, scratch_operands = 0 : i64, tpu.core_type = #tpu.core_type<tc>, window_params = [{transform_indices = @transform_0, window_bounds = array<i64: 2, 64>}, {pipeline_mode = #tpu.pipeline_mode<synchronous>, transform_indices = @transform_1, window_bounds = array<i64: 64, 1024>}, {pipeline_mode = #tpu.pipeline_mode<synchronous>, transform_indices = @transform_2, window_bounds = array<i64: 1, 1024>}, {pipeline_mode = #tpu.pipeline_mode<synchronous>, transform_indices = @transform_3, window_bounds = array<i64: 1, 1024>}, {transform_indices = @transform_4, window_bounds = array<i64: 2, 1024>}]} {
    %c0 = arith.constant 0 : index
    %c0_0 = arith.constant 0 : index
    %0 = vector.load %arg1[%c0, %c0_0] : memref<2x64xbf16, #tpu.memory_space<vmem>>, vector<2x64xbf16>
    %c0_1 = arith.constant 0 : index
    %c0_2 = arith.constant 0 : index
    %1 = vector.load %arg2[%c0_1, %c0_2] : memref<64x1024xbf16, #tpu.memory_space<vmem>>, vector<64x1024xbf16>
    %cst = arith.constant dense<0.000000e+00> : vector<2x1024xf32>
    %2 = tpu.matmul %0, %1, %cst {dimension_numbers = #tpu.dot_dimension_numbers<[1], [0], [0], [1], [0, 0, 1, 1], [], []>} : vector<2x64xbf16>, vector<64x1024xbf16>, vector<2x1024xf32> -> vector<2x1024xf32>
    %cst_3 = arith.constant dense<0.000000e+00> : vector<1024xf32>
    %3 = vector.multi_reduction <add>, %2, %cst_3 [0] : vector<2x1024xf32> to vector<1024xf32>
    %4 = vector.shape_cast %3 : vector<1024xf32> to vector<1x1024xf32>
    %5 = arith.mulf %2, %2 : vector<2x1024xf32>
    %cst_4 = arith.constant dense<0.000000e+00> : vector<1024xf32>
    %6 = vector.multi_reduction <add>, %5, %cst_4 [0] : vector<2x1024xf32> to vector<1024xf32>
    %7 = vector.shape_cast %6 : vector<1024xf32> to vector<1x1024xf32>
    %cst_5 = arith.constant 5.000000e-01 : f32
    %8 = vector.broadcast %cst_5 : f32 to vector<1x1024xf32>
    %9 = arith.mulf %4, %8 : vector<1x1024xf32>
    %cst_6 = arith.constant 5.000000e-01 : f32
    %10 = vector.broadcast %cst_6 : f32 to vector<1x1024xf32>
    %11 = arith.mulf %7, %10 : vector<1x1024xf32>
    %12 = arith.mulf %9, %9 : vector<1x1024xf32>
    %13 = arith.subf %11, %12 : vector<1x1024xf32>
    %14 = vector.broadcast %9 : vector<1x1024xf32> to vector<2x1024xf32>
    %15 = arith.subf %2, %14 : vector<2x1024xf32>
    %cst_7 = arith.constant 9.99999974E-6 : f32
    %16 = vector.broadcast %cst_7 : f32 to vector<1x1024xf32>
    %17 = arith.addf %13, %16 : vector<1x1024xf32>
    %18 = math.rsqrt %17 : vector<1x1024xf32>
    %19 = vector.broadcast %18 : vector<1x1024xf32> to vector<2x1024xf32>
    %20 = arith.mulf %15, %19 : vector<2x1024xf32>
    %c0_8 = arith.constant 0 : index
    %c0_9 = arith.constant 0 : index
    %21 = vector.load %arg3[%c0_8, %c0_9] : memref<1x1024xf32, #tpu.memory_space<vmem>>, vector<1x1024xf32>
    %22 = vector.broadcast %21 : vector<1x1024xf32> to vector<2x1024xf32>
    %23 = arith.mulf %20, %22 : vector<2x1024xf32>
    %c0_10 = arith.constant 0 : index
    %c0_11 = arith.constant 0 : index
    %24 = vector.load %arg4[%c0_10, %c0_11] : memref<1x1024xf32, #tpu.memory_space<vmem>>, vector<1x1024xf32>
    %25 = vector.broadcast %24 : vector<1x1024xf32> to vector<2x1024xf32>
    %26 = arith.addf %23, %25 : vector<2x1024xf32>
    %cst_12 = arith.constant 0.000000e+00 : f32
    %27 = vector.broadcast %cst_12 : f32 to vector<2x1024xf32>
    %28 = arith.maximumf %26, %27 : vector<2x1024xf32>
    %29 = arith.truncf %28 : vector<2x1024xf32> to vector<2x1024xbf16>
    %c0_13 = arith.constant 0 : index
    %c0_14 = arith.constant 0 : index
    %30 = vector.load %arg5[%c0_13, %c0_14] : memref<2x1024xbf16, #tpu.memory_space<vmem>>, vector<2x1024xbf16>
    tpu.vector_store %arg5[%c0_13, %c0_14], %29 {strides = array<i32>} : memref<2x1024xbf16, #tpu.memory_space<vmem>>, vector<2x1024xbf16>,
    return
  }
  func.func @transform_0(%arg0: i32) -> (i32, i32) {
    %c0_i32 = arith.constant 0 : i32
    %c0_i32_0 = arith.constant 0 : i32
    return %arg0, %c0_i32 : i32, i32
  }
  func.func @transform_1(%arg0: i32) -> (i32, i32) {
    %c0_i32 = arith.constant 0 : i32
    %c0_i32_0 = arith.constant 0 : i32
    %c0_i32_1 = arith.constant 0 : i32
    return %c0_i32, %c0_i32_0 : i32, i32
  }
  func.func @transform_2(%arg0: i32) -> (i32, i32) {
    %c0_i32 = arith.constant 0 : i32
    %c0_i32_0 = arith.constant 0 : i32
    %c0_i32_1 = arith.constant 0 : i32
    return %c0_i32, %c0_i32_0 : i32, i32
  }
  func.func @transform_3(%arg0: i32) -> (i32, i32) {
    %c0_i32 = arith.constant 0 : i32
    %c0_i32_0 = arith.constant 0 : i32
    %c0_i32_1 = arith.constant 0 : i32
    return %c0_i32, %c0_i32_0 : i32, i32
  }
  func.func @transform_4(%arg0: i32) -> (i32, i32) {
    %c0_i32 = arith.constant 0 : i32
    %c0_i32_0 = arith.constant 0 : i32
    return %arg0, %c0_i32 : i32, i32
  }
}

module attributes {stable_mosaic.version = 11 : i64} {
  func.func @_fused_mm_kernel(%arg0: i32, %arg1: memref<32x576xbf16, #tpu.memory_space<vmem>>, %arg2: memref<576x128xbf16, #tpu.memory_space<vmem>>, %arg3: memref<1x128xf32, #tpu.memory_space<vmem>>, %arg4: memref<1x128xf32, #tpu.memory_space<vmem>>, %arg5: memref<32x128xbf16, #tpu.memory_space<vmem>>) attributes {dimension_semantics = [#tpu.dimension_semantics<parallel>], iteration_bounds = array<i64: 1>, scalar_prefetch = 0 : i64, scratch_operands = 0 : i64, tpu.core_type = #tpu.core_type<tc>, window_params = [{transform_indices = @transform_0, window_bounds = array<i64: 32, 576>}, {pipeline_mode = #tpu.pipeline_mode<synchronous>, transform_indices = @transform_1, window_bounds = array<i64: 576, 128>}, {pipeline_mode = #tpu.pipeline_mode<synchronous>, transform_indices = @transform_2, window_bounds = array<i64: 1, 128>}, {pipeline_mode = #tpu.pipeline_mode<synchronous>, transform_indices = @transform_3, window_bounds = array<i64: 1, 128>}, {transform_indices = @transform_4, window_bounds = array<i64: 32, 128>}]} {
    %c0 = arith.constant 0 : index
    %c0_0 = arith.constant 0 : index
    %0 = vector.load %arg1[%c0, %c0_0] : memref<32x576xbf16, #tpu.memory_space<vmem>>, vector<32x576xbf16>
    %c0_1 = arith.constant 0 : index
    %c0_2 = arith.constant 0 : index
    %1 = vector.load %arg2[%c0_1, %c0_2] : memref<576x128xbf16, #tpu.memory_space<vmem>>, vector<576x128xbf16>
    %cst = arith.constant dense<0.000000e+00> : vector<32x128xf32>
    %2 = tpu.matmul %0, %1, %cst {dimension_numbers = #tpu.dot_dimension_numbers<[1], [0], [0], [1], [0, 0, 1, 1], [], []>} : vector<32x576xbf16>, vector<576x128xbf16>, vector<32x128xf32> -> vector<32x128xf32>
    %cst_3 = arith.constant dense<0.000000e+00> : vector<128xf32>
    %3 = vector.multi_reduction <add>, %2, %cst_3 [0] : vector<32x128xf32> to vector<128xf32>
    %4 = vector.shape_cast %3 : vector<128xf32> to vector<1x128xf32>
    %5 = arith.mulf %2, %2 : vector<32x128xf32>
    %cst_4 = arith.constant dense<0.000000e+00> : vector<128xf32>
    %6 = vector.multi_reduction <add>, %5, %cst_4 [0] : vector<32x128xf32> to vector<128xf32>
    %7 = vector.shape_cast %6 : vector<128xf32> to vector<1x128xf32>
    %c32_i32 = arith.constant 32 : i32
    %8 = tpu.dynamic_rotate %4 by %c32_i32 dim 1 : vector<1x128xf32>, i32 -> vector<1x128xf32>
    %9 = arith.addf %4, %8 : vector<1x128xf32>
    %c32_i32_5 = arith.constant 32 : i32
    %10 = tpu.dynamic_rotate %7 by %c32_i32_5 dim 1 : vector<1x128xf32>, i32 -> vector<1x128xf32>
    %11 = arith.addf %7, %10 : vector<1x128xf32>
    %c64_i32 = arith.constant 64 : i32
    %12 = tpu.dynamic_rotate %4 by %c64_i32 dim 1 : vector<1x128xf32>, i32 -> vector<1x128xf32>
    %13 = arith.addf %9, %12 : vector<1x128xf32>
    %c64_i32_6 = arith.constant 64 : i32
    %14 = tpu.dynamic_rotate %7 by %c64_i32_6 dim 1 : vector<1x128xf32>, i32 -> vector<1x128xf32>
    %15 = arith.addf %11, %14 : vector<1x128xf32>
    %c96_i32 = arith.constant 96 : i32
    %16 = tpu.dynamic_rotate %4 by %c96_i32 dim 1 : vector<1x128xf32>, i32 -> vector<1x128xf32>
    %17 = arith.addf %13, %16 : vector<1x128xf32>
    %c96_i32_7 = arith.constant 96 : i32
    %18 = tpu.dynamic_rotate %7 by %c96_i32_7 dim 1 : vector<1x128xf32>, i32 -> vector<1x128xf32>
    %19 = arith.addf %15, %18 : vector<1x128xf32>
    %cst_8 = arith.constant 7.812500e-03 : f32
    %20 = vector.broadcast %cst_8 : f32 to vector<1x128xf32>
    %21 = arith.mulf %17, %20 : vector<1x128xf32>
    %cst_9 = arith.constant 7.812500e-03 : f32
    %22 = vector.broadcast %cst_9 : f32 to vector<1x128xf32>
    %23 = arith.mulf %19, %22 : vector<1x128xf32>
    %24 = arith.mulf %21, %21 : vector<1x128xf32>
    %25 = arith.subf %23, %24 : vector<1x128xf32>
    %26 = vector.broadcast %21 : vector<1x128xf32> to vector<32x128xf32>
    %27 = arith.subf %2, %26 : vector<32x128xf32>
    %cst_10 = arith.constant 9.99999974E-6 : f32
    %28 = vector.broadcast %cst_10 : f32 to vector<1x128xf32>
    %29 = arith.addf %25, %28 : vector<1x128xf32>
    %30 = math.rsqrt %29 : vector<1x128xf32>
    %31 = vector.broadcast %30 : vector<1x128xf32> to vector<32x128xf32>
    %32 = arith.mulf %27, %31 : vector<32x128xf32>
    %c0_11 = arith.constant 0 : index
    %c0_12 = arith.constant 0 : index
    %33 = vector.load %arg3[%c0_11, %c0_12] : memref<1x128xf32, #tpu.memory_space<vmem>>, vector<1x128xf32>
    %34 = vector.broadcast %33 : vector<1x128xf32> to vector<32x128xf32>
    %35 = arith.mulf %32, %34 : vector<32x128xf32>
    %c0_13 = arith.constant 0 : index
    %c0_14 = arith.constant 0 : index
    %36 = vector.load %arg4[%c0_13, %c0_14] : memref<1x128xf32, #tpu.memory_space<vmem>>, vector<1x128xf32>
    %37 = vector.broadcast %36 : vector<1x128xf32> to vector<32x128xf32>
    %38 = arith.addf %35, %37 : vector<32x128xf32>
    %cst_15 = arith.constant 0.000000e+00 : f32
    %39 = vector.broadcast %cst_15 : f32 to vector<32x128xf32>
    %40 = arith.maximumf %38, %39 : vector<32x128xf32>
    %41 = arith.truncf %40 : vector<32x128xf32> to vector<32x128xbf16>
    %c0_16 = arith.constant 0 : index
    %c0_17 = arith.constant 0 : index
    %42 = vector.load %arg5[%c0_16, %c0_17] : memref<32x128xbf16, #tpu.memory_space<vmem>>, vector<32x128xbf16>
    tpu.vector_store %arg5[%c0_16, %c0_17], %41 {strides = array<i32>} : memref<32x128xbf16, #tpu.memory_space<vmem>>, vector<32x128xbf16>,
    return
  }
  func.func @transform_0(%arg0: i32) -> (i32, i32) {
    %c0_i32 = arith.constant 0 : i32
    %c0_i32_0 = arith.constant 0 : i32
    return %arg0, %c0_i32 : i32, i32
  }
  func.func @transform_1(%arg0: i32) -> (i32, i32) {
    %c0_i32 = arith.constant 0 : i32
    %c0_i32_0 = arith.constant 0 : i32
    %c0_i32_1 = arith.constant 0 : i32
    return %c0_i32, %c0_i32_0 : i32, i32
  }
  func.func @transform_2(%arg0: i32) -> (i32, i32) {
    %c0_i32 = arith.constant 0 : i32
    %c0_i32_0 = arith.constant 0 : i32
    %c0_i32_1 = arith.constant 0 : i32
    return %c0_i32, %c0_i32_0 : i32, i32
  }
  func.func @transform_3(%arg0: i32) -> (i32, i32) {
    %c0_i32 = arith.constant 0 : i32
    %c0_i32_0 = arith.constant 0 : i32
    %c0_i32_1 = arith.constant 0 : i32
    return %c0_i32, %c0_i32_0 : i32, i32
  }
  func.func @transform_4(%arg0: i32) -> (i32, i32) {
    %c0_i32 = arith.constant 0 : i32
    %c0_i32_0 = arith.constant 0 : i32
    return %arg0, %c0_i32 : i32, i32
  }
}

module attributes {stable_mosaic.version = 11 : i64} {
  func.func @_fused_mm_kernel(%arg0: i32, %arg1: memref<128x288xbf16, #tpu.memory_space<vmem>>, %arg2: memref<288x128xbf16, #tpu.memory_space<vmem>>, %arg3: memref<1x128xf32, #tpu.memory_space<vmem>>, %arg4: memref<1x128xf32, #tpu.memory_space<vmem>>, %arg5: memref<128x128xbf16, #tpu.memory_space<vmem>>) attributes {dimension_semantics = [#tpu.dimension_semantics<parallel>], iteration_bounds = array<i64: 1>, scalar_prefetch = 0 : i64, scratch_operands = 0 : i64, tpu.core_type = #tpu.core_type<tc>, window_params = [{transform_indices = @transform_0, window_bounds = array<i64: 128, 288>}, {pipeline_mode = #tpu.pipeline_mode<synchronous>, transform_indices = @transform_1, window_bounds = array<i64: 288, 128>}, {pipeline_mode = #tpu.pipeline_mode<synchronous>, transform_indices = @transform_2, window_bounds = array<i64: 1, 128>}, {pipeline_mode = #tpu.pipeline_mode<synchronous>, transform_indices = @transform_3, window_bounds = array<i64: 1, 128>}, {transform_indices = @transform_4, window_bounds = array<i64: 128, 128>}]} {
    %c0 = arith.constant 0 : index
    %c0_0 = arith.constant 0 : index
    %0 = vector.load %arg1[%c0, %c0_0] : memref<128x288xbf16, #tpu.memory_space<vmem>>, vector<128x288xbf16>
    %c0_1 = arith.constant 0 : index
    %c0_2 = arith.constant 0 : index
    %1 = vector.load %arg2[%c0_1, %c0_2] : memref<288x128xbf16, #tpu.memory_space<vmem>>, vector<288x128xbf16>
    %cst = arith.constant dense<0.000000e+00> : vector<128x128xf32>
    %2 = tpu.matmul %0, %1, %cst {dimension_numbers = #tpu.dot_dimension_numbers<[1], [0], [0], [1], [0, 0, 1, 1], [], []>} : vector<128x288xbf16>, vector<288x128xbf16>, vector<128x128xf32> -> vector<128x128xf32>
    %cst_3 = arith.constant dense<0.000000e+00> : vector<128xf32>
    %3 = vector.multi_reduction <add>, %2, %cst_3 [0] : vector<128x128xf32> to vector<128xf32>
    %4 = vector.shape_cast %3 : vector<128xf32> to vector<1x128xf32>
    %5 = arith.mulf %2, %2 : vector<128x128xf32>
    %cst_4 = arith.constant dense<0.000000e+00> : vector<128xf32>
    %6 = vector.multi_reduction <add>, %5, %cst_4 [0] : vector<128x128xf32> to vector<128xf32>
    %7 = vector.shape_cast %6 : vector<128xf32> to vector<1x128xf32>
    %c32_i32 = arith.constant 32 : i32
    %8 = tpu.dynamic_rotate %4 by %c32_i32 dim 1 : vector<1x128xf32>, i32 -> vector<1x128xf32>
    %9 = arith.addf %4, %8 : vector<1x128xf32>
    %c32_i32_5 = arith.constant 32 : i32
    %10 = tpu.dynamic_rotate %7 by %c32_i32_5 dim 1 : vector<1x128xf32>, i32 -> vector<1x128xf32>
    %11 = arith.addf %7, %10 : vector<1x128xf32>
    %c64_i32 = arith.constant 64 : i32
    %12 = tpu.dynamic_rotate %4 by %c64_i32 dim 1 : vector<1x128xf32>, i32 -> vector<1x128xf32>
    %13 = arith.addf %9, %12 : vector<1x128xf32>
    %c64_i32_6 = arith.constant 64 : i32
    %14 = tpu.dynamic_rotate %7 by %c64_i32_6 dim 1 : vector<1x128xf32>, i32 -> vector<1x128xf32>
    %15 = arith.addf %11, %14 : vector<1x128xf32>
    %c96_i32 = arith.constant 96 : i32
    %16 = tpu.dynamic_rotate %4 by %c96_i32 dim 1 : vector<1x128xf32>, i32 -> vector<1x128xf32>
    %17 = arith.addf %13, %16 : vector<1x128xf32>
    %c96_i32_7 = arith.constant 96 : i32
    %18 = tpu.dynamic_rotate %7 by %c96_i32_7 dim 1 : vector<1x128xf32>, i32 -> vector<1x128xf32>
    %19 = arith.addf %15, %18 : vector<1x128xf32>
    %cst_8 = arith.constant 0.001953125 : f32
    %20 = vector.broadcast %cst_8 : f32 to vector<1x128xf32>
    %21 = arith.mulf %17, %20 : vector<1x128xf32>
    %cst_9 = arith.constant 0.001953125 : f32
    %22 = vector.broadcast %cst_9 : f32 to vector<1x128xf32>
    %23 = arith.mulf %19, %22 : vector<1x128xf32>
    %24 = arith.mulf %21, %21 : vector<1x128xf32>
    %25 = arith.subf %23, %24 : vector<1x128xf32>
    %26 = vector.broadcast %21 : vector<1x128xf32> to vector<128x128xf32>
    %27 = arith.subf %2, %26 : vector<128x128xf32>
    %cst_10 = arith.constant 9.99999974E-6 : f32
    %28 = vector.broadcast %cst_10 : f32 to vector<1x128xf32>
    %29 = arith.addf %25, %28 : vector<1x128xf32>
    %30 = math.rsqrt %29 : vector<1x128xf32>
    %31 = vector.broadcast %30 : vector<1x128xf32> to vector<128x128xf32>
    %32 = arith.mulf %27, %31 : vector<128x128xf32>
    %c0_11 = arith.constant 0 : index
    %c0_12 = arith.constant 0 : index
    %33 = vector.load %arg3[%c0_11, %c0_12] : memref<1x128xf32, #tpu.memory_space<vmem>>, vector<1x128xf32>
    %34 = vector.broadcast %33 : vector<1x128xf32> to vector<128x128xf32>
    %35 = arith.mulf %32, %34 : vector<128x128xf32>
    %c0_13 = arith.constant 0 : index
    %c0_14 = arith.constant 0 : index
    %36 = vector.load %arg4[%c0_13, %c0_14] : memref<1x128xf32, #tpu.memory_space<vmem>>, vector<1x128xf32>
    %37 = vector.broadcast %36 : vector<1x128xf32> to vector<128x128xf32>
    %38 = arith.addf %35, %37 : vector<128x128xf32>
    %cst_15 = arith.constant 0.000000e+00 : f32
    %39 = vector.broadcast %cst_15 : f32 to vector<128x128xf32>
    %40 = arith.maximumf %38, %39 : vector<128x128xf32>
    %41 = arith.truncf %40 : vector<128x128xf32> to vector<128x128xbf16>
    %c0_16 = arith.constant 0 : index
    %c0_17 = arith.constant 0 : index
    %42 = vector.load %arg5[%c0_16, %c0_17] : memref<128x128xbf16, #tpu.memory_space<vmem>>, vector<128x128xbf16>
    tpu.vector_store %arg5[%c0_16, %c0_17], %41 {strides = array<i32>} : memref<128x128xbf16, #tpu.memory_space<vmem>>, vector<128x128xbf16>,
    return
  }
  func.func @transform_0(%arg0: i32) -> (i32, i32) {
    %c0_i32 = arith.constant 0 : i32
    %c0_i32_0 = arith.constant 0 : i32
    return %arg0, %c0_i32 : i32, i32
  }
  func.func @transform_1(%arg0: i32) -> (i32, i32) {
    %c0_i32 = arith.constant 0 : i32
    %c0_i32_0 = arith.constant 0 : i32
    %c0_i32_1 = arith.constant 0 : i32
    return %c0_i32, %c0_i32_0 : i32, i32
  }
  func.func @transform_2(%arg0: i32) -> (i32, i32) {
    %c0_i32 = arith.constant 0 : i32
    %c0_i32_0 = arith.constant 0 : i32
    %c0_i32_1 = arith.constant 0 : i32
    return %c0_i32, %c0_i32_0 : i32, i32
  }
  func.func @transform_3(%arg0: i32) -> (i32, i32) {
    %c0_i32 = arith.constant 0 : i32
    %c0_i32_0 = arith.constant 0 : i32
    %c0_i32_1 = arith.constant 0 : i32
    return %c0_i32, %c0_i32_0 : i32, i32
  }
  func.func @transform_4(%arg0: i32) -> (i32, i32) {
    %c0_i32 = arith.constant 0 : i32
    %c0_i32_0 = arith.constant 0 : i32
    return %arg0, %c0_i32 : i32, i32
  }
}

module attributes {stable_mosaic.version = 11 : i64} {
  func.func @_fused_mm_kernel(%arg0: i32, %arg1: memref<512x144xbf16, #tpu.memory_space<vmem>>, %arg2: memref<144x128xbf16, #tpu.memory_space<vmem>>, %arg3: memref<1x128xf32, #tpu.memory_space<vmem>>, %arg4: memref<1x128xf32, #tpu.memory_space<vmem>>, %arg5: memref<512x128xbf16, #tpu.memory_space<vmem>>) attributes {dimension_semantics = [#tpu.dimension_semantics<parallel>], iteration_bounds = array<i64: 1>, scalar_prefetch = 0 : i64, scratch_operands = 0 : i64, tpu.core_type = #tpu.core_type<tc>, window_params = [{transform_indices = @transform_0, window_bounds = array<i64: 512, 144>}, {pipeline_mode = #tpu.pipeline_mode<synchronous>, transform_indices = @transform_1, window_bounds = array<i64: 144, 128>}, {pipeline_mode = #tpu.pipeline_mode<synchronous>, transform_indices = @transform_2, window_bounds = array<i64: 1, 128>}, {pipeline_mode = #tpu.pipeline_mode<synchronous>, transform_indices = @transform_3, window_bounds = array<i64: 1, 128>}, {transform_indices = @transform_4, window_bounds = array<i64: 512, 128>}]} {
    %c0 = arith.constant 0 : index
    %c0_0 = arith.constant 0 : index
    %0 = vector.load %arg1[%c0, %c0_0] : memref<512x144xbf16, #tpu.memory_space<vmem>>, vector<512x144xbf16>
    %c0_1 = arith.constant 0 : index
    %c0_2 = arith.constant 0 : index
    %1 = vector.load %arg2[%c0_1, %c0_2] : memref<144x128xbf16, #tpu.memory_space<vmem>>, vector<144x128xbf16>
    %cst = arith.constant dense<0.000000e+00> : vector<512x128xf32>
    %2 = tpu.matmul %0, %1, %cst {dimension_numbers = #tpu.dot_dimension_numbers<[1], [0], [0], [1], [0, 0, 1, 1], [], []>} : vector<512x144xbf16>, vector<144x128xbf16>, vector<512x128xf32> -> vector<512x128xf32>
    %cst_3 = arith.constant dense<0.000000e+00> : vector<128xf32>
    %3 = vector.multi_reduction <add>, %2, %cst_3 [0] : vector<512x128xf32> to vector<128xf32>
    %4 = vector.shape_cast %3 : vector<128xf32> to vector<1x128xf32>
    %5 = arith.mulf %2, %2 : vector<512x128xf32>
    %cst_4 = arith.constant dense<0.000000e+00> : vector<128xf32>
    %6 = vector.multi_reduction <add>, %5, %cst_4 [0] : vector<512x128xf32> to vector<128xf32>
    %7 = vector.shape_cast %6 : vector<128xf32> to vector<1x128xf32>
    %c32_i32 = arith.constant 32 : i32
    %8 = tpu.dynamic_rotate %4 by %c32_i32 dim 1 : vector<1x128xf32>, i32 -> vector<1x128xf32>
    %9 = arith.addf %4, %8 : vector<1x128xf32>
    %c32_i32_5 = arith.constant 32 : i32
    %10 = tpu.dynamic_rotate %7 by %c32_i32_5 dim 1 : vector<1x128xf32>, i32 -> vector<1x128xf32>
    %11 = arith.addf %7, %10 : vector<1x128xf32>
    %c64_i32 = arith.constant 64 : i32
    %12 = tpu.dynamic_rotate %4 by %c64_i32 dim 1 : vector<1x128xf32>, i32 -> vector<1x128xf32>
    %13 = arith.addf %9, %12 : vector<1x128xf32>
    %c64_i32_6 = arith.constant 64 : i32
    %14 = tpu.dynamic_rotate %7 by %c64_i32_6 dim 1 : vector<1x128xf32>, i32 -> vector<1x128xf32>
    %15 = arith.addf %11, %14 : vector<1x128xf32>
    %c96_i32 = arith.constant 96 : i32
    %16 = tpu.dynamic_rotate %4 by %c96_i32 dim 1 : vector<1x128xf32>, i32 -> vector<1x128xf32>
    %17 = arith.addf %13, %16 : vector<1x128xf32>
    %c96_i32_7 = arith.constant 96 : i32
    %18 = tpu.dynamic_rotate %7 by %c96_i32_7 dim 1 : vector<1x128xf32>, i32 -> vector<1x128xf32>
    %19 = arith.addf %15, %18 : vector<1x128xf32>
    %cst_8 = arith.constant 4.8828125E-4 : f32
    %20 = vector.broadcast %cst_8 : f32 to vector<1x128xf32>
    %21 = arith.mulf %17, %20 : vector<1x128xf32>
    %cst_9 = arith.constant 4.8828125E-4 : f32
    %22 = vector.broadcast %cst_9 : f32 to vector<1x128xf32>
    %23 = arith.mulf %19, %22 : vector<1x128xf32>
    %24 = arith.mulf %21, %21 : vector<1x128xf32>
    %25 = arith.subf %23, %24 : vector<1x128xf32>
    %26 = vector.broadcast %21 : vector<1x128xf32> to vector<512x128xf32>
    %27 = arith.subf %2, %26 : vector<512x128xf32>
    %cst_10 = arith.constant 9.99999974E-6 : f32
    %28 = vector.broadcast %cst_10 : f32 to vector<1x128xf32>
    %29 = arith.addf %25, %28 : vector<1x128xf32>
    %30 = math.rsqrt %29 : vector<1x128xf32>
    %31 = vector.broadcast %30 : vector<1x128xf32> to vector<512x128xf32>
    %32 = arith.mulf %27, %31 : vector<512x128xf32>
    %c0_11 = arith.constant 0 : index
    %c0_12 = arith.constant 0 : index
    %33 = vector.load %arg3[%c0_11, %c0_12] : memref<1x128xf32, #tpu.memory_space<vmem>>, vector<1x128xf32>
    %34 = vector.broadcast %33 : vector<1x128xf32> to vector<512x128xf32>
    %35 = arith.mulf %32, %34 : vector<512x128xf32>
    %c0_13 = arith.constant 0 : index
    %c0_14 = arith.constant 0 : index
    %36 = vector.load %arg4[%c0_13, %c0_14] : memref<1x128xf32, #tpu.memory_space<vmem>>, vector<1x128xf32>
    %37 = vector.broadcast %36 : vector<1x128xf32> to vector<512x128xf32>
    %38 = arith.addf %35, %37 : vector<512x128xf32>
    %cst_15 = arith.constant 0.000000e+00 : f32
    %39 = vector.broadcast %cst_15 : f32 to vector<512x128xf32>
    %40 = arith.maximumf %38, %39 : vector<512x128xf32>
    %41 = arith.truncf %40 : vector<512x128xf32> to vector<512x128xbf16>
    %c0_16 = arith.constant 0 : index
    %c0_17 = arith.constant 0 : index
    %42 = vector.load %arg5[%c0_16, %c0_17] : memref<512x128xbf16, #tpu.memory_space<vmem>>, vector<512x128xbf16>
    tpu.vector_store %arg5[%c0_16, %c0_17], %41 {strides = array<i32>} : memref<512x128xbf16, #tpu.memory_space<vmem>>, vector<512x128xbf16>,
    return
  }
  func.func @transform_0(%arg0: i32) -> (i32, i32) {
    %c0_i32 = arith.constant 0 : i32
    %c0_i32_0 = arith.constant 0 : i32
    return %arg0, %c0_i32 : i32, i32
  }
  func.func @transform_1(%arg0: i32) -> (i32, i32) {
    %c0_i32 = arith.constant 0 : i32
    %c0_i32_0 = arith.constant 0 : i32
    %c0_i32_1 = arith.constant 0 : i32
    return %c0_i32, %c0_i32_0 : i32, i32
  }
  func.func @transform_2(%arg0: i32) -> (i32, i32) {
    %c0_i32 = arith.constant 0 : i32
    %c0_i32_0 = arith.constant 0 : i32
    %c0_i32_1 = arith.constant 0 : i32
    return %c0_i32, %c0_i32_0 : i32, i32
  }
  func.func @transform_3(%arg0: i32) -> (i32, i32) {
    %c0_i32 = arith.constant 0 : i32
    %c0_i32_0 = arith.constant 0 : i32
    %c0_i32_1 = arith.constant 0 : i32
    return %c0_i32, %c0_i32_0 : i32, i32
  }
  func.func @transform_4(%arg0: i32) -> (i32, i32) {
    %c0_i32 = arith.constant 0 : i32
    %c0_i32_0 = arith.constant 0 : i32
    return %arg0, %c0_i32 : i32, i32
  }
}

module attributes {stable_mosaic.version = 11 : i64} {
  func.func @_fused_mm_kernel(%arg0: i32, %arg1: memref<2048x80xbf16, #tpu.memory_space<vmem>>, %arg2: memref<80x128xbf16, #tpu.memory_space<vmem>>, %arg3: memref<1x128xf32, #tpu.memory_space<vmem>>, %arg4: memref<2048x128xf32, #tpu.memory_space<vmem>>) attributes {dimension_semantics = [#tpu.dimension_semantics<parallel>], iteration_bounds = array<i64: 1>, scalar_prefetch = 0 : i64, scratch_operands = 0 : i64, tpu.core_type = #tpu.core_type<tc>, window_params = [{transform_indices = @transform_0, window_bounds = array<i64: 2048, 80>}, {pipeline_mode = #tpu.pipeline_mode<synchronous>, transform_indices = @transform_1, window_bounds = array<i64: 80, 128>}, {pipeline_mode = #tpu.pipeline_mode<synchronous>, transform_indices = @transform_2, window_bounds = array<i64: 1, 128>}, {transform_indices = @transform_3, window_bounds = array<i64: 2048, 128>}]} {
    %c0 = arith.constant 0 : index
    %c0_0 = arith.constant 0 : index
    %0 = vector.load %arg1[%c0, %c0_0] : memref<2048x80xbf16, #tpu.memory_space<vmem>>, vector<2048x80xbf16>
    %c0_1 = arith.constant 0 : index
    %c0_2 = arith.constant 0 : index
    %1 = vector.load %arg2[%c0_1, %c0_2] : memref<80x128xbf16, #tpu.memory_space<vmem>>, vector<80x128xbf16>
    %cst = arith.constant dense<0.000000e+00> : vector<2048x128xf32>
    %2 = tpu.matmul %0, %1, %cst {dimension_numbers = #tpu.dot_dimension_numbers<[1], [0], [0], [1], [0, 0, 1, 1], [], []>} : vector<2048x80xbf16>, vector<80x128xbf16>, vector<2048x128xf32> -> vector<2048x128xf32>
    %c0_3 = arith.constant 0 : index
    %c0_4 = arith.constant 0 : index
    %3 = vector.load %arg3[%c0_3, %c0_4] : memref<1x128xf32, #tpu.memory_space<vmem>>, vector<1x128xf32>
    %4 = vector.broadcast %3 : vector<1x128xf32> to vector<2048x128xf32>
    %5 = arith.addf %2, %4 : vector<2048x128xf32>
    %6 = math.tanh %5 : vector<2048x128xf32>
    %c0_5 = arith.constant 0 : index
    %c0_6 = arith.constant 0 : index
    %7 = vector.load %arg4[%c0_5, %c0_6] : memref<2048x128xf32, #tpu.memory_space<vmem>>, vector<2048x128xf32>
    tpu.vector_store %arg4[%c0_5, %c0_6], %6 {strides = array<i32>} : memref<2048x128xf32, #tpu.memory_space<vmem>>, vector<2048x128xf32>,
    return
  }
  func.func @transform_0(%arg0: i32) -> (i32, i32) {
    %c0_i32 = arith.constant 0 : i32
    %c0_i32_0 = arith.constant 0 : i32
    return %arg0, %c0_i32 : i32, i32
  }
  func.func @transform_1(%arg0: i32) -> (i32, i32) {
    %c0_i32 = arith.constant 0 : i32
    %c0_i32_0 = arith.constant 0 : i32
    %c0_i32_1 = arith.constant 0 : i32
    return %c0_i32, %c0_i32_0 : i32, i32
  }
  func.func @transform_2(%arg0: i32) -> (i32, i32) {
    %c0_i32 = arith.constant 0 : i32
    %c0_i32_0 = arith.constant 0 : i32
    %c0_i32_1 = arith.constant 0 : i32
    return %c0_i32, %c0_i32_0 : i32, i32
  }
  func.func @transform_3(%arg0: i32) -> (i32, i32) {
    %c0_i32 = arith.constant 0 : i32
    %c0_i32_0 = arith.constant 0 : i32
    return %arg0, %c0_i32 : i32, i32
  }
}

</mosaic_0001>

<bundles_post_ra>
// kernel: poison_generator_forward.9
= control target key start
LH: loop header
LB: loop body
LE: loop exit
PB: predicated region body
PF: predicated region fallthrough
CT: control target
= control target key end

     0   :  { %v1781_v0 = vmov 0   ;;  %vm454_vm0 = vcmask 261120   ;;  %s2221_s1 = inlined_call_operand.vmem [shape: bf16[160,128], index: 1, kind: input, shape index: {}]   ;;  %s2222_s0 = inlined_call_operand.vmem [shape: bf16[512,160], index: 0, kind: input, shape index: {}]   ;;  %s2223_s2 = inlined_call_operand.vmem [shape: f32[1,128], index: 2, kind: input, shape index: {}]   ;;  %s2224_s3 = inlined_call_operand.vmem [shape: bf16[512,128], index: 3, kind: output, shape index: {}]  }
   0x1   :  { %551 = vmatprep.subr.bf16.mxu0 %v1781_v0  ;;  %1654 = vmatprep.subr.bf16.mxu1 %v1781_v0  ;;  %v1675_v1 = vld [vmem:[%s2221_s1] sm:$0xff]   ;;  %v1676_v2 = vld [vmem:[%s2221_s1 + $0x8] sm:$0xff]   ;;  %v1677_v3 = vld [vmem:[%s2221_s1 + $0x10] sm:$0xff]  }
   0x2   :  { %552 = vmatpush1.bf16.msra.mxu0 %v1675_v1  ;;  %1664 = vmatpush1.bf16.msra.mxu1 %v1675_v1  ;;  %v1678_v4 = vld [vmem:[%s2221_s1 + $0x18] sm:$0xff]   ;;  %v1687_v5 = vld [vmem:[%s2222_s0 + $0x4] ss:$8 sps:$4 sm:$0xff]   ;;  %v1681_v9 = vld [vmem:[%s2221_s1 + $0x30] sm:$0xff]  }
   0x3   :  { %553 = vmatprep.subr.bf16.mxu0 %v1781_v0  ;;  %1655 = vmatprep.subr.bf16.mxu1 %v1781_v0  ;;  %v1690_v6 = vld [vmem:[%s2222_s0 + $0x104] ss:$8 sps:$4 sm:$0xff]   ;;  %v1682_v10 = vld [vmem:[%s2221_s1 + $0x38] sm:$0xff]   ;;  %v1685_v13 = vld [vmem:[%s2222_s0] ss:$8 sps:$4 sm:$0xff]  }
   0x4   :  { %1303 = vmatprep.mubr.msk.bf16.mxu0 %vm454_vm0, %v1687_v5  ;;  %v1679_v7 = vld [vmem:[%s2221_s1 + $0x20] sm:$0xff]   ;;  %1319 = vmatprep.mubr.msk.bf16.mxu1 %vm454_vm0, %v1690_v6  ;;  %v1680_v8 = vld [vmem:[%s2221_s1 + $0x28] sm:$0xff]   ;;  %v1691_v15 = vld [vmem:[%s2222_s0 + $0x14] ss:$8 sps:$4 sm:$0xff]  }
   0x5   :  { %v1683_v11 = vld [vmem:[%s2221_s1 + $0x40] sm:$0xff]   ;;  %v1684_v12 = vld [vmem:[%s2221_s1 + $0x48] sm:$0xff]   ;;  %v1693_v16 = vld [vmem:[%s2222_s0 + $0x114] ss:$8 sps:$4 sm:$0xff]  }
   0x6   :  { %554 = vmatpush1.bf16.msra.mxu0 %v1676_v2  ;;  %1665 = vmatpush1.bf16.msra.mxu1 %v1676_v2  ;;  %v1688_v14 = vld [vmem:[%s2222_s0 + $0x100] ss:$8 sps:$4 sm:$0xff]   ;;  %v1695_v17 = vld [vmem:[%s2222_s0 + $0x10] ss:$8 sps:$4 sm:$0xff]   ;;  %v1697_v19 = vld [vmem:[%s2222_s0 + $0x24] ss:$8 sps:$4 sm:$0xff]  }
   0x7   :  { %555 = vmatprep.subr.bf16.mxu0 %v1781_v0  ;;  %1656 = vmatprep.subr.bf16.mxu1 %v1781_v0  ;;  %v1696_v18 = vld [vmem:[%s2222_s0 + $0x110] ss:$8 sps:$4 sm:$0xff]   ;;  %v1699_v20 = vld [vmem:[%s2222_s0 + $0x124] ss:$8 sps:$4 sm:$0xff]   ;;  %v1701_v21 = vld [vmem:[%s2222_s0 + $0x20] ss:$8 sps:$4 sm:$0xff]  }
   0x8   :  { %v1702_v22 = vld [vmem:[%s2222_s0 + $0x120] ss:$8 sps:$4 sm:$0xff]   ;;  %v1703_v23 = vld [vmem:[%s2222_s0 + $0x34] ss:$8 sps:$4 sm:$0xff]   ;;  %v1707_v25 = vld [vmem:[%s2222_s0 + $0x30] ss:$8 sps:$4 sm:$0xff]  }
   0x9   :  { %v1705_v24 = vld [vmem:[%s2222_s0 + $0x134] ss:$8 sps:$4 sm:$0xff]   ;;  %v1708_v26 = vld [vmem:[%s2222_s0 + $0x130] ss:$8 sps:$4 sm:$0xff]   ;;  %v1709_v27 = vld [vmem:[%s2222_s0 + $0x44] ss:$8 sps:$4 sm:$0xff]  }
   0xa   :  { %556 = vmatpush1.bf16.msra.mxu0 %v1677_v3  ;;  %1666 = vmatpush1.bf16.msra.mxu1 %v1677_v3  ;;  %v1711_v28 = vld [vmem:[%s2222_s0 + $0x144] ss:$8 sps:$4 sm:$0xff]   ;;  %v1713_v29 = vld [vmem:[%s2222_s0 + $0x40] ss:$8 sps:$4 sm:$0xff]   ;;  %v1715_v31 = vld [vmem:[%s2222_s0 + $0x54] ss:$8 sps:$4 sm:$0xff]  }
   0xb   :  { %557 = vmatprep.subr.bf16.mxu0 %v1781_v0  ;;  %1657 = vmatprep.subr.bf16.mxu1 %v1781_v0  ;;  %v1714_v30 = vld [vmem:[%s2222_s0 + $0x140] ss:$8 sps:$4 sm:$0xff]   ;;  %v1717_v32 = vld [vmem:[%s2222_s0 + $0x154] ss:$8 sps:$4 sm:$0xff]   ;;  %v1719_v33 = vld [vmem:[%s2222_s0 + $0x50] ss:$8 sps:$4 sm:$0xff]  }
   0xc   :  { %v1720_v34 = vld [vmem:[%s2222_s0 + $0x150] ss:$8 sps:$4 sm:$0xff]   ;;  %v1721_v35 = vld [vmem:[%s2222_s0 + $0x64] ss:$8 sps:$4 sm:$0xff]   ;;  %v1725_v37 = vld [vmem:[%s2222_s0 + $0x60] ss:$8 sps:$4 sm:$0xff]  }
   0xd   :  { %v1723_v36 = vld [vmem:[%s2222_s0 + $0x164] ss:$8 sps:$4 sm:$0xff]   ;;  %v1726_v38 = vld [vmem:[%s2222_s0 + $0x160] ss:$8 sps:$4 sm:$0xff]   ;;  %v1727_v39 = vld [vmem:[%s2222_s0 + $0x74] ss:$8 sps:$4 sm:$0xff]  }
   0xe   :  { %558 = vmatpush1.bf16.msra.mxu0 %v1678_v4  ;;  %1667 = vmatpush1.bf16.msra.mxu1 %v1678_v4  ;;  %v1729_v40 = vld [vmem:[%s2222_s0 + $0x174] ss:$8 sps:$4 sm:$0xff]   ;;  %v1731_v41 = vld [vmem:[%s2222_s0 + $0x70] ss:$8 sps:$4 sm:$0xff]   ;;  %v1733_v43 = vld [vmem:[%s2222_s0 + $0x84] ss:$8 sps:$4 sm:$0xff]  }
   0xf   :  { %559 = vmatprep.subr.bf16.mxu0 %v1781_v0  ;;  %1658 = vmatprep.subr.bf16.mxu1 %v1781_v0  ;;  %v1732_v42 = vld [vmem:[%s2222_s0 + $0x170] ss:$8 sps:$4 sm:$0xff]   ;;  %v1735_v44 = vld [vmem:[%s2222_s0 + $0x184] ss:$8 sps:$4 sm:$0xff]   ;;  %v1737_v45 = vld [vmem:[%s2222_s0 + $0x80] ss:$8 sps:$4 sm:$0xff]  }
  0x10   :  { %v1738_v46 = vld [vmem:[%s2222_s0 + $0x180] ss:$8 sps:$4 sm:$0xff]   ;;  %v1739_v47 = vld [vmem:[%s2222_s0 + $0x94] ss:$8 sps:$4 sm:$0xff]   ;;  %v1743_v49 = vld [vmem:[%s2222_s0 + $0x90] ss:$8 sps:$4 sm:$0xff]  }
  0x11   :  { %v1741_v48 = vld [vmem:[%s2222_s0 + $0x194] ss:$8 sps:$4 sm:$0xff]   ;;  %v1744_v50 = vld [vmem:[%s2222_s0 + $0x190] ss:$8 sps:$4 sm:$0xff]   ;;  %v1745_v51 = vld [vmem:[%s2222_s0 + $0xa4] ss:$8 sps:$4 sm:$0xff]  }
  0x12   :  { %560 = vmatpush1.bf16.msra.mxu0 %v1679_v7  ;;  %1668 = vmatpush1.bf16.msra.mxu1 %v1679_v7  ;;  %v1747_v52 = vld [vmem:[%s2222_s0 + $0x1a4] ss:$8 sps:$4 sm:$0xff]   ;;  %v1749_v53 = vld [vmem:[%s2222_s0 + $0xa0] ss:$8 sps:$4 sm:$0xff]   ;;  %v1751_v55 = vld [vmem:[%s2222_s0 + $0xb4] ss:$8 sps:$4 sm:$0xff]  }
  0x13   :  { %561 = vmatprep.subr.bf16.mxu0 %v1781_v0  ;;  %1659 = vmatprep.subr.bf16.mxu1 %v1781_v0  ;;  %v1750_v54 = vld [vmem:[%s2222_s0 + $0x1a0] ss:$8 sps:$4 sm:$0xff]   ;;  %v1753_v56 = vld [vmem:[%s2222_s0 + $0x1b4] ss:$8 sps:$4 sm:$0xff]   ;;  %v1755_v57 = vld [vmem:[%s2222_s0 + $0xb0] ss:$8 sps:$4 sm:$0xff]  }
  0x14   :  { %v1756_v58 = vld [vmem:[%s2222_s0 + $0x1b0] ss:$8 sps:$4 sm:$0xff]   ;;  %v1757_v59 = vld [vmem:[%s2222_s0 + $0xc4] ss:$8 sps:$4 sm:$0xff]   ;;  %v1761_v61 = vld [vmem:[%s2222_s0 + $0xc0] ss:$8 sps:$4 sm:$0xff]  }
  0x15   :  { %v1759_v60 = vld [vmem:[%s2222_s0 + $0x1c4] ss:$8 sps:$4 sm:$0xff]   ;;  %v1762_v62 = vld [vmem:[%s2222_s0 + $0x1c0] ss:$8 sps:$4 sm:$0xff]   ;;  %v1763_v63 = vld [vmem:[%s2222_s0 + $0xd4] ss:$8 sps:$4 sm:$0xff]  }
  0x16   :  { %562 = vmatpush1.bf16.msra.mxu0 %v1680_v8  ;;  %1669 = vmatpush1.bf16.msra.mxu1 %v1680_v8  ;;  %v1767_v1 = vld [vmem:[%s2222_s0 + $0xd0] ss:$8 sps:$4 sm:$0xff]   ;;  %v1769_v3 = vld [vmem:[%s2222_s0 + $0xe4] ss:$8 sps:$4 sm:$0xff]   ;;  %v1773_v5 = vld [vmem:[%s2222_s0 + $0xe0] ss:$8 sps:$4 sm:$0xff]  }
  0x17   :  { %563 = vmatprep.subr.bf16.mxu0 %v1781_v0  ;;  %1660 = vmatprep.subr.bf16.mxu1 %v1781_v0  ;;  %v1768_v2 = vld [vmem:[%s2222_s0 + $0x1d0] ss:$8 sps:$4 sm:$0xff]   ;;  %v1771_v4 = vld [vmem:[%s2222_s0 + $0x1e4] ss:$8 sps:$4 sm:$0xff]   ;;  %v1774_v6 = vld [vmem:[%s2222_s0 + $0x1e0] ss:$8 sps:$4 sm:$0xff]  }
  0x18   :  { %v1775_v7 = vld [vmem:[%s2222_s0 + $0xf4] ss:$8 sps:$4 sm:$0xff]  }
  0x19   :  { %v1777_v8 = vld [vmem:[%s2222_s0 + $0x1f4] ss:$8 sps:$4 sm:$0xff]  }
  0x1a   :  { %564 = vmatpush1.bf16.msra.mxu0 %v1681_v9  ;;  %1670 = vmatpush1.bf16.msra.mxu1 %v1681_v9  ;;  %v1779_v9 = vld [vmem:[%s2222_s0 + $0xf0] ss:$8 sps:$4 sm:$0xff]  }
  0x1b   :  { %565 = vmatprep.subr.bf16.mxu0 %v1781_v0  ;;  %1661 = vmatprep.subr.bf16.mxu1 %v1781_v0 }
  0x1e   :  { %566 = vmatpush1.bf16.msra.mxu0 %v1682_v10  ;;  %1671 = vmatpush1.bf16.msra.mxu1 %v1682_v10  ;;  %v1780_v10 = vld [vmem:[%s2222_s0 + $0x1f0] ss:$8 sps:$4 sm:$0xff]  }
  0x1f   :  { %567 = vmatprep.subr.bf16.mxu0 %v1781_v0  ;;  %1662 = vmatprep.subr.bf16.mxu1 %v1781_v0 }
  0x22   :  { %568 = vmatpush1.bf16.msra.mxu0 %v1683_v11  ;;  %1672 = vmatpush1.bf16.msra.mxu1 %v1683_v11  ;;  %v2059_v11 = vld [vmem:[%s2223_s2] ss:$0 sm:$0xff] }
  0x23   :  { %569 = vmatprep.subr.bf16.mxu0 %v1781_v0  ;;  %1663 = vmatprep.subr.bf16.mxu1 %v1781_v0  ;;  %v1765_v0 = vld [vmem:[%s2222_s0 + $0x1d4] ss:$8 sps:$4 sm:$0xff]  }
  0x26   :  { %570 = vmatpush1.bf16.msra.mxu0 %v1684_v12  ;;  %1673 = vmatpush1.bf16.msra.mxu1 %v1684_v12 }
  0x29   :  { %584 = vmatmul.mubr.bf16.vlgmr.msra.gmra.mrb[0].mxu0 %v1685_v13  ;;  %712 = vmatmul.mubr.bf16.vlgmr.msra.gmra.mrb[0].mxu1 %v1688_v14 }
  0x2a   :  { %1304 = vmatprep.mubr.msk.bf16.mxu0 %vm454_vm0, %v1691_v15  ;;  %1320 = vmatprep.mubr.msk.bf16.mxu1 %vm454_vm0, %v1693_v16 }
  0x31   :  { %592 = vmatmul.mubr.bf16.gmra.mrb[4].mxu0 %v1695_v17  ;;  %720 = vmatmul.mubr.bf16.gmra.mrb[4].mxu1 %v1696_v18 }
  0x32   :  { %1305 = vmatprep.mubr.msk.bf16.mxu0 %vm454_vm0, %v1697_v19  ;;  %1321 = vmatprep.mubr.msk.bf16.mxu1 %vm454_vm0, %v1699_v20 }
  0x39   :  { %600 = vmatmul.mubr.bf16.gmra.mrb[8].mxu0 %v1701_v21  ;;  %728 = vmatmul.mubr.bf16.gmra.mrb[8].mxu1 %v1702_v22 }
  0x3a   :  { %1306 = vmatprep.mubr.msk.bf16.mxu0 %vm454_vm0, %v1703_v23  ;;  %1322 = vmatprep.mubr.msk.bf16.mxu1 %vm454_vm0, %v1705_v24 }
  0x41   :  { %608 = vmatmul.mubr.bf16.gmra.mrb[12].mxu0 %v1707_v25  ;;  %736 = vmatmul.mubr.bf16.gmra.mrb[12].mxu1 %v1708_v26 }
  0x42   :  { %1307 = vmatprep.mubr.msk.bf16.mxu0 %vm454_vm0, %v1709_v27  ;;  %1323 = vmatprep.mubr.msk.bf16.mxu1 %vm454_vm0, %v1711_v28 }
  0x49   :  { %616 = vmatmul.mubr.bf16.gmra.mrb[16].mxu0 %v1713_v29  ;;  %744 = vmatmul.mubr.bf16.gmra.mrb[16].mxu1 %v1714_v30 }
  0x4a   :  { %1308 = vmatprep.mubr.msk.bf16.mxu0 %vm454_vm0, %v1715_v31  ;;  %1324 = vmatprep.mubr.msk.bf16.mxu1 %vm454_vm0, %v1717_v32 }
  0x51   :  { %624 = vmatmul.mubr.bf16.gmra.mrb[20].mxu0 %v1719_v33  ;;  %752 = vmatmul.mubr.bf16.gmra.mrb[20].mxu1 %v1720_v34 }
  0x52   :  { %1309 = vmatprep.mubr.msk.bf16.mxu0 %vm454_vm0, %v1721_v35  ;;  %1325 = vmatprep.mubr.msk.bf16.mxu1 %vm454_vm0, %v1723_v36 }
  0x59   :  { %632 = vmatmul.mubr.bf16.gmra.mrb[24].mxu0 %v1725_v37  ;;  %760 = vmatmul.mubr.bf16.gmra.mrb[24].mxu1 %v1726_v38 }
  0x5a   :  { %1310 = vmatprep.mubr.msk.bf16.mxu0 %vm454_vm0, %v1727_v39  ;;  %1326 = vmatprep.mubr.msk.bf16.mxu1 %vm454_vm0, %v1729_v40 }
  0x61   :  { %640 = vmatmul.mubr.bf16.gmra.mrb[28].mxu0 %v1731_v41  ;;  %768 = vmatmul.mubr.bf16.gmra.mrb[28].mxu1 %v1732_v42 }
  0x62   :  { %1311 = vmatprep.mubr.msk.bf16.mxu0 %vm454_vm0, %v1733_v43  ;;  %1327 = vmatprep.mubr.msk.bf16.mxu1 %vm454_vm0, %v1735_v44 }
  0x69   :  { %648 = vmatmul.mubr.bf16.gmra.mrb[32].mxu0 %v1737_v45  ;;  %776 = vmatmul.mubr.bf16.gmra.mrb[32].mxu1 %v1738_v46 }
  0x6a   :  { %1312 = vmatprep.mubr.msk.bf16.mxu0 %vm454_vm0, %v1739_v47  ;;  %1328 = vmatprep.mubr.msk.bf16.mxu1 %vm454_vm0, %v1741_v48 }
  0x71   :  { %656 = vmatmul.mubr.bf16.gmra.mrb[36].mxu0 %v1743_v49  ;;  %784 = vmatmul.mubr.bf16.gmra.mrb[36].mxu1 %v1744_v50 }
  0x72   :  { %1313 = vmatprep.mubr.msk.bf16.mxu0 %vm454_vm0, %v1745_v51  ;;  %1329 = vmatprep.mubr.msk.bf16.mxu1 %vm454_vm0, %v1747_v52 }
  0x79   :  { %664 = vmatmul.mubr.bf16.gmra.mrb[40].mxu0 %v1749_v53  ;;  %792 = vmatmul.mubr.bf16.gmra.mrb[40].mxu1 %v1750_v54 }
  0x7a   :  { %1314 = vmatprep.mubr.msk.bf16.mxu0 %vm454_vm0, %v1751_v55  ;;  %1330 = vmatprep.mubr.msk.bf16.mxu1 %vm454_vm0, %v1753_v56 }
  0x81   :  { %672 = vmatmul.mubr.bf16.gmra.mrb[44].mxu0 %v1755_v57  ;;  %800 = vmatmul.mubr.bf16.gmra.mrb[44].mxu1 %v1756_v58 }
  0x82   :  { %1315 = vmatprep.mubr.msk.bf16.mxu0 %vm454_vm0, %v1757_v59  ;;  %1331 = vmatprep.mubr.msk.bf16.mxu1 %vm454_vm0, %v1759_v60 }
  0x89   :  { %680 = vmatmul.mubr.bf16.gmra.mrb[48].mxu0 %v1761_v61  ;;  %808 = vmatmul.mubr.bf16.gmra.mrb[48].mxu1 %v1762_v62 }
  0x8a   :  { %1316 = vmatprep.mubr.msk.bf16.mxu0 %vm454_vm0, %v1763_v63  ;;  %1332 = vmatprep.mubr.msk.bf16.mxu1 %vm454_vm0, %v1765_v0 }
  0x91   :  { %688 = vmatmul.mubr.bf16.gmra.mrb[52].mxu0 %v1767_v1  ;;  %816 = vmatmul.mubr.bf16.gmra.mrb[52].mxu1 %v1768_v2 }
  0x92   :  { %1317 = vmatprep.mubr.msk.bf16.mxu0 %vm454_vm0, %v1769_v3  ;;  %1333 = vmatprep.mubr.msk.bf16.mxu1 %vm454_vm0, %v1771_v4 }
  0x99   :  { %696 = vmatmul.mubr.bf16.gmra.mrb[56].mxu0 %v1773_v5  ;;  %824 = vmatmul.mubr.bf16.gmra.mrb[56].mxu1 %v1774_v6 }
  0x9a   :  { %1318 = vmatprep.mubr.msk.bf16.mxu0 %vm454_vm0, %v1775_v7  ;;  %1334 = vmatprep.mubr.msk.bf16.mxu1 %vm454_vm0, %v1777_v8 }
  0xa1   :  { %704 = vmatmul.mubr.bf16.gmra.mrb[60].mxu0 %v1779_v9  ;;  %832 = vmatmul.mubr.bf16.gmra.mrb[60].mxu1 %v1780_v10 }
  0xfc   :  { %v585_v12 = vpop.f32.mrb[0].mxu0  ;;  %v713_v13 = vpop.f32.mrb[0].mxu1 }
  0xfd   :  { %v586_v14 = vadd.f32 %v2059_v11, %v585_v12  ;;  %v714_v15 = vadd.f32 %v2059_v11, %v713_v13  ;;  %v587_v16 = vpop.f32.mrb[1].mxu0  ;;  %v715_v17 = vpop.f32.mrb[1].mxu1 }
  0xfe   :  { %v588_v18 = vpop.f32.mrb[2].mxu0  ;;  %v716_v19 = vpop.f32.mrb[2].mxu1 }
  0xff   :  { %v589_v20 = vadd.f32 %v2059_v11, %v588_v18  ;;  %v717_v21 = vadd.f32 %v2059_v11, %v716_v19  ;;  %v590_v22 = vpop.f32.mrb[3].mxu0  ;;  %v718_v23 = vpop.f32.mrb[3].mxu1  ;;  %v840_v24 = vmax.f32 %v586_v14, 0.0  ;;  %v872_v25 = vmax.f32 %v714_v15, 0.0 }
 0x101   :  { %v841_v26 = vmax.f32 %v589_v20, 0.0  ;;  %v873_v27 = vmax.f32 %v717_v21, 0.0 }
 0x103   :  { %v1466_v28 = vpack.c.bf16 %v841_v26, %v840_v24  ;;  %v1546_v29 = vpack.c.bf16 %v873_v27, %v872_v25 }
 0x104   :  { %v593_v30 = vpop.f32.mrb[4].mxu0  ;;  %v721_v31 = vpop.f32.mrb[4].mxu1 }
 0x105   :  { %1467 = vst [vmem:[%s2224_s3] sm:$0xff] %v1466_v28   ;;  %1638 = vst [vmem:[%s2224_s3 + $0x80] sm:$0xff] %v1546_v29   ;;  %v594_v32 = vadd.f32 %v2059_v11, %v593_v30  ;;  %v722_v33 = vadd.f32 %v2059_v11, %v721_v31  ;;  %v595_v34 = vpop.f32.mrb[5].mxu0  ;;  %v723_v35 = vpop.f32.mrb[5].mxu1 }
 0x106   :  { %v596_v36 = vpop.f32.mrb[6].mxu0  ;;  %v724_v37 = vpop.f32.mrb[6].mxu1 }
 0x107   :  { %v597_v38 = vadd.f32 %v2059_v11, %v596_v36  ;;  %v725_v39 = vadd.f32 %v2059_v11, %v724_v37  ;;  %v598_v40 = vpop.f32.mrb[7].mxu0  ;;  %v726_v41 = vpop.f32.mrb[7].mxu1  ;;  %v842_v42 = vmax.f32 %v594_v32, 0.0  ;;  %v874_v43 = vmax.f32 %v722_v33, 0.0 }
 0x109   :  { %v843_v44 = vmax.f32 %v597_v38, 0.0  ;;  %v875_v45 = vmax.f32 %v725_v39, 0.0 }
 0x10b   :  { %v1471_v46 = vpack.c.bf16 %v843_v44, %v842_v42  ;;  %v1551_v47 = vpack.c.bf16 %v875_v45, %v874_v43 }
 0x10c   :  { %v601_v48 = vpop.f32.mrb[8].mxu0  ;;  %v729_v49 = vpop.f32.mrb[8].mxu1 }
 0x10d   :  { %1623 = vst [vmem:[%s2224_s3 + $0x8] sm:$0xff] %v1471_v46   ;;  %1639 = vst [vmem:[%s2224_s3 + $0x88] sm:$0xff] %v1551_v47   ;;  %v602_v50 = vadd.f32 %v2059_v11, %v601_v48  ;;  %v730_v51 = vadd.f32 %v2059_v11, %v729_v49  ;;  %v603_v52 = vpop.f32.mrb[9].mxu0  ;;  %v731_v53 = vpop.f32.mrb[9].mxu1 }
 0x10e   :  { %v604_v54 = vpop.f32.mrb[10].mxu0  ;;  %v732_v55 = vpop.f32.mrb[10].mxu1 }
 0x10f   :  { %v605_v56 = vadd.f32 %v2059_v11, %v604_v54  ;;  %v733_v57 = vadd.f32 %v2059_v11, %v732_v55  ;;  %v606_v58 = vpop.f32.mrb[11].mxu0  ;;  %v734_v59 = vpop.f32.mrb[11].mxu1  ;;  %v844_v60 = vmax.f32 %v602_v50, 0.0  ;;  %v876_v61 = vmax.f32 %v730_v51, 0.0 }
 0x111   :  { %v845_v62 = vmax.f32 %v605_v56, 0.0  ;;  %v877_v63 = vmax.f32 %v733_v57, 0.0 }
 0x113   :  { %v1476_v0 = vpack.c.bf16 %v845_v62, %v844_v60  ;;  %v1556_v1 = vpack.c.bf16 %v877_v63, %v876_v61 }
 0x114   :  { %v609_v2 = vpop.f32.mrb[12].mxu0  ;;  %v737_v3 = vpop.f32.mrb[12].mxu1 }
 0x115   :  { %1624 = vst [vmem:[%s2224_s3 + $0x10] sm:$0xff] %v1476_v0   ;;  %1640 = vst [vmem:[%s2224_s3 + $0x90] sm:$0xff] %v1556_v1   ;;  %v610_v4 = vadd.f32 %v2059_v11, %v609_v2  ;;  %v738_v5 = vadd.f32 %v2059_v11, %v737_v3  ;;  %v611_v6 = vpop.f32.mrb[13].mxu0  ;;  %v739_v7 = vpop.f32.mrb[13].mxu1 }
 0x116   :  { %v612_v8 = vpop.f32.mrb[14].mxu0  ;;  %v740_v9 = vpop.f32.mrb[14].mxu1 }
 0x117   :  { %v613_v10 = vadd.f32 %v2059_v11, %v612_v8  ;;  %v741_v12 = vadd.f32 %v2059_v11, %v740_v9  ;;  %v614_v13 = vpop.f32.mrb[15].mxu0  ;;  %v742_v14 = vpop.f32.mrb[15].mxu1  ;;  %v846_v15 = vmax.f32 %v610_v4, 0.0  ;;  %v878_v16 = vmax.f32 %v738_v5, 0.0 }
 0x119   :  { %v847_v17 = vmax.f32 %v613_v10, 0.0  ;;  %v879_v18 = vmax.f32 %v741_v12, 0.0 }
 0x11b   :  { %v1481_v19 = vpack.c.bf16 %v847_v17, %v846_v15  ;;  %v1561_v20 = vpack.c.bf16 %v879_v18, %v878_v16 }
 0x11c   :  { %v617_v21 = vpop.f32.mrb[16].mxu0  ;;  %v745_v22 = vpop.f32.mrb[16].mxu1 }
 0x11d   :  { %1625 = vst [vmem:[%s2224_s3 + $0x18] sm:$0xff] %v1481_v19   ;;  %1641 = vst [vmem:[%s2224_s3 + $0x98] sm:$0xff] %v1561_v20   ;;  %v618_v23 = vadd.f32 %v2059_v11, %v617_v21  ;;  %v746_v24 = vadd.f32 %v2059_v11, %v745_v22  ;;  %v619_v25 = vpop.f32.mrb[17].mxu0  ;;  %v747_v26 = vpop.f32.mrb[17].mxu1 }
 0x11e   :  { %v620_v27 = vpop.f32.mrb[18].mxu0  ;;  %v748_v28 = vpop.f32.mrb[18].mxu1 }
 0x11f   :  { %v621_v29 = vadd.f32 %v2059_v11, %v620_v27  ;;  %v749_v30 = vadd.f32 %v2059_v11, %v748_v28  ;;  %v622_v31 = vpop.f32.mrb[19].mxu0  ;;  %v750_v32 = vpop.f32.mrb[19].mxu1  ;;  %v848_v33 = vmax.f32 %v618_v23, 0.0  ;;  %v880_v34 = vmax.f32 %v746_v24, 0.0 }
 0x121   :  { %v849_v35 = vmax.f32 %v621_v29, 0.0  ;;  %v881_v36 = vmax.f32 %v749_v30, 0.0 }
 0x123   :  { %v1486_v37 = vpack.c.bf16 %v849_v35, %v848_v33  ;;  %v1566_v38 = vpack.c.bf16 %v881_v36, %v880_v34 }
 0x124   :  { %v625_v39 = vpop.f32.mrb[20].mxu0  ;;  %v753_v40 = vpop.f32.mrb[20].mxu1 }
 0x125   :  { %1626 = vst [vmem:[%s2224_s3 + $0x20] sm:$0xff] %v1486_v37   ;;  %1642 = vst [vmem:[%s2224_s3 + $0xa0] sm:$0xff] %v1566_v38   ;;  %v626_v41 = vadd.f32 %v2059_v11, %v625_v39  ;;  %v754_v42 = vadd.f32 %v2059_v11, %v753_v40  ;;  %v627_v43 = vpop.f32.mrb[21].mxu0  ;;  %v755_v44 = vpop.f32.mrb[21].mxu1 }
 0x126   :  { %v628_v45 = vpop.f32.mrb[22].mxu0  ;;  %v756_v46 = vpop.f32.mrb[22].mxu1 }
 0x127   :  { %v629_v47 = vadd.f32 %v2059_v11, %v628_v45  ;;  %v757_v48 = vadd.f32 %v2059_v11, %v756_v46  ;;  %v630_v49 = vpop.f32.mrb[23].mxu0  ;;  %v758_v50 = vpop.f32.mrb[23].mxu1  ;;  %v850_v51 = vmax.f32 %v626_v41, 0.0  ;;  %v882_v52 = vmax.f32 %v754_v42, 0.0 }
 0x129   :  { %v851_v53 = vmax.f32 %v629_v47, 0.0  ;;  %v883_v54 = vmax.f32 %v757_v48, 0.0 }
 0x12b   :  { %v1491_v55 = vpack.c.bf16 %v851_v53, %v850_v51  ;;  %v1571_v56 = vpack.c.bf16 %v883_v54, %v882_v52 }
 0x12c   :  { %v633_v57 = vpop.f32.mrb[24].mxu0  ;;  %v761_v58 = vpop.f32.mrb[24].mxu1 }
 0x12d   :  { %1627 = vst [vmem:[%s2224_s3 + $0x28] sm:$0xff] %v1491_v55   ;;  %1643 = vst [vmem:[%s2224_s3 + $0xa8] sm:$0xff] %v1571_v56   ;;  %v634_v59 = vadd.f32 %v2059_v11, %v633_v57  ;;  %v762_v60 = vadd.f32 %v2059_v11, %v761_v58  ;;  %v635_v61 = vpop.f32.mrb[25].mxu0  ;;  %v763_v62 = vpop.f32.mrb[25].mxu1 }
 0x12e   :  { %v636_v63 = vpop.f32.mrb[26].mxu0  ;;  %v764_v0 = vpop.f32.mrb[26].mxu1 }
 0x12f   :  { %v637_v1 = vadd.f32 %v2059_v11, %v636_v63  ;;  %v765_v2 = vadd.f32 %v2059_v11, %v764_v0  ;;  %v638_v3 = vpop.f32.mrb[27].mxu0  ;;  %v766_v4 = vpop.f32.mrb[27].mxu1  ;;  %v852_v5 = vmax.f32 %v634_v59, 0.0  ;;  %v884_v6 = vmax.f32 %v762_v60, 0.0 }
 0x131   :  { %v853_v7 = vmax.f32 %v637_v1, 0.0  ;;  %v885_v8 = vmax.f32 %v765_v2, 0.0 }
 0x133   :  { %v1496_v9 = vpack.c.bf16 %v853_v7, %v852_v5  ;;  %v1576_v10 = vpack.c.bf16 %v885_v8, %v884_v6 }
 0x134   :  { %v641_v12 = vpop.f32.mrb[28].mxu0  ;;  %v769_v13 = vpop.f32.mrb[28].mxu1 }
 0x135   :  { %1628 = vst [vmem:[%s2224_s3 + $0x30] sm:$0xff] %v1496_v9   ;;  %1644 = vst [vmem:[%s2224_s3 + $0xb0] sm:$0xff] %v1576_v10   ;;  %v642_v14 = vadd.f32 %v2059_v11, %v641_v12  ;;  %v770_v15 = vadd.f32 %v2059_v11, %v769_v13  ;;  %v643_v16 = vpop.f32.mrb[29].mxu0  ;;  %v771_v17 = vpop.f32.mrb[29].mxu1 }
 0x136   :  { %v644_v18 = vpop.f32.mrb[30].mxu0  ;;  %v772_v19 = vpop.f32.mrb[30].mxu1 }
 0x137   :  { %v645_v20 = vadd.f32 %v2059_v11, %v644_v18  ;;  %v773_v21 = vadd.f32 %v2059_v11, %v772_v19  ;;  %v646_v22 = vpop.f32.mrb[31].mxu0  ;;  %v774_v23 = vpop.f32.mrb[31].mxu1  ;;  %v854_v24 = vmax.f32 %v642_v14, 0.0  ;;  %v886_v25 = vmax.f32 %v770_v15, 0.0 }
 0x139   :  { %v855_v26 = vmax.f32 %v645_v20, 0.0  ;;  %v887_v27 = vmax.f32 %v773_v21, 0.0 }
 0x13b   :  { %v1501_v28 = vpack.c.bf16 %v855_v26, %v854_v24  ;;  %v1581_v29 = vpack.c.bf16 %v887_v27, %v886_v25 }
 0x13c   :  { %v649_v30 = vpop.f32.mrb[32].mxu0  ;;  %v777_v31 = vpop.f32.mrb[32].mxu1 }
 0x13d   :  { %1629 = vst [vmem:[%s2224_s3 + $0x38] sm:$0xff] %v1501_v28   ;;  %1645 = vst [vmem:[%s2224_s3 + $0xb8] sm:$0xff] %v1581_v29   ;;  %v650_v32 = vadd.f32 %v2059_v11, %v649_v30  ;;  %v778_v33 = vadd.f32 %v2059_v11, %v777_v31  ;;  %v651_v34 = vpop.f32.mrb[33].mxu0  ;;  %v779_v35 = vpop.f32.mrb[33].mxu1 }
 0x13e   :  { %v652_v36 = vpop.f32.mrb[34].mxu0  ;;  %v780_v37 = vpop.f32.mrb[34].mxu1 }
 0x13f   :  { %v653_v38 = vadd.f32 %v2059_v11, %v652_v36  ;;  %v781_v39 = vadd.f32 %v2059_v11, %v780_v37  ;;  %v654_v40 = vpop.f32.mrb[35].mxu0  ;;  %v782_v41 = vpop.f32.mrb[35].mxu1  ;;  %v856_v42 = vmax.f32 %v650_v32, 0.0  ;;  %v888_v43 = vmax.f32 %v778_v33, 0.0 }
 0x141   :  { %v857_v44 = vmax.f32 %v653_v38, 0.0  ;;  %v889_v45 = vmax.f32 %v781_v39, 0.0 }
 0x143   :  { %v1506_v46 = vpack.c.bf16 %v857_v44, %v856_v42  ;;  %v1586_v47 = vpack.c.bf16 %v889_v45, %v888_v43 }
 0x144   :  { %v657_v48 = vpop.f32.mrb[36].mxu0  ;;  %v785_v49 = vpop.f32.mrb[36].mxu1 }
 0x145   :  { %1630 = vst [vmem:[%s2224_s3 + $0x40] sm:$0xff] %v1506_v46   ;;  %1646 = vst [vmem:[%s2224_s3 + $0xc0] sm:$0xff] %v1586_v47   ;;  %v658_v50 = vadd.f32 %v2059_v11, %v657_v48  ;;  %v786_v51 = vadd.f32 %v2059_v11, %v785_v49  ;;  %v659_v52 = vpop.f32.mrb[37].mxu0  ;;  %v787_v53 = vpop.f32.mrb[37].mxu1 }
 0x146   :  { %v660_v54 = vpop.f32.mrb[38].mxu0  ;;  %v788_v55 = vpop.f32.mrb[38].mxu1 }
 0x147   :  { %v661_v56 = vadd.f32 %v2059_v11, %v660_v54  ;;  %v789_v57 = vadd.f32 %v2059_v11, %v788_v55  ;;  %v662_v58 = vpop.f32.mrb[39].mxu0  ;;  %v790_v59 = vpop.f32.mrb[39].mxu1  ;;  %v858_v60 = vmax.f32 %v658_v50, 0.0  ;;  %v890_v61 = vmax.f32 %v786_v51, 0.0 }
 0x149   :  { %v859_v62 = vmax.f32 %v661_v56, 0.0  ;;  %v891_v63 = vmax.f32 %v789_v57, 0.0 }
 0x14b   :  { %v1511_v0 = vpack.c.bf16 %v859_v62, %v858_v60  ;;  %v1591_v1 = vpack.c.bf16 %v891_v63, %v890_v61 }
 0x14c   :  { %v665_v2 = vpop.f32.mrb[40].mxu0  ;;  %v793_v3 = vpop.f32.mrb[40].mxu1 }
 0x14d   :  { %1631 = vst [vmem:[%s2224_s3 + $0x48] sm:$0xff] %v1511_v0   ;;  %1647 = vst [vmem:[%s2224_s3 + $0xc8] sm:$0xff] %v1591_v1   ;;  %v666_v4 = vadd.f32 %v2059_v11, %v665_v2  ;;  %v794_v5 = vadd.f32 %v2059_v11, %v793_v3  ;;  %v667_v6 = vpop.f32.mrb[41].mxu0  ;;  %v795_v7 = vpop.f32.mrb[41].mxu1 }
 0x14e   :  { %v668_v8 = vpop.f32.mrb[42].mxu0  ;;  %v796_v9 = vpop.f32.mrb[42].mxu1 }
 0x14f   :  { %v669_v10 = vadd.f32 %v2059_v11, %v668_v8  ;;  %v797_v12 = vadd.f32 %v2059_v11, %v796_v9  ;;  %v670_v13 = vpop.f32.mrb[43].mxu0  ;;  %v798_v14 = vpop.f32.mrb[43].mxu1  ;;  %v860_v15 = vmax.f32 %v666_v4, 0.0  ;;  %v892_v16 = vmax.f32 %v794_v5, 0.0 }
 0x151   :  { %v861_v17 = vmax.f32 %v669_v10, 0.0  ;;  %v893_v18 = vmax.f32 %v797_v12, 0.0 }
 0x153   :  { %v1516_v19 = vpack.c.bf16 %v861_v17, %v860_v15  ;;  %v1596_v20 = vpack.c.bf16 %v893_v18, %v892_v16 }
 0x154   :  { %v673_v21 = vpop.f32.mrb[44].mxu0  ;;  %v801_v22 = vpop.f32.mrb[44].mxu1 }
 0x155   :  { %1632 = vst [vmem:[%s2224_s3 + $0x50] sm:$0xff] %v1516_v19   ;;  %1648 = vst [vmem:[%s2224_s3 + $0xd0] sm:$0xff] %v1596_v20   ;;  %v674_v23 = vadd.f32 %v2059_v11, %v673_v21  ;;  %v802_v24 = vadd.f32 %v2059_v11, %v801_v22  ;;  %v675_v25 = vpop.f32.mrb[45].mxu0  ;;  %v803_v26 = vpop.f32.mrb[45].mxu1 }
 0x156   :  { %v676_v27 = vpop.f32.mrb[46].mxu0  ;;  %v804_v28 = vpop.f32.mrb[46].mxu1 }
 0x157   :  { %v677_v29 = vadd.f32 %v2059_v11, %v676_v27  ;;  %v805_v30 = vadd.f32 %v2059_v11, %v804_v28  ;;  %v678_v31 = vpop.f32.mrb[47].mxu0  ;;  %v806_v32 = vpop.f32.mrb[47].mxu1  ;;  %v862_v33 = vmax.f32 %v674_v23, 0.0  ;;  %v894_v34 = vmax.f32 %v802_v24, 0.0 }
 0x159   :  { %v863_v35 = vmax.f32 %v677_v29, 0.0  ;;  %v895_v36 = vmax.f32 %v805_v30, 0.0 }
 0x15b   :  { %v1521_v37 = vpack.c.bf16 %v863_v35, %v862_v33  ;;  %v1601_v38 = vpack.c.bf16 %v895_v36, %v894_v34 }
 0x15c   :  { %v681_v39 = vpop.f32.mrb[48].mxu0  ;;  %v809_v40 = vpop.f32.mrb[48].mxu1 }
 0x15d   :  { %1633 = vst [vmem:[%s2224_s3 + $0x58] sm:$0xff] %v1521_v37   ;;  %1649 = vst [vmem:[%s2224_s3 + $0xd8] sm:$0xff] %v1601_v38   ;;  %v682_v41 = vadd.f32 %v2059_v11, %v681_v39  ;;  %v810_v42 = vadd.f32 %v2059_v11, %v809_v40  ;;  %v683_v43 = vpop.f32.mrb[49].mxu0  ;;  %v811_v44 = vpop.f32.mrb[49].mxu1 }
 0x15e   :  { %v684_v45 = vpop.f32.mrb[50].mxu0  ;;  %v812_v46 = vpop.f32.mrb[50].mxu1 }
 0x15f   :  { %v685_v47 = vadd.f32 %v2059_v11, %v684_v45  ;;  %v813_v48 = vadd.f32 %v2059_v11, %v812_v46  ;;  %v686_v49 = vpop.f32.mrb[51].mxu0  ;;  %v814_v50 = vpop.f32.mrb[51].mxu1  ;;  %v864_v51 = vmax.f32 %v682_v41, 0.0  ;;  %v896_v52 = vmax.f32 %v810_v42, 0.0 }
 0x161   :  { %v865_v53 = vmax.f32 %v685_v47, 0.0  ;;  %v897_v54 = vmax.f32 %v813_v48, 0.0 }
 0x163   :  { %v1526_v55 = vpack.c.bf16 %v865_v53, %v864_v51  ;;  %v1606_v56 = vpack.c.bf16 %v897_v54, %v896_v52 }
 0x164   :  { %v689_v57 = vpop.f32.mrb[52].mxu0  ;;  %v817_v58 = vpop.f32.mrb[52].mxu1 }
 0x165   :  { %1634 = vst [vmem:[%s2224_s3 + $0x60] sm:$0xff] %v1526_v55   ;;  %1650 = vst [vmem:[%s2224_s3 + $0xe0] sm:$0xff] %v1606_v56   ;;  %v690_v59 = vadd.f32 %v2059_v11, %v689_v57  ;;  %v818_v60 = vadd.f32 %v2059_v11, %v817_v58  ;;  %v691_v61 = vpop.f32.mrb[53].mxu0  ;;  %v819_v62 = vpop.f32.mrb[53].mxu1 }
 0x166   :  { %v692_v63 = vpop.f32.mrb[54].mxu0  ;;  %v820_v0 = vpop.f32.mrb[54].mxu1 }
 0x167   :  { %v693_v1 = vadd.f32 %v2059_v11, %v692_v63  ;;  %v821_v2 = vadd.f32 %v2059_v11, %v820_v0  ;;  %v694_v3 = vpop.f32.mrb[55].mxu0  ;;  %v822_v4 = vpop.f32.mrb[55].mxu1  ;;  %v866_v5 = vmax.f32 %v690_v59, 0.0  ;;  %v898_v6 = vmax.f32 %v818_v60, 0.0 }
 0x169   :  { %v867_v7 = vmax.f32 %v693_v1, 0.0  ;;  %v899_v8 = vmax.f32 %v821_v2, 0.0 }
 0x16b   :  { %v1531_v9 = vpack.c.bf16 %v867_v7, %v866_v5  ;;  %v1611_v10 = vpack.c.bf16 %v899_v8, %v898_v6 }
 0x16c   :  { %v697_v12 = vpop.f32.mrb[56].mxu0  ;;  %v825_v13 = vpop.f32.mrb[56].mxu1 }
 0x16d   :  { %1635 = vst [vmem:[%s2224_s3 + $0x68] sm:$0xff] %v1531_v9   ;;  %1651 = vst [vmem:[%s2224_s3 + $0xe8] sm:$0xff] %v1611_v10   ;;  %v698_v14 = vadd.f32 %v2059_v11, %v697_v12  ;;  %v826_v15 = vadd.f32 %v2059_v11, %v825_v13  ;;  %v699_v16 = vpop.f32.mrb[57].mxu0  ;;  %v827_v17 = vpop.f32.mrb[57].mxu1 }
 0x16e   :  { %v700_v18 = vpop.f32.mrb[58].mxu0  ;;  %v828_v19 = vpop.f32.mrb[58].mxu1 }
 0x16f   :  { %v701_v20 = vadd.f32 %v2059_v11, %v700_v18  ;;  %v829_v21 = vadd.f32 %v2059_v11, %v828_v19  ;;  %v702_v22 = vpop.f32.mrb[59].mxu0  ;;  %v830_v23 = vpop.f32.mrb[59].mxu1  ;;  %v868_v24 = vmax.f32 %v698_v14, 0.0  ;;  %v900_v25 = vmax.f32 %v826_v15, 0.0 }
 0x171   :  { %v869_v26 = vmax.f32 %v701_v20, 0.0  ;;  %v901_v27 = vmax.f32 %v829_v21, 0.0 }
 0x173   :  { %v1536_v28 = vpack.c.bf16 %v869_v26, %v868_v24  ;;  %v1616_v29 = vpack.c.bf16 %v901_v27, %v900_v25 }
 0x174   :  { %v705_v30 = vpop.f32.mrb[60].mxu0  ;;  %v833_v31 = vpop.f32.mrb[60].mxu1 }
 0x175   :  { %1636 = vst [vmem:[%s2224_s3 + $0x70] sm:$0xff] %v1536_v28   ;;  %1652 = vst [vmem:[%s2224_s3 + $0xf0] sm:$0xff] %v1616_v29   ;;  %v706_v32 = vadd.f32 %v2059_v11, %v705_v30  ;;  %v834_v33 = vadd.f32 %v2059_v11, %v833_v31  ;;  %v707_v34 = vpop.f32.mrb[61].mxu0  ;;  %v835_v35 = vpop.f32.mrb[61].mxu1 }
 0x176   :  { %v708_v36 = vpop.f32.mrb[62].mxu0  ;;  %v836_v37 = vpop.f32.mrb[62].mxu1 }
 0x177   :  { %v709_v38 = vadd.f32 %v2059_v11, %v708_v36  ;;  %v837_v39 = vadd.f32 %v2059_v11, %v836_v37  ;;  %v710_v40 = vpop.f32.mrb[63].mxu0  ;;  %v838_v41 = vpop.f32.mrb[63].mxu1  ;;  %v870_v42 = vmax.f32 %v706_v32, 0.0  ;;  %v902_v43 = vmax.f32 %v834_v33, 0.0 }
 0x179   :  { %v871_v44 = vmax.f32 %v709_v38, 0.0  ;;  %v903_v45 = vmax.f32 %v837_v39, 0.0 }
 0x17b   :  { %v1541_v46 = vpack.c.bf16 %v871_v44, %v870_v42  ;;  %v1621_v47 = vpack.c.bf16 %v903_v45, %v902_v43 }
 0x17d   :  { %1637 = vst [vmem:[%s2224_s3 + $0x78] sm:$0xff] %v1541_v46   ;;  %1653 = vst [vmem:[%s2224_s3 + $0xf8] sm:$0xff] %v1621_v47  }

// kernel: poison_generator_forward.10
= control target key start
LH: loop header
LB: loop body
LE: loop exit
PB: predicated region body
PF: predicated region fallthrough
CT: control target
= control target key end

     0   :  { %v3296_v1 = vmov 0   ;;  %vm149_vm0 = vcmask 654336   ;;  %v4058_v24 = vmov 0.0   ;;  %v49_v38 = vlaneseq  ;;  %s4052_s1 = inlined_call_operand.vmem [shape: bf16[80,256], index: 1, kind: input, shape index: {}]   ;;  %s4053_s0 = inlined_call_operand.vmem [shape: bf16[128,80], index: 0, kind: input, shape index: {}]   ;;  %s4054_s3 = inlined_call_operand.vmem [shape: bf16[9,128,128], index: 3, kind: input, shape index: {}]   ;;  %s4055_s2 = inlined_call_operand.vmem [shape: f32[1,256], index: 2, kind: input, shape index: {}]   ;;  %s4056_s4 = inlined_call_operand.vmem [shape: f32[1,128], index: 4, kind: input, shape index: {}]   ;;  %s4057_s5 = inlined_call_operand.vmem [shape: bf16[128,128], index: 5, kind: output, shape index: {}]  }
   0x1   :  { %v3201_v0 = vld [vmem:[%s4052_s1 + $0x4] ss:$8 sps:$4 sm:$0xff]   ;;  %206 = vmatprep.mubr.bf16.mxu0 %v3296_v1  ;;  %v3203_v2 = vld [vmem:[%s4052_s1] ss:$8 sps:$4 sm:$0xff]   ;;  %v3204_v3 = vld [vmem:[%s4052_s1 + $0x14] ss:$8 sps:$4 sm:$0xff]  }
   0x2   :  { %174 = vmatprep.subr.bf16.mxu0 %v3201_v0  ;;  %v3206_v4 = vld [vmem:[%s4052_s1 + $0x10] ss:$8 sps:$4 sm:$0xff]   ;;  %v3207_v5 = vld [vmem:[%s4052_s1 + $0x24] ss:$8 sps:$4 sm:$0xff]   ;;  %v3209_v6 = vld [vmem:[%s4052_s1 + $0x20] ss:$8 sps:$4 sm:$0xff]  }
   0x3   :  { %175 = vmatpush1.bf16.msra.mxu0 %v3203_v2  ;;  %v3210_v7 = vld [vmem:[%s4052_s1 + $0x34] ss:$8 sps:$4 sm:$0xff]   ;;  %v3212_v8 = vld [vmem:[%s4052_s1 + $0x30] ss:$8 sps:$4 sm:$0xff]   ;;  %v3213_v9 = vld [vmem:[%s4052_s1 + $0x44] ss:$8 sps:$4 sm:$0xff]  }
   0x4   :  { %176 = vmatprep.subr.bf16.mxu0 %v3204_v3  ;;  %v3215_v10 = vld [vmem:[%s4052_s1 + $0x40] ss:$8 sps:$4 sm:$0xff]   ;;  %v3228_v16 = vld [vmem:[%s4054_s3 + $0x10] sm:$0xff]   ;;  %v3219_v19 = vld [vmem:[%s4053_s0 + $0x18] sm:$0xff]   ;;  %305 = vst [vmem:[#allocation2 + $0x10] sm:$0xff] %v4058_v24  ;;  %v3487_v39 = vshrl.u32 %v49_v38, 7 }
   0x5   :  { %v3224_v11 = vld [vmem:[%s4054_s3] sm:$0xff]   ;;  %v3227_v14 = vld [vmem:[%s4054_s3 + $0xc8] sm:$0xff]   ;;  %v3218_v18 = vld [vmem:[%s4053_s0 + $0x10] sm:$0xff]   ;;  %306 = vst [vmem:[#allocation2 + $0x18] sm:$0x3] %v4058_v24 }
   0x6   :  { %v3225_v12 = vld [vmem:[%s4054_s3 + $0xc0] sm:$0xff]   ;;  %v3226_v15 = vld [vmem:[%s4054_s3 + $0x8] sm:$0xff]   ;;  %v3222_v22 = vld [vmem:[%s4053_s0 + $0x30] sm:$0xff]   ;;  %303 = vst [vmem:[#allocation2] sm:$0xff] %v4058_v24  ;;  %v51_v40 = vsub.s32 0, %v3487_v39 }
   0x7   :  { %177 = vmatpush1.bf16.msra.mxu0 %v3206_v4  ;;  %v3216_v13 = vld [vmem:[%s4053_s0] sm:$0xff]   ;;  %2847 = vmatprep.subr.bf16.mxu1 %v3225_v12  ;;  %v3217_v17 = vld [vmem:[%s4053_s0 + $0x8] sm:$0xff]   ;;  %v3223_v23 = vld [vmem:[%s4053_s0 + $0x38] sm:$0xff]   ;;  %304 = vst [vmem:[#allocation2 + $0x8] sm:$0x3] %v4058_v24 }
   0x8   :  { %178 = vmatprep.subr.bf16.mxu0 %v3207_v5  ;;  %2848 = vmatpush3.bf16.msra.mxu1 %v3225_v12  ;;  %v3220_v20 = vld [vmem:[%s4053_s0 + $0x20] sm:$0xff]   ;;  %v3221_v21 = vld [vmem:[%s4053_s0 + $0x28] sm:$0xff]   ;;  %307 = vst [vmem:[#allocation2 + $0x20] sm:$0xff] %v4058_v24  ;;  %308 = vst [vmem:[#allocation2 + $0x28] sm:$0x3] %v4058_v24 }
   0x9   :  { %2849 = vmatprep.subr.bf16.mxu1 %v3227_v14  ;;  %309 = vst [vmem:[#allocation2 + $0x30] sm:$0xff] %v4058_v24  ;;  %310 = vst [vmem:[#allocation2 + $0x38] sm:$0x3] %v4058_v24  ;;  %v3229_v25 = vld [vmem:[%s4054_s3 + $0xd0] sm:$0xff]   ;;  %v3230_v26 = vld [vmem:[%s4054_s3 + $0x18] sm:$0xff]  }
   0xa   :  { %311 = vst [vmem:[#allocation2 + $0x40] sm:$0xff] %v4058_v24  ;;  %312 = vst [vmem:[#allocation2 + $0x48] sm:$0x3] %v4058_v24  ;;  %v3231_v27 = vld [vmem:[%s4054_s3 + $0xd8] sm:$0xff]   ;;  %v3232_v28 = vld [vmem:[%s4054_s3 + $0x20] sm:$0xff]  }
   0xb   :  { %179 = vmatpush1.bf16.msra.mxu0 %v3209_v6  ;;  %313 = vst [vmem:[#allocation2 + $0x50] sm:$0xff] %v4058_v24  ;;  %314 = vst [vmem:[#allocation2 + $0x58] sm:$0x3] %v4058_v24  ;;  %v3233_v29 = vld [vmem:[%s4054_s3 + $0xe0] sm:$0xff]   ;;  %v3234_v30 = vld [vmem:[%s4054_s3 + $0x28] sm:$0xff]  }
   0xc   :  { %180 = vmatprep.subr.bf16.mxu0 %v3210_v7  ;;  %2850 = vmatpush3.bf16.msra.mxu1 %v3227_v14  ;;  %315 = vst [vmem:[#allocation2 + $0x60] sm:$0xff] %v4058_v24  ;;  %316 = vst [vmem:[#allocation2 + $0x68] sm:$0x3] %v4058_v24  ;;  %v3235_v31 = vld [vmem:[%s4054_s3 + $0xe8] sm:$0xff]   ;;  %v3236_v32 = vld [vmem:[%s4054_s3 + $0x30] sm:$0xff]  }
   0xd   :  { %317 = vst [vmem:[#allocation2 + $0x70] sm:$0xff] %v4058_v24  ;;  %318 = vst [vmem:[#allocation2 + $0x78] sm:$0x3] %v4058_v24  ;;  %2851 = vmatprep.subr.bf16.mxu1 %v3229_v25  ;;  %v3237_v33 = vld [vmem:[%s4054_s3 + $0xf0] sm:$0xff]   ;;  %v3238_v34 = vld [vmem:[%s4054_s3 + $0x38] sm:$0xff]  }
   0xe   :  { %319 = vst [vmem:[#allocation2 + $0x80] sm:$0xff] %v4058_v24  ;;  %320 = vst [vmem:[#allocation2 + $0x88] sm:$0x3] %v4058_v24  ;;  %v3239_v35 = vld [vmem:[%s4054_s3 + $0xf8] sm:$0xff]   ;;  %v3240_v36 = vld [vmem:[%s4054_s3 + $0x40] sm:$0xff]  }
   0xf   :  { %181 = vmatpush1.bf16.msra.mxu0 %v3212_v8  ;;  %321 = vst [vmem:[#allocation2 + $0x90] sm:$0xff] %v4058_v24  ;;  %322 = vst [vmem:[#allocation2 + $0x98] sm:$0x3] %v4058_v24  ;;  %v3484_v37 = vld [vmem:[%s4054_s3 + $0x100] sm:$0xff]   ;;  %v3242_v12 = vld [vmem:[%s4054_s3 + $0x48] sm:$0xff]  }
  0x10   :  { %182 = vmatprep.subr.bf16.mxu0 %v3213_v9  ;;  %323 = vst [vmem:[#allocation2 + $0xa0] sm:$0xff] %v4058_v24  ;;  %324 = vst [vmem:[#allocation2 + $0xa8] sm:$0x3] %v4058_v24  ;;  %2852 = vmatpush3.bf16.msra.mxu1 %v3229_v25  ;;  %v3493_v41 = vld [vmem:[%s4055_s2] sm:$0x3] }
  0x11   :  { %325 = vst [vmem:[#allocation2 + $0xb0] sm:$0xff] %v4058_v24  ;;  %326 = vst [vmem:[#allocation2 + $0xb8] sm:$0x3] %v4058_v24  ;;  %2853 = vmatprep.subr.bf16.mxu1 %v3231_v27  ;;  %v3496_v42 = vrot.slane %v3493_v41, %v51_v40 }
  0x12   :  { %327 = vst [vmem:[#allocation2 + $0xc0] sm:$0xff] %v4058_v24  ;;  %328 = vst [vmem:[#allocation2 + $0xc8] sm:$0x3] %v4058_v24 }
  0x13   :  { %183 = vmatpush1.bf16.msra.mxu0 %v3215_v10  ;;  %329 = vst [vmem:[#allocation2 + $0xd0] sm:$0xff] %v4058_v24  ;;  %330 = vst [vmem:[#allocation2 + $0xd8] sm:$0x3] %v4058_v24 }
  0x14   :  { %2751 = vmatprep.subr.bf16.mxu0 %v3224_v11  ;;  %331 = vst [vmem:[#allocation2 + $0xe0] sm:$0xff] %v4058_v24  ;;  %332 = vst [vmem:[#allocation2 + $0xe8] sm:$0x3] %v4058_v24  ;;  %2854 = vmatpush3.bf16.msra.mxu1 %v3231_v27  ;;  %v3245_v27 = vld [vmem:[%s4054_s3 + $0x110] sm:$0xff]  }
  0x15   :  { %333 = vst [vmem:[#allocation2 + $0xf0] sm:$0xff] %v4058_v24  ;;  %334 = vst [vmem:[#allocation2 + $0xf8] sm:$0x3] %v4058_v24  ;;  %2855 = vmatprep.subr.bf16.mxu1 %v3233_v29 }
  0x16   :  { %2319 = vmatmul.mubr.msk.bf16.vlgmr.msra.gmra.mrb[0].mxu0 %vm149_vm0, %v3216_v13  ;;  %335 = vst [vmem:[#allocation2 + $0x100] sm:$0xff] %v4058_v24  ;;  %336 = vst [vmem:[#allocation2 + $0x108] sm:$0x3] %v4058_v24 }
  0x17   :  { %216 = vmatprep.mubr.bf16.mxu0 %v3296_v1  ;;  %2752 = vmatpush3.bf16.msra.mxu0 %v3224_v11  ;;  %337 = vst [vmem:[#allocation2 + $0x110] sm:$0xff] %v4058_v24  ;;  %338 = vst [vmem:[#allocation2 + $0x118] sm:$0x3] %v4058_v24 }
  0x18   :  { %2753 = vmatprep.subr.bf16.mxu0 %v3226_v15  ;;  %339 = vst [vmem:[#allocation2 + $0x120] sm:$0xff] %v4058_v24  ;;  %340 = vst [vmem:[#allocation2 + $0x128] sm:$0x3] %v4058_v24  ;;  %2856 = vmatpush3.bf16.msra.mxu1 %v3233_v29 }
  0x19   :  { %341 = vst [vmem:[#allocation2 + $0x130] sm:$0xff] %v4058_v24  ;;  %342 = vst [vmem:[#allocation2 + $0x138] sm:$0x3] %v4058_v24  ;;  %2857 = vmatprep.subr.bf16.mxu1 %v3235_v31 }
  0x1b   :  { %2754 = vmatpush3.bf16.msra.mxu0 %v3226_v15 }
  0x1c   :  { %2755 = vmatprep.subr.bf16.mxu0 %v3228_v16  ;;  %2858 = vmatpush3.bf16.msra.mxu1 %v3235_v31  ;;  %v3246_v31 = vld [vmem:[%s4054_s3 + $0x58] sm:$0xff]  }
  0x1d   :  { %2859 = vmatprep.subr.bf16.mxu1 %v3237_v33 }
  0x1e   :  { %2320 = vmatmul.mubr.msk.bf16.gmra.mrb[4].mxu0 %vm149_vm0, %v3217_v17 }
  0x1f   :  { %226 = vmatprep.mubr.bf16.mxu0 %v3296_v1  ;;  %2756 = vmatpush3.bf16.msra.mxu0 %v3228_v16  ;;  %v3243_v16 = vld [vmem:[%s4054_s3 + $0x108] sm:$0xff]  }
  0x20   :  { %2757 = vmatprep.subr.bf16.mxu0 %v3230_v26  ;;  %2860 = vmatpush3.bf16.msra.mxu1 %v3237_v33 }
  0x21   :  { %2861 = vmatprep.subr.bf16.mxu1 %v3239_v35 }
  0x23   :  { %2758 = vmatpush3.bf16.msra.mxu0 %v3230_v26 }
  0x24   :  { %2759 = vmatprep.subr.bf16.mxu0 %v3232_v28  ;;  %2862 = vmatpush3.bf16.msra.mxu1 %v3239_v35  ;;  %v3247_v35 = vld [vmem:[%s4054_s3 + $0x118] sm:$0xff]  }
  0x25   :  { %2879 = vmatprep.subr.bf16.mxu1 %v3484_v37 }
  0x26   :  { %2321 = vmatmul.mubr.msk.bf16.gmra.mrb[8].mxu0 %vm149_vm0, %v3218_v18 }
  0x27   :  { %236 = vmatprep.mubr.bf16.mxu0 %v3296_v1  ;;  %2760 = vmatpush3.bf16.msra.mxu0 %v3232_v28 }
  0x28   :  { %2761 = vmatprep.subr.bf16.mxu0 %v3234_v30 }
  0x2b   :  { %2762 = vmatpush3.bf16.msra.mxu0 %v3234_v30 }
  0x2c   :  { %2763 = vmatprep.subr.bf16.mxu0 %v3236_v32 }
  0x2e   :  { %2322 = vmatmul.mubr.msk.bf16.gmra.mrb[12].mxu0 %vm149_vm0, %v3219_v19 }
  0x2f   :  { %246 = vmatprep.mubr.bf16.mxu0 %v3296_v1  ;;  %2764 = vmatpush3.bf16.msra.mxu0 %v3236_v32 }
  0x30   :  { %2765 = vmatprep.subr.bf16.mxu0 %v3238_v34 }
  0x33   :  { %2766 = vmatpush3.bf16.msra.mxu0 %v3238_v34 }
  0x34   :  { %2783 = vmatprep.subr.bf16.mxu0 %v3240_v36 }
  0x36   :  { %2323 = vmatmul.mubr.msk.bf16.gmra.mrb[16].mxu0 %vm149_vm0, %v3220_v20 }
  0x37   :  { %256 = vmatprep.mubr.bf16.mxu0 %v3296_v1 }
  0x3e   :  { %2324 = vmatmul.mubr.msk.bf16.gmra.mrb[20].mxu0 %vm149_vm0, %v3221_v21  ;;  %v3244_v21 = vld [vmem:[%s4054_s3 + $0x50] sm:$0xff]  }
  0x3f   :  { %266 = vmatprep.mubr.bf16.mxu0 %v3296_v1 }
  0x46   :  { %2325 = vmatmul.mubr.msk.bf16.gmra.mrb[24].mxu0 %vm149_vm0, %v3222_v22 }
  0x47   :  { %276 = vmatprep.mubr.bf16.mxu0 %v3296_v1 }
  0x4e   :  { %2326 = vmatmul.mubr.msk.bf16.gmra.mrb[28].mxu0 %vm149_vm0, %v3223_v23 }
  0xe9   :  { %v208_v43 = vpop.f32.mrb[0].mxu0 }
  0xea   :  { %v209_v44 = vadd.f32 %v208_v43, %v3496_v42  ;;  %v3499_v45 = vpop.f32.mrb[1].mxu0  ;;  %v3248_v43 = vld [vmem:[%s4054_s3 + $0x60] sm:$0xff]  }
  0xeb   :  { %v212_v46 = vpop.f32.mrb[2].mxu0 }
  0xec   :  { %v3501_v47 = vmax.f32 %v209_v44, 0.0  ;;  %v213_v48 = vadd.f32 %v212_v46, %v3496_v42  ;;  %v3504_v49 = vpop.f32.mrb[3].mxu0 }
  0xee   :  { %344 = vst [vmem:[#allocation2 + $0x11] sm:$0xff] %v3501_v47  ;;  %v3507_v50 = vmax.f32 %v213_v48, 0.0 }
  0xf0   :  { %345 = vst [vmem:[#allocation2 + $0x21] sm:$0xff] %v3507_v50  ;;  %v1190_v51 = vpack.c.bf16 %v3507_v50, %v3501_v47 }
  0xf1   :  { %v218_v52 = vpop.f32.mrb[4].mxu0 }
  0xf2   :  { %v219_v53 = vadd.f32 %v218_v52, %v3496_v42  ;;  %v3513_v54 = vpop.f32.mrb[5].mxu0 }
  0xf3   :  { %v222_v55 = vpop.f32.mrb[6].mxu0 }
  0xf4   :  { %v3515_v56 = vmax.f32 %v219_v53, 0.0  ;;  %v223_v57 = vadd.f32 %v222_v55, %v3496_v42  ;;  %v3518_v58 = vpop.f32.mrb[7].mxu0  ;;  %v3249_v53 = vld [vmem:[%s4054_s3 + $0x120] sm:$0xff]  }
  0xf5   :  { %v362_v59 = vld [vmem:[#allocation2 + $0x10] sm:$0xff] }
  0xf6   :  { %346 = vst [vmem:[#allocation2 + $0x31] sm:$0xff] %v3515_v56  ;;  %v3521_v60 = vmax.f32 %v223_v57, 0.0  ;;  %v377_v61 = vpack.c.bf16 %v362_v59, %v4058_v24  ;;  %v585_v62 = vpack.c.bf16 %v3515_v56, %v3507_v50  ;;  %v3261_v50 = vld [vmem:[%s4054_s3 + $0x150] sm:$0xff]  }
  0xf7   :  { %v973_v63 = vld [vmem:[#allocation2 + $0x20] sm:$0xff] }
  0xf8   :  { %347 = vst [vmem:[#allocation2 + $0x41] sm:$0xff] %v3521_v60  ;;  %2767 = vmatprep.mubr.bf16.mxu0 %v377_v61  ;;  %v988_v0 = vpack.c.bf16 %v973_v63, %v362_v59  ;;  %v1191_v1 = vpack.c.bf16 %v3521_v60, %v3515_v56  ;;  %v3250_v61 = vld [vmem:[%s4054_s3 + $0x68] sm:$0xff]  }
  0xf9   :  { %v228_v2 = vpop.f32.mrb[8].mxu0 }
  0xfa   :  { %v229_v3 = vadd.f32 %v228_v2, %v3496_v42  ;;  %v3530_v4 = vpop.f32.mrb[9].mxu0  ;;  %2863 = vmatprep.mubr.bf16.mxu1 %v988_v0  ;;  %v3251_v2 = vld [vmem:[%s4054_s3 + $0x128] sm:$0xff]  }
  0xfb   :  { %v232_v5 = vpop.f32.mrb[10].mxu0 }
  0xfc   :  { %v3532_v6 = vmax.f32 %v229_v3, 0.0  ;;  %v233_v7 = vadd.f32 %v232_v5, %v3496_v42  ;;  %v3535_v8 = vpop.f32.mrb[11].mxu0 }
  0xfd   :  { %v364_v9 = vld [vmem:[#allocation2 + $0x30] sm:$0xff] }
  0xfe   :  { %348 = vst [vmem:[#allocation2 + $0x51] sm:$0xff] %v3532_v6  ;;  %v3538_v10 = vmax.f32 %v233_v7, 0.0  ;;  %v3540_v11 = vpack.c.bf16 %v364_v9, %v973_v63  ;;  %v586_v13 = vpack.c.bf16 %v3532_v6, %v3521_v60  ;;  %v3263_v60 = vld [vmem:[%s4054_s3 + $0x158] sm:$0xff]  }
  0xff   :  { %v975_v14 = vld [vmem:[#allocation2 + $0x40] sm:$0xff] }
 0x100   :  { %349 = vst [vmem:[#allocation2 + $0x61] sm:$0xff] %v3538_v10  ;;  %2768 = vmatmul.mubr.bf16.vlgmr.msra.gmra.mrb[32].mxu0 %v3540_v11  ;;  %v989_v15 = vpack.c.bf16 %v975_v14, %v364_v9  ;;  %v1192_v17 = vpack.c.bf16 %v3538_v10, %v3532_v6  ;;  %v3266_v6 = vld [vmem:[%s4054_s3 + $0xa8] sm:$0xff]  }
 0x101   :  { %v238_v18 = vpop.f32.mrb[12].mxu0  ;;  %2784 = vmatpush3.bf16.msra.mxu0 %v3240_v36 }
 0x102   :  { %v239_v19 = vadd.f32 %v238_v18, %v3496_v42  ;;  %v3555_v20 = vpop.f32.mrb[13].mxu0  ;;  %2864 = vmatmul.mubr.bf16.vlgmr.msra.gmra.mrb[0].mxu1 %v989_v15  ;;  %2785 = vmatprep.subr.bf16.mxu0 %v3242_v12 }
 0x103   :  { %v242_v22 = vpop.f32.mrb[14].mxu0  ;;  %2880 = vmatpush3.bf16.msra.mxu1 %v3484_v37 }
 0x104   :  { %v3561_v23 = vmax.f32 %v239_v19, 0.0  ;;  %v243_v25 = vadd.f32 %v242_v22, %v3496_v42  ;;  %v3564_v26 = vpop.f32.mrb[15].mxu0  ;;  %2881 = vmatprep.subr.bf16.mxu1 %v3243_v16  ;;  %v3253_v19 = vld [vmem:[%s4054_s3 + $0x130] sm:$0xff]  }
 0x105   :  { %v366_v28 = vld [vmem:[#allocation2 + $0x50] sm:$0xff]  ;;  %2786 = vmatpush3.bf16.msra.mxu0 %v3242_v12 }
 0x106   :  { %350 = vst [vmem:[#allocation2 + $0x71] sm:$0xff] %v3561_v23  ;;  %v294_v29 = vmax.f32 %v243_v25, 0.0  ;;  %v3570_v30 = vpack.c.bf16 %v366_v28, %v975_v14  ;;  %2787 = vmatprep.subr.bf16.mxu0 %v3244_v21  ;;  %v587_v32 = vpack.c.bf16 %v3561_v23, %v3538_v10  ;;  %v3252_v12 = vld [vmem:[%s4054_s3 + $0x70] sm:$0xff]   ;;  %v3267_v10 = vld [vmem:[%s4054_s3 + $0x168] sm:$0xff]  }
 0x107   :  { %v977_v33 = vld [vmem:[#allocation2 + $0x60] sm:$0xff]  ;;  %2882 = vmatpush3.bf16.msra.mxu1 %v3243_v16 }
 0x108   :  { %351 = vst [vmem:[#allocation2 + $0x81] sm:$0xff] %v294_v29  ;;  %2771 = vmatprep.mubr.bf16.mxu0 %v3570_v30  ;;  %v990_v34 = vpack.c.bf16 %v977_v33, %v366_v28  ;;  %2883 = vmatprep.subr.bf16.mxu1 %v3245_v27  ;;  %v3582_v36 = vpack.c.bf16 %v294_v29, %v3561_v23  ;;  %v771_v23 = vld [vmem:[#allocation2 + $0x12] sm:$0xff] }
 0x109   :  { %v248_v37 = vpop.f32.mrb[16].mxu0  ;;  %2788 = vmatpush3.bf16.msra.mxu0 %v3244_v21 }
 0x10a   :  { %v249_v38 = vadd.f32 %v248_v37, %v3496_v42  ;;  %v3585_v40 = vpop.f32.mrb[17].mxu0  ;;  %2867 = vmatprep.mubr.bf16.mxu1 %v990_v34  ;;  %2789 = vmatprep.subr.bf16.mxu0 %v3246_v31 }
 0x10b   :  { %v252_v44 = vpop.f32.mrb[18].mxu0  ;;  %2884 = vmatpush3.bf16.msra.mxu1 %v3245_v27  ;;  %v3254_v27 = vld [vmem:[%s4054_s3 + $0x78] sm:$0xff]  }
 0x10c   :  { %v3590_v46 = vmax.f32 %v249_v38, 0.0  ;;  %v253_v48 = vadd.f32 %v252_v44, %v3496_v42  ;;  %v3593_v52 = vpop.f32.mrb[19].mxu0  ;;  %2885 = vmatprep.subr.bf16.mxu1 %v3247_v35 }
 0x10d   :  { %v368_v55 = vld [vmem:[#allocation2 + $0x70] sm:$0xff]  ;;  %2790 = vmatpush3.bf16.msra.mxu0 %v3246_v31 }
 0x10e   :  { %352 = vst [vmem:[#allocation2 + $0xb1] sm:$0xff] %v3590_v46  ;;  %v3599_v57 = vmax.f32 %v253_v48, 0.0  ;;  %v3601_v59 = vpack.c.bf16 %v368_v55, %v977_v33  ;;  %2791 = vmatprep.subr.bf16.mxu0 %v3248_v43  ;;  %v3255_v33 = vld [vmem:[%s4054_s3 + $0x138] sm:$0xff]  }
 0x10f   :  { %v3606_v63 = vld [vmem:[#allocation2 + $0x80] sm:$0xff]  ;;  %2886 = vmatpush3.bf16.msra.mxu1 %v3247_v35 }
 0x110   :  { %353 = vst [vmem:[#allocation2 + $0xc1] sm:$0xff] %v3599_v57  ;;  %2772 = vmatmul.mubr.bf16.gmra.mrb[36].mxu0 %v3601_v59  ;;  %v991_v0 = vpack.c.bf16 %v3606_v63, %v368_v55  ;;  %2887 = vmatprep.subr.bf16.mxu1 %v3249_v53  ;;  %v1194_v3 = vpack.c.bf16 %v3599_v57, %v3590_v46 }
 0x111   :  { %v258_v5 = vpop.f32.mrb[20].mxu0  ;;  %2792 = vmatpush3.bf16.msra.mxu0 %v3248_v43  ;;  %v3256_v43 = vld [vmem:[%s4054_s3 + $0x80] sm:$0xff]  }
 0x112   :  { %v259_v7 = vadd.f32 %v258_v5, %v3496_v42  ;;  %v3617_v9 = vpop.f32.mrb[21].mxu0  ;;  %2868 = vmatmul.mubr.bf16.gmra.mrb[4].mxu1 %v991_v0  ;;  %2793 = vmatprep.subr.bf16.mxu0 %v3250_v61 }
 0x113   :  { %v262_v14 = vpop.f32.mrb[22].mxu0  ;;  %2888 = vmatpush3.bf16.msra.mxu1 %v3249_v53 }
 0x114   :  { %v3622_v15 = vmax.f32 %v259_v7, 0.0  ;;  %v263_v16 = vadd.f32 %v262_v14, %v3496_v42  ;;  %v3625_v18 = vpop.f32.mrb[23].mxu0  ;;  %2889 = vmatprep.subr.bf16.mxu1 %v3251_v2 }
 0x115   :  { %v370_v21 = vld [vmem:[#allocation2 + $0xb0] sm:$0xff]  ;;  %2794 = vmatpush3.bf16.msra.mxu0 %v3250_v61  ;;  %v3257_v61 = vld [vmem:[%s4054_s3 + $0x140] sm:$0xff]  }
 0x116   :  { %354 = vst [vmem:[#allocation2 + $0xd1] sm:$0xff] %v3622_v15  ;;  %v3631_v22 = vmax.f32 %v263_v16, 0.0  ;;  %v381_v25 = vpack.c.bf16 %v370_v21, %v4058_v24  ;;  %2795 = vmatprep.subr.bf16.mxu0 %v3252_v12  ;;  %v589_v28 = vpack.c.bf16 %v3622_v15, %v3599_v57 }
 0x117   :  { %v981_v29 = vld [vmem:[#allocation2 + $0xc0] sm:$0xff]  ;;  %2890 = vmatpush3.bf16.msra.mxu1 %v3251_v2 }
 0x118   :  { %355 = vst [vmem:[#allocation2 + $0xe1] sm:$0xff] %v3631_v22  ;;  %2775 = vmatprep.mubr.bf16.mxu0 %v381_v25  ;;  %v992_v31 = vpack.c.bf16 %v981_v29, %v370_v21  ;;  %2891 = vmatprep.subr.bf16.mxu1 %v3253_v19  ;;  %v1195_v34 = vpack.c.bf16 %v3631_v22, %v3622_v15 }
 0x119   :  { %v268_v35 = vpop.f32.mrb[24].mxu0  ;;  %2796 = vmatpush3.bf16.msra.mxu0 %v3252_v12 }
 0x11a   :  { %v269_v37 = vadd.f32 %v268_v35, %v3496_v42  ;;  %v3646_v38 = vpop.f32.mrb[25].mxu0  ;;  %2871 = vmatprep.mubr.bf16.mxu1 %v992_v31  ;;  %2797 = vmatprep.subr.bf16.mxu0 %v3254_v27 }
 0x11b   :  { %v272_v44 = vpop.f32.mrb[26].mxu0  ;;  %2892 = vmatpush3.bf16.msra.mxu1 %v3253_v19 }
 0x11c   :  { %v3651_v48 = vmax.f32 %v269_v37, 0.0  ;;  %v273_v53 = vadd.f32 %v272_v44, %v3496_v42  ;;  %v3654_v55 = vpop.f32.mrb[27].mxu0  ;;  %2893 = vmatprep.subr.bf16.mxu1 %v3255_v33 }
 0x11d   :  { %v372_v0 = vld [vmem:[#allocation2 + $0xd0] sm:$0xff]  ;;  %2798 = vmatpush3.bf16.msra.mxu0 %v3254_v27 }
 0x11e   :  { %356 = vst [vmem:[#allocation2 + $0xf1] sm:$0xff] %v3651_v48  ;;  %v3660_v2 = vmax.f32 %v273_v53, 0.0  ;;  %v3662_v5 = vpack.c.bf16 %v372_v0, %v981_v29  ;;  %2815 = vmatprep.subr.bf16.mxu0 %v3256_v43  ;;  %v590_v7 = vpack.c.bf16 %v3651_v48, %v3631_v22  ;;  %v3782_v22 = vld [vmem:[%s4054_s3 + $0x200] sm:$0xff]  }
 0x11f   :  { %v983_v12 = vld [vmem:[#allocation2 + $0xe0] sm:$0xff]  ;;  %2894 = vmatpush3.bf16.msra.mxu1 %v3255_v33 }
 0x120   :  { %357 = vst [vmem:[#allocation2 + $0x101] sm:$0xff] %v3660_v2  ;;  %2776 = vmatmul.mubr.bf16.gmra.mrb[40].mxu0 %v3662_v5  ;;  %v993_v14 = vpack.c.bf16 %v983_v12, %v372_v0  ;;  %2911 = vmatprep.subr.bf16.mxu1 %v3257_v61  ;;  %v1196_v16 = vpack.c.bf16 %v3660_v2, %v3651_v48  ;;  %v774_v48 = vld [vmem:[#allocation2 + $0x42] sm:$0xff] }
 0x121   :  { %v278_v19 = vpop.f32.mrb[28].mxu0 }
 0x122   :  { %v279_v21 = vadd.f32 %v278_v19, %v3496_v42  ;;  %v3671_v25 = vpop.f32.mrb[29].mxu0  ;;  %2872 = vmatmul.mubr.bf16.gmra.mrb[8].mxu1 %v993_v14  ;;  %v568_v19 = vld [vmem:[#allocation2 + $0x1] sm:$0xff] }
 0x123   :  { %v282_v27 = vpop.f32.mrb[30].mxu0 }
 0x124   :  { %v3673_v29 = vmax.f32 %v279_v21, 0.0  ;;  %v283_v31 = vadd.f32 %v282_v27, %v3496_v42  ;;  %v3676_v33 = vpop.f32.mrb[31].mxu0 }
 0x125   :  { %v374_v35 = vld [vmem:[#allocation2 + $0xf0] sm:$0xff] }
 0x126   :  { %358 = vst [vmem:[#allocation2 + $0x111] sm:$0xff] %v3673_v29  ;;  %v3679_v37 = vmax.f32 %v283_v31, 0.0  ;;  %v3681_v44 = vpack.c.bf16 %v374_v35, %v983_v12  ;;  %v591_v53 = vpack.c.bf16 %v3673_v29, %v3660_v2  ;;  %v584_v12 = vpack.c.bf16 %v3501_v47, %v568_v19  ;;  %v576_v47 = vld [vmem:[#allocation2 + $0xa1] sm:$0xff]  ;;  %v3807_v19 = vld [vmem:[%s4054_s3 + $0x210] sm:$0xff]  }
 0x127   :  { %v985_v0 = vld [vmem:[#allocation2 + $0x100] sm:$0xff]  ;;  %v588_v56 = vpack.c.bf16 %v3590_v46, %v576_v47  ;;  %v3270_v46 = vld [vmem:[%s4054_s3 + $0xb8] sm:$0xff]  }
 0x128   :  { %359 = vst [vmem:[#allocation2 + $0x121] sm:$0xff] %v3679_v37  ;;  %2779 = vmatprep.mubr.bf16.mxu0 %v3681_v44  ;;  %v994_v14 = vpack.c.bf16 %v985_v0, %v374_v35  ;;  %v1197_v42 = vpack.c.bf16 %v3679_v37, %v3673_v29  ;;  %v3258_v35 = vld [vmem:[%s4054_s3 + $0x88] sm:$0xff]  }
 0x129   :  { %v1381_v2 = vld [vmem:[#allocation2 + $0x62] sm:$0xff] }
 0x12a   :  { %2875 = vmatprep.mubr.bf16.mxu1 %v994_v14  ;;  %v3275_v14 = vld [vmem:[%s4054_s3 + $0x188] sm:$0xff]  }
 0x12d   :  { %v376_v21 = vld [vmem:[#allocation2 + $0x110] sm:$0xff] }
 0x12e   :  { %v3689_v27 = vpack.c.bf16 %v376_v21, %v985_v0  ;;  %v3259_v0 = vld [vmem:[%s4054_s3 + $0x148] sm:$0xff]  }
 0x12f   :  { %v3692_v31 = vld [vmem:[#allocation2 + $0x120] sm:$0xff] }
 0x130   :  { %2780 = vmatmul.mubr.bf16.gmra.mrb[44].mxu0 %v3689_v27  ;;  %v995_v24 = vpack.c.bf16 %v3692_v31, %v376_v21  ;;  %v777_v21 = vld [vmem:[#allocation2 + $0x72] sm:$0xff] }
 0x131   :  { %2799 = vmatprep.mubr.bf16.mxu0 %v584_v12  ;;  %v778_v12 = vld [vmem:[#allocation2 + $0xa2] sm:$0xff]  ;;  %v3815_v47 = vpack.c.bf16 %v777_v21, %v1381_v2 }
 0x132   :  { %2876 = vmatmul.mubr.bf16.gmra.mrb[12].mxu1 %v995_v24  ;;  %v3260_v24 = vld [vmem:[%s4054_s3 + $0x90] sm:$0xff]  }
 0x133   :  { %2895 = vmatprep.mubr.bf16.mxu1 %v1190_v51  ;;  %v3262_v51 = vld [vmem:[%s4054_s3 + $0x98] sm:$0xff]  }
 0x138   :  { %2800 = vmatmul.mubr.bf16.vlgmr.msra.gmra.mrb[32].mxu0 %v585_v62  ;;  %v3264_v62 = vld [vmem:[%s4054_s3 + $0xa0] sm:$0xff]  }
 0x139   :  { %2803 = vmatprep.mubr.bf16.mxu0 %v586_v13  ;;  %2816 = vmatpush3.bf16.msra.mxu0 %v3256_v43  ;;  %v3268_v13 = vld [vmem:[%s4054_s3 + $0xb0] sm:$0xff]   ;;  %v3273_v43 = vld [vmem:[%s4054_s3 + $0x180] sm:$0xff]  }
 0x13a   :  { %2896 = vmatmul.mubr.bf16.vlgmr.msra.gmra.mrb[0].mxu1 %v1191_v1  ;;  %2817 = vmatprep.subr.bf16.mxu0 %v3258_v35  ;;  %v3265_v1 = vld [vmem:[%s4054_s3 + $0x160] sm:$0xff]  }
 0x13b   :  { %2912 = vmatpush3.bf16.msra.mxu1 %v3257_v61  ;;  %2899 = vmatprep.mubr.bf16.mxu1 %v1192_v17  ;;  %v770_v17 = vld [vmem:[#allocation2 + $0x2] sm:$0xff] }
 0x13c   :  { %2913 = vmatprep.subr.bf16.mxu1 %v3259_v0  ;;  %v786_v57 = vpack.c.bf16 %v771_v23, %v770_v17  ;;  %v3281_v17 = vld [vmem:[%s4054_s3 + $0x1a0] sm:$0xff]  }
 0x13d   :  { %2818 = vmatpush3.bf16.msra.mxu0 %v3258_v35  ;;  %v779_v35 = vld [vmem:[#allocation2 + $0xb2] sm:$0xff] }
 0x13e   :  { %2819 = vmatprep.subr.bf16.mxu0 %v3260_v24 }
 0x13f   :  { %2914 = vmatpush3.bf16.msra.mxu1 %v3259_v0  ;;  %v3277_v0 = vld [vmem:[%s4054_s3 + $0x190] sm:$0xff]  }
 0x140   :  { %2804 = vmatmul.mubr.bf16.gmra.mrb[36].mxu0 %v587_v32  ;;  %2915 = vmatprep.subr.bf16.mxu1 %v3261_v50  ;;  %v3269_v32 = vld [vmem:[%s4054_s3 + $0x170] sm:$0xff]  }
 0x141   :  { %2807 = vmatprep.mubr.bf16.mxu0 %v588_v56  ;;  %2820 = vmatpush3.bf16.msra.mxu0 %v3260_v24  ;;  %v3813_v24 = vld [vmem:[#allocation2 + $0x82] sm:$0xff]  ;;  %v790_v56 = vpack.c.bf16 %v779_v35, %v778_v12 }
 0x142   :  { %2900 = vmatmul.mubr.bf16.gmra.mrb[4].mxu1 %v3582_v36  ;;  %2821 = vmatprep.subr.bf16.mxu0 %v3262_v51  ;;  %v1377_v36 = vld [vmem:[#allocation2 + $0x22] sm:$0xff] }
 0x143   :  { %2916 = vmatpush3.bf16.msra.mxu1 %v3261_v50  ;;  %2903 = vmatprep.mubr.bf16.mxu1 %v1194_v3  ;;  %v3271_v3 = vld [vmem:[%s4054_s3 + $0x178] sm:$0xff]   ;;  %v1392_v15 = vpack.c.bf16 %v1377_v36, %v771_v23  ;;  %v1385_v50 = vld [vmem:[#allocation2 + $0xc2] sm:$0xff] }
 0x144   :  { %2917 = vmatprep.subr.bf16.mxu1 %v3263_v60  ;;  %v782_v23 = vld [vmem:[#allocation2 + $0xe2] sm:$0xff] }
 0x145   :  { %2822 = vmatpush3.bf16.msra.mxu0 %v3262_v51  ;;  %v3821_v51 = vld [vmem:[%s4054_s3 + $0x218] sm:$0xff]   ;;  %v3288_v12 = vld [vmem:[%s4054_s3 + $0x1c0] sm:$0xff]  }
 0x146   :  { %2823 = vmatprep.subr.bf16.mxu0 %v3264_v62 }
 0x147   :  { %2918 = vmatpush3.bf16.msra.mxu1 %v3263_v60  ;;  %v1395_v60 = vpack.c.bf16 %v3813_v24, %v777_v21  ;;  %v3287_v21 = vld [vmem:[%s4054_s3 + $0x1b8] sm:$0xff]  }
 0x148   :  { %2808 = vmatmul.mubr.bf16.gmra.mrb[40].mxu0 %v589_v28  ;;  %2919 = vmatprep.subr.bf16.mxu1 %v3265_v1  ;;  %v773_v28 = vld [vmem:[#allocation2 + $0x32] sm:$0xff] }
 0x149   :  { %2811 = vmatprep.mubr.bf16.mxu0 %v590_v7  ;;  %2824 = vmatpush3.bf16.msra.mxu0 %v3264_v62  ;;  %v3787_v61 = vpack.c.bf16 %v773_v28, %v1377_v36  ;;  %v3793_v7 = vld [vmem:[%s4054_s3 + $0x208] sm:$0xff]   ;;  %v3279_v62 = vld [vmem:[%s4054_s3 + $0x198] sm:$0xff]  }
 0x14a   :  { %2904 = vmatmul.mubr.bf16.gmra.mrb[8].mxu1 %v1195_v34  ;;  %2825 = vmatprep.subr.bf16.mxu0 %v3266_v6  ;;  %v775_v34 = vld [vmem:[#allocation2 + $0x52] sm:$0xff]  ;;  %v1389_v36 = vld [vmem:[#allocation2 + $0x102] sm:$0xff] }
 0x14b   :  { %2920 = vmatpush3.bf16.msra.mxu1 %v3265_v1  ;;  %2907 = vmatprep.mubr.bf16.mxu1 %v1196_v16  ;;  %v3795_v16 = vpack.c.bf16 %v775_v34, %v774_v48  ;;  %v1396_v1 = vpack.c.bf16 %v1385_v50, %v779_v35  ;;  %v3290_v35 = vld [vmem:[%s4054_s3 + $0x1d0] sm:$0xff]  }
 0x14c   :  { %2921 = vmatprep.subr.bf16.mxu1 %v3267_v10 }
 0x14d   :  { %2826 = vmatpush3.bf16.msra.mxu0 %v3266_v6  ;;  %v3833_v6 = vld [vmem:[%s4054_s3 + $0x220] sm:$0xff]  }
 0x14e   :  { %2827 = vmatprep.subr.bf16.mxu0 %v3268_v13 }
 0x14f   :  { %2922 = vmatpush3.bf16.msra.mxu1 %v3267_v10  ;;  %v781_v10 = vld [vmem:[#allocation2 + $0xd2] sm:$0xff] }
 0x150   :  { %2812 = vmatmul.mubr.bf16.gmra.mrb[44].mxu0 %v591_v53  ;;  %2923 = vmatprep.subr.bf16.mxu1 %v3269_v32  ;;  %v1393_v53 = vpack.c.bf16 %v774_v48, %v773_v28  ;;  %v3285_v48 = vld [vmem:[%s4054_s3 + $0x1b0] sm:$0xff]  }
 0x151   :  { %2828 = vmatpush3.bf16.msra.mxu0 %v3268_v13  ;;  %2831 = vmatprep.mubr.bf16.mxu0 %v786_v57  ;;  %v783_v13 = vld [vmem:[#allocation2 + $0xf2] sm:$0xff] }
 0x152   :  { %2908 = vmatmul.mubr.bf16.gmra.mrb[12].mxu1 %v1197_v42  ;;  %2829 = vmatprep.subr.bf16.mxu0 %v3270_v46  ;;  %v1394_v42 = vpack.c.bf16 %v1381_v2, %v775_v34  ;;  %v792_v57 = vpack.c.bf16 %v783_v13, %v782_v23  ;;  %v1398_v28 = vpack.c.bf16 %v1389_v36, %v783_v13  ;;  %v3853_v34 = vld [vmem:[%s4054_s3 + $0x230] sm:$0xff]   ;;  %v3859_v2 = vld [vmem:[#allocation2 + $0x122] sm:$0xff] }
 0x153   :  { %2924 = vmatpush3.bf16.msra.mxu1 %v3269_v32  ;;  %2927 = vmatprep.mubr.bf16.mxu1 %v1392_v15  ;;  %v791_v32 = vpack.c.bf16 %v781_v10, %v1385_v50  ;;  %v3283_v15 = vld [vmem:[%s4054_s3 + $0x1a8] sm:$0xff]  }
 0x154   :  { %2925 = vmatprep.subr.bf16.mxu1 %v3271_v3  ;;  %v1785_v13 = vld [vmem:[#allocation2 + $0x61] sm:$0xff] }
 0x155   :  { %2830 = vmatpush3.bf16.msra.mxu0 %v3270_v46  ;;  %v3843_v46 = vld [vmem:[%s4054_s3 + $0x228] sm:$0xff]  }
 0x156   :  { %3007 = vmatprep.subr.bf16.mxu0 %v3782_v22 }
 0x157   :  { %2926 = vmatpush3.bf16.msra.mxu1 %v3271_v3  ;;  %v1397_v3 = vpack.c.bf16 %v782_v23, %v781_v10  ;;  %v1788_v23 = vld [vmem:[#allocation2 + $0x91] sm:$0xff] }
 0x158   :  { %2832 = vmatmul.mubr.bf16.vlgmr.msra.gmra.mrb[32].mxu0 %v3787_v61  ;;  %2943 = vmatprep.subr.bf16.mxu1 %v3273_v43 }
 0x159   :  { %2835 = vmatprep.mubr.bf16.mxu0 %v3795_v16  ;;  %3008 = vmatpush3.bf16.msra.mxu0 %v3782_v22 }
 0x15a   :  { %2928 = vmatmul.mubr.bf16.vlgmr.msra.gmra.mrb[0].mxu1 %v1393_v53  ;;  %3009 = vmatprep.subr.bf16.mxu0 %v3793_v7 }
 0x15b   :  { %2944 = vmatpush3.bf16.msra.mxu1 %v3273_v43  ;;  %2931 = vmatprep.mubr.bf16.mxu1 %v1394_v42  ;;  %v785_v43 = vld [vmem:[#allocation2 + $0x112] sm:$0xff] }
 0x15c   :  { %2945 = vmatprep.subr.bf16.mxu1 %v3275_v14  ;;  %v3861_v53 = vpack.c.bf16 %v785_v43, %v1389_v36  ;;  %v1399_v42 = vpack.c.bf16 %v3859_v2, %v785_v43 }
 0x15d   :  { %3010 = vmatpush3.bf16.msra.mxu0 %v3793_v7 }
 0x15e   :  { %3011 = vmatprep.subr.bf16.mxu0 %v3807_v19 }
 0x15f   :  { %2946 = vmatpush3.bf16.msra.mxu1 %v3275_v14  ;;  %v3867_v14 = vld [vmem:[%s4054_s3 + $0x238] sm:$0xff]  }
 0x160   :  { %2836 = vmatmul.mubr.bf16.gmra.mrb[36].mxu0 %v3815_v47  ;;  %2947 = vmatprep.subr.bf16.mxu1 %v3277_v0 }
 0x161   :  { %2839 = vmatprep.mubr.bf16.mxu0 %v790_v56  ;;  %3012 = vmatpush3.bf16.msra.mxu0 %v3807_v19  ;;  %v1781_v56 = vld [vmem:[#allocation2 + $0x21] sm:$0xff] }
 0x162   :  { %2932 = vmatmul.mubr.bf16.gmra.mrb[4].mxu1 %v1395_v60  ;;  %3013 = vmatprep.subr.bf16.mxu0 %v3821_v51  ;;  %v3295_v60 = vld [vmem:[%s4054_s3 + $0x1f8] sm:$0xff]  }
 0x163   :  { %2948 = vmatpush3.bf16.msra.mxu1 %v3277_v0  ;;  %2935 = vmatprep.mubr.bf16.mxu1 %v1396_v1  ;;  %v4060_v0 = vmov 0.0   ;;  %v1783_v1 = vld [vmem:[#allocation2 + $0x41] sm:$0xff] }
 0x164   :  { %2949 = vmatprep.subr.bf16.mxu1 %v3279_v62  ;;  %v1598_v50 = vpack.c.bf16 %v4060_v0, %v3606_v63  ;;  %v3293_v63 = vld [vmem:[%s4054_s3 + $0x1e8] sm:$0xff]  }
 0x165   :  { %3014 = vmatpush3.bf16.msra.mxu0 %v3821_v51 }
 0x166   :  { %3015 = vmatprep.subr.bf16.mxu0 %v3833_v6 }
 0x167   :  { %2950 = vmatpush3.bf16.msra.mxu1 %v3279_v62  ;;  %v1786_v62 = vld [vmem:[#allocation2 + $0x71] sm:$0xff] }
 0x168   :  { %2840 = vmatmul.mubr.bf16.gmra.mrb[40].mxu0 %v791_v32  ;;  %2951 = vmatprep.subr.bf16.mxu1 %v3281_v17 }
 0x169   :  { %2843 = vmatprep.mubr.bf16.mxu0 %v792_v57  ;;  %3016 = vmatpush3.bf16.msra.mxu0 %v3833_v6 }
 0x16a   :  { %2936 = vmatmul.mubr.bf16.gmra.mrb[8].mxu1 %v1397_v3  ;;  %3017 = vmatprep.subr.bf16.mxu0 %v3843_v46 }
 0x16b   :  { %2952 = vmatpush3.bf16.msra.mxu1 %v3281_v17  ;;  %2939 = vmatprep.mubr.bf16.mxu1 %v1398_v28  ;;  %v1799_v17 = vpack.c.bf16 %v1786_v62, %v1785_v13  ;;  %v1791_v28 = vld [vmem:[#allocation2 + $0xe1] sm:$0xff]  ;;  %v55_v13 = vsub.s32 1, %v3487_v39 }
 0x16c   :  { %2953 = vmatprep.subr.bf16.mxu1 %v3283_v15 }
 0x16d   :  { %3018 = vmatpush3.bf16.msra.mxu0 %v3843_v46 }
 0x16e   :  { %3019 = vmatprep.subr.bf16.mxu0 %v3853_v34 }
 0x16f   :  { %2954 = vmatpush3.bf16.msra.mxu1 %v3283_v15  ;;  %v1793_v15 = vld [vmem:[#allocation2 + $0x101] sm:$0xff] }
 0x170   :  { %2844 = vmatmul.mubr.bf16.gmra.mrb[44].mxu0 %v3861_v53  ;;  %2955 = vmatprep.subr.bf16.mxu1 %v3285_v48 }
 0x171   :  { %3020 = vmatpush3.bf16.msra.mxu0 %v3853_v34  ;;  %3023 = vmatprep.mubr.bf16.mxu0 %v3787_v61  ;;  %v3289_v61 = vld [vmem:[%s4054_s3 + $0x1c8] sm:$0xff]  }
 0x172   :  { %2940 = vmatmul.mubr.bf16.gmra.mrb[12].mxu1 %v1399_v42  ;;  %3021 = vmatprep.subr.bf16.mxu0 %v3867_v14 }
 0x173   :  { %2956 = vmatpush3.bf16.msra.mxu1 %v3285_v48  ;;  %2959 = vmatprep.mubr.bf16.mxu1 %v3540_v11  ;;  %v1990_v11 = vld [vmem:[#allocation2 + $0x92] sm:$0xff] }
 0x174   :  { %2957 = vmatprep.subr.bf16.mxu1 %v3287_v21  ;;  %v1796_v48 = vld [vmem:[#allocation2 + $0x131] sm:$0xff] }
 0x175   :  { %3022 = vmatpush3.bf16.msra.mxu0 %v3867_v14 }
 0x177   :  { %2958 = vmatpush3.bf16.msra.mxu1 %v3287_v21 }
 0x178   :  { %3024 = vmatmul.mubr.bf16.vlgmr.msra.gmra.mrb[48].mxu0 %v3795_v16  ;;  %2975 = vmatprep.subr.bf16.mxu1 %v3288_v12  ;;  %v2002_v16 = vpack.c.bf16 %v1990_v11, %v3813_v24  ;;  %v1782_v24 = vld [vmem:[#allocation2 + $0x31] sm:$0xff] }
 0x179   :  { %3027 = vmatprep.mubr.bf16.mxu0 %v3815_v47  ;;  %v1602_v47 = vpack.c.bf16 %v4060_v0, %v3692_v31  ;;  %v1787_v31 = vld [vmem:[#allocation2 + $0x81] sm:$0xff] }
 0x17a   :  { %2960 = vmatmul.mubr.bf16.vlgmr.msra.gmra.mrb[0].mxu1 %v3570_v30  ;;  %v3291_v30 = vld [vmem:[%s4054_s3 + $0x1d8] sm:$0xff]   ;;  %v1800_v36 = vpack.c.bf16 %v1788_v23, %v1787_v31 }
 0x17b   :  { %2976 = vmatpush3.bf16.msra.mxu1 %v3288_v12  ;;  %2963 = vmatprep.mubr.bf16.mxu1 %v3601_v59  ;;  %v3292_v59 = vld [vmem:[%s4054_s3 + $0x1e0] sm:$0xff]  }
 0x17c   :  { %2977 = vmatprep.subr.bf16.mxu1 %v3289_v61 }
 0x17f   :  { %2978 = vmatpush3.bf16.msra.mxu1 %v3289_v61 }
 0x180   :  { %3028 = vmatmul.mubr.bf16.gmra.mrb[52].mxu0 %v2002_v16  ;;  %2979 = vmatprep.subr.bf16.mxu1 %v3290_v35 }
 0x181   :  { %3031 = vmatprep.mubr.bf16.mxu0 %v791_v32  ;;  %v1790_v32 = vld [vmem:[#allocation2 + $0xd1] sm:$0xff] }
 0x182   :  { %2964 = vmatmul.mubr.bf16.gmra.mrb[4].mxu1 %v1598_v50 }
 0x183   :  { %2980 = vmatpush3.bf16.msra.mxu1 %v3290_v35  ;;  %2967 = vmatprep.mubr.bf16.mxu1 %v3662_v5  ;;  %v3294_v5 = vld [vmem:[%s4054_s3 + $0x1f0] sm:$0xff]  }
 0x184   :  { %2981 = vmatprep.subr.bf16.mxu1 %v3291_v30 }
 0x187   :  { %2982 = vmatpush3.bf16.msra.mxu1 %v3291_v30 }
 0x188   :  { %3032 = vmatmul.mubr.bf16.gmra.mrb[56].mxu0 %v792_v57  ;;  %2983 = vmatprep.subr.bf16.mxu1 %v3292_v59  ;;  %v1789_v57 = vld [vmem:[#allocation2 + $0xc1] sm:$0xff] }
 0x189   :  { %v1801_v3 = vpack.c.bf16 %v1790_v32, %v1789_v57 }
 0x18a   :  { %2968 = vmatmul.mubr.bf16.gmra.mrb[8].mxu1 %v3681_v44  ;;  %v1797_v44 = vpack.c.bf16 %v1782_v24, %v1781_v56 }
 0x18b   :  { %2984 = vmatpush3.bf16.msra.mxu1 %v3292_v59  ;;  %2971 = vmatprep.mubr.bf16.mxu1 %v3689_v27  ;;  %v1784_v27 = vld [vmem:[#allocation2 + $0x51] sm:$0xff] }
 0x18c   :  { %2985 = vmatprep.subr.bf16.mxu1 %v3293_v63  ;;  %v1798_v10 = vpack.c.bf16 %v1784_v27, %v1783_v1 }
 0x18f   :  { %2986 = vmatpush3.bf16.msra.mxu1 %v3293_v63 }
 0x190   :  { %2987 = vmatprep.subr.bf16.mxu1 %v3294_v5 }
 0x192   :  { %2972 = vmatmul.mubr.bf16.gmra.mrb[12].mxu1 %v1602_v47 }
 0x193   :  { %2988 = vmatpush3.bf16.msra.mxu1 %v3294_v5  ;;  %2991 = vmatprep.mubr.bf16.mxu1 %v1797_v44 }
 0x194   :  { %2989 = vmatprep.subr.bf16.mxu1 %v3295_v60 }
 0x197   :  { %2990 = vmatpush3.bf16.msra.mxu1 %v3295_v60 }
 0x198   :  { %3039 = vmatprep.subr.bf16.mxu1 %v3782_v22 }
 0x19a   :  { %2992 = vmatmul.mubr.bf16.vlgmr.msra.gmra.mrb[0].mxu1 %v1798_v10  ;;  %v3962_v10 = vld [vmem:[%s4056_s4] ss:$0 sm:$0xff] }
 0x19b   :  { %3047 = vmatpush3.bf16.msra.mxu1 %v3782_v22  ;;  %2995 = vmatprep.mubr.bf16.mxu1 %v1799_v17  ;;  %v1792_v22 = vld [vmem:[#allocation2 + $0xf1] sm:$0xff] }
 0x19c   :  { %3040 = vmatprep.subr.bf16.mxu1 %v3793_v7  ;;  %v1802_v43 = vpack.c.bf16 %v1792_v22, %v1791_v28 }
 0x19f   :  { %3048 = vmatpush3.bf16.msra.mxu1 %v3793_v7  ;;  %v1803_v7 = vpack.c.bf16 %v3673_v29, %v1793_v15  ;;  %v1998_v29 = vld [vmem:[#allocation2 + $0x132] sm:$0xff] }
 0x1a0   :  { %3041 = vmatprep.subr.bf16.mxu1 %v3807_v19 }
 0x1a2   :  { %2996 = vmatmul.mubr.bf16.gmra.mrb[4].mxu1 %v1800_v36 }
 0x1a3   :  { %2999 = vmatprep.mubr.bf16.mxu1 %v1801_v3  ;;  %3049 = vmatpush3.bf16.msra.mxu1 %v3807_v19  ;;  %v1804_v19 = vpack.c.bf16 %v1796_v48, %v3679_v37  ;;  %v3969_v3 = vrot.slane %v3493_v41, %v55_v13 }
 0x1a4   :  { %3042 = vmatprep.subr.bf16.mxu1 %v3821_v51 }
 0x1a7   :  { %3050 = vmatpush3.bf16.msra.mxu1 %v3821_v51  ;;  %v2006_v51 = vpack.c.bf16 %v1998_v29, %v3859_v2  ;;  %v221_v29 = vadd.f32 %v3513_v54, %v3969_v3 }
 0x1a8   :  { %3043 = vmatprep.subr.bf16.mxu1 %v3833_v6 }
 0x1aa   :  { %3000 = vmatmul.mubr.bf16.gmra.mrb[8].mxu1 %v1802_v43 }
 0x1ab   :  { %3003 = vmatprep.mubr.bf16.mxu1 %v1803_v7  ;;  %3051 = vmatpush3.bf16.msra.mxu1 %v3833_v6 }
 0x1ac   :  { %3044 = vmatprep.subr.bf16.mxu1 %v3843_v46 }
 0x1af   :  { %3052 = vmatpush3.bf16.msra.mxu1 %v3843_v46 }
 0x1b0   :  { %3045 = vmatprep.subr.bf16.mxu1 %v3853_v34 }
 0x1b2   :  { %3004 = vmatmul.mubr.bf16.gmra.mrb[12].mxu1 %v1804_v19 }
 0x1b3   :  { %3035 = vmatprep.mubr.bf16.mxu1 %v3861_v53  ;;  %3053 = vmatpush3.bf16.msra.mxu1 %v3853_v34 }
 0x1b4   :  { %3046 = vmatprep.subr.bf16.mxu1 %v3867_v14 }
 0x1b7   :  { %3054 = vmatpush3.bf16.msra.mxu1 %v3867_v14 }
 0x1be   :  { %3036 = vmatmul.mubr.bf16.vlgmr.msra.gmra.mrb[12].mxu1 %v2006_v51 }
 0x22b   :  { %v2833_v6 = vpop.f32.mrb[32].mxu0 }
 0x22c   :  { %v893_v42 = vpop.f32.mrb[33].mxu0  ;;  %v3055_v17 = vadd.f32 %v2833_v6, %v3962_v10 }
 0x22d   :  { %v2834_v46 = vpop.f32.mrb[34].mxu0  ;;  %v3058_v31 = vadd.f32 %v3962_v10, %v893_v42  ;;  %v211_v42 = vadd.f32 %v3499_v45, %v3969_v3 }
 0x22e   :  { %v896_v21 = vpop.f32.mrb[35].mxu0  ;;  %v3061_v32 = vadd.f32 %v2834_v46, %v3962_v10 }
 0x22f   :  { %v3064_v22 = vadd.f32 %v3962_v10, %v896_v21  ;;  %v225_v21 = vadd.f32 %v3518_v58, %v3969_v3 }
 0x233   :  { %v2837_v37 = vpop.f32.mrb[36].mxu0 }
 0x234   :  { %v909_v12 = vpop.f32.mrb[37].mxu0  ;;  %v3067_v13 = vadd.f32 %v2837_v37, %v3962_v10 }
 0x235   :  { %v2838_v61 = vpop.f32.mrb[38].mxu0 }
 0x236   :  { %v912_v11 = vpop.f32.mrb[39].mxu0 }
 0x23b   :  { %v3935_v35 = vpop.f32.mrb[40].mxu0 }
 0x23c   :  { %v3937_v53 = vpop.f32.mrb[41].mxu0 }
 0x23d   :  { %v3939_v34 = vpop.f32.mrb[42].mxu0 }
 0x23e   :  { %v3941_v16 = vpop.f32.mrb[43].mxu0 }
 0x243   :  { %v3943_v14 = vpop.f32.mrb[44].mxu0 }
 0x244   :  { %v3945_v2 = vpop.f32.mrb[45].mxu0 }
 0x245   :  { %v3947_v0 = vpop.f32.mrb[46].mxu0 }
 0x246   :  { %v3949_v50 = vpop.f32.mrb[47].mxu0 }
 0x24b   :  { %v3025_v30 = vpop.f32.mrb[48].mxu0 }
 0x24c   :  { %v2106_v59 = vpop.f32.mrb[49].mxu0 }
 0x24d   :  { %v3026_v63 = vpop.f32.mrb[50].mxu0 }
 0x24e   :  { %v2109_v5 = vpop.f32.mrb[51].mxu0 }
 0x253   :  { %v3029_v24 = vpop.f32.mrb[52].mxu0 }
 0x254   :  { %v2122_v47 = vpop.f32.mrb[53].mxu0 }
 0x255   :  { %v3030_v56 = vpop.f32.mrb[54].mxu0 }
 0x256   :  { %v2125_v60 = vpop.f32.mrb[55].mxu0 }
 0x25b   :  { %v3951_v44 = vpop.f32.mrb[56].mxu0 }
 0x25c   :  { %v3953_v27 = vpop.f32.mrb[57].mxu0 }
 0x25d   :  { %v3955_v62 = vpop.f32.mrb[58].mxu0 }
 0x25e   :  { %v3957_v1 = vpop.f32.mrb[59].mxu0 }
 0x26d   :  { %v2993_v23 = vpop.f32.mrb[0].mxu1 }
 0x26e   :  { %v3056_v36 = vadd.f32 %v3055_v17, %v2993_v23  ;;  %v1904_v57 = vpop.f32.mrb[1].mxu1 }
 0x26f   :  { %v3059_v15 = vadd.f32 %v3058_v31, %v1904_v57  ;;  %v2994_v28 = vpop.f32.mrb[2].mxu1  ;;  %v3070_v31 = vadd.f32 %v3962_v10, %v909_v12  ;;  %v3076_v57 = vadd.f32 %v3962_v10, %v912_v11  ;;  %v231_v11 = vadd.f32 %v3530_v4, %v3969_v3 }
 0x270   :  { %v3057_v43 = vadd.f32 %v3056_v36, %v3025_v30  ;;  %v3062_v7 = vadd.f32 %v3061_v32, %v2994_v28  ;;  %v1907_v48 = vpop.f32.mrb[3].mxu1  ;;  %v3073_v32 = vadd.f32 %v2838_v61, %v3962_v10  ;;  %v3082_v4 = vadd.f32 %v3962_v10, %v3937_v53 }
 0x271   :  { %v3060_v39 = vadd.f32 %v3059_v15, %v2106_v59  ;;  %v3065_v19 = vadd.f32 %v3064_v22, %v1907_v48  ;;  %v215_v59 = vadd.f32 %v3504_v49, %v3969_v3 }
 0x272   :  { %v2187_v51 = vmax.f32 %v3057_v43, 0.0  ;;  %v3063_v6 = vadd.f32 %v3062_v7, %v3026_v63 }
 0x273   :  { %v2185_v46 = vmax.f32 %v3060_v39, 0.0  ;;  %v3066_v41 = vadd.f32 %v3065_v19, %v2109_v5  ;;  %v241_v39 = vadd.f32 %v3555_v20, %v3969_v3  ;;  %v3079_v20 = vadd.f32 %v3935_v35, %v3962_v10 }
 0x274   :  { %v2203_v30 = vadd.f32 %v2187_v51, %v221_v29  ;;  %v2188_v17 = vmax.f32 %v3063_v6, 0.0  ;;  %v3088_v35 = vadd.f32 %v3962_v10, %v3941_v16 }
 0x275   :  { %v2201_v54 = vadd.f32 %v2185_v46, %v211_v42  ;;  %v2186_v23 = vmax.f32 %v3066_v41, 0.0  ;;  %v2997_v63 = vpop.f32.mrb[4].mxu1 }
 0x276   :  { %v2204_v45 = vadd.f32 %v2188_v17, %v225_v21  ;;  %v3068_v36 = vadd.f32 %v3067_v13, %v2997_v63  ;;  %v1920_v5 = vpop.f32.mrb[5].mxu1 }
 0x277   :  { %v2202_v58 = vadd.f32 %v2186_v23, %v215_v59  ;;  %v3071_v22 = vadd.f32 %v3070_v31, %v1920_v5  ;;  %v2998_v37 = vpop.f32.mrb[6].mxu1 }
 0x278   :  { %v2568_v15 = vpack.c.bf16 %v2204_v45, %v2203_v30  ;;  %v3069_v28 = vadd.f32 %v3068_v36, %v3029_v24  ;;  %v3074_v43 = vadd.f32 %v3073_v32, %v2998_v37  ;;  %v1923_v7 = vpop.f32.mrb[7].mxu1  ;;  %v251_v36 = vadd.f32 %v3585_v40, %v3969_v3 }
 0x279   :  { %v2563_v49 = vpack.c.bf16 %v2202_v58, %v2201_v54  ;;  %v3072_v48 = vadd.f32 %v3071_v22, %v2122_v47  ;;  %v3077_v12 = vadd.f32 %v3076_v57, %v1923_v7  ;;  %v245_v47 = vadd.f32 %v3564_v26, %v3969_v3 }
 0x27a   :  { %2600 = vst [vmem:[%s4057_s5 + $0x8] sm:$0xff] %v2568_v15   ;;  %v2191_v61 = vmax.f32 %v3069_v28, 0.0  ;;  %v3075_v19 = vadd.f32 %v3074_v43, %v3030_v56  ;;  %v235_v56 = vadd.f32 %v3535_v8, %v3969_v3  ;;  %v255_v58 = vadd.f32 %v3593_v52, %v3969_v3 }
 0x27b   :  { %2564 = vst [vmem:[%s4057_s5] sm:$0xff] %v2563_v49   ;;  %v2189_v24 = vmax.f32 %v3072_v48, 0.0  ;;  %v3078_v29 = vadd.f32 %v3077_v12, %v2125_v60  ;;  %v3085_v60 = vadd.f32 %v3939_v34, %v3962_v10  ;;  %v261_v34 = vadd.f32 %v3617_v9, %v3969_v3 }
 0x27c   :  { %v2207_v51 = vadd.f32 %v2191_v61, %v241_v39  ;;  %v2192_v6 = vmax.f32 %v3075_v19, 0.0  ;;  %v265_v9 = vadd.f32 %v3625_v18, %v3969_v3  ;;  %v3091_v18 = vadd.f32 %v3943_v14, %v3962_v10 }
 0x27d   :  { %v2205_v42 = vadd.f32 %v2189_v24, %v231_v11  ;;  %v2190_v46 = vmax.f32 %v3078_v29, 0.0  ;;  %v3001_v41 = vpop.f32.mrb[8].mxu1  ;;  %v3093_v52 = vadd.f32 %v3962_v10, %v3945_v2  ;;  %v3095_v43 = vadd.f32 %v3947_v0, %v3962_v10 }
 0x27e   :  { %v2208_v21 = vadd.f32 %v2192_v6, %v245_v47  ;;  %v3080_v13 = vadd.f32 %v3079_v20, %v3001_v41  ;;  %v1936_v26 = vpop.f32.mrb[9].mxu1  ;;  %v3097_v48 = vadd.f32 %v3962_v10, %v3949_v50  ;;  %v281_v61 = vadd.f32 %v3671_v25, %v3969_v3 }
 0x27f   :  { %v2206_v30 = vadd.f32 %v2190_v46, %v235_v56  ;;  %v3083_v17 = vadd.f32 %v3082_v4, %v1936_v26  ;;  %v3002_v59 = vpop.f32.mrb[10].mxu1  ;;  %v271_v2 = vadd.f32 %v3646_v38, %v3969_v3  ;;  %v285_v0 = vadd.f32 %v3676_v33, %v3969_v3 }
 0x280   :  { %v2578_v31 = vpack.c.bf16 %v2208_v21, %v2207_v51  ;;  %v3081_v8 = vadd.f32 %v3080_v13, %v3951_v44  ;;  %v3086_v54 = vadd.f32 %v3085_v60, %v3002_v59  ;;  %v1939_v53 = vpop.f32.mrb[11].mxu1  ;;  %v275_v50 = vadd.f32 %v3654_v55, %v3969_v3 }
 0x281   :  { %v2573_v23 = vpack.c.bf16 %v2206_v30, %v2205_v42  ;;  %v3084_v63 = vadd.f32 %v3083_v17, %v3953_v27  ;;  %v3089_v32 = vadd.f32 %v3088_v35, %v1939_v53 }
 0x282   :  { %2602 = vst [vmem:[%s4057_s5 + $0x18] sm:$0xff] %v2578_v31   ;;  %v2195_v16 = vmax.f32 %v3081_v8, 0.0  ;;  %v3087_v45 = vadd.f32 %v3086_v54, %v3955_v62 }
 0x283   :  { %2601 = vst [vmem:[%s4057_s5 + $0x10] sm:$0xff] %v2573_v23   ;;  %v2193_v44 = vmax.f32 %v3084_v63, 0.0  ;;  %v3090_v27 = vadd.f32 %v3089_v32, %v3957_v1 }
 0x284   :  { %v2211_v5 = vadd.f32 %v2195_v16, %v261_v34  ;;  %v2196_v57 = vmax.f32 %v3087_v45, 0.0 }
 0x285   :  { %v2209_v22 = vadd.f32 %v2193_v44, %v251_v36  ;;  %v2194_v62 = vmax.f32 %v3090_v27, 0.0 }
 0x286   :  { %v2212_v37 = vadd.f32 %v2196_v57, %v265_v9 }
 0x287   :  { %v2210_v15 = vadd.f32 %v2194_v62, %v255_v58 }
 0x288   :  { %v2588_v40 = vpack.c.bf16 %v2212_v37, %v2211_v5 }
 0x289   :  { %v2583_v28 = vpack.c.bf16 %v2210_v15, %v2209_v22 }
 0x28a   :  { %2604 = vst [vmem:[%s4057_s5 + $0x28] sm:$0xff] %v2588_v40  }
 0x28b   :  { %2603 = vst [vmem:[%s4057_s5 + $0x20] sm:$0xff] %v2583_v28  }
 0x291   :  { %v3037_v1 = vpop.f32.mrb[12].mxu1 }
 0x292   :  { %v3092_v7 = vadd.f32 %v3091_v18, %v3037_v1  ;;  %v2154_v49 = vpop.f32.mrb[13].mxu1 }
 0x293   :  { %v3094_v12 = vadd.f32 %v3093_v52, %v2154_v49  ;;  %v3038_v39 = vpop.f32.mrb[14].mxu1 }
 0x294   :  { %v2199_v19 = vmax.f32 %v3092_v7, 0.0  ;;  %v3096_v11 = vadd.f32 %v3095_v43, %v3038_v39  ;;  %v2157_v14 = vpop.f32.mrb[15].mxu1 }
 0x295   :  { %v2197_v24 = vmax.f32 %v3094_v12, 0.0  ;;  %v3098_v29 = vadd.f32 %v3097_v48, %v2157_v14 }
 0x296   :  { %v2215_v47 = vadd.f32 %v2199_v19, %v281_v61  ;;  %v2200_v20 = vmax.f32 %v3096_v11, 0.0 }
 0x297   :  { %v2213_v10 = vadd.f32 %v2197_v24, %v271_v2  ;;  %v2198_v51 = vmax.f32 %v3098_v29, 0.0 }
 0x298   :  { %v2216_v6 = vadd.f32 %v2200_v20, %v285_v0 }
 0x299   :  { %v2214_v25 = vadd.f32 %v2198_v51, %v275_v50 }
 0x29a   :  { %v2598_v56 = vpack.c.bf16 %v2216_v6, %v2215_v47 }
 0x29b   :  { %v2593_v4 = vpack.c.bf16 %v2214_v25, %v2213_v10 }
 0x29c   :  { %2606 = vst [vmem:[%s4057_s5 + $0x38] sm:$0xff] %v2598_v56  }
 0x29d   :  { %2605 = vst [vmem:[%s4057_s5 + $0x30] sm:$0xff] %v2593_v4  }

// kernel: poison_generator_forward.11
= control target key start
LH: loop header
LB: loop body
LE: loop exit
PB: predicated region body
PF: predicated region fallthrough
CT: control target
= control target key end

     0   :  { %vm163_vm0 = vcmask 130048   ;;  %v2287_v29 = vmov 0.0   ;;  %v45_v41 = vlaneseq  ;;  %s2642_s1 = inlined_call_operand.vmem [shape: bf16[144,256], index: 1, kind: input, shape index: {}]   ;;  %s2643_s0 = inlined_call_operand.vmem [shape: bf16[32,144], index: 0, kind: input, shape index: {}]   ;;  %s2644_s3 = inlined_call_operand.vmem [shape: bf16[9,128,128], index: 3, kind: input, shape index: {}]   ;;  %s2645_s2 = inlined_call_operand.vmem [shape: f32[1,256], index: 2, kind: input, shape index: {}]   ;;  %s2646_s4 = inlined_call_operand.vmem [shape: f32[1,128], index: 4, kind: input, shape index: {}]   ;;  %s2647_s5 = inlined_call_operand.vmem [shape: bf16[32,128], index: 5, kind: output, shape index: {}]  }
   0x1   :  { %v2146_v0 = vld [vmem:[%s2642_s1 + $0x4] ss:$8 sps:$4 sm:$0xff]   ;;  %v2148_v1 = vld [vmem:[%s2642_s1] ss:$8 sps:$4 sm:$0xff]   ;;  %v2149_v2 = vld [vmem:[%s2642_s1 + $0x14] ss:$8 sps:$4 sm:$0xff]  }
   0x2   :  { %170 = vmatprep.subr.bf16.mxu0 %v2146_v0  ;;  %v2151_v3 = vld [vmem:[%s2642_s1 + $0x10] ss:$8 sps:$4 sm:$0xff]   ;;  %v2152_v4 = vld [vmem:[%s2642_s1 + $0x24] ss:$8 sps:$4 sm:$0xff]   ;;  %v2154_v5 = vld [vmem:[%s2642_s1 + $0x20] ss:$8 sps:$4 sm:$0xff]  }
   0x3   :  { %171 = vmatpush1.bf16.msra.mxu0 %v2148_v1  ;;  %v2155_v6 = vld [vmem:[%s2642_s1 + $0x34] ss:$8 sps:$4 sm:$0xff]   ;;  %v2157_v7 = vld [vmem:[%s2642_s1 + $0x30] ss:$8 sps:$4 sm:$0xff]   ;;  %v2158_v8 = vld [vmem:[%s2642_s1 + $0x44] ss:$8 sps:$4 sm:$0xff]  }
   0x4   :  { %172 = vmatprep.subr.bf16.mxu0 %v2149_v2  ;;  %v2175_v9 = vld [vmem:[%s2643_s0 + $0x4] ss:$8 sps:$4 sm:$0xff]   ;;  %v2160_v10 = vld [vmem:[%s2642_s1 + $0x40] ss:$8 sps:$4 sm:$0xff]   ;;  %v2161_v11 = vld [vmem:[%s2642_s1 + $0x54] ss:$8 sps:$4 sm:$0xff]  }
   0x5   :  { %1617 = vmatprep.mubr.msk.bf16.mxu0 %vm163_vm0, %v2175_v9  ;;  %v2180_v12 = vld [vmem:[%s2644_s3 + $0x100] sm:$0xff]   ;;  %v2163_v13 = vld [vmem:[%s2642_s1 + $0x50] ss:$8 sps:$4 sm:$0xff]   ;;  %v2167_v16 = vld [vmem:[%s2642_s1 + $0x74] ss:$8 sps:$4 sm:$0xff]   ;;  %v2446_v42 = vshrl.u32 %v45_v41, 7 }
   0x6   :  { %v2164_v14 = vld [vmem:[%s2642_s1 + $0x64] ss:$8 sps:$4 sm:$0xff]   ;;  %2009 = vmatprep.subr.bf16.mxu1 %v2180_v12  ;;  %v2166_v15 = vld [vmem:[%s2642_s1 + $0x60] ss:$8 sps:$4 sm:$0xff]   ;;  %v2169_v17 = vld [vmem:[%s2642_s1 + $0x70] ss:$8 sps:$4 sm:$0xff]  }
   0x7   :  { %173 = vmatpush1.bf16.msra.mxu0 %v2151_v3  ;;  %2010 = vmatpush3.bf16.msra.mxu1 %v2180_v12  ;;  %v2170_v18 = vld [vmem:[%s2642_s1 + $0x84] ss:$8 sps:$4 sm:$0xff]   ;;  %v2172_v19 = vld [vmem:[%s2642_s1 + $0x80] ss:$8 sps:$4 sm:$0xff]   ;;  %v2176_v22 = vld [vmem:[%s2643_s0 + $0x14] ss:$8 sps:$4 sm:$0xff]  }
   0x8   :  { %174 = vmatprep.subr.bf16.mxu0 %v2152_v4  ;;  %v2179_v20 = vld [vmem:[%s2644_s3] sm:$0xff]   ;;  %v2181_v23 = vld [vmem:[%s2644_s3 + $0x8] sm:$0xff]   ;;  %v2178_v24 = vld [vmem:[%s2643_s0 + $0x10] ss:$8 sps:$4 sm:$0xff]   ;;  %228 = vst [vmem:[#allocation2 + $0x8] sm:$0x3f] %v2287_v29 }
   0x9   :  { %v2173_v21 = vld [vmem:[%s2643_s0] ss:$8 sps:$4 sm:$0xff]   ;;  %v2183_v26 = vld [vmem:[%s2644_s3 + $0x10] sm:$0xff]   ;;  %v2185_v28 = vld [vmem:[%s2644_s3 + $0x18] sm:$0xff]   ;;  %229 = vst [vmem:[#allocation2 + $0x10] sm:$0x3f] %v2287_v29 }
   0xa   :  { %v2182_v25 = vld [vmem:[%s2644_s3 + $0x108] sm:$0xff]   ;;  %v2184_v27 = vld [vmem:[%s2644_s3 + $0x110] sm:$0xff]   ;;  %227 = vst [vmem:[#allocation2] sm:$0x3f] %v2287_v29  ;;  %230 = vst [vmem:[#allocation2 + $0x18] sm:$0x3f] %v2287_v29 }
   0xb   :  { %175 = vmatpush1.bf16.msra.mxu0 %v2154_v5  ;;  %2011 = vmatprep.subr.bf16.mxu1 %v2182_v25  ;;  %231 = vst [vmem:[#allocation2 + $0x20] sm:$0x3f] %v2287_v29  ;;  %232 = vst [vmem:[#allocation2 + $0x28] sm:$0x3f] %v2287_v29  ;;  %v2186_v30 = vld [vmem:[%s2644_s3 + $0x118] sm:$0xff]   ;;  %v2187_v31 = vld [vmem:[%s2644_s3 + $0x20] sm:$0xff]  }
   0xc   :  { %176 = vmatprep.subr.bf16.mxu0 %v2155_v6  ;;  %2012 = vmatpush3.bf16.msra.mxu1 %v2182_v25  ;;  %233 = vst [vmem:[#allocation2 + $0x30] sm:$0x3f] %v2287_v29  ;;  %234 = vst [vmem:[#allocation2 + $0x38] sm:$0x3f] %v2287_v29  ;;  %v2188_v32 = vld [vmem:[%s2644_s3 + $0x120] sm:$0xff]   ;;  %v2189_v33 = vld [vmem:[%s2644_s3 + $0x28] sm:$0xff]  }
   0xd   :  { %2013 = vmatprep.subr.bf16.mxu1 %v2184_v27  ;;  %235 = vst [vmem:[#allocation2 + $0x40] sm:$0x3f] %v2287_v29  ;;  %236 = vst [vmem:[#allocation2 + $0x48] sm:$0x3f] %v2287_v29  ;;  %v2190_v34 = vld [vmem:[%s2644_s3 + $0x128] sm:$0xff]   ;;  %v2191_v35 = vld [vmem:[%s2644_s3 + $0x30] sm:$0xff]  }
   0xe   :  { %237 = vst [vmem:[#allocation2 + $0x50] sm:$0x3f] %v2287_v29  ;;  %238 = vst [vmem:[#allocation2 + $0x58] sm:$0x3f] %v2287_v29  ;;  %v2194_v36 = vld [vmem:[%s2644_s3 + $0x130] sm:$0xff]   ;;  %v2197_v37 = vld [vmem:[%s2644_s3 + $0x38] sm:$0xff]  }
   0xf   :  { %177 = vmatpush1.bf16.msra.mxu0 %v2157_v7  ;;  %v2198_v38 = vld [vmem:[%s2644_s3 + $0x138] sm:$0xff]   ;;  %v2437_v39 = vld [vmem:[%s2644_s3 + $0x40] sm:$0xff]   ;;  %v47_v43 = vsub.s32 0, %v2446_v42  ;;  %v2218_v29 = vld [vmem:[%s2644_s3 + $0x168] sm:$0xff]  }
  0x10   :  { %178 = vmatprep.subr.bf16.mxu0 %v2158_v8  ;;  %2014 = vmatpush3.bf16.msra.mxu1 %v2184_v27  ;;  %v2443_v40 = vld [vmem:[%s2644_s3 + $0x140] sm:$0xff]   ;;  %v2214_v25 = vld [vmem:[%s2644_s3 + $0x158] sm:$0xff]  }
  0x11   :  { %2015 = vmatprep.subr.bf16.mxu1 %v2186_v30  ;;  %v2452_v44 = vld [vmem:[%s2645_s2] sm:$0x3] }
  0x12   :  { %v48_v45 = vrot.slane %v2452_v44, %v47_v43  ;;  %v2216_v27 = vld [vmem:[%s2644_s3 + $0x160] sm:$0xff]  }
  0x13   :  { %179 = vmatpush1.bf16.msra.mxu0 %v2160_v10 }
  0x14   :  { %180 = vmatprep.subr.bf16.mxu0 %v2161_v11  ;;  %2016 = vmatpush3.bf16.msra.mxu1 %v2186_v30  ;;  %v2219_v30 = vld [vmem:[%s2644_s3 + $0x70] sm:$0xff]  }
  0x15   :  { %2017 = vmatprep.subr.bf16.mxu1 %v2188_v32 }
  0x17   :  { %181 = vmatpush1.bf16.msra.mxu0 %v2163_v13  ;;  %v2207_v13 = vld [vmem:[%s2644_s3 + $0x48] sm:$0xff]  }
  0x18   :  { %182 = vmatprep.subr.bf16.mxu0 %v2164_v14  ;;  %2018 = vmatpush3.bf16.msra.mxu1 %v2188_v32  ;;  %v2221_v32 = vld [vmem:[%s2644_s3 + $0x78] sm:$0xff]  }
  0x19   :  { %2019 = vmatprep.subr.bf16.mxu1 %v2190_v34 }
  0x1b   :  { %183 = vmatpush1.bf16.msra.mxu0 %v2166_v15 }
  0x1c   :  { %184 = vmatprep.subr.bf16.mxu0 %v2167_v16  ;;  %2020 = vmatpush3.bf16.msra.mxu1 %v2190_v34 }
  0x1d   :  { %2021 = vmatprep.subr.bf16.mxu1 %v2194_v36 }
  0x1f   :  { %185 = vmatpush1.bf16.msra.mxu0 %v2169_v17 }
  0x20   :  { %186 = vmatprep.subr.bf16.mxu0 %v2170_v18  ;;  %2022 = vmatpush3.bf16.msra.mxu1 %v2194_v36 }
  0x21   :  { %2023 = vmatprep.subr.bf16.mxu1 %v2198_v38 }
  0x23   :  { %187 = vmatpush1.bf16.msra.mxu0 %v2172_v19 }
  0x24   :  { %1929 = vmatprep.subr.bf16.mxu0 %v2179_v20  ;;  %2024 = vmatpush3.bf16.msra.mxu1 %v2198_v38 }
  0x25   :  { %2029 = vmatprep.subr.bf16.mxu1 %v2443_v40 }
  0x26   :  { %203 = vmatmul.mubr.bf16.vlgmr.msra.gmra.mrb[0].mxu0 %v2173_v21 }
  0x27   :  { %1618 = vmatprep.mubr.msk.bf16.mxu0 %vm163_vm0, %v2176_v22  ;;  %1930 = vmatpush3.bf16.msra.mxu0 %v2179_v20  ;;  %v2210_v20 = vld [vmem:[%s2644_s3 + $0x148] sm:$0xff]   ;;  %v2211_v22 = vld [vmem:[%s2644_s3 + $0x50] sm:$0xff]  }
  0x28   :  { %1931 = vmatprep.subr.bf16.mxu0 %v2181_v23 }
  0x2b   :  { %1932 = vmatpush3.bf16.msra.mxu0 %v2181_v23  ;;  %v2212_v23 = vld [vmem:[%s2644_s3 + $0x150] sm:$0xff]  }
  0x2c   :  { %1933 = vmatprep.subr.bf16.mxu0 %v2183_v26 }
  0x2e   :  { %213 = vmatmul.mubr.bf16.gmra.mrb[4].mxu0 %v2178_v24  ;;  %v2213_v24 = vld [vmem:[%s2644_s3 + $0x58] sm:$0xff]  }
  0x2f   :  { %1934 = vmatpush3.bf16.msra.mxu0 %v2183_v26  ;;  %v2215_v26 = vld [vmem:[%s2644_s3 + $0x60] sm:$0xff]  }
  0x30   :  { %1935 = vmatprep.subr.bf16.mxu0 %v2185_v28 }
  0x33   :  { %1936 = vmatpush3.bf16.msra.mxu0 %v2185_v28  ;;  %v2217_v28 = vld [vmem:[%s2644_s3 + $0x68] sm:$0xff]  }
  0x34   :  { %1937 = vmatprep.subr.bf16.mxu0 %v2187_v31 }
  0x37   :  { %1938 = vmatpush3.bf16.msra.mxu0 %v2187_v31  ;;  %v2220_v31 = vld [vmem:[%s2644_s3 + $0x170] sm:$0xff]  }
  0x38   :  { %1939 = vmatprep.subr.bf16.mxu0 %v2189_v33 }
  0x3b   :  { %1940 = vmatpush3.bf16.msra.mxu0 %v2189_v33  ;;  %v2222_v33 = vld [vmem:[%s2644_s3 + $0x178] sm:$0xff]  }
  0x3c   :  { %1941 = vmatprep.subr.bf16.mxu0 %v2191_v35 }
  0x3f   :  { %1942 = vmatpush3.bf16.msra.mxu0 %v2191_v35  ;;  %v2225_v35 = vld [vmem:[%s2644_s3 + $0x80] sm:$0xff]  }
  0x40   :  { %1943 = vmatprep.subr.bf16.mxu0 %v2197_v37 }
  0x43   :  { %1944 = vmatpush3.bf16.msra.mxu0 %v2197_v37 }
  0x44   :  { %1949 = vmatprep.subr.bf16.mxu0 %v2437_v39 }
  0xf9   :  { %v204_v46 = vpop.f32.mrb[0].mxu0 }
  0xfa   :  { %v205_v47 = vadd.f32 %v204_v46, %v48_v45  ;;  %v2455_v48 = vpop.f32.mrb[1].mxu0  ;;  %v2233_v46 = vld [vmem:[%s2644_s3 + $0x88] sm:$0xff]  }
  0xfb   :  { %v208_v49 = vpop.f32.mrb[2].mxu0 }
  0xfc   :  { %v223_v50 = vmax.f32 %v205_v47, 0.0  ;;  %v209_v51 = vadd.f32 %v208_v49, %v48_v45  ;;  %v2457_v52 = vpop.f32.mrb[3].mxu0 }
  0xfe   :  { %v243_v53 = vcombine.high %v223_v50, %v223_v50  ;;  %252 = vst [vmem:[#allocation2 + $0x9] sm:$0xf] %v223_v50  ;;  %v224_v54 = vmax.f32 %v209_v51, 0.0  ;;  %v2234_v51 = vld [vmem:[%s2644_s3 + $0x188] sm:$0xff]  }
 0x100   :  { %253 = vst [vmem:[#allocation2 + $0x11] sm:$0xf] %v243_v53  ;;  %v244_v55 = vcombine.high %v224_v54, %v224_v54  ;;  %254 = vst [vmem:[#allocation2 + $0x19] sm:$0xf] %v224_v54  ;;  %v2235_v54 = vld [vmem:[%s2644_s3 + $0x90] sm:$0xff]  }
 0x101   :  { %v214_v56 = vpop.f32.mrb[4].mxu0 }
 0x102   :  { %255 = vst [vmem:[#allocation2 + $0x21] sm:$0xf] %v244_v55  ;;  %v215_v57 = vadd.f32 %v214_v56, %v48_v45  ;;  %v2459_v58 = vpop.f32.mrb[5].mxu0  ;;  %v2236_v55 = vld [vmem:[%s2644_s3 + $0x190] sm:$0xff]   ;;  %v2237_v56 = vld [vmem:[%s2644_s3 + $0x98] sm:$0xff]  }
 0x103   :  { %v218_v59 = vpop.f32.mrb[6].mxu0 }
 0x104   :  { %v225_v60 = vmax.f32 %v215_v57, 0.0  ;;  %v219_v61 = vadd.f32 %v218_v59, %v48_v45  ;;  %v2461_v62 = vpop.f32.mrb[7].mxu0  ;;  %v2238_v57 = vld [vmem:[%s2644_s3 + $0x198] sm:$0xff]   ;;  %v2239_v59 = vld [vmem:[%s2644_s3 + $0xa0] sm:$0xff]  }
 0x105   :  { %v2192_v1 = vld [vmem:[#allocation2] ss:$8 sps:$4 sm:$0xff]  }
 0x106   :  { %v245_v63 = vcombine.high %v225_v60, %v225_v60  ;;  %256 = vst [vmem:[#allocation2 + $0x39] sm:$0xf] %v225_v60  ;;  %v226_v0 = vmax.f32 %v219_v61, 0.0  ;;  %v2202_v10 = vld [vmem:[#allocation2 + $0x1] ss:$8 sps:$4 sm:$0xff]  }
 0x107   :  { %v2193_v2 = vld [vmem:[#allocation2 + $0x10] ss:$8 sps:$4 sm:$0xff]   ;;  %v2240_v60 = vld [vmem:[%s2644_s3 + $0x1a0] sm:$0xff]   ;;  %v2241_v61 = vld [vmem:[%s2644_s3 + $0xa8] sm:$0xff]  }
 0x108   :  { %257 = vst [vmem:[#allocation2 + $0x41] sm:$0xf] %v245_v63  ;;  %v246_v3 = vcombine.high %v226_v0, %v226_v0  ;;  %258 = vst [vmem:[#allocation2 + $0x49] sm:$0xf] %v226_v0  ;;  %v2195_v4 = vld [vmem:[#allocation2 + $0x9] ss:$8 sps:$4 sm:$0xff]   ;;  %v285_v5 = vpack.c.bf16 %v2193_v2, %v2192_v1 }
 0x109   :  { %v2196_v6 = vld [vmem:[#allocation2 + $0x19] ss:$8 sps:$4 sm:$0xff]   ;;  %v2208_v18 = vld [vmem:[#allocation2 + $0xa] ss:$8 sps:$4 sm:$0xff]  }
 0x10a   :  { %259 = vst [vmem:[#allocation2 + $0x51] sm:$0xf] %v246_v3  ;;  %1945 = vmatprep.mubr.bf16.mxu0 %v285_v5  ;;  %v866_v7 = vpack.c.bf16 %v2196_v6, %v2195_v4  ;;  %v2203_v8 = vld [vmem:[#allocation2 + $0x11] ss:$8 sps:$4 sm:$0xff]   ;;  %v2232_v41 = vld [vmem:[#allocation2 + $0x20] ss:$8 sps:$4 sm:$0xff]  }
 0x10b   :  { %v2209_v11 = vld [vmem:[#allocation2 + $0x1a] ss:$8 sps:$4 sm:$0xff]   ;;  %v434_v17 = vpack.c.bf16 %v2203_v8, %v2202_v10  ;;  %v2242_v63 = vld [vmem:[%s2644_s3 + $0x1a8] sm:$0xff]   ;;  %v2243_v0 = vld [vmem:[%s2644_s3 + $0xb0] sm:$0xff]  }
 0x10c   :  { %2025 = vmatprep.mubr.bf16.mxu1 %v866_v7  ;;  %v1010_v21 = vpack.c.bf16 %v2209_v11, %v2208_v18  ;;  %v2227_v36 = vld [vmem:[#allocation2 + $0x12] ss:$8 sps:$4 sm:$0xff]   ;;  %v2249_v5 = vld [vmem:[%s2644_s3 + $0xc0] sm:$0xff]   ;;  %v2258_v18 = vld [vmem:[%s2644_s3 + $0x1c8] sm:$0xff]  }
 0x10d   :  { %v2200_v9 = vld [vmem:[#allocation2 + $0x30] ss:$8 sps:$4 sm:$0xff]   ;;  %v2256_v11 = vld [vmem:[#allocation2 + $0x21] ss:$8 sps:$4 sm:$0xff]  }
 0x10e   :  { %v2223_v37 = vld [vmem:[#allocation2 + $0x31] ss:$8 sps:$4 sm:$0xff]  }
 0x10f   :  { %v2201_v12 = vld [vmem:[#allocation2 + $0x40] ss:$8 sps:$4 sm:$0xff]   ;;  %v2231_v49 = vld [vmem:[#allocation2 + $0x10] ss:$8 sps:$4 sm:$0xff]  }
 0x110   :  { %v2205_v14 = vld [vmem:[#allocation2 + $0x39] ss:$8 sps:$4 sm:$0xff]   ;;  %v286_v15 = vpack.c.bf16 %v2201_v12, %v2200_v9  ;;  %v1155_v53 = vpack.c.bf16 %v2232_v41, %v2231_v49  ;;  %v2244_v1 = vld [vmem:[%s2644_s3 + $0x1b0] sm:$0xff]   ;;  %v2278_v41 = vld [vmem:[%s2644_s3 + $0x208] sm:$0xff]  }
 0x111   :  { %v2206_v16 = vld [vmem:[#allocation2 + $0x49] ss:$8 sps:$4 sm:$0xff]   ;;  %v2228_v45 = vld [vmem:[#allocation2 + $0x3a] ss:$8 sps:$4 sm:$0xff]  }
 0x112   :  { %1946 = vmatmul.mubr.bf16.vlgmr.msra.gmra.mrb[8].mxu0 %v286_v15  ;;  %v867_v19 = vpack.c.bf16 %v2206_v16, %v2205_v14  ;;  %v2224_v34 = vld [vmem:[#allocation2 + $0x41] ss:$8 sps:$4 sm:$0xff]   ;;  %v2245_v2 = vld [vmem:[%s2644_s3 + $0xb8] sm:$0xff]  }
 0x113   :  { %1950 = vmatpush3.bf16.msra.mxu0 %v2437_v39  ;;  %1965 = vmatprep.mubr.bf16.mxu0 %v434_v17  ;;  %v2229_v38 = vld [vmem:[#allocation2 + $0x4a] ss:$8 sps:$4 sm:$0xff]   ;;  %v2230_v39 = vld [vmem:[%s2644_s3 + $0x180] sm:$0xff]   ;;  %v435_v43 = vpack.c.bf16 %v2224_v34, %v2223_v37  ;;  %v2246_v3 = vld [vmem:[%s2644_s3 + $0x1b8] sm:$0xff]  }
 0x114   :  { %2026 = vmatmul.mubr.bf16.vlgmr.msra.gmra.mrb[0].mxu1 %v867_v19  ;;  %1951 = vmatprep.subr.bf16.mxu0 %v2207_v13  ;;  %v1011_v50 = vpack.c.bf16 %v2229_v38, %v2228_v45  ;;  %v2248_v4 = vld [vmem:[#allocation2 + $0x42] ss:$8 sps:$4 sm:$0xff]   ;;  %v2247_v7 = vld [vmem:[#allocation2 + $0x32] ss:$8 sps:$4 sm:$0xff]  }
 0x115   :  { %2030 = vmatpush3.bf16.msra.mxu1 %v2443_v40  ;;  %2045 = vmatprep.mubr.bf16.mxu1 %v1010_v21  ;;  %v2226_v40 = vld [vmem:[#allocation2 + $0x2] ss:$8 sps:$4 sm:$0xff]   ;;  %v2253_v8 = vld [vmem:[#allocation2 + $0x50] ss:$8 sps:$4 sm:$0xff]   ;;  %v579_v12 = vpack.c.bf16 %v2248_v4, %v2247_v7 }
 0x116   :  { %2031 = vmatprep.subr.bf16.mxu1 %v2210_v20  ;;  %v578_v47 = vpack.c.bf16 %v2227_v36, %v2226_v40  ;;  %v2251_v6 = vld [vmem:[#allocation2 + $0x18] ss:$8 sps:$4 sm:$0xff]   ;;  %v2250_v10 = vld [vmem:[#allocation2 + $0x8] ss:$8 sps:$4 sm:$0xff]  }
 0x117   :  { %1952 = vmatpush3.bf16.msra.mxu0 %v2207_v13  ;;  %v2254_v9 = vld [vmem:[%s2644_s3 + $0x1c0] sm:$0xff]   ;;  %v2257_v14 = vld [vmem:[%s2644_s3 + $0xc8] sm:$0xff]   ;;  %v722_v15 = vpack.c.bf16 %v2251_v6, %v2250_v10  ;;  %v2255_v16 = vld [vmem:[#allocation2 + $0x11] ss:$8 sps:$4 sm:$0xff]  }
 0x118   :  { %1953 = vmatprep.subr.bf16.mxu0 %v2211_v22  ;;  %v2252_v13 = vld [vmem:[#allocation2 + $0x40] ss:$8 sps:$4 sm:$0xff]   ;;  %v1299_v19 = vpack.c.bf16 %v2256_v11, %v2255_v16  ;;  %v2260_v21 = vld [vmem:[%s2644_s3 + $0x1d0] sm:$0xff]  }
 0x119   :  { %2032 = vmatpush3.bf16.msra.mxu1 %v2210_v20  ;;  %v1156_v17 = vpack.c.bf16 %v2253_v8, %v2252_v13  ;;  %v2259_v20 = vld [vmem:[%s2644_s3 + $0xd0] sm:$0xff]   ;;  %v2277_v36 = vld [vmem:[#allocation2 + $0x22] ss:$8 sps:$4 sm:$0xff]  }
 0x11a   :  { %2033 = vmatprep.subr.bf16.mxu1 %v2212_v23  ;;  %v2274_v34 = vld [vmem:[#allocation2 + $0x51] ss:$8 sps:$4 sm:$0xff]   ;;  %v2273_v38 = vld [vmem:[#allocation2 + $0x41] ss:$8 sps:$4 sm:$0xff]  }
 0x11b   :  { %1954 = vmatpush3.bf16.msra.mxu0 %v2211_v22  ;;  %v2261_v22 = vld [vmem:[%s2644_s3 + $0xd8] sm:$0xff]   ;;  %v1300_v40 = vpack.c.bf16 %v2274_v34, %v2273_v38  ;;  %v2279_v45 = vld [vmem:[%s2644_s3 + $0x210] sm:$0xff]   ;;  %v2282_v49 = vld [vmem:[%s2644_s3 + $0x228] sm:$0xff]  }
 0x11c   :  { %1955 = vmatprep.subr.bf16.mxu0 %v2213_v24 }
 0x11d   :  { %2034 = vmatpush3.bf16.msra.mxu1 %v2212_v23  ;;  %v2262_v23 = vld [vmem:[%s2644_s3 + $0x1d8] sm:$0xff]  }
 0x11e   :  { %2035 = vmatprep.subr.bf16.mxu1 %v2214_v25 }
 0x11f   :  { %1956 = vmatpush3.bf16.msra.mxu0 %v2213_v24  ;;  %v2263_v24 = vld [vmem:[%s2644_s3 + $0xe0] sm:$0xff]  }
 0x120   :  { %1957 = vmatprep.subr.bf16.mxu0 %v2215_v26 }
 0x121   :  { %2036 = vmatpush3.bf16.msra.mxu1 %v2214_v25  ;;  %v2264_v25 = vld [vmem:[%s2644_s3 + $0x1e0] sm:$0xff]  }
 0x122   :  { %2037 = vmatprep.subr.bf16.mxu1 %v2216_v27 }
 0x123   :  { %1958 = vmatpush3.bf16.msra.mxu0 %v2215_v26  ;;  %v2265_v26 = vld [vmem:[%s2644_s3 + $0xe8] sm:$0xff]  }
 0x124   :  { %1959 = vmatprep.subr.bf16.mxu0 %v2217_v28 }
 0x125   :  { %2038 = vmatpush3.bf16.msra.mxu1 %v2216_v27  ;;  %v2266_v27 = vld [vmem:[%s2644_s3 + $0x1e8] sm:$0xff]  }
 0x126   :  { %2039 = vmatprep.subr.bf16.mxu1 %v2218_v29 }
 0x127   :  { %1960 = vmatpush3.bf16.msra.mxu0 %v2217_v28  ;;  %v2267_v28 = vld [vmem:[%s2644_s3 + $0xf0] sm:$0xff]  }
 0x128   :  { %1961 = vmatprep.subr.bf16.mxu0 %v2219_v30 }
 0x129   :  { %2040 = vmatpush3.bf16.msra.mxu1 %v2218_v29  ;;  %v2268_v29 = vld [vmem:[%s2644_s3 + $0x1f0] sm:$0xff]  }
 0x12a   :  { %2041 = vmatprep.subr.bf16.mxu1 %v2220_v31 }
 0x12b   :  { %1962 = vmatpush3.bf16.msra.mxu0 %v2219_v30  ;;  %v2269_v30 = vld [vmem:[%s2644_s3 + $0xf8] sm:$0xff]  }
 0x12c   :  { %1963 = vmatprep.subr.bf16.mxu0 %v2221_v32 }
 0x12d   :  { %2042 = vmatpush3.bf16.msra.mxu1 %v2220_v31  ;;  %v2270_v31 = vld [vmem:[%s2644_s3 + $0x1f8] sm:$0xff]  }
 0x12e   :  { %2043 = vmatprep.subr.bf16.mxu1 %v2222_v33 }
 0x12f   :  { %1964 = vmatpush3.bf16.msra.mxu0 %v2221_v32  ;;  %v2272_v32 = vld [vmem:[#allocation2 + $0x48] ss:$8 sps:$4 sm:$0xff]  }
 0x130   :  { %1969 = vmatprep.subr.bf16.mxu0 %v2225_v35 }
 0x131   :  { %2044 = vmatpush3.bf16.msra.mxu1 %v2222_v33  ;;  %v2271_v33 = vld [vmem:[#allocation2 + $0x38] ss:$8 sps:$4 sm:$0xff]  }
 0x132   :  { %1966 = vmatmul.mubr.bf16.vlgmr.msra.gmra.mrb[8].mxu0 %v435_v43  ;;  %2049 = vmatprep.subr.bf16.mxu1 %v2230_v39  ;;  %v723_v37 = vpack.c.bf16 %v2272_v32, %v2271_v33 }
 0x133   :  { %1970 = vmatpush3.bf16.msra.mxu0 %v2225_v35  ;;  %1985 = vmatprep.mubr.bf16.mxu0 %v578_v47  ;;  %v2275_v35 = vld [vmem:[%s2644_s3 + $0x200] sm:$0xff]  }
 0x134   :  { %2046 = vmatmul.mubr.bf16.vlgmr.msra.gmra.mrb[0].mxu1 %v1011_v50  ;;  %1971 = vmatprep.subr.bf16.mxu0 %v2233_v46  ;;  %v2281_v47 = vld [vmem:[%s2644_s3 + $0x220] sm:$0xff]   ;;  %v2283_v50 = vld [vmem:[%s2644_s3 + $0x230] sm:$0xff]  }
 0x135   :  { %2050 = vmatpush3.bf16.msra.mxu1 %v2230_v39  ;;  %2065 = vmatprep.mubr.bf16.mxu1 %v1155_v53  ;;  %v2276_v39 = vld [vmem:[#allocation2 + $0x12] ss:$8 sps:$4 sm:$0xff]  }
 0x136   :  { %2051 = vmatprep.subr.bf16.mxu1 %v2234_v51  ;;  %v1443_v43 = vpack.c.bf16 %v2277_v36, %v2276_v39  ;;  %v2286_v53 = vld [vmem:[#allocation2 + $0x52] ss:$8 sps:$4 sm:$0xff]  }
 0x137   :  { %1972 = vmatpush3.bf16.msra.mxu0 %v2233_v46  ;;  %v2280_v46 = vld [vmem:[%s2644_s3 + $0x218] sm:$0xff]  }
 0x138   :  { %1973 = vmatprep.subr.bf16.mxu0 %v2235_v54 }
 0x139   :  { %2052 = vmatpush3.bf16.msra.mxu1 %v2234_v51  ;;  %v2284_v51 = vld [vmem:[%s2644_s3 + $0x238] sm:$0xff]  }
 0x13a   :  { %2053 = vmatprep.subr.bf16.mxu1 %v2236_v55 }
 0x13b   :  { %1974 = vmatpush3.bf16.msra.mxu0 %v2235_v54  ;;  %v2285_v54 = vld [vmem:[#allocation2 + $0x42] ss:$8 sps:$4 sm:$0xff]  }
 0x13c   :  { %1975 = vmatprep.subr.bf16.mxu0 %v2237_v56 }
 0x13d   :  { %2054 = vmatpush3.bf16.msra.mxu1 %v2236_v55  ;;  %v1444_v55 = vpack.c.bf16 %v2286_v53, %v2285_v54 }
 0x13e   :  { %2055 = vmatprep.subr.bf16.mxu1 %v2238_v57 }
 0x13f   :  { %1976 = vmatpush3.bf16.msra.mxu0 %v2237_v56 }
 0x140   :  { %1977 = vmatprep.subr.bf16.mxu0 %v2239_v59 }
 0x141   :  { %2056 = vmatpush3.bf16.msra.mxu1 %v2238_v57 }
 0x142   :  { %2057 = vmatprep.subr.bf16.mxu1 %v2240_v60 }
 0x143   :  { %1978 = vmatpush3.bf16.msra.mxu0 %v2239_v59 }
 0x144   :  { %1979 = vmatprep.subr.bf16.mxu0 %v2241_v61 }
 0x145   :  { %2058 = vmatpush3.bf16.msra.mxu1 %v2240_v60 }
 0x146   :  { %2059 = vmatprep.subr.bf16.mxu1 %v2242_v63 }
 0x147   :  { %1980 = vmatpush3.bf16.msra.mxu0 %v2241_v61  ;;  %v51_v61 = vsub.s32 1, %v2446_v42 }
 0x148   :  { %1981 = vmatprep.subr.bf16.mxu0 %v2243_v0 }
 0x149   :  { %2060 = vmatpush3.bf16.msra.mxu1 %v2242_v63  ;;  %v1627_v63 = vld [vmem:[%s2646_s4] ss:$0 sm:$0xff] }
 0x14a   :  { %2061 = vmatprep.subr.bf16.mxu1 %v2244_v1 }
 0x14b   :  { %1982 = vmatpush3.bf16.msra.mxu0 %v2243_v0 }
 0x14c   :  { %1983 = vmatprep.subr.bf16.mxu0 %v2245_v2 }
 0x14d   :  { %2062 = vmatpush3.bf16.msra.mxu1 %v2244_v1  ;;  %v52_v1 = vrot.slane %v2452_v44, %v51_v61 }
 0x14e   :  { %2063 = vmatprep.subr.bf16.mxu1 %v2246_v3 }
 0x14f   :  { %1984 = vmatpush3.bf16.msra.mxu0 %v2245_v2  ;;  %v217_v10 = vadd.f32 %v2459_v58, %v52_v1  ;;  %v207_v13 = vadd.f32 %v2455_v48, %v52_v1  ;;  %v221_v16 = vadd.f32 %v2461_v62, %v52_v1 }
 0x150   :  { %1989 = vmatprep.subr.bf16.mxu0 %v2249_v5 }
 0x151   :  { %2064 = vmatpush3.bf16.msra.mxu1 %v2246_v3 }
 0x152   :  { %1986 = vmatmul.mubr.bf16.vlgmr.msra.gmra.mrb[8].mxu0 %v579_v12  ;;  %2069 = vmatprep.subr.bf16.mxu1 %v2254_v9 }
 0x153   :  { %1990 = vmatpush3.bf16.msra.mxu0 %v2249_v5  ;;  %2005 = vmatprep.mubr.bf16.mxu0 %v722_v15 }
 0x154   :  { %2066 = vmatmul.mubr.bf16.vlgmr.msra.gmra.mrb[0].mxu1 %v1156_v17  ;;  %1991 = vmatprep.subr.bf16.mxu0 %v2257_v14 }
 0x155   :  { %2070 = vmatpush3.bf16.msra.mxu1 %v2254_v9  ;;  %2085 = vmatprep.mubr.bf16.mxu1 %v1299_v19 }
 0x156   :  { %2071 = vmatprep.subr.bf16.mxu1 %v2258_v18 }
 0x157   :  { %1992 = vmatpush3.bf16.msra.mxu0 %v2257_v14 }
 0x158   :  { %1993 = vmatprep.subr.bf16.mxu0 %v2259_v20 }
 0x159   :  { %2072 = vmatpush3.bf16.msra.mxu1 %v2258_v18  ;;  %v211_v18 = vadd.f32 %v2457_v52, %v52_v1 }
 0x15a   :  { %2073 = vmatprep.subr.bf16.mxu1 %v2260_v21 }
 0x15b   :  { %1994 = vmatpush3.bf16.msra.mxu0 %v2259_v20 }
 0x15c   :  { %1995 = vmatprep.subr.bf16.mxu0 %v2261_v22 }
 0x15d   :  { %2074 = vmatpush3.bf16.msra.mxu1 %v2260_v21 }
 0x15e   :  { %2075 = vmatprep.subr.bf16.mxu1 %v2262_v23 }
 0x15f   :  { %1996 = vmatpush3.bf16.msra.mxu0 %v2261_v22 }
 0x160   :  { %1997 = vmatprep.subr.bf16.mxu0 %v2263_v24 }
 0x161   :  { %2076 = vmatpush3.bf16.msra.mxu1 %v2262_v23 }
 0x162   :  { %2077 = vmatprep.subr.bf16.mxu1 %v2264_v25 }
 0x163   :  { %1998 = vmatpush3.bf16.msra.mxu0 %v2263_v24 }
 0x164   :  { %1999 = vmatprep.subr.bf16.mxu0 %v2265_v26 }
 0x165   :  { %2078 = vmatpush3.bf16.msra.mxu1 %v2264_v25 }
 0x166   :  { %2079 = vmatprep.subr.bf16.mxu1 %v2266_v27 }
 0x167   :  { %2000 = vmatpush3.bf16.msra.mxu0 %v2265_v26 }
 0x168   :  { %2001 = vmatprep.subr.bf16.mxu0 %v2267_v28 }
 0x169   :  { %2080 = vmatpush3.bf16.msra.mxu1 %v2266_v27 }
 0x16a   :  { %2081 = vmatprep.subr.bf16.mxu1 %v2268_v29 }
 0x16b   :  { %2002 = vmatpush3.bf16.msra.mxu0 %v2267_v28 }
 0x16c   :  { %2003 = vmatprep.subr.bf16.mxu0 %v2269_v30 }
 0x16d   :  { %2082 = vmatpush3.bf16.msra.mxu1 %v2268_v29 }
 0x16e   :  { %2083 = vmatprep.subr.bf16.mxu1 %v2270_v31 }
 0x16f   :  { %2004 = vmatpush3.bf16.msra.mxu0 %v2269_v30 }
 0x171   :  { %2084 = vmatpush3.bf16.msra.mxu1 %v2270_v31 }
 0x172   :  { %2006 = vmatmul.mubr.bf16.vlgmr.msra.gmra.mrb[8].mxu0 %v723_v37  ;;  %2089 = vmatprep.subr.bf16.mxu1 %v2275_v35 }
 0x174   :  { %2086 = vmatmul.mubr.bf16.vlgmr.msra.gmra.mrb[0].mxu1 %v1300_v40 }
 0x175   :  { %2090 = vmatpush3.bf16.msra.mxu1 %v2275_v35  ;;  %2105 = vmatprep.mubr.bf16.mxu1 %v1443_v43 }
 0x176   :  { %2091 = vmatprep.subr.bf16.mxu1 %v2278_v41 }
 0x179   :  { %2092 = vmatpush3.bf16.msra.mxu1 %v2278_v41 }
 0x17a   :  { %2093 = vmatprep.subr.bf16.mxu1 %v2279_v45 }
 0x17d   :  { %2094 = vmatpush3.bf16.msra.mxu1 %v2279_v45 }
 0x17e   :  { %2095 = vmatprep.subr.bf16.mxu1 %v2280_v46 }
 0x181   :  { %2096 = vmatpush3.bf16.msra.mxu1 %v2280_v46 }
 0x182   :  { %2097 = vmatprep.subr.bf16.mxu1 %v2281_v47 }
 0x185   :  { %2098 = vmatpush3.bf16.msra.mxu1 %v2281_v47 }
 0x186   :  { %2099 = vmatprep.subr.bf16.mxu1 %v2282_v49 }
 0x189   :  { %2100 = vmatpush3.bf16.msra.mxu1 %v2282_v49 }
 0x18a   :  { %2101 = vmatprep.subr.bf16.mxu1 %v2283_v50 }
 0x18d   :  { %2102 = vmatpush3.bf16.msra.mxu1 %v2283_v50 }
 0x18e   :  { %2103 = vmatprep.subr.bf16.mxu1 %v2284_v51 }
 0x191   :  { %2104 = vmatpush3.bf16.msra.mxu1 %v2284_v51 }
 0x194   :  { %2106 = vmatmul.mubr.bf16.vlgmr.msra.gmra.mrb[0].mxu1 %v1444_v55 }
 0x245   :  { %v2007_v56 = vpop.f32.mrb[8].mxu0 }
 0x246   :  { %v823_v57 = vpop.f32.mrb[9].mxu0  ;;  %v2109_v0 = vadd.f32 %v2007_v56, %v1627_v63 }
 0x247   :  { %v2008_v59 = vpop.f32.mrb[10].mxu0  ;;  %v2111_v2 = vadd.f32 %v1627_v63, %v823_v57 }
 0x248   :  { %v826_v60 = vpop.f32.mrb[11].mxu0  ;;  %v2113_v4 = vadd.f32 %v2008_v59, %v1627_v63 }
 0x249   :  { %v2115_v7 = vadd.f32 %v1627_v63, %v826_v60 }
 0x267   :  { %v2107_v3 = vpop.f32.mrb[0].mxu1 }
 0x268   :  { %v2110_v5 = vadd.f32 %v2109_v0, %v2107_v3  ;;  %v1544_v6 = vpop.f32.mrb[1].mxu1 }
 0x269   :  { %v2112_v8 = vadd.f32 %v2111_v2, %v1544_v6  ;;  %v2108_v9 = vpop.f32.mrb[2].mxu1 }
 0x26a   :  { %v1565_v11 = vmax.f32 %v2110_v5, 0.0  ;;  %v2114_v12 = vadd.f32 %v2113_v4, %v2108_v9  ;;  %v1547_v42 = vpop.f32.mrb[3].mxu1 }
 0x26b   :  { %v1563_v14 = vmax.f32 %v2112_v8, 0.0  ;;  %v2116_v15 = vadd.f32 %v2115_v7, %v1547_v42 }
 0x26c   :  { %v1569_v44 = vadd.f32 %v1565_v11, %v217_v10  ;;  %v1566_v17 = vmax.f32 %v2114_v12, 0.0 }
 0x26d   :  { %v1567_v19 = vadd.f32 %v1563_v14, %v207_v13  ;;  %v1564_v20 = vmax.f32 %v2116_v15, 0.0 }
 0x26e   :  { %v1570_v21 = vadd.f32 %v1566_v17, %v221_v16 }
 0x26f   :  { %v1568_v22 = vadd.f32 %v1564_v20, %v211_v18 }
 0x270   :  { %v1836_v23 = vpack.c.bf16 %v1570_v21, %v1569_v44 }
 0x271   :  { %v1831_v24 = vpack.c.bf16 %v1568_v22, %v1567_v19 }
 0x272   :  { %1838 = vst [vmem:[%s2647_s5 + $0x8] sm:$0xff] %v1836_v23  }
 0x273   :  { %1832 = vst [vmem:[%s2647_s5] sm:$0xff] %v1831_v24  }

// kernel: poison_generator_forward.13
= control target key start
LH: loop header
LB: loop body
LE: loop exit
PB: predicated region body
PF: predicated region fallthrough
CT: control target
= control target key end

     0   :  { %v801_v3 = vmov 0   ;;  %vm211_vm0 = vcmask 523264   ;;  %vm379_vm1 = vcmask 1041408   ;;  %s1105_s1 = inlined_call_operand.vmem [shape: bf16[64,1024], index: 1, kind: input, shape index: {}]   ;;  %s1106_s0 = inlined_call_operand.vmem [shape: bf16[2,64], index: 0, kind: input, shape index: {}]   ;;  %s1107_s2 = inlined_call_operand.vmem [shape: f32[1,1024], index: 2, kind: input, shape index: {}]   ;;  %s1108_s3 = inlined_call_operand.vmem [shape: f32[1,1024], index: 3, kind: input, shape index: {}]   ;;  %s1109_s4 = inlined_call_operand.vmem [shape: bf16[2,1024], index: 4, kind: output, shape index: {}]  }
   0x1   :  { %v19_v0 = vld [vmem:[%s1105_s1] sm:$0xff]  ;;  %v20_v2 = vld [vmem:[%s1105_s1 + $0x8] sm:$0xff]  ;;  %247 = vmatprep.mubr.bf16.mxu0 %v801_v3  ;;  %288 = vmatprep.mubr.bf16.mxu1 %v801_v3  ;;  %v21_v31 = vld [vmem:[%s1105_s1 + $0x10] sm:$0xff] }
   0x2   :  { %v23_v1 = vld [vmem:[%s1105_s1 + $0x20] sm:$0xff]  ;;  %v24_v5 = vld [vmem:[%s1105_s1 + $0x28] sm:$0xff]  ;;  %v25_v32 = vld [vmem:[%s1105_s1 + $0x30] sm:$0xff] }
   0x3   :  { %v744_v4 = vcombine.high %v19_v0, %v23_v1  ;;  %v743_v6 = vcombine.low %v19_v0, %v23_v1  ;;  %v27_v7 = vld [vmem:[%s1105_s1 + $0x40] sm:$0xff]  ;;  %v746_v9 = vcombine.high %v20_v2, %v24_v5  ;;  %v745_v10 = vcombine.low %v20_v2, %v24_v5  ;;  %v28_v12 = vld [vmem:[%s1105_s1 + $0x48] sm:$0xff]  ;;  %v22_v33 = vld [vmem:[%s1105_s1 + $0x18] sm:$0xff] }
   0x4   :  { %v31_v8 = vld [vmem:[%s1105_s1 + $0x60] sm:$0xff]  ;;  %v32_v13 = vld [vmem:[%s1105_s1 + $0x68] sm:$0xff]  ;;  %v26_v34 = vld [vmem:[%s1105_s1 + $0x38] sm:$0xff]  ;;  %v748_v37 = vcombine.high %v21_v31, %v25_v32  ;;  %v747_v44 = vcombine.low %v21_v31, %v25_v32  ;;  %v566_v2 = vlaneseq }
   0x5   :  { %v752_v11 = vcombine.high %v27_v7, %v31_v8  ;;  %v35_v14 = vld [vmem:[%s1105_s1 + $0x80] sm:$0xff]  ;;  %215 = vmatprep.subr.bf16.mxu0 %v744_v4  ;;  %v754_v15 = vcombine.high %v28_v12, %v32_v13  ;;  %v36_v17 = vld [vmem:[%s1105_s1 + $0x88] sm:$0xff]  ;;  %256 = vmatprep.subr.bf16.mxu1 %v746_v9  ;;  %v751_v19 = vcombine.low %v27_v7, %v31_v8  ;;  %v29_v39 = vld [vmem:[%s1105_s1 + $0x50] sm:$0xff] }
   0x6   :  { %v39_v16 = vld [vmem:[%s1105_s1 + $0xa0] sm:$0xff]  ;;  %v40_v18 = vld [vmem:[%s1105_s1 + $0xa8] sm:$0xff]  ;;  %216 = vmatpush1.bf16.msra.mxu0 %v743_v6  ;;  %257 = vmatpush1.bf16.msra.mxu1 %v745_v10  ;;  %v753_v20 = vcombine.low %v28_v12, %v32_v13  ;;  %v750_v38 = vcombine.high %v22_v33, %v26_v34  ;;  %v33_v40 = vld [vmem:[%s1105_s1 + $0x70] sm:$0xff]  ;;  %v749_v45 = vcombine.low %v22_v33, %v26_v34 }
   0x7   :  { %217 = vmatprep.subr.bf16.mxu0 %v752_v11  ;;  %v760_v21 = vcombine.high %v35_v14, %v39_v16  ;;  %258 = vmatprep.subr.bf16.mxu1 %v754_v15  ;;  %v762_v22 = vcombine.high %v36_v17, %v40_v18  ;;  %v43_v23 = vld [vmem:[%s1105_s1 + $0xc0] sm:$0xff]  ;;  %v44_v25 = vld [vmem:[%s1105_s1 + $0xc8] sm:$0xff]  ;;  %v759_v27 = vcombine.low %v35_v14, %v39_v16  ;;  %v30_v41 = vld [vmem:[%s1105_s1 + $0x58] sm:$0xff] }
   0x8   :  { %v47_v24 = vld [vmem:[%s1105_s1 + $0xe0] sm:$0xff]  ;;  %v48_v26 = vld [vmem:[%s1105_s1 + $0xe8] sm:$0xff]  ;;  %v761_v28 = vcombine.low %v36_v17, %v40_v18  ;;  %v34_v42 = vld [vmem:[%s1105_s1 + $0x78] sm:$0xff]  ;;  %v756_v46 = vcombine.high %v29_v39, %v33_v40  ;;  %v755_v52 = vcombine.low %v29_v39, %v33_v40 }
   0x9   :  { %v768_v29 = vcombine.high %v43_v23, %v47_v24  ;;  %v770_v30 = vcombine.high %v44_v25, %v48_v26  ;;  %v767_v35 = vcombine.low %v43_v23, %v47_v24  ;;  %v769_v36 = vcombine.low %v44_v25, %v48_v26  ;;  %v18_v43 = vld [vmem:[%s1106_s0] sm:$0x1]  ;;  %v37_v48 = vld [vmem:[%s1105_s1 + $0x90] sm:$0xff]  ;;  %v38_v50 = vld [vmem:[%s1105_s1 + $0x98] sm:$0xff] }
   0xa   :  { %218 = vmatpush1.bf16.msra.mxu0 %v751_v19  ;;  %259 = vmatpush1.bf16.msra.mxu1 %v753_v20  ;;  %v758_v47 = vcombine.high %v30_v41, %v34_v42  ;;  %v41_v49 = vld [vmem:[%s1105_s1 + $0xb0] sm:$0xff]  ;;  %v42_v51 = vld [vmem:[%s1105_s1 + $0xb8] sm:$0xff]  ;;  %v757_v53 = vcombine.low %v30_v41, %v34_v42  ;;  %v941_v5 = vld [vmem:[%s1107_s2] sm:$0xff] }
   0xb   :  { %219 = vmatprep.subr.bf16.mxu0 %v760_v21  ;;  %260 = vmatprep.subr.bf16.mxu1 %v762_v22  ;;  %v764_v54 = vcombine.high %v37_v48, %v41_v49  ;;  %v766_v55 = vcombine.high %v38_v50, %v42_v51  ;;  %v45_v56 = vld [vmem:[%s1105_s1 + $0xd0] sm:$0xff]  ;;  %v46_v58 = vld [vmem:[%s1105_s1 + $0xd8] sm:$0xff]  ;;  %v763_v60 = vcombine.low %v37_v48, %v41_v49  ;;  %v948_v8 = vld [vmem:[%s1108_s3] sm:$0xff] }
   0xc   :  { %v49_v57 = vld [vmem:[%s1105_s1 + $0xf0] sm:$0xff]  ;;  %v50_v59 = vld [vmem:[%s1105_s1 + $0xf8] sm:$0xff]  ;;  %v765_v61 = vcombine.low %v38_v50, %v42_v51 }
   0xd   :  { %v772_v62 = vcombine.high %v45_v56, %v49_v57  ;;  %v774_v63 = vcombine.high %v46_v58, %v50_v59  ;;  %v771_v0 = vcombine.low %v45_v56, %v49_v57  ;;  %v773_v1 = vcombine.low %v46_v58, %v50_v59 }
   0xe   :  { %220 = vmatpush1.bf16.msra.mxu0 %v759_v27  ;;  %261 = vmatpush1.bf16.msra.mxu1 %v761_v28 }
   0xf   :  { %221 = vmatprep.subr.bf16.mxu0 %v768_v29  ;;  %262 = vmatprep.subr.bf16.mxu1 %v770_v30 }
  0x12   :  { %222 = vmatpush1.bf16.msra.mxu0 %v767_v35  ;;  %263 = vmatpush1.bf16.msra.mxu1 %v769_v36 }
  0x13   :  { %297 = vmatprep.subr.bf16.mxu0 %v748_v37  ;;  %338 = vmatprep.subr.bf16.mxu1 %v750_v38 }
  0x15   :  { %775 = vmatmul.mubr.msk.bf16.vlgmr.msra.gmra.mrb[0].mxu0 %vm211_vm0, %v18_v43  ;;  %776 = vmatmul.mubr.msk.bf16.vlgmr.msra.gmra.mrb[0].mxu1 %vm211_vm0, %v18_v43 }
  0x16   :  { %298 = vmatpush1.bf16.msra.mxu0 %v747_v44  ;;  %339 = vmatpush1.bf16.msra.mxu1 %v749_v45 }
  0x17   :  { %299 = vmatprep.subr.bf16.mxu0 %v756_v46  ;;  %340 = vmatprep.subr.bf16.mxu1 %v758_v47 }
  0x18   :  { %329 = vmatprep.mubr.bf16.mxu0 %v801_v3  ;;  %370 = vmatprep.mubr.bf16.mxu1 %v801_v3  ;;  %v935_v3 = vshrl.u32 %v566_v2, 7 }
  0x1a   :  { %300 = vmatpush1.bf16.msra.mxu0 %v755_v52  ;;  %341 = vmatpush1.bf16.msra.mxu1 %v757_v53  ;;  %v568_v4 = vsub.s32 0, %v935_v3  ;;  %v576_v6 = vsub.s32 2, %v935_v3  ;;  %v572_v7 = vsub.s32 1, %v935_v3 }
  0x1b   :  { %301 = vmatprep.subr.bf16.mxu0 %v764_v54  ;;  %342 = vmatprep.subr.bf16.mxu1 %v766_v55 }
  0x1c   :  { %v951_v9 = vrot.slane %v941_v5, %v568_v4  ;;  %v956_v11 = vrot.slane %v948_v8, %v568_v4  ;;  %v959_v12 = vrot.slane %v941_v5, %v576_v6  ;;  %v962_v13 = vrot.slane %v948_v8, %v576_v6 }
  0x1d   :  { %v965_v14 = vrot.slane %v941_v5, %v572_v7  ;;  %v976_v19 = vrot.slane %v948_v8, %v572_v7 }
  0x1e   :  { %302 = vmatpush1.bf16.msra.mxu0 %v763_v60  ;;  %343 = vmatpush1.bf16.msra.mxu1 %v765_v61 }
  0x1f   :  { %303 = vmatprep.subr.bf16.mxu0 %v772_v62  ;;  %344 = vmatprep.subr.bf16.mxu1 %v774_v63 }
  0x22   :  { %304 = vmatpush1.bf16.msra.mxu0 %v771_v0  ;;  %345 = vmatpush1.bf16.msra.mxu1 %v773_v1 }
  0x25   :  { %777 = vmatmul.mubr.msk.bf16.vlgmr.msra.gmra.mrb[4].mxu0 %vm211_vm0, %v18_v43  ;;  %778 = vmatmul.mubr.msk.bf16.vlgmr.msra.gmra.mrb[4].mxu1 %vm211_vm0, %v18_v43 }
  0xe8   :  { %v953_v10 = vpop.f32.mrb[0].mxu0  ;;  %v971_v17 = vpop.f32.mrb[0].mxu1 }
  0xe9   :  { %v380_v15 = vsel %vm379_vm1, %v953_v10, 0.0  ;;  %v436_v16 = vmul.f32 %v953_v10, %v953_v10  ;;  %v973_v18 = vpop.f32.mrb[1].mxu0  ;;  %v394_v21 = vsel %vm379_vm1, %v971_v17, 0.0  ;;  %v438_v22 = vmul.f32 %v971_v17, %v971_v17  ;;  %v984_v24 = vpop.f32.mrb[1].mxu1 }
  0xea   :  { %v381_v20 = vrot.slane %v380_v15, 4  ;;  %v387_v23 = vsel %vm379_vm1, %v973_v18, 0.0  ;;  %v253_v25 = vpop.f32.mrb[2].mxu0  ;;  %v395_v27 = vrot.slane %v394_v21, 4  ;;  %v437_v29 = vmul.f32 %v973_v18, %v973_v18  ;;  %v294_v30 = vpop.f32.mrb[2].mxu1 }
  0xeb   :  { %v444_v26 = vsel %vm379_vm1, %v436_v16, 0.0  ;;  %v388_v28 = vrot.slane %v387_v23, 4  ;;  %v254_v31 = vpop.f32.mrb[3].mxu0  ;;  %v458_v34 = vsel %vm379_vm1, %v438_v22, 0.0  ;;  %v401_v35 = vsel %vm379_vm1, %v984_v24, 0.0  ;;  %v295_v36 = vpop.f32.mrb[3].mxu1 }
  0xec   :  { %v382_v32 = vadd.f32 %v381_v20, %v380_v15  ;;  %v445_v33 = vrot.slane %v444_v26, 4  ;;  %v396_v37 = vadd.f32 %v395_v27, %v394_v21  ;;  %v459_v38 = vrot.slane %v458_v34, 4 }
  0xed   :  { %v389_v39 = vadd.f32 %v388_v28, %v387_v23  ;;  %v451_v40 = vsel %vm379_vm1, %v437_v29, 0.0  ;;  %v402_v44 = vrot.slane %v401_v35, 4  ;;  %v439_v48 = vmul.f32 %v984_v24, %v984_v24 }
  0xee   :  { %v383_v41 = vrot.slane %v382_v32, 2  ;;  %v446_v42 = vadd.f32 %v445_v33, %v444_v26  ;;  %v452_v43 = vrot.slane %v451_v40, 4  ;;  %v397_v45 = vrot.slane %v396_v37, 2 }
  0xef   :  { %v460_v46 = vadd.f32 %v459_v38, %v458_v34  ;;  %v390_v47 = vrot.slane %v389_v39, 2  ;;  %v403_v52 = vadd.f32 %v402_v44, %v401_v35  ;;  %v465_v56 = vsel %vm379_vm1, %v439_v48, 0.0 }
  0xf0   :  { %v384_v49 = vadd.f32 %v383_v41, %v382_v32  ;;  %v447_v50 = vrot.slane %v446_v42, 2  ;;  %v453_v51 = vadd.f32 %v452_v43, %v451_v40  ;;  %v398_v53 = vadd.f32 %v397_v45, %v396_v37 }
  0xf1   :  { %v461_v54 = vrot.slane %v460_v46, 2  ;;  %v391_v55 = vadd.f32 %v390_v47, %v389_v39  ;;  %v404_v60 = vrot.slane %v403_v52, 2  ;;  %v466_v0 = vrot.slane %v465_v56, 4 }
  0xf2   :  { %v385_v57 = vrot.slane %v384_v49, 1  ;;  %v448_v58 = vadd.f32 %v447_v50, %v446_v42  ;;  %v454_v59 = vrot.slane %v453_v51, 2  ;;  %v399_v61 = vrot.slane %v398_v53, 1 }
  0xf3   :  { %v462_v62 = vadd.f32 %v461_v54, %v460_v46  ;;  %v392_v63 = vrot.slane %v391_v55, 1  ;;  %v405_v6 = vadd.f32 %v404_v60, %v403_v52  ;;  %v467_v20 = vadd.f32 %v466_v0, %v465_v56 }
  0xf4   :  { %v386_v1 = vadd.f32 %v385_v57, %v384_v49  ;;  %v449_v2 = vrot.slane %v448_v58, 1  ;;  %v455_v4 = vadd.f32 %v454_v59, %v453_v51  ;;  %v400_v7 = vadd.f32 %v399_v61, %v398_v53 }
  0xf5   :  { %v463_v15 = vrot.slane %v462_v62, 1  ;;  %v393_v16 = vadd.f32 %v392_v63, %v391_v55  ;;  %v406_v25 = vrot.slane %v405_v6, 1  ;;  %v468_v29 = vrot.slane %v467_v20, 2 }
  0xf6   :  { %v450_v21 = vadd.f32 %v449_v2, %v448_v58  ;;  %v996_v22 = vmul.f32 0.5, %v386_v1  ;;  %v456_v23 = vrot.slane %v455_v4, 1  ;;  %v998_v27 = vmul.f32 0.5, %v400_v7 }
  0xf7   :  { %v464_v26 = vadd.f32 %v463_v15, %v462_v62  ;;  %v1000_v28 = vmul.f32 0.5, %v393_v16  ;;  %v802_v33 = vmov 1966171168   ;;  %v580_v39 = vsub.s32 3, %v935_v3 }
  0xf8   :  { %v508_v30 = vmul.f32 0.5, %v450_v21  ;;  %v516_v31 = vmul.f32 %v996_v22, %v996_v22  ;;  %v457_v32 = vadd.f32 %v456_v23, %v455_v4  ;;  %v1004_v34 = vunpack.c.l.s4 %v802_v33  ;;  %v1006_v35 = vpop.f32.mrb[4].mxu0  ;;  %v1013_v40 = vpop.f32.mrb[4].mxu1 }
  0xf9   :  { %v510_v36 = vmul.f32 0.5, %v464_v26  ;;  %v518_v37 = vmul.f32 %v998_v27, %v998_v27  ;;  %v517_v38 = vmul.f32 %v1000_v28, %v1000_v28  ;;  %v1015_v41 = vpop.f32.mrb[5].mxu0  ;;  %v532_v43 = vsub.f32 %v953_v10, %v996_v22  ;;  %v1019_v46 = vpop.f32.mrb[5].mxu1 }
  0xfa   :  { %v524_v42 = vsub.f32 %v508_v30, %v516_v31  ;;  %v509_v44 = vmul.f32 0.5, %v457_v32  ;;  %v407_v45 = vadd.f32 %v406_v25, %v405_v6  ;;  %v335_v47 = vpop.f32.mrb[6].mxu0  ;;  %v469_v49 = vadd.f32 %v468_v29, %v467_v20  ;;  %v376_v52 = vpop.f32.mrb[6].mxu1 }
  0xfb   :  { %v526_v48 = vsub.f32 %v510_v36, %v518_v37  ;;  %v408_v50 = vsel %vm379_vm1, %v1006_v35, 0.0  ;;  %v440_v51 = vmul.f32 %v1006_v35, %v1006_v35  ;;  %v336_v53 = vpop.f32.mrb[7].mxu0  ;;  %v377_v58 = vpop.f32.mrb[7].mxu1  ;;  %v422_v62 = vsel %vm379_vm1, %v1013_v40, 0.0 }
  0xfc   :  { %v540_v54 = vadd.f32 1e-05, %v524_v42  ;;  %v525_v55 = vsub.f32 %v509_v44, %v517_v38  ;;  %v1025_v56 = vmul.f32 0.5, %v407_v45  ;;  %v409_v57 = vrot.slane %v408_v50, 4 }
  0xfd   :  { %v542_v59 = vadd.f32 1e-05, %v526_v48  ;;  %v470_v60 = vrot.slane %v469_v49, 1  ;;  %v472_v61 = vsel %vm379_vm1, %v440_v51, 0.0  ;;  %v534_v63 = vsub.f32 %v971_v17, %v998_v27 }
  0xfe   :  { %785 = vrsqrt.f32 %v540_v54  ;;  %v541_v0 = vadd.f32 1e-05, %v525_v55  ;;  %v519_v1 = vmul.f32 %v1025_v56, %v1025_v56  ;;  %v410_v4 = vadd.f32 %v409_v57, %v408_v50 }
  0xff   :  { %787 = vrsqrt.f32 %v542_v59  ;;  %v471_v2 = vadd.f32 %v470_v60, %v469_v49  ;;  %v473_v6 = vrot.slane %v472_v61, 4  ;;  %v423_v7 = vrot.slane %v422_v62, 4 }
 0x100   :  { %789 = vrsqrt.f32 %v541_v0  ;;  %v442_v15 = vmul.f32 %v1013_v40, %v1013_v40  ;;  %v415_v16 = vsel %vm379_vm1, %v1015_v41, 0.0  ;;  %v411_v21 = vrot.slane %v410_v4, 2 }
 0x101   :  { %v511_v20 = vmul.f32 0.5, %v471_v2  ;;  %v474_v23 = vadd.f32 %v473_v6, %v472_v61  ;;  %v416_v17 = vrot.slane %v415_v16, 4  ;;  %v424_v25 = vadd.f32 %v423_v7, %v422_v62 }
 0x102   :  { %v486_v26 = vsel %vm379_vm1, %v442_v15, 0.0  ;;  %v441_v27 = vmul.f32 %v1015_v41, %v1015_v41  ;;  %v429_v29 = vsel %vm379_vm1, %v1019_v46, 0.0  ;;  %v412_v31 = vadd.f32 %v411_v21, %v410_v4 }
 0x103   :  { %v527_v30 = vsub.f32 %v511_v20, %v519_v1  ;;  %v475_v32 = vrot.slane %v474_v23, 2  ;;  %v487_v33 = vrot.slane %v486_v26, 4  ;;  %v425_v36 = vrot.slane %v424_v25, 2 }
 0x104   :  { %v417_v37 = vadd.f32 %v416_v17, %v415_v16  ;;  %v479_v38 = vsel %vm379_vm1, %v441_v27, 0.0  ;;  %v430_v42 = vrot.slane %v429_v29, 4  ;;  %v413_v45 = vrot.slane %v412_v31, 1 }
 0x105   :  { %v543_v44 = vadd.f32 1e-05, %v527_v30  ;;  %v476_v47 = vadd.f32 %v475_v32, %v474_v23  ;;  %v488_v48 = vadd.f32 %v487_v33, %v486_v26  ;;  %v533_v49 = vsub.f32 %v973_v18, %v1000_v28 }
 0x106   :  { %v426_v50 = vadd.f32 %v425_v36, %v424_v25  ;;  %v418_v51 = vrot.slane %v417_v37, 2  ;;  %v480_v52 = vrot.slane %v479_v38, 4  ;;  %v414_v53 = vadd.f32 %v413_v45, %v412_v31 }
 0x107   :  { %791 = vrsqrt.f32 %v543_v44  ;;  %v477_v54 = vrot.slane %v476_v47, 1  ;;  %v489_v55 = vrot.slane %v488_v48, 2  ;;  %v431_v61 = vadd.f32 %v430_v42, %v429_v29 }
 0x108   :  { %v786_v57 = vpop.eup %785  ;;  %v427_v58 = vrot.slane %v426_v50, 1  ;;  %v419_v59 = vadd.f32 %v418_v51, %v417_v37  ;;  %v481_v60 = vadd.f32 %v480_v52, %v479_v38  ;;  %v1049_v2 = vmul.f32 0.5, %v414_v53 }
 0x109   :  { %v788_v62 = vpop.eup %787  ;;  %v556_v0 = vmul.f32 %v786_v57, %v532_v43  ;;  %v478_v1 = vadd.f32 %v477_v54, %v476_v47  ;;  %v490_v18 = vadd.f32 %v489_v55, %v488_v48  ;;  %v694_v17 = vunpack.c.0.s8 %v1004_v34 }
 0x10a   :  { %v790_v28 = vpop.eup %789  ;;  %v558_v4 = vmul.f32 %v788_v62, %v534_v63  ;;  %v428_v6 = vadd.f32 %v427_v58, %v426_v50  ;;  %v420_v7 = vrot.slane %v419_v59, 1  ;;  %v482_v15 = vrot.slane %v481_v60, 2 }
 0x10b   :  { %v606_v16 = vmul.f32 %v951_v9, %v556_v0  ;;  %v557_v20 = vmul.f32 %v790_v28, %v533_v49  ;;  %v512_v21 = vmul.f32 0.5, %v478_v1  ;;  %v520_v23 = vmul.f32 %v1049_v2, %v1049_v2 }
 0x10c   :  { %v491_v10 = vrot.slane %v490_v18, 1  ;;  %v1055_v22 = vmul.f32 0.5, %v428_v6  ;;  %v432_v43 = vrot.slane %v431_v61, 2  ;;  %v421_v27 = vadd.f32 %v420_v7, %v419_v59 }
 0x10d   :  { %v656_v25 = vadd.f32 %v956_v11, %v606_v16  ;;  %v607_v63 = vmul.f32 %v965_v14, %v557_v20  ;;  %v528_v26 = vsub.f32 %v512_v21, %v520_v23  ;;  %v608_v29 = vmul.f32 %v959_v12, %v558_v4 }
 0x10e   :  { %v535_v9 = vsub.f32 %v984_v24, %v1025_v56  ;;  %v581_v30 = vrot.slane %v941_v5, %v580_v39  ;;  %v492_v34 = vadd.f32 %v491_v10, %v490_v18  ;;  %v483_v36 = vadd.f32 %v482_v15, %v481_v60 }
 0x10f   :  { %v664_v31 = vmax.f32 %v656_v25, 0.0  ;;  %v657_v32 = vadd.f32 %v976_v19, %v607_v63  ;;  %v544_v33 = vadd.f32 1e-05, %v528_v26  ;;  %v522_v14 = vmul.f32 %v1055_v22, %v1055_v22 }
 0x110   :  { %v514_v11 = vmul.f32 0.5, %v492_v34  ;;  %v505_v37 = vmul.f32 0.5, %v421_v27  ;;  %v433_v38 = vadd.f32 %v432_v43, %v431_v61  ;;  %v484_v24 = vrot.slane %v483_v36, 1 }
 0x111   :  { %v792_v12 = vpop.eup %791  ;;  %v665_v42 = vmax.f32 %v657_v32, 0.0  ;;  %793 = vrsqrt.f32 %v544_v33  ;;  %v443_v56 = vmul.f32 %v1019_v46, %v1019_v46  ;;  %v658_v44 = vadd.f32 %v962_v13, %v608_v29 }
 0x112   :  { %v559_v45 = vmul.f32 %v792_v12, %v535_v9  ;;  %v631_v19 = vrot.slane %v948_v8, %v580_v39  ;;  %v521_v47 = vmul.f32 %v505_v37, %v505_v37  ;;  %v485_v49 = vadd.f32 %v484_v24, %v483_v36 }
 0x113   :  { %v779_v48 = vpack.c.bf16 %v665_v42, %v664_v31  ;;  %v434_v50 = vrot.slane %v433_v38, 1  ;;  %v493_v51 = vsel %vm379_vm1, %v443_v56, 0.0  ;;  %v530_v53 = vsub.f32 %v514_v11, %v522_v14 }
 0x114   :  { %v609_v52 = vmul.f32 %v581_v30, %v559_v45  ;;  %v494_v54 = vrot.slane %v493_v51, 4  ;;  %v1076_v55 = vsub.s32 %v694_v17, %v935_v3  ;;  %v513_v57 = vmul.f32 0.5, %v485_v49 }
 0x115   :  { %v666_v58 = vmax.f32 %v658_v44, 0.0  ;;  %v435_v59 = vadd.f32 %v434_v50, %v433_v38  ;;  %v546_v39 = vadd.f32 1e-05, %v530_v53  ;;  %v584_v1 = vsub.s32 4, %v935_v3 }
 0x116   :  { %v659_v13 = vadd.f32 %v631_v19, %v609_v52  ;;  %v495_v60 = vadd.f32 %v494_v54, %v493_v51  ;;  %v529_v61 = vsub.f32 %v513_v57, %v521_v47  ;;  %v698_v28 = vrot.slane %v779_v48, %v1076_v55 }
 0x117   :  { %v507_v7 = vmul.f32 0.5, %v435_v59  ;;  %v536_v20 = vsub.f32 %v1006_v35, %v1049_v2  ;;  %v585_v23 = vrot.slane %v941_v5, %v584_v1  ;;  %v588_v63 = vsub.s32 5, %v935_v3 }
 0x118   :  { %v667_v62 = vmax.f32 %v659_v13, 0.0  ;;  %v496_v0 = vrot.slane %v495_v60, 2  ;;  %v545_v18 = vadd.f32 1e-05, %v529_v61  ;;  %v635_v29 = vrot.slane %v948_v8, %v584_v1 }
 0x119   :  { %v523_v25 = vmul.f32 %v507_v7, %v507_v7  ;;  %v537_v30 = vsub.f32 %v1015_v41, %v505_v37  ;;  %v589_v34 = vrot.slane %v941_v5, %v588_v63  ;;  %v592_v31 = vsub.s32 6, %v935_v3 }
 0x11a   :  { %v780_v4 = vpack.c.bf16 %v667_v62, %v666_v58  ;;  %v497_v6 = vadd.f32 %v496_v0, %v495_v60  ;;  %795 = vrsqrt.f32 %v545_v18  ;;  %v639_v11 = vrot.slane %v948_v8, %v588_v63 }
 0x11b   :  { %v794_v15 = vpop.eup %793  ;;  %797 = vrsqrt.f32 %v546_v39  ;;  %v538_v14 = vsub.f32 %v1013_v40, %v1055_v22  ;;  %v593_v42 = vrot.slane %v941_v5, %v592_v31  ;;  %v596_v24 = vsub.s32 7, %v935_v3 }
 0x11c   :  { %v705_v16 = vrot.slane %v780_v4, %v1076_v55  ;;  %v498_v21 = vrot.slane %v497_v6, 1  ;;  %v560_v10 = vmul.f32 %v794_v15, %v536_v20  ;;  %v643_v45 = vrot.slane %v948_v8, %v592_v31 }
 0x11d   :  { %v539_v47 = vsub.f32 %v1019_v46, %v507_v7  ;;  %v597_v48 = vrot.slane %v941_v5, %v596_v24  ;;  %v647_v22 = vrot.slane %v948_v8, %v596_v24 }
 0x11e   :  { %v720_v17 = vcombine.low %v698_v28, %v705_v16  ;;  %v499_v43 = vadd.f32 %v498_v21, %v497_v6  ;;  %v610_v27 = vmul.f32 %v585_v23, %v560_v10 }
 0x120   :  { %v515_v26 = vmul.f32 0.5, %v499_v43  ;;  %v660_v33 = vadd.f32 %v635_v29, %v610_v27  ;;  %v728_v59 = vrot.slane %v720_v17, %v1076_v55 }
 0x122   :  { %v531_v9 = vsub.f32 %v515_v26, %v523_v25  ;;  %v668_v41 = vmax.f32 %v660_v33, 0.0 }
 0x124   :  { %v547_v35 = vadd.f32 1e-05, %v531_v9  ;;  %v796_v2 = vpop.eup %795 }
 0x125   :  { %v798_v32 = vpop.eup %797  ;;  %v561_v36 = vmul.f32 %v796_v2, %v537_v30 }
 0x126   :  { %799 = vrsqrt.f32 %v547_v35  ;;  %v562_v12 = vmul.f32 %v798_v32, %v538_v14 }
 0x127   :  { %v611_v38 = vmul.f32 %v589_v34, %v561_v36 }
 0x128   :  { %v612_v44 = vmul.f32 %v593_v42, %v562_v12 }
 0x129   :  { %v661_v37 = vadd.f32 %v639_v11, %v611_v38 }
 0x12a   :  { %v662_v50 = vadd.f32 %v643_v45, %v612_v44 }
 0x12b   :  { %v669_v56 = vmax.f32 %v661_v37, 0.0 }
 0x12c   :  { %v670_v52 = vmax.f32 %v662_v50, 0.0 }
 0x12d   :  { %v781_v19 = vpack.c.bf16 %v669_v56, %v668_v41 }
 0x12f   :  { %v712_v3 = vrot.slane %v781_v19, %v1076_v55 }
 0x130   :  { %v800_v49 = vpop.eup %799 }
 0x131   :  { %v563_v40 = vmul.f32 %v800_v49, %v539_v47 }
 0x133   :  { %v613_v51 = vmul.f32 %v597_v48, %v563_v40 }
 0x135   :  { %v663_v53 = vadd.f32 %v647_v22, %v613_v51 }
 0x137   :  { %v671_v54 = vmax.f32 %v663_v53, 0.0 }
 0x139   :  { %v782_v57 = vpack.c.bf16 %v671_v54, %v670_v52 }
 0x13b   :  { %v719_v58 = vrot.slane %v782_v57, %v1076_v55 }
 0x13d   :  { %v721_v13 = vcombine.low %v712_v3, %v719_v58 }
 0x13f   :  { %v735_v46 = vrot.slane %v721_v13, %v1076_v55 }
 0x141   :  { %v736_v5 = vcombine.low %v728_v59, %v735_v46 }
 0x143   :  { %738 = vst [vmem:[%s1109_s4] sm:$0xff] %v736_v5 }

// kernel: poison_generator_forward.12
= control target key start
LH: loop header
LB: loop body
LE: loop exit
PB: predicated region body
PF: predicated region fallthrough
CT: control target
= control target key end

     0   :  { %v2298_v1 = vmov 0.0   ;;  %vm261_vm0 = vcmask 261120   ;;  %v2299_v40 = vmov 0   ;;  %vm2300_vm1 = vmmov 0   ;;  %s2772_s1 = inlined_call_operand.vmem [shape: bf16[288,256], index: 1, kind: input, shape index: {}]   ;;  %s2773_s0 = inlined_call_operand.vmem [shape: bf16[8,288], index: 0, kind: input, shape index: {}]   ;;  %s2774_s3 = inlined_call_operand.vmem [shape: bf16[9,128,128], index: 3, kind: input, shape index: {}]   ;;  %s2775_s2 = inlined_call_operand.vmem [shape: f32[1,256], index: 2, kind: input, shape index: {}]   ;;  %s2776_s4 = inlined_call_operand.vmem [shape: f32[1,128], index: 4, kind: input, shape index: {}]   ;;  %s2777_s5 = inlined_call_operand.vmem [shape: bf16[8,128], index: 5, kind: output, shape index: {}]  }
   0x1   :  { %v2133_v0 = vld [vmem:[%s2772_s1 + $0x4] ss:$8 sps:$4 sm:$0xff]   ;;  %348 = vst [vmem:[#allocation2] sm:$0xf] %v2298_v1  ;;  %349 = vst [vmem:[#allocation2 + $0x4] sm:$0xf] %v2298_v1  ;;  %1979 = vmatprep.subr.bf16.mxu1 %v2298_v1  ;;  %1995 = vmatprep.mubr.msk.bf16.mxu1 %vm2300_vm1, %v2298_v1  ;;  %v61_v58 = vlaneseq }
   0x2   :  { %350 = vst [vmem:[#allocation2 + $0x8] sm:$0xf] %v2298_v1  ;;  %351 = vst [vmem:[#allocation2 + $0xc] sm:$0xf] %v2298_v1  ;;  %v2135_v2 = vld [vmem:[%s2772_s1] ss:$8 sps:$4 sm:$0xff]   ;;  %265 = vmatprep.subr.bf16.mxu0 %v2133_v0 }
   0x3   :  { %352 = vst [vmem:[#allocation2 + $0x10] sm:$0xf] %v2298_v1  ;;  %353 = vst [vmem:[#allocation2 + $0x14] sm:$0xf] %v2298_v1  ;;  %v2136_v3 = vld [vmem:[%s2772_s1 + $0x14] ss:$8 sps:$4 sm:$0xff]   ;;  %266 = vmatpush1.bf16.msra.mxu0 %v2135_v2 }
   0x4   :  { %354 = vst [vmem:[#allocation2 + $0x18] sm:$0xf] %v2298_v1  ;;  %355 = vst [vmem:[#allocation2 + $0x1c] sm:$0xf] %v2298_v1  ;;  %v2138_v4 = vld [vmem:[%s2772_s1 + $0x10] ss:$8 sps:$4 sm:$0xff]   ;;  %267 = vmatprep.subr.bf16.mxu0 %v2136_v3 }
   0x5   :  { %v2139_v5 = vld [vmem:[%s2772_s1 + $0x24] ss:$8 sps:$4 sm:$0xff]   ;;  %v2141_v6 = vld [vmem:[%s2772_s1 + $0x20] ss:$8 sps:$4 sm:$0xff]   ;;  %v2142_v7 = vld [vmem:[%s2772_s1 + $0x34] ss:$8 sps:$4 sm:$0xff]  }
   0x6   :  { %v2144_v8 = vld [vmem:[%s2772_s1 + $0x30] ss:$8 sps:$4 sm:$0xff]   ;;  %v2145_v9 = vld [vmem:[%s2772_s1 + $0x44] ss:$8 sps:$4 sm:$0xff]   ;;  %v2147_v10 = vld [vmem:[%s2772_s1 + $0x40] ss:$8 sps:$4 sm:$0xff]  }
   0x7   :  { %268 = vmatpush1.bf16.msra.mxu0 %v2138_v4  ;;  %v2148_v11 = vld [vmem:[%s2772_s1 + $0x54] ss:$8 sps:$4 sm:$0xff]   ;;  %v2150_v12 = vld [vmem:[%s2772_s1 + $0x50] ss:$8 sps:$4 sm:$0xff]   ;;  %v2151_v13 = vld [vmem:[%s2772_s1 + $0x64] ss:$8 sps:$4 sm:$0xff]  }
   0x8   :  { %269 = vmatprep.subr.bf16.mxu0 %v2139_v5  ;;  %v21_v14 = vld [vmem:[%s2773_s0] sm:$0xff]  ;;  %v2154_v17 = vld [vmem:[%s2772_s1 + $0x74] ss:$8 sps:$4 sm:$0xff]   ;;  %v2156_v18 = vld [vmem:[%s2772_s1 + $0x70] ss:$8 sps:$4 sm:$0xff]   ;;  %v62_v59 = vshrl.u32 %v61_v58, 7 }
   0x9   :  { %v1596_v15 = vcombine.high %v21_v14, %v21_v14  ;;  %v2153_v16 = vld [vmem:[%s2772_s1 + $0x60] ss:$8 sps:$4 sm:$0xff]   ;;  %v2157_v19 = vld [vmem:[%s2772_s1 + $0x84] ss:$8 sps:$4 sm:$0xff]   ;;  %v2160_v21 = vld [vmem:[%s2772_s1 + $0x94] ss:$8 sps:$4 sm:$0xff]   ;;  %v1595_v37 = vcombine.low %v21_v14, %v21_v14 }
   0xa   :  { %v2159_v20 = vld [vmem:[%s2772_s1 + $0x80] ss:$8 sps:$4 sm:$0xff]   ;;  %v2162_v22 = vld [vmem:[%s2772_s1 + $0x90] ss:$8 sps:$4 sm:$0xff]   ;;  %v2163_v23 = vld [vmem:[%s2772_s1 + $0xa4] ss:$8 sps:$4 sm:$0xff]  }
   0xb   :  { %270 = vmatpush1.bf16.msra.mxu0 %v2141_v6  ;;  %297 = vmatprep.mubr.bf16.mxu0 %v1596_v15  ;;  %v2165_v24 = vld [vmem:[%s2772_s1 + $0xa0] ss:$8 sps:$4 sm:$0xff]   ;;  %v2166_v25 = vld [vmem:[%s2772_s1 + $0xb4] ss:$8 sps:$4 sm:$0xff]   ;;  %v2168_v26 = vld [vmem:[%s2772_s1 + $0xb0] ss:$8 sps:$4 sm:$0xff]  }
   0xc   :  { %271 = vmatprep.subr.bf16.mxu0 %v2142_v7  ;;  %v2169_v27 = vld [vmem:[%s2772_s1 + $0xc4] ss:$8 sps:$4 sm:$0xff]   ;;  %v2171_v28 = vld [vmem:[%s2772_s1 + $0xc0] ss:$8 sps:$4 sm:$0xff]   ;;  %v2172_v29 = vld [vmem:[%s2772_s1 + $0xd4] ss:$8 sps:$4 sm:$0xff]  }
   0xd   :  { %v2174_v30 = vld [vmem:[%s2772_s1 + $0xd0] ss:$8 sps:$4 sm:$0xff]   ;;  %v2175_v31 = vld [vmem:[%s2772_s1 + $0xe4] ss:$8 sps:$4 sm:$0xff]   ;;  %v2177_v32 = vld [vmem:[%s2772_s1 + $0xe0] ss:$8 sps:$4 sm:$0xff]  }
   0xe   :  { %v2178_v33 = vld [vmem:[%s2772_s1 + $0xf4] ss:$8 sps:$4 sm:$0xff]   ;;  %v2180_v34 = vld [vmem:[%s2772_s1 + $0xf0] ss:$8 sps:$4 sm:$0xff]   ;;  %v2186_v35 = vld [vmem:[%s2772_s1 + $0x104] ss:$8 sps:$4 sm:$0xff]  }
   0xf   :  { %272 = vmatpush1.bf16.msra.mxu0 %v2144_v8  ;;  %v2184_v36 = vld [vmem:[%s2772_s1 + $0x100] ss:$8 sps:$4 sm:$0xff]   ;;  %v2189_v38 = vld [vmem:[%s2772_s1 + $0x114] ss:$8 sps:$4 sm:$0xff]   ;;  %v2187_v39 = vld [vmem:[%s2772_s1 + $0x110] ss:$8 sps:$4 sm:$0xff]  }
  0x10   :  { %273 = vmatprep.subr.bf16.mxu0 %v2145_v9  ;;  %v2183_v41 = vld [vmem:[%s2773_s0 + $0x8] ss:$0 sps:$4 sm:$0xff]   ;;  %v2190_v42 = vld [vmem:[%s2774_s3] sm:$0xff]   ;;  %v2193_v45 = vld [vmem:[%s2774_s3 + $0x10] sm:$0xff]   ;;  %v63_v60 = vsub.s32 0, %v62_v59  ;;  %v67_v63 = vsub.s32 1, %v62_v59 }
  0x11   :  { %v2191_v43 = vld [vmem:[%s2774_s3 + $0x8] sm:$0xff]   ;;  %v2192_v44 = vld [vmem:[%s2774_s3 + $0xc0] sm:$0xff]   ;;  %v2195_v47 = vld [vmem:[%s2774_s3 + $0x18] sm:$0xff]   ;;  %v2301_v0 = vmov 1983009808  }
  0x12   :  { %1980 = vmatpush3.bf16.msra.mxu1 %v2192_v44  ;;  %v2194_v46 = vld [vmem:[%s2774_s3 + $0xc8] sm:$0xff]   ;;  %v2196_v48 = vld [vmem:[%s2774_s3 + $0xd0] sm:$0xff]   ;;  %v2197_v49 = vld [vmem:[%s2774_s3 + $0x20] sm:$0xff]   ;;  %v359_v2 = vunpack.c.l.s4 %v2301_v0 }
  0x13   :  { %274 = vmatpush1.bf16.msra.mxu0 %v2147_v10  ;;  %1981 = vmatprep.subr.bf16.mxu1 %v2298_v1  ;;  %v2198_v50 = vld [vmem:[%s2774_s3 + $0xd8] sm:$0xff]   ;;  %v2199_v51 = vld [vmem:[%s2774_s3 + $0x28] sm:$0xff]   ;;  %v2200_v52 = vld [vmem:[%s2774_s3 + $0xe0] sm:$0xff]  }
  0x14   :  { %275 = vmatprep.subr.bf16.mxu0 %v2148_v11  ;;  %v2201_v53 = vld [vmem:[%s2774_s3 + $0x30] sm:$0xff]   ;;  %v2202_v54 = vld [vmem:[%s2774_s3 + $0xe8] sm:$0xff]   ;;  %v2203_v55 = vld [vmem:[%s2774_s3 + $0x38] sm:$0xff]   ;;  %v360_v8 = vunpack.c.0.s8 %v359_v2 }
  0x15   :  { %v2204_v56 = vld [vmem:[%s2774_s3 + $0xf0] sm:$0xff]   ;;  %v2208_v57 = vld [vmem:[%s2774_s3 + $0xf8] sm:$0xff]   ;;  %v59_v61 = vld [vmem:[%s2775_s2] sm:$0x3] }
  0x16   :  { %1982 = vmatpush3.bf16.msra.mxu1 %v2194_v46  ;;  %v64_v5 = vrot.slane %v59_v61, %v63_v60  ;;  %v68_v7 = vrot.slane %v59_v61, %v67_v63  ;;  %v2222_v46 = vld [vmem:[%s2774_s3 + $0x128] sm:$0xff]   ;;  %v2235_v61 = vld [vmem:[%s2774_s3 + $0x98] sm:$0xff]   ;;  %v2237_v63 = vld [vmem:[%s2774_s3 + $0xa0] sm:$0xff]  }
  0x17   :  { %276 = vmatpush1.bf16.msra.mxu0 %v2150_v12  ;;  %1983 = vmatprep.subr.bf16.mxu1 %v2298_v1  ;;  %v363_v12 = vsub.s32 %v360_v8, %v62_v59  ;;  %v2233_v59 = vld [vmem:[%s2774_s3 + $0x90] sm:$0xff]   ;;  %v2234_v60 = vld [vmem:[%s2774_s3 + $0x148] sm:$0xff]   ;;  %v2238_v0 = vld [vmem:[%s2774_s3 + $0x158] sm:$0xff]  }
  0x18   :  { %277 = vmatprep.subr.bf16.mxu0 %v2151_v13  ;;  %v2239_v2 = vld [vmem:[%s2774_s3 + $0xa8] sm:$0xff]  }
  0x1a   :  { %1984 = vmatpush3.bf16.msra.mxu1 %v2196_v48 }
  0x1b   :  { %278 = vmatpush1.bf16.msra.mxu0 %v2153_v16  ;;  %1985 = vmatprep.subr.bf16.mxu1 %v2298_v1 }
  0x1c   :  { %279 = vmatprep.subr.bf16.mxu0 %v2154_v17 }
  0x1e   :  { %1986 = vmatpush3.bf16.msra.mxu1 %v2198_v50  ;;  %v2224_v50 = vld [vmem:[%s2774_s3 + $0x130] sm:$0xff]  }
  0x1f   :  { %280 = vmatpush1.bf16.msra.mxu0 %v2156_v18  ;;  %1987 = vmatprep.subr.bf16.mxu1 %v2298_v1 }
  0x20   :  { %281 = vmatprep.subr.bf16.mxu0 %v2157_v19 }
  0x22   :  { %1988 = vmatpush3.bf16.msra.mxu1 %v2200_v52  ;;  %v2227_v52 = vld [vmem:[%s2774_s3 + $0x80] sm:$0xff]  }
  0x23   :  { %282 = vmatpush1.bf16.msra.mxu0 %v2159_v20  ;;  %1989 = vmatprep.subr.bf16.mxu1 %v2298_v1 }
  0x24   :  { %283 = vmatprep.subr.bf16.mxu0 %v2160_v21 }
  0x26   :  { %1990 = vmatpush3.bf16.msra.mxu1 %v2202_v54 }
  0x27   :  { %284 = vmatpush1.bf16.msra.mxu0 %v2162_v22  ;;  %1991 = vmatprep.subr.bf16.mxu1 %v2298_v1 }
  0x28   :  { %285 = vmatprep.subr.bf16.mxu0 %v2163_v23 }
  0x2a   :  { %1992 = vmatpush3.bf16.msra.mxu1 %v2204_v56  ;;  %v2231_v56 = vld [vmem:[%s2774_s3 + $0x88] sm:$0xff]  }
  0x2b   :  { %286 = vmatpush1.bf16.msra.mxu0 %v2165_v24  ;;  %1993 = vmatprep.subr.bf16.mxu1 %v2298_v1 }
  0x2c   :  { %287 = vmatprep.subr.bf16.mxu0 %v2166_v25 }
  0x2e   :  { %1994 = vmatpush3.bf16.msra.mxu1 %v2208_v57  ;;  %v2232_v57 = vld [vmem:[%s2774_s3 + $0x140] sm:$0xff]  }
  0x2f   :  { %288 = vmatpush1.bf16.msra.mxu0 %v2168_v26  ;;  %1999 = vmatprep.subr.bf16.mxu1 %v2298_v1 }
  0x30   :  { %289 = vmatprep.subr.bf16.mxu0 %v2169_v27 }
  0x33   :  { %290 = vmatpush1.bf16.msra.mxu0 %v2171_v28 }
  0x34   :  { %291 = vmatprep.subr.bf16.mxu0 %v2172_v29  ;;  %v2207_v29 = vld [vmem:[%s2774_s3 + $0x40] sm:$0xff]  }
  0x37   :  { %292 = vmatpush1.bf16.msra.mxu0 %v2174_v30 }
  0x38   :  { %293 = vmatprep.subr.bf16.mxu0 %v2175_v31 }
  0x3b   :  { %294 = vmatpush1.bf16.msra.mxu0 %v2177_v32  ;;  %v2209_v32 = vld [vmem:[%s2774_s3 + $0x48] sm:$0xff]  }
  0x3c   :  { %295 = vmatprep.subr.bf16.mxu0 %v2178_v33  ;;  %v2212_v33 = vld [vmem:[%s2774_s3 + $0x100] sm:$0xff]  }
  0x3f   :  { %296 = vmatpush1.bf16.msra.mxu0 %v2180_v34 }
  0x40   :  { %306 = vmatprep.subr.bf16.mxu0 %v2186_v35  ;;  %v2213_v35 = vld [vmem:[%s2774_s3 + $0x50] sm:$0xff]  }
  0x42   :  { %298 = vmatmul.mubr.bf16.vlgmr.msra.gmra.mrb[0].mxu0 %v1595_v37  ;;  %v2215_v37 = vld [vmem:[%s2774_s3 + $0x58] sm:$0xff]  }
  0x43   :  { %307 = vmatpush1.bf16.msra.mxu0 %v2184_v36  ;;  %338 = vmatprep.mubr.bf16.mxu0 %v2299_v40  ;;  %v2214_v36 = vld [vmem:[%s2774_s3 + $0x108] sm:$0xff]   ;;  %v2218_v40 = vld [vmem:[%s2774_s3 + $0x118] sm:$0xff]  }
  0x44   :  { %308 = vmatprep.subr.bf16.mxu0 %v2189_v38  ;;  %v2216_v38 = vld [vmem:[%s2774_s3 + $0x110] sm:$0xff]  }
  0x47   :  { %309 = vmatpush1.bf16.msra.mxu0 %v2187_v39  ;;  %v2217_v39 = vld [vmem:[%s2774_s3 + $0x60] sm:$0xff]  }
  0x48   :  { %1919 = vmatprep.subr.bf16.mxu0 %v2298_v1 }
  0x4a   :  { %1634 = vmatmul.mubr.msk.bf16.vlgmr.msra.gmra.mrb[4].mxu0 %vm261_vm0, %v2183_v41  ;;  %v2219_v41 = vld [vmem:[%s2774_s3 + $0x68] sm:$0xff]  }
  0x4b   :  { %1920 = vmatpush3.bf16.msra.mxu0 %v2190_v42  ;;  %1935 = vmatprep.mubr.msk.bf16.mxu0 %vm2300_vm1, %v2298_v1  ;;  %v2220_v42 = vld [vmem:[%s2774_s3 + $0x120] sm:$0xff]  }
  0x4c   :  { %1921 = vmatprep.subr.bf16.mxu0 %v2298_v1 }
  0x4f   :  { %1922 = vmatpush3.bf16.msra.mxu0 %v2191_v43 }
  0x50   :  { %1923 = vmatprep.subr.bf16.mxu0 %v2298_v1 }
  0x53   :  { %1924 = vmatpush3.bf16.msra.mxu0 %v2193_v45  ;;  %v2221_v45 = vld [vmem:[%s2774_s3 + $0x70] sm:$0xff]  }
  0x54   :  { %1925 = vmatprep.subr.bf16.mxu0 %v2298_v1 }
  0x57   :  { %1926 = vmatpush3.bf16.msra.mxu0 %v2195_v47 }
  0x58   :  { %1927 = vmatprep.subr.bf16.mxu0 %v2298_v1 }
  0x5b   :  { %1928 = vmatpush3.bf16.msra.mxu0 %v2197_v49  ;;  %v2223_v49 = vld [vmem:[%s2774_s3 + $0x78] sm:$0xff]  }
  0x5c   :  { %1929 = vmatprep.subr.bf16.mxu0 %v2298_v1 }
  0x5f   :  { %1930 = vmatpush3.bf16.msra.mxu0 %v2199_v51 }
  0x60   :  { %1931 = vmatprep.subr.bf16.mxu0 %v2298_v1 }
  0x63   :  { %1932 = vmatpush3.bf16.msra.mxu0 %v2201_v53  ;;  %v2228_v53 = vld [vmem:[%s2774_s3 + $0x138] sm:$0xff]  }
  0x64   :  { %1933 = vmatprep.subr.bf16.mxu0 %v2298_v1 }
  0x67   :  { %1934 = vmatpush3.bf16.msra.mxu0 %v2203_v55 }
  0x68   :  { %1939 = vmatprep.subr.bf16.mxu0 %v2298_v1 }
 0x115   :  { %v299_v62 = vpop.f32.mrb[0].mxu0 }
 0x116   :  { %v301_v3 = vpop.f32.mrb[1].mxu0  ;;  %v300_v9 = vadd.f32 %v299_v62, %v64_v5  ;;  %v2236_v62 = vld [vmem:[%s2774_s3 + $0x150] sm:$0xff]  }
 0x117   :  { %v303_v4 = vpop.f32.mrb[2].mxu0  ;;  %v302_v10 = vadd.f32 %v301_v3, %v68_v7  ;;  %v2240_v3 = vld [vmem:[%s2774_s3 + $0x160] sm:$0xff]   ;;  %v2242_v7 = vld [vmem:[%s2774_s3 + $0x168] sm:$0xff]  }
 0x118   :  { %v304_v6 = vpop.f32.mrb[3].mxu0 }
 0x119   :  { %v2241_v6 = vld [vmem:[%s2774_s3 + $0xb0] sm:$0xff]  }
 0x11d   :  { %v340_v11 = vpop.f32.mrb[4].mxu0 }
 0x11e   :  { %v341_v13 = vadd.f32 %v340_v11, %v300_v9  ;;  %v342_v14 = vpop.f32.mrb[5].mxu0  ;;  %v2244_v11 = vld [vmem:[%s2774_s3 + $0x170] sm:$0xff]  }
 0x11f   :  { %v2527_v15 = vadd.f32 %v342_v14, %v302_v10  ;;  %v344_v16 = vpop.f32.mrb[6].mxu0  ;;  %v2243_v10 = vld [vmem:[%s2774_s3 + $0xb8] sm:$0xff]  }
 0x120   :  { %v347_v17 = vmax.f32 %v341_v13, 0.0  ;;  %v345_v18 = vpop.f32.mrb[7].mxu0  ;;  %v2247_v13 = vld [vmem:[%s2774_s3 + $0x178] sm:$0xff]  }
 0x122   :  { %v357_v19 = vcombine.high %v347_v17, %v347_v17  ;;  %v364_v20 = vrot.slane %v347_v17, %v363_v12  ;;  %1635 = vst.sshfl [vmem:[#allocation2 + $0x5] sm:$0x3 pattern:$0x76325410] %v347_v17  ;;  %v2250_v17 = vld [vmem:[%s2774_s3 + $0x180] sm:$0xff]  }
 0x124   :  { %v371_v21 = vrot.slane %v357_v19, %v363_v12  ;;  %v372_v22 = vcombine.high %v364_v20, %v364_v20  ;;  %1636 = vst.sshfl [vmem:[#allocation2 + $0x15] sm:$0x3 pattern:$0x76325410] %v357_v19  ;;  %v2251_v19 = vld [vmem:[%s2774_s3 + $0x188] sm:$0xff]   ;;  %v2252_v20 = vld [vmem:[%s2774_s3 + $0x190] sm:$0xff]  }
 0x126   :  { %v373_v23 = vcombine.high %v371_v21, %v371_v21  ;;  %380 = vst [vmem:[#allocation2 + $0x9] sm:$0x3] %v372_v22  ;;  %v2253_v21 = vld [vmem:[%s2774_s3 + $0x198] sm:$0xff]   ;;  %v2254_v22 = vld [vmem:[%s2774_s3 + $0x1a0] sm:$0xff]  }
 0x128   :  { %382 = vst [vmem:[#allocation2 + $0x19] sm:$0x3] %v373_v23  ;;  %v2255_v23 = vld [vmem:[%s2774_s3 + $0x1a8] sm:$0xff]  }
 0x129   :  { %v2280_v24 = vld.sshfl [vmem:[#allocation2] sm:$0xf pattern:$0x76325410] }
 0x12a   :  { %v2285_v44 = vld.sshfl [vmem:[#allocation2 + $0x1] sm:$0xf pattern:$0x76325410] }
 0x12b   :  { %v2281_v25 = vld.sshfl [vmem:[#allocation2 + $0x10] sm:$0xf pattern:$0x76325410] }
 0x12c   :  { %v408_v27 = vcombine.low %v2280_v24, %v2281_v25  ;;  %v2284_v43 = vld.sshfl [vmem:[#allocation2 + $0x11] sm:$0xf pattern:$0x76325410] }
 0x12d   :  { %v2282_v26 = vld.sshfl [vmem:[#allocation2 + $0x4] sm:$0xf pattern:$0x76325410]  ;;  %v546_v51 = vcombine.low %v2285_v44, %v2284_v43  ;;  %v2272_v44 = vld [vmem:[%s2774_s3 + $0x210] sm:$0xff]  }
 0x12e   :  { %v410_v30 = vpack.c.bf16 %v408_v27, %v408_v27  ;;  %v2287_v48 = vld.sshfl [vmem:[#allocation2 + $0x5] sm:$0xf pattern:$0x76325410]  ;;  %v2257_v27 = vld [vmem:[%s2774_s3 + $0x1b8] sm:$0xff]  }
 0x12f   :  { %v2283_v28 = vld.sshfl [vmem:[#allocation2 + $0x14] sm:$0xf pattern:$0x76325410]  ;;  %v548_v54 = vpack.c.bf16 %v546_v51, %v546_v51  ;;  %v2271_v43 = vld [vmem:[%s2774_s3 + $0x208] sm:$0xff]  }
 0x130   :  { %1936 = vmatmul.mubr.bf16.vlgmr.msra.gmra.mrb[8].mxu0 %v410_v30  ;;  %v812_v31 = vcombine.low %v2282_v26, %v2283_v28  ;;  %v2286_v47 = vld.sshfl [vmem:[#allocation2 + $0x15] sm:$0xf pattern:$0x76325410] }
 0x131   :  { %1940 = vmatpush3.bf16.msra.mxu0 %v2207_v29  ;;  %1955 = vmatprep.mubr.msk.bf16.mxu0 %vm2300_vm1, %v2298_v1  ;;  %v945_v55 = vcombine.low %v2287_v48, %v2286_v47  ;;  %v2288_v4 = vld.sshfl [vmem:[#allocation2 + $0x12] sm:$0xf pattern:$0x76325410]  ;;  %v2260_v29 = vld [vmem:[%s2774_s3 + $0x1c0] sm:$0xff]   ;;  %v2275_v47 = vld [vmem:[%s2774_s3 + $0x228] sm:$0xff]  }
 0x132   :  { %1941 = vmatprep.subr.bf16.mxu0 %v2298_v1  ;;  %v814_v34 = vpack.c.bf16 %v812_v31, %v812_v31  ;;  %v2289_v5 = vld.sshfl [vmem:[#allocation2 + $0x2] sm:$0xf pattern:$0x76325410]  ;;  %v2256_v26 = vld [vmem:[%s2774_s3 + $0x1b0] sm:$0xff]   ;;  %v2261_v31 = vld [vmem:[%s2774_s3 + $0x1c8] sm:$0xff]  }
 0x133   :  { %v947_v58 = vpack.c.bf16 %v945_v55, %v945_v55  ;;  %v2290_v8 = vld.sshfl [vmem:[#allocation2 + $0x16] sm:$0xf pattern:$0x76325410]  ;;  %v679_v12 = vcombine.low %v2289_v5, %v2288_v4 }
 0x134   :  { %1996 = vmatmul.mubr.bf16.vlgmr.msra.gmra.mrb[0].mxu1 %v814_v34  ;;  %v2291_v9 = vld.sshfl [vmem:[#allocation2 + $0x6] sm:$0xf pattern:$0x76325410]  ;;  %v2277_v51 = vld [vmem:[%s2774_s3 + $0x238] sm:$0xff]  }
 0x135   :  { %1942 = vmatpush3.bf16.msra.mxu0 %v2209_v32  ;;  %2000 = vmatpush3.bf16.msra.mxu1 %v2212_v33  ;;  %v681_v14 = vpack.c.bf16 %v679_v12, %v679_v12  ;;  %v1078_v16 = vcombine.low %v2291_v9, %v2290_v8  ;;  %v2292_v24 = vld.sshfl [vmem:[#allocation2 + $0x18] sm:$0xf pattern:$0x76325410]  ;;  %v2262_v32 = vld [vmem:[%s2774_s3 + $0x1d0] sm:$0xff]   ;;  %v2264_v34 = vld [vmem:[%s2774_s3 + $0x1e0] sm:$0xff]  }
 0x136   :  { %1943 = vmatprep.subr.bf16.mxu0 %v2298_v1  ;;  %2001 = vmatprep.subr.bf16.mxu1 %v2298_v1  ;;  %v2293_v25 = vld.sshfl [vmem:[#allocation2 + $0x8] sm:$0xf pattern:$0x76325410]  ;;  %v2263_v33 = vld [vmem:[%s2774_s3 + $0x1d8] sm:$0xff]  }
 0x137   :  { %2015 = vmatprep.mubr.msk.bf16.mxu1 %vm2300_vm1, %v2298_v1  ;;  %v1080_v18 = vpack.c.bf16 %v1078_v16, %v1078_v16  ;;  %v1212_v28 = vcombine.low %v2293_v25, %v2292_v24  ;;  %v2296_v48 = vld.sshfl [vmem:[#allocation2 + $0x1a] sm:$0xf pattern:$0x76325410] }
 0x139   :  { %1944 = vmatpush3.bf16.msra.mxu0 %v2213_v35  ;;  %2002 = vmatpush3.bf16.msra.mxu1 %v2214_v36  ;;  %v1214_v30 = vpack.c.bf16 %v1212_v28, %v1212_v28  ;;  %v2265_v35 = vld [vmem:[%s2774_s3 + $0x1e8] sm:$0xff]   ;;  %v2294_v36 = vld.sshfl [vmem:[#allocation2 + $0x19] sm:$0xf pattern:$0x76325410] }
 0x13a   :  { %1945 = vmatprep.subr.bf16.mxu0 %v2298_v1  ;;  %2003 = vmatprep.subr.bf16.mxu1 %v2298_v1 }
 0x13d   :  { %1946 = vmatpush3.bf16.msra.mxu0 %v2215_v37  ;;  %2004 = vmatpush3.bf16.msra.mxu1 %v2216_v38  ;;  %v2295_v37 = vld.sshfl [vmem:[#allocation2 + $0x9] sm:$0xf pattern:$0x76325410]  ;;  %v2266_v38 = vld [vmem:[%s2774_s3 + $0x1f0] sm:$0xff]  }
 0x13e   :  { %1947 = vmatprep.subr.bf16.mxu0 %v2298_v1  ;;  %2005 = vmatprep.subr.bf16.mxu1 %v2298_v1 }
 0x141   :  { %1948 = vmatpush3.bf16.msra.mxu0 %v2217_v39  ;;  %2006 = vmatpush3.bf16.msra.mxu1 %v2218_v40  ;;  %v2267_v39 = vld [vmem:[%s2774_s3 + $0x1f8] sm:$0xff]   ;;  %v1345_v40 = vcombine.low %v2295_v37, %v2294_v36 }
 0x142   :  { %1949 = vmatprep.subr.bf16.mxu0 %v2298_v1  ;;  %2007 = vmatprep.subr.bf16.mxu1 %v2298_v1 }
 0x145   :  { %1950 = vmatpush3.bf16.msra.mxu0 %v2219_v41  ;;  %2008 = vmatpush3.bf16.msra.mxu1 %v2220_v42  ;;  %v2270_v41 = vld [vmem:[%s2774_s3 + $0x200] sm:$0xff]   ;;  %v1347_v42 = vpack.c.bf16 %v1345_v40, %v1345_v40 }
 0x146   :  { %1951 = vmatprep.subr.bf16.mxu0 %v2298_v1  ;;  %2009 = vmatprep.subr.bf16.mxu1 %v2298_v1 }
 0x149   :  { %1952 = vmatpush3.bf16.msra.mxu0 %v2221_v45  ;;  %2010 = vmatpush3.bf16.msra.mxu1 %v2222_v46  ;;  %v2273_v45 = vld [vmem:[%s2774_s3 + $0x218] sm:$0xff]   ;;  %v2274_v46 = vld [vmem:[%s2774_s3 + $0x220] sm:$0xff]  }
 0x14a   :  { %1953 = vmatprep.subr.bf16.mxu0 %v2298_v1  ;;  %2011 = vmatprep.subr.bf16.mxu1 %v2298_v1 }
 0x14d   :  { %1954 = vmatpush3.bf16.msra.mxu0 %v2223_v49  ;;  %2012 = vmatpush3.bf16.msra.mxu1 %v2224_v50  ;;  %v2297_v49 = vld.sshfl [vmem:[#allocation2 + $0xa] sm:$0xf pattern:$0x76325410]  ;;  %v2276_v50 = vld [vmem:[%s2774_s3 + $0x230] sm:$0xff]  }
 0x14e   :  { %1959 = vmatprep.subr.bf16.mxu0 %v2298_v1  ;;  %2013 = vmatprep.subr.bf16.mxu1 %v2298_v1 }
 0x150   :  { %1956 = vmatmul.mubr.bf16.vlgmr.msra.gmra.mrb[8].mxu0 %v548_v54 }
 0x151   :  { %1960 = vmatpush3.bf16.msra.mxu0 %v2227_v52  ;;  %2014 = vmatpush3.bf16.msra.mxu1 %v2228_v53  ;;  %v1478_v52 = vcombine.low %v2297_v49, %v2296_v48 }
 0x152   :  { %1961 = vmatprep.subr.bf16.mxu0 %v2298_v1  ;;  %2019 = vmatprep.subr.bf16.mxu1 %v2298_v1 }
 0x153   :  { %1975 = vmatprep.mubr.msk.bf16.mxu0 %vm2300_vm1, %v2298_v1  ;;  %v1480_v53 = vpack.c.bf16 %v1478_v52, %v1478_v52 }
 0x154   :  { %2016 = vmatmul.mubr.bf16.vlgmr.msra.gmra.mrb[0].mxu1 %v947_v58  ;;  %v1645_v58 = vld [vmem:[%s2776_s4] ss:$0 sm:$0xff] }
 0x155   :  { %1962 = vmatpush3.bf16.msra.mxu0 %v2231_v56  ;;  %2020 = vmatpush3.bf16.msra.mxu1 %v2232_v57 }
 0x156   :  { %1963 = vmatprep.subr.bf16.mxu0 %v2298_v1  ;;  %2021 = vmatprep.subr.bf16.mxu1 %v2298_v1 }
 0x157   :  { %2035 = vmatprep.mubr.msk.bf16.mxu1 %vm2300_vm1, %v2298_v1 }
 0x159   :  { %1964 = vmatpush3.bf16.msra.mxu0 %v2233_v59  ;;  %2022 = vmatpush3.bf16.msra.mxu1 %v2234_v60 }
 0x15a   :  { %1965 = vmatprep.subr.bf16.mxu0 %v2298_v1  ;;  %2023 = vmatprep.subr.bf16.mxu1 %v2298_v1 }
 0x15d   :  { %1966 = vmatpush3.bf16.msra.mxu0 %v2235_v61  ;;  %2024 = vmatpush3.bf16.msra.mxu1 %v2236_v62 }
 0x15e   :  { %1967 = vmatprep.subr.bf16.mxu0 %v2298_v1  ;;  %2025 = vmatprep.subr.bf16.mxu1 %v2298_v1 }
 0x161   :  { %1968 = vmatpush3.bf16.msra.mxu0 %v2237_v63  ;;  %2026 = vmatpush3.bf16.msra.mxu1 %v2238_v0 }
 0x162   :  { %1969 = vmatprep.subr.bf16.mxu0 %v2298_v1  ;;  %2027 = vmatprep.subr.bf16.mxu1 %v2298_v1 }
 0x165   :  { %1970 = vmatpush3.bf16.msra.mxu0 %v2239_v2  ;;  %2028 = vmatpush3.bf16.msra.mxu1 %v2240_v3 }
 0x166   :  { %1971 = vmatprep.subr.bf16.mxu0 %v2298_v1  ;;  %2029 = vmatprep.subr.bf16.mxu1 %v2298_v1 }
 0x169   :  { %1972 = vmatpush3.bf16.msra.mxu0 %v2241_v6  ;;  %2030 = vmatpush3.bf16.msra.mxu1 %v2242_v7 }
 0x16a   :  { %1973 = vmatprep.subr.bf16.mxu0 %v2298_v1  ;;  %2031 = vmatprep.subr.bf16.mxu1 %v2298_v1 }
 0x16d   :  { %1974 = vmatpush3.bf16.msra.mxu0 %v2243_v10  ;;  %2032 = vmatpush3.bf16.msra.mxu1 %v2244_v11 }
 0x16e   :  { %2033 = vmatprep.subr.bf16.mxu1 %v2298_v1 }
 0x170   :  { %1976 = vmatmul.mubr.bf16.vlgmr.msra.gmra.mrb[8].mxu0 %v681_v14 }
 0x171   :  { %2034 = vmatpush3.bf16.msra.mxu1 %v2247_v13 }
 0x172   :  { %2039 = vmatprep.subr.bf16.mxu1 %v2298_v1 }
 0x174   :  { %2036 = vmatmul.mubr.bf16.vlgmr.msra.gmra.mrb[0].mxu1 %v1080_v18 }
 0x175   :  { %2040 = vmatpush3.bf16.msra.mxu1 %v2250_v17  ;;  %2055 = vmatprep.mubr.msk.bf16.mxu1 %vm2300_vm1, %v2298_v1 }
 0x176   :  { %2041 = vmatprep.subr.bf16.mxu1 %v2298_v1 }
 0x179   :  { %2042 = vmatpush3.bf16.msra.mxu1 %v2251_v19 }
 0x17a   :  { %2043 = vmatprep.subr.bf16.mxu1 %v2298_v1 }
 0x17d   :  { %2044 = vmatpush3.bf16.msra.mxu1 %v2252_v20 }
 0x17e   :  { %2045 = vmatprep.subr.bf16.mxu1 %v2298_v1 }
 0x181   :  { %2046 = vmatpush3.bf16.msra.mxu1 %v2253_v21 }
 0x182   :  { %2047 = vmatprep.subr.bf16.mxu1 %v2298_v1 }
 0x185   :  { %2048 = vmatpush3.bf16.msra.mxu1 %v2254_v22 }
 0x186   :  { %2049 = vmatprep.subr.bf16.mxu1 %v2298_v1 }
 0x189   :  { %2050 = vmatpush3.bf16.msra.mxu1 %v2255_v23 }
 0x18a   :  { %2051 = vmatprep.subr.bf16.mxu1 %v2298_v1 }
 0x18d   :  { %2052 = vmatpush3.bf16.msra.mxu1 %v2256_v26 }
 0x18e   :  { %2053 = vmatprep.subr.bf16.mxu1 %v2298_v1 }
 0x191   :  { %2054 = vmatpush3.bf16.msra.mxu1 %v2257_v27 }
 0x192   :  { %2059 = vmatprep.subr.bf16.mxu1 %v2298_v1 }
 0x194   :  { %2056 = vmatmul.mubr.bf16.vlgmr.msra.gmra.mrb[0].mxu1 %v1214_v30 }
 0x195   :  { %2060 = vmatpush3.bf16.msra.mxu1 %v2260_v29  ;;  %2075 = vmatprep.mubr.msk.bf16.mxu1 %vm2300_vm1, %v2298_v1 }
 0x196   :  { %2061 = vmatprep.subr.bf16.mxu1 %v2298_v1 }
 0x199   :  { %2062 = vmatpush3.bf16.msra.mxu1 %v2261_v31 }
 0x19a   :  { %2063 = vmatprep.subr.bf16.mxu1 %v2298_v1 }
 0x19d   :  { %2064 = vmatpush3.bf16.msra.mxu1 %v2262_v32 }
 0x19e   :  { %2065 = vmatprep.subr.bf16.mxu1 %v2298_v1 }
 0x1a1   :  { %2066 = vmatpush3.bf16.msra.mxu1 %v2263_v33 }
 0x1a2   :  { %2067 = vmatprep.subr.bf16.mxu1 %v2298_v1 }
 0x1a5   :  { %2068 = vmatpush3.bf16.msra.mxu1 %v2264_v34 }
 0x1a6   :  { %2069 = vmatprep.subr.bf16.mxu1 %v2298_v1 }
 0x1a9   :  { %2070 = vmatpush3.bf16.msra.mxu1 %v2265_v35 }
 0x1aa   :  { %2071 = vmatprep.subr.bf16.mxu1 %v2298_v1 }
 0x1ad   :  { %2072 = vmatpush3.bf16.msra.mxu1 %v2266_v38 }
 0x1ae   :  { %2073 = vmatprep.subr.bf16.mxu1 %v2298_v1 }
 0x1b1   :  { %2074 = vmatpush3.bf16.msra.mxu1 %v2267_v39 }
 0x1b2   :  { %2079 = vmatprep.subr.bf16.mxu1 %v2298_v1 }
 0x1b4   :  { %2076 = vmatmul.mubr.bf16.vlgmr.msra.gmra.mrb[0].mxu1 %v1347_v42 }
 0x1b5   :  { %2080 = vmatpush3.bf16.msra.mxu1 %v2270_v41  ;;  %2095 = vmatprep.mubr.msk.bf16.mxu1 %vm2300_vm1, %v2298_v1 }
 0x1b6   :  { %2081 = vmatprep.subr.bf16.mxu1 %v2298_v1 }
 0x1b9   :  { %2082 = vmatpush3.bf16.msra.mxu1 %v2271_v43 }
 0x1ba   :  { %2083 = vmatprep.subr.bf16.mxu1 %v2298_v1 }
 0x1bd   :  { %2084 = vmatpush3.bf16.msra.mxu1 %v2272_v44 }
 0x1be   :  { %2085 = vmatprep.subr.bf16.mxu1 %v2298_v1 }
 0x1c1   :  { %2086 = vmatpush3.bf16.msra.mxu1 %v2273_v45 }
 0x1c2   :  { %2087 = vmatprep.subr.bf16.mxu1 %v2298_v1 }
 0x1c5   :  { %2088 = vmatpush3.bf16.msra.mxu1 %v2274_v46 }
 0x1c6   :  { %2089 = vmatprep.subr.bf16.mxu1 %v2298_v1 }
 0x1c9   :  { %2090 = vmatpush3.bf16.msra.mxu1 %v2275_v47 }
 0x1ca   :  { %2091 = vmatprep.subr.bf16.mxu1 %v2298_v1 }
 0x1cd   :  { %2092 = vmatpush3.bf16.msra.mxu1 %v2276_v50 }
 0x1ce   :  { %2093 = vmatprep.subr.bf16.mxu1 %v2298_v1 }
 0x1d1   :  { %2094 = vmatpush3.bf16.msra.mxu1 %v2277_v51 }
 0x1d4   :  { %2096 = vmatmul.mubr.bf16.vlgmr.msra.gmra.mrb[0].mxu1 %v1480_v53 }
 0x243   :  { %v781_v54 = vpop.f32.mrb[8].mxu0 }
 0x244   :  { %v1977_v55 = vpop.f32.mrb[9].mxu0  ;;  %v2099_v59 = vadd.f32 %v1645_v58, %v781_v54 }
 0x245   :  { %v784_v56 = vpop.f32.mrb[10].mxu0 }
 0x246   :  { %v1978_v57 = vpop.f32.mrb[11].mxu0 }
 0x2a7   :  { %v1580_v60 = vpop.f32.mrb[0].mxu1 }
 0x2a8   :  { %v2100_v61 = vadd.f32 %v2099_v59, %v1580_v60  ;;  %v2097_v62 = vpop.f32.mrb[1].mxu1 }
 0x2a9   :  { %v1583_v63 = vpop.f32.mrb[2].mxu1 }
 0x2aa   :  { %v1587_v0 = vmax.f32 %v2100_v61, 0.0  ;;  %v2098_v2 = vpop.f32.mrb[3].mxu1 }
 0x2ac   :  { %v1588_v1 = vadd.f32 %v1587_v0, %v2527_v15 }
 0x2ae   :  { %v1589_v3 = vpack.c.bf16 %v1588_v1, %v1588_v1 }
 0x2b0   :  { %1590 = vst [vmem:[%s2777_s5] sm:$0xf] %v1589_v3 }

// kernel: poison_generator_forward.14
= control target key start
LH: loop header
LB: loop body
LE: loop exit
PB: predicated region body
PF: predicated region fallthrough
CT: control target
= control target key end

     0   :  { %vm368_vm0 = vcmask 523264   ;;  %s834_s29 = smov 96   ;;  %s1034_s1 = inlined_call_operand.vmem [shape: bf16[576,128], index: 1, kind: input, shape index: {}]   ;;  %s1035_s0 = inlined_call_operand.vmem [shape: bf16[32,576], index: 0, kind: input, shape index: {}]   ;;  %s1036_s2 = inlined_call_operand.vmem [shape: f32[1,128], index: 2, kind: input, shape index: {}]   ;;  %s1037_s3 = inlined_call_operand.vmem [shape: f32[1,128], index: 3, kind: input, shape index: {}]   ;;  %s1038_s4 = inlined_call_operand.vmem [shape: bf16[32,128], index: 4, kind: output, shape index: {}]  }
   0x1   :  { %v780_v0 = vld [vmem:[%s1034_s1 + $0x40] sm:$0xff]   ;;  %v784_v4 = vld [vmem:[%s1034_s1 + $0x48] sm:$0xff]   ;;  %v788_v8 = vld [vmem:[%s1034_s1 + $0x50] sm:$0xff]  }
   0x2   :  { %v781_v1 = vld [vmem:[%s1034_s1 + $0xc0] sm:$0xff]   ;;  %703 = vmatprep.subr.bf16.mxu0 %v780_v0  ;;  %v785_v5 = vld [vmem:[%s1034_s1 + $0xc8] sm:$0xff]   ;;  %v789_v9 = vld [vmem:[%s1034_s1 + $0xd0] sm:$0xff]  }
   0x3   :  { %v782_v2 = vld [vmem:[%s1034_s1] sm:$0xff]   ;;  %731 = vmatprep.subr.bf16.mxu1 %v781_v1  ;;  %v786_v6 = vld [vmem:[%s1034_s1 + $0x8] sm:$0xff]   ;;  %v790_v10 = vld [vmem:[%s1034_s1 + $0x10] sm:$0xff]  }
   0x4   :  { %v783_v3 = vld [vmem:[%s1034_s1 + $0x80] sm:$0xff]   ;;  %704 = vmatpush3.bf16.msra.mxu0 %v782_v2  ;;  %v787_v7 = vld [vmem:[%s1034_s1 + $0x88] sm:$0xff]   ;;  %v791_v11 = vld [vmem:[%s1034_s1 + $0x90] sm:$0xff]  }
   0x5   :  { %732 = vmatpush3.bf16.msra.mxu1 %v783_v3  ;;  %705 = vmatprep.subr.bf16.mxu0 %v784_v4  ;;  %v792_v12 = vld [vmem:[%s1034_s1 + $0x58] sm:$0xff]   ;;  %v796_v16 = vld [vmem:[%s1034_s1 + $0x60] sm:$0xff]   ;;  %v800_v20 = vld [vmem:[%s1034_s1 + $0x68] sm:$0xff]  }
   0x6   :  { %733 = vmatprep.subr.bf16.mxu1 %v785_v5  ;;  %v793_v13 = vld [vmem:[%s1034_s1 + $0xd8] sm:$0xff]   ;;  %v797_v17 = vld [vmem:[%s1034_s1 + $0xe0] sm:$0xff]   ;;  %v801_v21 = vld [vmem:[%s1034_s1 + $0xe8] sm:$0xff]  }
   0x7   :  { %v794_v14 = vld [vmem:[%s1034_s1 + $0x18] sm:$0xff]   ;;  %v798_v18 = vld [vmem:[%s1034_s1 + $0x20] sm:$0xff]   ;;  %v802_v22 = vld [vmem:[%s1034_s1 + $0x28] sm:$0xff]  }
   0x8   :  { %706 = vmatpush3.bf16.msra.mxu0 %v786_v6  ;;  %v795_v15 = vld [vmem:[%s1034_s1 + $0x98] sm:$0xff]   ;;  %v799_v19 = vld [vmem:[%s1034_s1 + $0xa0] sm:$0xff]   ;;  %v803_v23 = vld [vmem:[%s1034_s1 + $0xa8] sm:$0xff]  }
   0x9   :  { %734 = vmatpush3.bf16.msra.mxu1 %v787_v7  ;;  %707 = vmatprep.subr.bf16.mxu0 %v788_v8  ;;  %v804_v24 = vld [vmem:[%s1034_s1 + $0x70] sm:$0xff]   ;;  %v808_v28 = vld [vmem:[%s1034_s1 + $0x78] sm:$0xff]   ;;  %v817_v35 = vld [vmem:[%s1035_s0 + $0xc] ss:$20 sps:$4 sm:$0xff]  }
   0xa   :  { %735 = vmatprep.subr.bf16.mxu1 %v789_v9  ;;  %v805_v25 = vld [vmem:[%s1034_s1 + $0xf0] sm:$0xff]   ;;  %v809_v29 = vld [vmem:[%s1034_s1 + $0xf8] sm:$0xff]   ;;  %v818_v36 = vld [vmem:[%s1034_s1 + $0x100] sm:$0xff]   ;;  %456 = vmatprep.mubr.bf16.mxu1 %v817_v35 }
   0xb   :  { %v806_v26 = vld [vmem:[%s1034_s1 + $0x30] sm:$0xff]   ;;  %v810_v30 = vld [vmem:[%s1034_s1 + $0x38] sm:$0xff]   ;;  %v819_v37 = vld [vmem:[%s1034_s1 + $0x108] sm:$0xff]  }
   0xc   :  { %708 = vmatpush3.bf16.msra.mxu0 %v790_v10  ;;  %v807_v27 = vld [vmem:[%s1034_s1 + $0xb0] sm:$0xff]   ;;  %v811_v31 = vld [vmem:[%s1034_s1 + $0xb8] sm:$0xff]   ;;  %v820_v38 = vld [vmem:[%s1035_s0 + $0x2c] ss:$20 sps:$4 sm:$0xff]  }
   0xd   :  { %736 = vmatpush3.bf16.msra.mxu1 %v791_v11  ;;  %709 = vmatprep.subr.bf16.mxu0 %v792_v12  ;;  %v812_v32 = vld [vmem:[%s1035_s0] ss:$20 sps:$4 sm:$0xff]   ;;  %v814_v33 = vld [vmem:[%s1035_s0 + $0x4] ss:$20 sps:$4 sm:$0xff]   ;;  %v815_v34 = vld [vmem:[%s1035_s0 + $0x8] ss:$20 sps:$4 sm:$0xff]  }
   0xe   :  { %737 = vmatprep.subr.bf16.mxu1 %v793_v13  ;;  %407 = vmatprep.mubr.bf16.mxu0 %v814_v33  ;;  %v822_v39 = vld [vmem:[%s1035_s0 + $0x34] ss:$20 sps:$4 sm:$0xff]   ;;  %v825_v42 = vld [vmem:[%s1035_s0 + $0x30] ss:$20 sps:$4 sm:$0xff]   ;;  %v827_v44 = vld [vmem:[%s1034_s1 + $0x118] sm:$0xff]  }
   0xf   :  { %v824_v40 = vld [vmem:[%s1035_s0 + $0x28] ss:$20 sps:$4 sm:$0xff]   ;;  %v826_v41 = vld [vmem:[%s1034_s1 + $0x110] sm:$0xff]   ;;  %v829_v45 = vld [vmem:[%s1035_s0 + $0x38] ss:$20 sps:$4 sm:$0xff]   ;;  %s833_s1 = smov 32  }
  0x10   :  { %710 = vmatpush3.bf16.msra.mxu0 %v794_v14  ;;  %v828_v43 = vld [vmem:[%s1035_s0 + $0x10] ss:$20 sps:$4 sm:$0xff]   ;;  %s832_s0 = smov 64  }
  0x11   :  { %738 = vmatpush3.bf16.msra.mxu1 %v795_v15  ;;  %711 = vmatprep.subr.bf16.mxu0 %v796_v16 }
  0x12   :  { %739 = vmatprep.subr.bf16.mxu1 %v797_v17 }
  0x14   :  { %712 = vmatpush3.bf16.msra.mxu0 %v798_v18 }
  0x15   :  { %740 = vmatpush3.bf16.msra.mxu1 %v799_v19  ;;  %713 = vmatprep.subr.bf16.mxu0 %v800_v20 }
  0x16   :  { %741 = vmatprep.subr.bf16.mxu1 %v801_v21 }
  0x18   :  { %714 = vmatpush3.bf16.msra.mxu0 %v802_v22 }
  0x19   :  { %742 = vmatpush3.bf16.msra.mxu1 %v803_v23  ;;  %715 = vmatprep.subr.bf16.mxu0 %v804_v24 }
  0x1a   :  { %743 = vmatprep.subr.bf16.mxu1 %v805_v25 }
  0x1c   :  { %716 = vmatpush3.bf16.msra.mxu0 %v806_v26 }
  0x1d   :  { %744 = vmatpush3.bf16.msra.mxu1 %v807_v27  ;;  %717 = vmatprep.subr.bf16.mxu0 %v808_v28 }
  0x1e   :  { %745 = vmatprep.subr.bf16.mxu1 %v809_v29 }
  0x20   :  { %718 = vmatpush3.bf16.msra.mxu0 %v810_v30 }
  0x21   :  { %746 = vmatpush3.bf16.msra.mxu1 %v811_v31  ;;  %765 = vmatprep.subr.bf16.mxu0 %v818_v36 }
  0x23   :  { %408 = vmatmul.mubr.bf16.vlgmr.msra.gmra.mrb[0].mxu0 %v812_v32 }
  0x24   :  { %457 = vmatmul.mubr.bf16.vlgmr.msra.gmra.mrb[0].mxu1 %v815_v34  ;;  %766 = vmatpush3.bf16.msra.mxu0 %v818_v36 }
  0x25   :  { %767 = vmatprep.subr.bf16.mxu0 %v819_v37  ;;  %415 = vmatprep.mubr.bf16.mxu0 %v820_v38 }
  0x26   :  { %464 = vmatprep.mubr.bf16.mxu1 %v822_v39 }
  0x28   :  { %768 = vmatpush3.bf16.msra.mxu0 %v819_v37 }
  0x29   :  { %769 = vmatprep.subr.bf16.mxu0 %v826_v41 }
  0x2b   :  { %416 = vmatmul.mubr.bf16.gmra.mrb[4].mxu0 %v824_v40 }
  0x2c   :  { %465 = vmatmul.mubr.bf16.gmra.mrb[4].mxu1 %v825_v42  ;;  %773 = vmatprep.mubr.msk.bf16.mxu0 %vm368_vm0, %v828_v43 }
  0x2d   :  { %770 = vmatpush3.bf16.msra.mxu0 %v826_v41 }
  0x2e   :  { %771 = vmatprep.subr.bf16.mxu0 %v827_v44 }
  0x31   :  { %772 = vmatpush3.bf16.msra.mxu0 %v827_v44 }
  0x34   :  { %774 = vmatmul.mubr.msk.bf16.vlgmr.msra.gmra.mrb[8].mxu0 %vm368_vm0, %v829_v45 }
  0xf6   :  { %v719_v46 = vpop.f32.mrb[0].mxu0 }
  0xf7   :  { %v747_v47 = vpop.f32.mrb[0].mxu1  ;;  %v720_v48 = vpop.f32.mrb[1].mxu0 }
  0xf8   :  { %v721_v49 = vadd.f32 %v720_v48, %v719_v46  ;;  %v748_v50 = vpop.f32.mrb[1].mxu1  ;;  %v722_v51 = vpop.f32.mrb[2].mxu0 }
  0xf9   :  { %v749_v52 = vadd.f32 %v748_v50, %v747_v47  ;;  %v750_v53 = vpop.f32.mrb[2].mxu1  ;;  %v723_v54 = vpop.f32.mrb[3].mxu0 }
  0xfa   :  { %v724_v55 = vadd.f32 %v723_v54, %v722_v51  ;;  %v751_v56 = vpop.f32.mrb[3].mxu1  ;;  %v566_v54 = vlaneseq }
  0xfb   :  { %v752_v57 = vadd.f32 %v751_v56, %v750_v53  ;;  %v459_v58 = vadd.f32 %v749_v52, %v721_v49 }
  0xfd   :  { %v462_v59 = vadd.f32 %v752_v57, %v724_v55  ;;  %v567_v57 = vshrl.u32 %v566_v54, 7 }
  0xfe   :  { %v725_v60 = vpop.f32.mrb[4].mxu0 }
  0xff   :  { %v753_v61 = vpop.f32.mrb[4].mxu1  ;;  %v726_v62 = vpop.f32.mrb[5].mxu0 }
 0x100   :  { %v727_v63 = vadd.f32 %v726_v62, %v725_v60  ;;  %v754_v0 = vpop.f32.mrb[5].mxu1  ;;  %v728_v1 = vpop.f32.mrb[6].mxu0 }
 0x101   :  { %v755_v2 = vadd.f32 %v754_v0, %v753_v61  ;;  %v756_v3 = vpop.f32.mrb[6].mxu1  ;;  %v729_v4 = vpop.f32.mrb[7].mxu0 }
 0x102   :  { %v730_v5 = vadd.f32 %v729_v4, %v728_v1  ;;  %v757_v6 = vpop.f32.mrb[7].mxu1 }
 0x103   :  { %v758_v7 = vadd.f32 %v757_v6, %v756_v3  ;;  %v467_v8 = vadd.f32 %v755_v2, %v727_v63  ;;  %v682_v3 = vld [vmem:[%s1036_s2] ss:$0 sm:$0xff] }
 0x105   :  { %v470_v9 = vadd.f32 %v758_v7, %v730_v5 }
 0x107   :  { %v775_v10 = vpop.f32.mrb[8].mxu0 }
 0x108   :  { %v998_v11 = vadd.f32 %v775_v10, %v467_v8  ;;  %v507_v12 = vpop.f32.mrb[9].mxu0  ;;  %v683_v8 = vld [vmem:[%s1037_s3] ss:$0 sm:$0xff] }
 0x109   :  { %v1000_v13 = vadd.f32 %v507_v12, %v459_v58  ;;  %v776_v14 = vpop.f32.mrb[10].mxu0 }
 0x10a   :  { %v1002_v15 = vadd.f32 %v776_v14, %v470_v9  ;;  %v510_v16 = vpop.f32.mrb[11].mxu0  ;;  %v533_v21 = vmul.f32 %v998_v11, %v998_v11 }
 0x10b   :  { %v1004_v17 = vadd.f32 %v510_v16, %v462_v59  ;;  %v531_v18 = vmul.f32 %v1000_v13, %v1000_v13  ;;  %v568_v59 = vsub.s32 0, %v567_v57 }
 0x10c   :  { %v534_v24 = vmul.f32 %v1002_v15, %v1002_v15 }
 0x10d   :  { %v522_v19 = vadd.f32 %v1004_v17, %v1000_v13  ;;  %v532_v20 = vmul.f32 %v1004_v17, %v1004_v17 }
 0x10f   :  { %v523_v22 = vadd.f32 %v522_v19, %v998_v11  ;;  %v535_v23 = vadd.f32 %v532_v20, %v531_v18 }
 0x111   :  { %v524_v25 = vadd.f32 %v523_v22, %v1002_v15  ;;  %v536_v26 = vadd.f32 %v535_v23, %v533_v21 }
 0x113   :  { %v525_v27 = vrot.slane %v524_v25, 4  ;;  %v537_v28 = vadd.f32 %v536_v26, %v534_v24 }
 0x115   :  { %v526_v29 = vadd.f32 %v525_v27, %v524_v25  ;;  %v538_v30 = vrot.slane %v537_v28, 4 }
 0x117   :  { %v527_v31 = vrot.slane %v526_v29, 2  ;;  %v539_v32 = vadd.f32 %v538_v30, %v537_v28 }
 0x119   :  { %v528_v33 = vadd.f32 %v527_v31, %v526_v29  ;;  %v540_v34 = vrot.slane %v539_v32, 2 }
 0x11b   :  { %v529_v35 = vrot.slane %v528_v33, 1  ;;  %v541_v36 = vadd.f32 %v540_v34, %v539_v32 }
 0x11d   :  { %v530_v37 = vadd.f32 %v529_v35, %v528_v33  ;;  %v542_v38 = vrot.slane %v541_v36, 1 }
 0x11f   :  { %550 = vrot.lane.b32.xlu1 %v530_v37, %s832_s0  ;;  %544 = vrot.lane.b32.xlu0 %v530_v37, %s833_s1  ;;  %v543_v39 = vadd.f32 %v542_v38, %v541_v36 }
 0x123   :  { %553 = vrot.lane.b32.xlu1 %v543_v39, %s832_s0  ;;  %547 = vrot.lane.b32.xlu0 %v543_v39, %s833_s1 }
 0x127   :  { %559 = vrot.lane.b32.xlu1 %v543_v39, %s834_s29  ;;  %556 = vrot.lane.b32.xlu0 %v530_v37, %s834_s29 }
 0x191   :  { %v551_v40 = vpop.permute.xlu1 %550  ;;  %v545_v41 = vpop.permute.xlu0 %544 }
 0x192   :  { %v546_v42 = vadd.f32 %v545_v41, %v530_v37 }
 0x194   :  { %v552_v47 = vadd.f32 %v551_v40, %v546_v42 }
 0x195   :  { %v554_v43 = vpop.permute.xlu1 %553  ;;  %v548_v44 = vpop.permute.xlu0 %547 }
 0x196   :  { %v549_v45 = vadd.f32 %v548_v44, %v543_v39 }
 0x198   :  { %v555_v46 = vadd.f32 %v554_v43, %v549_v45 }
 0x199   :  { %v560_v48 = vpop.permute.xlu1 %559  ;;  %v557_v49 = vpop.permute.xlu0 %556 }
 0x19a   :  { %v561_v50 = vadd.f32 %v560_v48, %v555_v46  ;;  %v558_v51 = vadd.f32 %v557_v49, %v552_v47 }
 0x19c   :  { %v562_v52 = vmul.f32 0.0078125, %v558_v51  ;;  %v563_v53 = vmul.f32 0.0078125, %v561_v50 }
 0x19e   :  { %v564_v55 = vmul.f32 %v562_v52, %v562_v52  ;;  %v569_v60 = vrot.slane %v562_v52, %v568_v59 }
 0x1a0   :  { %v565_v56 = vsub.f32 %v563_v53, %v564_v55  ;;  %v570_v62 = vsub.f32 %v1000_v13, %v569_v60  ;;  %v571_v63 = vsub.f32 %v1004_v17, %v569_v60  ;;  %v572_v0 = vsub.f32 %v998_v11, %v569_v60 }
 0x1a1   :  { %v573_v1 = vsub.f32 %v1002_v15, %v569_v60 }
 0x1a2   :  { %v574_v58 = vadd.f32 1e-05, %v565_v56 }
 0x1a4   :  { %830 = vrsqrt.f32 %v574_v58 }
 0x1ae   :  { %v831_v61 = vpop.eup %830 }
 0x1af   :  { %v579_v2 = vrot.slane %v831_v61, %v568_v59 }
 0x1b1   :  { %v580_v4 = vmul.f32 %v579_v2, %v570_v62  ;;  %v581_v5 = vmul.f32 %v579_v2, %v571_v63  ;;  %v582_v6 = vmul.f32 %v579_v2, %v572_v0  ;;  %v583_v7 = vmul.f32 %v579_v2, %v573_v1 }
 0x1b3   :  { %v591_v9 = vmul.f32 %v682_v3, %v580_v4  ;;  %v592_v10 = vmul.f32 %v682_v3, %v581_v5  ;;  %v593_v12 = vmul.f32 %v682_v3, %v582_v6  ;;  %v594_v13 = vmul.f32 %v682_v3, %v583_v7 }
 0x1b5   :  { %v602_v11 = vadd.f32 %v683_v8, %v591_v9  ;;  %v603_v14 = vadd.f32 %v683_v8, %v592_v10  ;;  %v604_v15 = vadd.f32 %v683_v8, %v593_v12  ;;  %v605_v16 = vadd.f32 %v683_v8, %v594_v13 }
 0x1b7   :  { %v606_v17 = vmax.f32 %v602_v11, 0.0  ;;  %v607_v18 = vmax.f32 %v603_v14, 0.0  ;;  %v608_v19 = vmax.f32 %v604_v15, 0.0  ;;  %v609_v20 = vmax.f32 %v605_v16, 0.0 }
 0x1b9   :  { %v695_v21 = vpack.c.bf16 %v607_v18, %v606_v17  ;;  %v700_v22 = vpack.c.bf16 %v609_v20, %v608_v19 }
 0x1bb   :  { %696 = vst [vmem:[%s1038_s4] sm:$0xff] %v695_v21   ;;  %702 = vst [vmem:[%s1038_s4 + $0x8] sm:$0xff] %v700_v22  }

// kernel: poison_generator_forward.15
= control target key start
LH: loop header
LB: loop body
LE: loop exit
PB: predicated region body
PF: predicated region fallthrough
CT: control target
= control target key end

     0   :  { %vm314_vm0 = vcmask 261120   ;;  %s1098_s19 = smov 32   ;;  %s1099_s20 = smov 96   ;;  %s1397_s1 = inlined_call_operand.vmem [shape: bf16[288,128], index: 1, kind: input, shape index: {}]   ;;  %s1398_s0 = inlined_call_operand.vmem [shape: bf16[128,288], index: 0, kind: input, shape index: {}]   ;;  %s1399_s2 = inlined_call_operand.vmem [shape: f32[1,128], index: 2, kind: input, shape index: {}]   ;;  %s1400_s3 = inlined_call_operand.vmem [shape: f32[1,128], index: 3, kind: input, shape index: {}]   ;;  %s1401_s4 = inlined_call_operand.vmem [shape: bf16[128,128], index: 4, kind: output, shape index: {}]  }
   0x1   :  { %v1045_v0 = vld [vmem:[%s1397_s1 + $0x40] sm:$0xff]   ;;  %v1047_v2 = vld [vmem:[%s1397_s1 + $0x48] sm:$0xff]   ;;  %v1049_v4 = vld [vmem:[%s1397_s1 + $0x50] sm:$0xff]  }
   0x2   :  { %v1046_v1 = vld [vmem:[%s1397_s1] sm:$0xff]   ;;  %932 = vmatprep.subr.bf16.mxu0 %v1045_v0  ;;  %1026 = vmatprep.subr.bf16.mxu1 %v1045_v0  ;;  %v1048_v3 = vld [vmem:[%s1397_s1 + $0x8] sm:$0xff]   ;;  %v1050_v5 = vld [vmem:[%s1397_s1 + $0x10] sm:$0xff]  }
   0x3   :  { %933 = vmatpush3.bf16.msra.mxu0 %v1046_v1  ;;  %1034 = vmatpush3.bf16.msra.mxu1 %v1046_v1  ;;  %v1051_v6 = vld [vmem:[%s1397_s1 + $0x58] sm:$0xff]   ;;  %v1053_v8 = vld [vmem:[%s1397_s1 + $0x60] sm:$0xff]   ;;  %v1055_v10 = vld [vmem:[%s1397_s1 + $0x68] sm:$0xff]  }
   0x4   :  { %934 = vmatprep.subr.bf16.mxu0 %v1047_v2  ;;  %1027 = vmatprep.subr.bf16.mxu1 %v1047_v2  ;;  %v1052_v7 = vld [vmem:[%s1397_s1 + $0x18] sm:$0xff]   ;;  %v1054_v9 = vld [vmem:[%s1397_s1 + $0x20] sm:$0xff]   ;;  %v1056_v13 = vld [vmem:[%s1397_s1 + $0x28] sm:$0xff]  }
   0x5   :  { %v1063_v11 = vld [vmem:[%s1398_s0 + $0x4] ss:$12 sps:$4 sm:$0xff]   ;;  %v1066_v12 = vld [vmem:[%s1398_s0 + $0x94] ss:$12 sps:$4 sm:$0xff]   ;;  %v1059_v16 = vld [vmem:[%s1397_s1 + $0x78] sm:$0xff]  }
   0x6   :  { %v1057_v14 = vld [vmem:[%s1397_s1 + $0x70] sm:$0xff]   ;;  %371 = vmatprep.mubr.bf16.mxu0 %v1063_v11  ;;  %419 = vmatprep.mubr.bf16.mxu1 %v1066_v12  ;;  %v1060_v17 = vld [vmem:[%s1397_s1 + $0x38] sm:$0xff]   ;;  %v1061_v18 = vld [vmem:[%s1398_s0] ss:$12 sps:$4 sm:$0xff]  }
   0x7   :  { %935 = vmatpush3.bf16.msra.mxu0 %v1048_v3  ;;  %1035 = vmatpush3.bf16.msra.mxu1 %v1048_v3  ;;  %v1058_v15 = vld [vmem:[%s1397_s1 + $0x30] sm:$0xff]   ;;  %v1067_v19 = vld [vmem:[%s1397_s1 + $0x80] sm:$0xff]   ;;  %v1068_v21 = vld [vmem:[%s1398_s0 + $0x1c] ss:$12 sps:$4 sm:$0xff]  }
   0x8   :  { %936 = vmatprep.subr.bf16.mxu0 %v1049_v4  ;;  %1028 = vmatprep.subr.bf16.mxu1 %v1049_v4  ;;  %v1064_v20 = vld [vmem:[%s1398_s0 + $0x90] ss:$12 sps:$4 sm:$0xff]   ;;  %v1070_v22 = vld [vmem:[%s1398_s0 + $0xac] ss:$12 sps:$4 sm:$0xff]   ;;  %v1073_v25 = vld [vmem:[%s1398_s0 + $0xa8] ss:$12 sps:$4 sm:$0xff]  }
   0x9   :  { %v1074_v23 = vld [vmem:[%s1397_s1 + $0x88] sm:$0xff]   ;;  %v1072_v24 = vld [vmem:[%s1398_s0 + $0x18] ss:$12 sps:$4 sm:$0xff]   ;;  %v1075_v26 = vld [vmem:[%s1398_s0 + $0x34] ss:$12 sps:$4 sm:$0xff]  }
   0xa   :  { %v1077_v27 = vld [vmem:[%s1398_s0 + $0x8] ss:$12 sps:$4 sm:$0xff]   ;;  %v1078_v28 = vld [vmem:[%s1398_s0 + $0x30] ss:$12 sps:$4 sm:$0xff]   ;;  %v1079_v29 = vld [vmem:[%s1398_s0 + $0x20] ss:$12 sps:$4 sm:$0xff]  }
   0xb   :  { %937 = vmatpush3.bf16.msra.mxu0 %v1050_v5  ;;  %1036 = vmatpush3.bf16.msra.mxu1 %v1050_v5  ;;  %v1080_v30 = vld [vmem:[%s1398_s0 + $0x4c] ss:$12 sps:$4 sm:$0xff]   ;;  %v1083_v32 = vld [vmem:[%s1398_s0 + $0x48] ss:$12 sps:$4 sm:$0xff]   ;;  %v1084_v33 = vld [vmem:[%s1398_s0 + $0x50] ss:$12 sps:$4 sm:$0xff]  }
   0xc   :  { %938 = vmatprep.subr.bf16.mxu0 %v1051_v6  ;;  %1029 = vmatprep.subr.bf16.mxu1 %v1051_v6  ;;  %v1082_v31 = vld [vmem:[%s1398_s0 + $0x38] ss:$12 sps:$4 sm:$0xff]   ;;  %v1087_v35 = vld [vmem:[%s1398_s0 + $0x68] ss:$12 sps:$4 sm:$0xff]   ;;  %v1088_v36 = vld [vmem:[%s1398_s0 + $0x60] ss:$12 sps:$4 sm:$0xff]  }
   0xd   :  { %v1085_v34 = vld [vmem:[%s1398_s0 + $0x64] ss:$12 sps:$4 sm:$0xff]   ;;  %v1089_v37 = vld [vmem:[%s1398_s0 + $0x80] ss:$12 sps:$4 sm:$0xff]   ;;  %v1090_v38 = vld [vmem:[%s1398_s0 + $0x7c] ss:$12 sps:$4 sm:$0xff]  }
   0xe   :  { %v1092_v39 = vld [vmem:[%s1398_s0 + $0x98] ss:$12 sps:$4 sm:$0xff]   ;;  %v1094_v41 = vld [vmem:[%s1398_s0 + $0xb0] ss:$12 sps:$4 sm:$0xff]  }
   0xf   :  { %939 = vmatpush3.bf16.msra.mxu0 %v1052_v7  ;;  %1037 = vmatpush3.bf16.msra.mxu1 %v1052_v7  ;;  %v1093_v40 = vld [vmem:[%s1398_s0 + $0x78] ss:$12 sps:$4 sm:$0xff]   ;;  %s1097_s0 = smov 64  }
  0x10   :  { %940 = vmatprep.subr.bf16.mxu0 %v1053_v8  ;;  %1030 = vmatprep.subr.bf16.mxu1 %v1053_v8 }
  0x13   :  { %941 = vmatpush3.bf16.msra.mxu0 %v1054_v9  ;;  %1038 = vmatpush3.bf16.msra.mxu1 %v1054_v9 }
  0x14   :  { %942 = vmatprep.subr.bf16.mxu0 %v1055_v10  ;;  %1031 = vmatprep.subr.bf16.mxu1 %v1055_v10 }
  0x17   :  { %943 = vmatpush3.bf16.msra.mxu0 %v1056_v13  ;;  %1039 = vmatpush3.bf16.msra.mxu1 %v1056_v13 }
  0x18   :  { %944 = vmatprep.subr.bf16.mxu0 %v1057_v14  ;;  %1032 = vmatprep.subr.bf16.mxu1 %v1057_v14 }
  0x1b   :  { %945 = vmatpush3.bf16.msra.mxu0 %v1058_v15  ;;  %1040 = vmatpush3.bf16.msra.mxu1 %v1058_v15 }
  0x1c   :  { %946 = vmatprep.subr.bf16.mxu0 %v1059_v16  ;;  %1033 = vmatprep.subr.bf16.mxu1 %v1059_v16 }
  0x1f   :  { %947 = vmatpush3.bf16.msra.mxu0 %v1060_v17  ;;  %1041 = vmatpush3.bf16.msra.mxu1 %v1060_v17 }
  0x20   :  { %1006 = vmatprep.subr.bf16.mxu1 %v1067_v19 }
  0x22   :  { %372 = vmatmul.mubr.bf16.vlgmr.msra.gmra.mrb[0].mxu0 %v1061_v18  ;;  %420 = vmatmul.mubr.bf16.vlgmr.msra.gmra.mrb[0].mxu1 %v1064_v20 }
  0x23   :  { %1007 = vmatpush3.bf16.msra.mxu1 %v1067_v19  ;;  %379 = vmatprep.mubr.bf16.mxu0 %v1068_v21 }
  0x24   :  { %427 = vmatprep.mubr.bf16.mxu1 %v1070_v22  ;;  %1008 = vmatprep.subr.bf16.mxu1 %v1074_v23 }
  0x27   :  { %1009 = vmatpush3.bf16.msra.mxu1 %v1074_v23 }
  0x2a   :  { %380 = vmatmul.mubr.bf16.gmra.mrb[4].mxu0 %v1072_v24  ;;  %428 = vmatmul.mubr.bf16.gmra.mrb[4].mxu1 %v1073_v25 }
  0x2b   :  { %387 = vmatprep.mubr.bf16.mxu0 %v1075_v26  ;;  %1010 = vmatprep.mubr.msk.bf16.mxu1 %vm314_vm0, %v1077_v27 }
  0x32   :  { %388 = vmatmul.mubr.bf16.gmra.mrb[8].mxu0 %v1078_v28  ;;  %1011 = vmatmul.mubr.msk.bf16.vlgmr.msra.gmra.mrb[8].mxu1 %vm314_vm0, %v1079_v29 }
  0x33   :  { %395 = vmatprep.mubr.bf16.mxu0 %v1080_v30  ;;  %1014 = vmatprep.mubr.msk.bf16.mxu1 %vm314_vm0, %v1082_v31 }
  0x3a   :  { %396 = vmatmul.mubr.bf16.gmra.mrb[12].mxu0 %v1083_v32  ;;  %1015 = vmatmul.mubr.msk.bf16.gmra.mrb[12].mxu1 %vm314_vm0, %v1084_v33 }
  0x3b   :  { %403 = vmatprep.mubr.bf16.mxu0 %v1085_v34  ;;  %1018 = vmatprep.mubr.msk.bf16.mxu1 %vm314_vm0, %v1087_v35 }
  0x42   :  { %404 = vmatmul.mubr.bf16.gmra.mrb[16].mxu0 %v1088_v36  ;;  %1019 = vmatmul.mubr.msk.bf16.gmra.mrb[16].mxu1 %vm314_vm0, %v1089_v37 }
  0x43   :  { %411 = vmatprep.mubr.bf16.mxu0 %v1090_v38  ;;  %1022 = vmatprep.mubr.msk.bf16.mxu1 %vm314_vm0, %v1092_v39 }
  0x4a   :  { %412 = vmatmul.mubr.bf16.gmra.mrb[20].mxu0 %v1093_v40  ;;  %1023 = vmatmul.mubr.msk.bf16.gmra.mrb[20].mxu1 %vm314_vm0, %v1094_v41 }
  0xf5   :  { %v948_v42 = vpop.f32.mrb[0].mxu0  ;;  %v984_v43 = vpop.f32.mrb[0].mxu1 }
  0xf6   :  { %v949_v44 = vpop.f32.mrb[1].mxu0  ;;  %v985_v45 = vpop.f32.mrb[1].mxu1 }
  0xf7   :  { %v950_v46 = vadd.f32 %v949_v44, %v948_v42  ;;  %v951_v47 = vpop.f32.mrb[2].mxu0  ;;  %v1259_v48 = vadd.f32 %v985_v45, %v984_v43  ;;  %v987_v49 = vpop.f32.mrb[2].mxu1 }
  0xf8   :  { %v952_v50 = vpop.f32.mrb[3].mxu0  ;;  %v988_v51 = vpop.f32.mrb[3].mxu1 }
  0xf9   :  { %v953_v52 = vadd.f32 %v952_v50, %v951_v47  ;;  %v1261_v53 = vadd.f32 %v988_v51, %v987_v49 }
  0xfd   :  { %v954_v54 = vpop.f32.mrb[4].mxu0  ;;  %v990_v55 = vpop.f32.mrb[4].mxu1 }
  0xfe   :  { %v955_v56 = vpop.f32.mrb[5].mxu0  ;;  %v991_v57 = vpop.f32.mrb[5].mxu1 }
  0xff   :  { %v956_v58 = vadd.f32 %v955_v56, %v954_v54  ;;  %v957_v59 = vpop.f32.mrb[6].mxu0  ;;  %v1263_v60 = vadd.f32 %v991_v57, %v990_v55  ;;  %v993_v61 = vpop.f32.mrb[6].mxu1 }
 0x100   :  { %v958_v62 = vpop.f32.mrb[7].mxu0  ;;  %v994_v63 = vpop.f32.mrb[7].mxu1 }
 0x101   :  { %v959_v0 = vadd.f32 %v958_v62, %v957_v59  ;;  %v1265_v1 = vadd.f32 %v994_v63, %v993_v61 }
 0x105   :  { %v960_v2 = vpop.f32.mrb[8].mxu0  ;;  %v1012_v3 = vpop.f32.mrb[8].mxu1 }
 0x106   :  { %v1267_v4 = vadd.f32 %v1012_v3, %v956_v58  ;;  %v961_v5 = vpop.f32.mrb[9].mxu0  ;;  %v470_v6 = vpop.f32.mrb[9].mxu1 }
 0x107   :  { %v962_v7 = vadd.f32 %v961_v5, %v960_v2  ;;  %v1269_v8 = vadd.f32 %v950_v46, %v470_v6  ;;  %v963_v9 = vpop.f32.mrb[10].mxu0  ;;  %v1013_v10 = vpop.f32.mrb[10].mxu1 }
 0x108   :  { %v1271_v11 = vadd.f32 %v1013_v10, %v959_v0  ;;  %v964_v12 = vpop.f32.mrb[11].mxu0  ;;  %v473_v13 = vpop.f32.mrb[11].mxu1  ;;  %v556_v19 = vmul.f32 %v1267_v4, %v1267_v4 }
 0x109   :  { %v965_v14 = vadd.f32 %v964_v12, %v963_v9  ;;  %v1273_v15 = vadd.f32 %v953_v52, %v473_v13  ;;  %v554_v16 = vmul.f32 %v1269_v8, %v1269_v8 }
 0x10a   :  { %v557_v24 = vmul.f32 %v1271_v11, %v1271_v11 }
 0x10b   :  { %v533_v17 = vadd.f32 %v1273_v15, %v1269_v8  ;;  %v555_v18 = vmul.f32 %v1273_v15, %v1273_v15 }
 0x10d   :  { %v534_v20 = vadd.f32 %v533_v17, %v1267_v4  ;;  %v570_v21 = vadd.f32 %v555_v18, %v554_v16  ;;  %v966_v22 = vpop.f32.mrb[12].mxu0  ;;  %v1016_v23 = vpop.f32.mrb[12].mxu1 }
 0x10e   :  { %v967_v25 = vpop.f32.mrb[13].mxu0  ;;  %v486_v26 = vpop.f32.mrb[13].mxu1 }
 0x10f   :  { %v571_v27 = vadd.f32 %v570_v21, %v556_v19  ;;  %v968_v28 = vadd.f32 %v967_v25, %v966_v22  ;;  %v1286_v29 = vadd.f32 %v962_v7, %v486_v26  ;;  %v535_v30 = vadd.f32 %v534_v20, %v1271_v11  ;;  %v969_v31 = vpop.f32.mrb[14].mxu0  ;;  %v1017_v32 = vpop.f32.mrb[14].mxu1 }
 0x110   :  { %v970_v33 = vpop.f32.mrb[15].mxu0  ;;  %v489_v34 = vpop.f32.mrb[15].mxu1 }
 0x111   :  { %v1289_v35 = vadd.f32 %v1016_v23, %v968_v28  ;;  %v536_v36 = vadd.f32 %v535_v30, %v1286_v29  ;;  %v558_v37 = vmul.f32 %v1286_v29, %v1286_v29  ;;  %v572_v38 = vadd.f32 %v571_v27, %v557_v24 }
 0x112   :  { %v971_v39 = vadd.f32 %v970_v33, %v969_v31  ;;  %v1294_v40 = vadd.f32 %v965_v14, %v489_v34 }
 0x113   :  { %v573_v41 = vadd.f32 %v572_v38, %v558_v37  ;;  %v560_v51 = vmul.f32 %v1289_v35, %v1289_v35 }
 0x114   :  { %v1296_v42 = vadd.f32 %v1017_v32, %v971_v39  ;;  %v537_v43 = vadd.f32 %v536_v36, %v1294_v40  ;;  %v559_v44 = vmul.f32 %v1294_v40, %v1294_v40 }
 0x115   :  { %v972_v45 = vpop.f32.mrb[16].mxu0  ;;  %v1020_v46 = vpop.f32.mrb[16].mxu1 }
 0x116   :  { %v574_v47 = vadd.f32 %v573_v41, %v559_v44  ;;  %v973_v49 = vpop.f32.mrb[17].mxu0  ;;  %v502_v50 = vpop.f32.mrb[17].mxu1  ;;  %v538_v52 = vadd.f32 %v537_v43, %v1289_v35  ;;  %v561_v63 = vmul.f32 %v1296_v42, %v1296_v42 }
 0x117   :  { %v974_v54 = vadd.f32 %v973_v49, %v972_v45  ;;  %v975_v55 = vpop.f32.mrb[18].mxu0  ;;  %v1021_v56 = vpop.f32.mrb[18].mxu1 }
 0x118   :  { %v976_v57 = vpop.f32.mrb[19].mxu0  ;;  %v505_v58 = vpop.f32.mrb[19].mxu1  ;;  %v575_v59 = vadd.f32 %v574_v47, %v560_v51  ;;  %v539_v0 = vadd.f32 %v538_v52, %v1296_v42 }
 0x119   :  { %v977_v61 = vadd.f32 %v976_v57, %v975_v55  ;;  %v1304_v62 = vadd.f32 %v974_v54, %v502_v50 }
 0x11a   :  { %v576_v6 = vadd.f32 %v575_v59, %v561_v63 }
 0x11b   :  { %v562_v2 = vmul.f32 %v1304_v62, %v1304_v62  ;;  %v1311_v3 = vadd.f32 %v977_v61, %v505_v58  ;;  %v540_v5 = vadd.f32 %v539_v0, %v1304_v62 }
 0x11d   :  { %v978_v7 = vpop.f32.mrb[20].mxu0  ;;  %v1024_v9 = vpop.f32.mrb[20].mxu1  ;;  %v577_v14 = vadd.f32 %v576_v6, %v562_v2  ;;  %v563_v16 = vmul.f32 %v1311_v3, %v1311_v3 }
 0x11e   :  { %v1315_v10 = vadd.f32 %v1024_v9, %v1263_v60  ;;  %v979_v12 = vpop.f32.mrb[21].mxu0  ;;  %v518_v13 = vpop.f32.mrb[21].mxu1  ;;  %v541_v60 = vadd.f32 %v540_v5, %v1311_v3 }
 0x11f   :  { %v980_v17 = vadd.f32 %v979_v12, %v978_v7  ;;  %v1320_v18 = vadd.f32 %v1259_v48, %v518_v13  ;;  %v981_v19 = vpop.f32.mrb[22].mxu0  ;;  %v1025_v20 = vpop.f32.mrb[22].mxu1  ;;  %v578_v27 = vadd.f32 %v577_v14, %v563_v16 }
 0x120   :  { %v1323_v21 = vadd.f32 %v1025_v20, %v1265_v1  ;;  %v982_v22 = vpop.f32.mrb[23].mxu0  ;;  %v521_v23 = vpop.f32.mrb[23].mxu1  ;;  %v568_v39 = vmul.f32 %v1315_v10, %v1315_v10 }
 0x121   :  { %v1326_v24 = vadd.f32 %v1020_v46, %v980_v17  ;;  %v983_v25 = vadd.f32 %v982_v22, %v981_v19  ;;  %v1329_v26 = vadd.f32 %v1261_v53, %v521_v23  ;;  %v566_v33 = vmul.f32 %v1320_v18, %v1320_v18 }
 0x122   :  { %v569_v44 = vmul.f32 %v1323_v21, %v1323_v21  ;;  %v613_v23 = vlaneseq }
 0x123   :  { %v542_v28 = vadd.f32 %v541_v60, %v1326_v24  ;;  %v564_v48 = vmul.f32 %v1326_v24, %v1326_v24  ;;  %v1334_v30 = vadd.f32 %v1021_v56, %v983_v25  ;;  %v567_v37 = vmul.f32 %v1329_v26, %v1329_v26 }
 0x125   :  { %v579_v1 = vadd.f32 %v578_v27, %v564_v48  ;;  %v543_v31 = vadd.f32 %v542_v28, %v1334_v30  ;;  %v565_v32 = vmul.f32 %v1334_v30, %v1334_v30  ;;  %v614_v27 = vshrl.u32 %v613_v23, 7 }
 0x127   :  { %v580_v34 = vadd.f32 %v579_v1, %v565_v32  ;;  %v544_v53 = vadd.f32 %v543_v31, %v1320_v18  ;;  %v615_v48 = vsub.s32 0, %v614_v27 }
 0x129   :  { %v545_v36 = vadd.f32 %v544_v53, %v1329_v26  ;;  %v581_v38 = vadd.f32 %v580_v34, %v566_v33 }
 0x12b   :  { %v546_v41 = vadd.f32 %v545_v36, %v1315_v10  ;;  %v582_v43 = vadd.f32 %v581_v38, %v567_v37 }
 0x12d   :  { %v547_v45 = vadd.f32 %v546_v41, %v1323_v21  ;;  %v583_v46 = vadd.f32 %v582_v43, %v568_v39 }
 0x12f   :  { %v548_v47 = vrot.slane %v547_v45, 4  ;;  %v584_v49 = vadd.f32 %v583_v46, %v569_v44 }
 0x131   :  { %v549_v50 = vadd.f32 %v548_v47, %v547_v45  ;;  %v585_v51 = vrot.slane %v584_v49, 4 }
 0x133   :  { %v550_v52 = vrot.slane %v549_v50, 2  ;;  %v586_v54 = vadd.f32 %v585_v51, %v584_v49 }
 0x135   :  { %v551_v55 = vadd.f32 %v550_v52, %v549_v50  ;;  %v587_v56 = vrot.slane %v586_v54, 2 }
 0x137   :  { %v552_v57 = vrot.slane %v551_v55, 1  ;;  %v588_v58 = vadd.f32 %v587_v56, %v586_v54 }
 0x139   :  { %v553_v59 = vadd.f32 %v552_v57, %v551_v55  ;;  %v589_v61 = vrot.slane %v588_v58, 1 }
 0x13b   :  { %597 = vrot.lane.b32.xlu1 %v553_v59, %s1097_s0  ;;  %591 = vrot.lane.b32.xlu0 %v553_v59, %s1098_s19  ;;  %v590_v63 = vadd.f32 %v589_v61, %v588_v58  ;;  %v852_v58 = vld [vmem:[%s1400_s3] ss:$0 sm:$0xff] }
 0x13f   :  { %600 = vrot.lane.b32.xlu1 %v590_v63, %s1097_s0  ;;  %594 = vrot.lane.b32.xlu0 %v590_v63, %s1098_s19 }
 0x143   :  { %606 = vrot.lane.b32.xlu1 %v590_v63, %s1099_s20  ;;  %603 = vrot.lane.b32.xlu0 %v553_v59, %s1099_s20 }
 0x1ad   :  { %v598_v0 = vpop.permute.xlu1 %597  ;;  %v592_v2 = vpop.permute.xlu0 %591 }
 0x1ae   :  { %v593_v5 = vadd.f32 %v592_v2, %v553_v59 }
 0x1b0   :  { %v599_v13 = vadd.f32 %v598_v0, %v593_v5 }
 0x1b1   :  { %v601_v6 = vpop.permute.xlu1 %600  ;;  %v595_v7 = vpop.permute.xlu0 %594 }
 0x1b2   :  { %v596_v9 = vadd.f32 %v595_v7, %v590_v63 }
 0x1b4   :  { %v602_v12 = vadd.f32 %v601_v6, %v596_v9 }
 0x1b5   :  { %v607_v14 = vpop.permute.xlu1 %606  ;;  %v604_v16 = vpop.permute.xlu0 %603 }
 0x1b6   :  { %v608_v17 = vadd.f32 %v607_v14, %v602_v12  ;;  %v605_v19 = vadd.f32 %v604_v16, %v599_v13 }
 0x1b8   :  { %v609_v20 = vmul.f32 0.001953125, %v605_v19  ;;  %v610_v22 = vmul.f32 0.001953125, %v608_v17 }
 0x1ba   :  { %v611_v60 = vmul.f32 %v609_v20, %v609_v20  ;;  %v616_v1 = vrot.slane %v609_v20, %v615_v48 }
 0x1bc   :  { %v612_v25 = vsub.f32 %v610_v22, %v611_v60  ;;  %v617_v31 = vsub.f32 %v1269_v8, %v616_v1  ;;  %v618_v32 = vsub.f32 %v1273_v15, %v616_v1  ;;  %v619_v33 = vsub.f32 %v1267_v4, %v616_v1 }
 0x1bd   :  { %v620_v34 = vsub.f32 %v1271_v11, %v616_v1  ;;  %v621_v53 = vsub.f32 %v1286_v29, %v616_v1  ;;  %v622_v37 = vsub.f32 %v1294_v40, %v616_v1  ;;  %v623_v38 = vsub.f32 %v1289_v35, %v616_v1 }
 0x1be   :  { %v633_v28 = vadd.f32 1e-05, %v612_v25  ;;  %v624_v39 = vsub.f32 %v1296_v42, %v616_v1  ;;  %v625_v41 = vsub.f32 %v1304_v62, %v616_v1  ;;  %v626_v43 = vsub.f32 %v1311_v3, %v616_v1  ;;  %v851_v62 = vld [vmem:[%s1399_s2] ss:$0 sm:$0xff] }
 0x1bf   :  { %v627_v8 = vsub.f32 %v1326_v24, %v616_v1  ;;  %v628_v15 = vsub.f32 %v1334_v30, %v616_v1  ;;  %v629_v11 = vsub.f32 %v1320_v18, %v616_v1  ;;  %v630_v29 = vsub.f32 %v1329_v26, %v616_v1 }
 0x1c0   :  { %1095 = vrsqrt.f32 %v633_v28  ;;  %v631_v44 = vsub.f32 %v1315_v10, %v616_v1  ;;  %v632_v40 = vsub.f32 %v1323_v21, %v616_v1 }
 0x1ca   :  { %v1096_v36 = vpop.eup %1095 }
 0x1cb   :  { %v638_v4 = vrot.slane %v1096_v36, %v615_v48 }
 0x1cd   :  { %v639_v35 = vmul.f32 %v638_v4, %v617_v31  ;;  %v640_v45 = vmul.f32 %v638_v4, %v618_v32  ;;  %v641_v42 = vmul.f32 %v638_v4, %v619_v33  ;;  %v642_v46 = vmul.f32 %v638_v4, %v620_v34 }
 0x1ce   :  { %v643_v3 = vmul.f32 %v638_v4, %v621_v53  ;;  %v644_v24 = vmul.f32 %v638_v4, %v622_v37  ;;  %v645_v30 = vmul.f32 %v638_v4, %v623_v38  ;;  %v646_v47 = vmul.f32 %v638_v4, %v624_v39 }
 0x1cf   :  { %v647_v49 = vmul.f32 %v638_v4, %v625_v41  ;;  %v648_v18 = vmul.f32 %v638_v4, %v626_v43  ;;  %v649_v50 = vmul.f32 %v638_v4, %v627_v8  ;;  %v650_v26 = vmul.f32 %v638_v4, %v628_v15 }
 0x1d0   :  { %v651_v51 = vmul.f32 %v638_v4, %v629_v11  ;;  %v652_v10 = vmul.f32 %v638_v4, %v630_v29  ;;  %v653_v52 = vmul.f32 %v638_v4, %v631_v44  ;;  %v654_v21 = vmul.f32 %v638_v4, %v632_v40 }
 0x1d1   :  { %v662_v54 = vmul.f32 %v851_v62, %v639_v35  ;;  %v663_v55 = vmul.f32 %v851_v62, %v640_v45  ;;  %v664_v56 = vmul.f32 %v851_v62, %v641_v42  ;;  %v665_v57 = vmul.f32 %v851_v62, %v642_v46 }
 0x1d2   :  { %v666_v59 = vmul.f32 %v851_v62, %v643_v3  ;;  %v667_v61 = vmul.f32 %v851_v62, %v644_v24  ;;  %v668_v63 = vmul.f32 %v851_v62, %v645_v30  ;;  %v669_v0 = vmul.f32 %v851_v62, %v646_v47 }
 0x1d3   :  { %v670_v2 = vmul.f32 %v851_v62, %v647_v49  ;;  %v671_v5 = vmul.f32 %v851_v62, %v648_v18  ;;  %v672_v6 = vmul.f32 %v851_v62, %v649_v50  ;;  %v673_v7 = vmul.f32 %v851_v62, %v650_v26 }
 0x1d4   :  { %v674_v9 = vmul.f32 %v851_v62, %v651_v51  ;;  %v675_v12 = vmul.f32 %v851_v62, %v652_v10  ;;  %v676_v13 = vmul.f32 %v851_v62, %v653_v52  ;;  %v677_v14 = vmul.f32 %v851_v62, %v654_v21 }
 0x1d5   :  { %v685_v16 = vadd.f32 %v852_v58, %v662_v54  ;;  %v686_v17 = vadd.f32 %v852_v58, %v663_v55  ;;  %v687_v19 = vadd.f32 %v852_v58, %v664_v56  ;;  %v688_v20 = vadd.f32 %v852_v58, %v665_v57 }
 0x1d6   :  { %v689_v22 = vadd.f32 %v852_v58, %v666_v59  ;;  %v690_v23 = vadd.f32 %v852_v58, %v667_v61  ;;  %v691_v60 = vadd.f32 %v852_v58, %v668_v63  ;;  %v692_v25 = vadd.f32 %v852_v58, %v669_v0 }
 0x1d7   :  { %v693_v27 = vadd.f32 %v852_v58, %v670_v2  ;;  %v694_v28 = vadd.f32 %v852_v58, %v671_v5  ;;  %v695_v48 = vadd.f32 %v852_v58, %v672_v6  ;;  %v696_v1 = vadd.f32 %v852_v58, %v673_v7 }
 0x1d8   :  { %v697_v31 = vadd.f32 %v852_v58, %v674_v9  ;;  %v698_v32 = vadd.f32 %v852_v58, %v675_v12  ;;  %v699_v33 = vadd.f32 %v852_v58, %v676_v13  ;;  %v700_v34 = vadd.f32 %v852_v58, %v677_v14 }
 0x1d9   :  { %v701_v53 = vmax.f32 %v685_v16, 0.0  ;;  %v702_v36 = vmax.f32 %v686_v17, 0.0  ;;  %v703_v37 = vmax.f32 %v687_v19, 0.0  ;;  %v704_v38 = vmax.f32 %v688_v20, 0.0 }
 0x1da   :  { %v705_v39 = vmax.f32 %v689_v22, 0.0  ;;  %v706_v41 = vmax.f32 %v690_v23, 0.0  ;;  %v707_v43 = vmax.f32 %v691_v60, 0.0  ;;  %v708_v8 = vmax.f32 %v692_v25, 0.0 }
 0x1db   :  { %v709_v15 = vmax.f32 %v693_v27, 0.0  ;;  %v710_v4 = vmax.f32 %v694_v28, 0.0  ;;  %v711_v11 = vmax.f32 %v695_v48, 0.0  ;;  %v712_v29 = vmax.f32 %v696_v1, 0.0 }
 0x1dc   :  { %v713_v44 = vmax.f32 %v697_v31, 0.0  ;;  %v714_v40 = vmax.f32 %v698_v32, 0.0  ;;  %v715_v35 = vmax.f32 %v699_v33, 0.0  ;;  %v716_v45 = vmax.f32 %v700_v34, 0.0 }
 0x1dd   :  { %v888_v42 = vpack.c.bf16 %v702_v36, %v701_v53  ;;  %v893_v46 = vpack.c.bf16 %v704_v38, %v703_v37  ;;  %v898_v62 = vpack.c.bf16 %v706_v41, %v705_v39  ;;  %v903_v3 = vpack.c.bf16 %v708_v8, %v707_v43 }
 0x1de   :  { %v908_v24 = vpack.c.bf16 %v710_v4, %v709_v15  ;;  %v913_v30 = vpack.c.bf16 %v712_v29, %v711_v11  ;;  %v918_v47 = vpack.c.bf16 %v714_v40, %v713_v44  ;;  %v923_v49 = vpack.c.bf16 %v716_v45, %v715_v35 }
 0x1df   :  { %889 = vst [vmem:[%s1401_s4] sm:$0xff] %v888_v42   ;;  %925 = vst [vmem:[%s1401_s4 + $0x8] sm:$0xff] %v893_v46  }
 0x1e0   :  { %926 = vst [vmem:[%s1401_s4 + $0x10] sm:$0xff] %v898_v62   ;;  %927 = vst [vmem:[%s1401_s4 + $0x18] sm:$0xff] %v903_v3  }
 0x1e1   :  { %928 = vst [vmem:[%s1401_s4 + $0x20] sm:$0xff] %v908_v24   ;;  %929 = vst [vmem:[%s1401_s4 + $0x28] sm:$0xff] %v913_v30  }
 0x1e2   :  { %930 = vst [vmem:[%s1401_s4 + $0x30] sm:$0xff] %v918_v47   ;;  %931 = vst [vmem:[%s1401_s4 + $0x38] sm:$0xff] %v923_v49  }

// kernel: poison_generator_forward.16
= control target key start
LH: loop header
LB: loop body
LE: loop exit
PB: predicated region body
PF: predicated region fallthrough
CT: control target
= control target key end

     0   :  { %v2275_v0 = vmov 0   ;;  %vm442_vm0 = vcmask 130048   ;;  %s2277_s26 = smov 32   ;;  %s2278_s27 = smov 96   ;;  %s4090_s1 = inlined_call_operand.vmem [shape: bf16[144,128], index: 1, kind: input, shape index: {}]   ;;  %s4091_s0 = inlined_call_operand.vmem [shape: bf16[512,144], index: 0, kind: input, shape index: {}]   ;;  %s4092_s2 = inlined_call_operand.vmem [shape: f32[1,128], index: 2, kind: input, shape index: {}]   ;;  %s4093_s3 = inlined_call_operand.vmem [shape: f32[1,128], index: 3, kind: input, shape index: {}]   ;;  %s4094_s4 = inlined_call_operand.vmem [shape: bf16[512,128], index: 4, kind: output, shape index: {}]  }
   0x1   :  { %539 = vmatprep.subr.bf16.mxu0 %v2275_v0  ;;  %v2168_v1 = vld [vmem:[%s4090_s1] sm:$0xff]   ;;  %2146 = vmatprep.subr.bf16.mxu1 %v2275_v0  ;;  %v2169_v2 = vld [vmem:[%s4090_s1 + $0x8] sm:$0xff]   ;;  %v2170_v3 = vld [vmem:[%s4090_s1 + $0x10] sm:$0xff]  }
   0x2   :  { %540 = vmatpush1.bf16.msra.mxu0 %v2168_v1  ;;  %2155 = vmatpush1.bf16.msra.mxu1 %v2168_v1  ;;  %v2171_v4 = vld [vmem:[%s4090_s1 + $0x18] sm:$0xff]   ;;  %v2179_v5 = vld [vmem:[%s4091_s0 + $0x4] ss:$8 sps:$4 sm:$0xff]   ;;  %v2174_v9 = vld [vmem:[%s4090_s1 + $0x30] sm:$0xff]  }
   0x3   :  { %541 = vmatprep.subr.bf16.mxu0 %v2275_v0  ;;  %2147 = vmatprep.subr.bf16.mxu1 %v2275_v0  ;;  %v2172_v6 = vld [vmem:[%s4090_s1 + $0x20] sm:$0xff]   ;;  %v2173_v7 = vld [vmem:[%s4090_s1 + $0x28] sm:$0xff]   ;;  %v2175_v10 = vld [vmem:[%s4090_s1 + $0x38] sm:$0xff]  }
   0x4   :  { %1793 = vmatprep.mubr.msk.bf16.mxu0 %vm442_vm0, %v2179_v5  ;;  %v2203_v8 = vld [vmem:[%s4091_s0 + $0x104] ss:$8 sps:$4 sm:$0xff]   ;;  %v2177_v12 = vld [vmem:[%s4091_s0] ss:$8 sps:$4 sm:$0xff]   ;;  %v2180_v13 = vld [vmem:[%s4091_s0 + $0x14] ss:$8 sps:$4 sm:$0xff]  }
   0x5   :  { %1809 = vmatprep.mubr.msk.bf16.mxu1 %vm442_vm0, %v2203_v8  ;;  %v2176_v11 = vld [vmem:[%s4090_s1 + $0x40] sm:$0xff]   ;;  %v2207_v15 = vld [vmem:[%s4091_s0 + $0x114] ss:$8 sps:$4 sm:$0xff]   ;;  %v2182_v16 = vld [vmem:[%s4091_s0 + $0x10] ss:$8 sps:$4 sm:$0xff]  }
   0x6   :  { %542 = vmatpush1.bf16.msra.mxu0 %v2169_v2  ;;  %2156 = vmatpush1.bf16.msra.mxu1 %v2169_v2  ;;  %v2201_v14 = vld [vmem:[%s4091_s0 + $0x100] ss:$8 sps:$4 sm:$0xff]   ;;  %v2183_v17 = vld [vmem:[%s4091_s0 + $0x24] ss:$8 sps:$4 sm:$0xff]   ;;  %v2209_v18 = vld [vmem:[%s4091_s0 + $0x110] ss:$8 sps:$4 sm:$0xff]  }
   0x7   :  { %543 = vmatprep.subr.bf16.mxu0 %v2275_v0  ;;  %2148 = vmatprep.subr.bf16.mxu1 %v2275_v0  ;;  %v2213_v19 = vld [vmem:[%s4091_s0 + $0x124] ss:$8 sps:$4 sm:$0xff]   ;;  %v2185_v20 = vld [vmem:[%s4091_s0 + $0x20] ss:$8 sps:$4 sm:$0xff]   ;;  %v2186_v21 = vld [vmem:[%s4091_s0 + $0x34] ss:$8 sps:$4 sm:$0xff]  }
   0x8   :  { %v2215_v22 = vld [vmem:[%s4091_s0 + $0x120] ss:$8 sps:$4 sm:$0xff]   ;;  %v2219_v23 = vld [vmem:[%s4091_s0 + $0x134] ss:$8 sps:$4 sm:$0xff]   ;;  %v2188_v24 = vld [vmem:[%s4091_s0 + $0x30] ss:$8 sps:$4 sm:$0xff]  }
   0x9   :  { %v2221_v25 = vld [vmem:[%s4091_s0 + $0x130] ss:$8 sps:$4 sm:$0xff]   ;;  %v2189_v26 = vld [vmem:[%s4091_s0 + $0x44] ss:$8 sps:$4 sm:$0xff]   ;;  %v2191_v28 = vld [vmem:[%s4091_s0 + $0x40] ss:$8 sps:$4 sm:$0xff]  }
   0xa   :  { %544 = vmatpush1.bf16.msra.mxu0 %v2170_v3  ;;  %2157 = vmatpush1.bf16.msra.mxu1 %v2170_v3  ;;  %v2225_v27 = vld [vmem:[%s4091_s0 + $0x144] ss:$8 sps:$4 sm:$0xff]   ;;  %v2227_v29 = vld [vmem:[%s4091_s0 + $0x140] ss:$8 sps:$4 sm:$0xff]   ;;  %v2192_v30 = vld [vmem:[%s4091_s0 + $0x54] ss:$8 sps:$4 sm:$0xff]  }
   0xb   :  { %545 = vmatprep.subr.bf16.mxu0 %v2275_v0  ;;  %2149 = vmatprep.subr.bf16.mxu1 %v2275_v0  ;;  %v2231_v31 = vld [vmem:[%s4091_s0 + $0x154] ss:$8 sps:$4 sm:$0xff]   ;;  %v2194_v32 = vld [vmem:[%s4091_s0 + $0x50] ss:$8 sps:$4 sm:$0xff]   ;;  %v2195_v34 = vld [vmem:[%s4091_s0 + $0x64] ss:$8 sps:$4 sm:$0xff]  }
   0xc   :  { %v2233_v33 = vld [vmem:[%s4091_s0 + $0x150] ss:$8 sps:$4 sm:$0xff]   ;;  %v2237_v35 = vld [vmem:[%s4091_s0 + $0x164] ss:$8 sps:$4 sm:$0xff]   ;;  %v2197_v36 = vld [vmem:[%s4091_s0 + $0x60] ss:$8 sps:$4 sm:$0xff]  }
   0xd   :  { %v2239_v37 = vld [vmem:[%s4091_s0 + $0x160] ss:$8 sps:$4 sm:$0xff]   ;;  %v2198_v38 = vld [vmem:[%s4091_s0 + $0x74] ss:$8 sps:$4 sm:$0xff]   ;;  %v2200_v40 = vld [vmem:[%s4091_s0 + $0x70] ss:$8 sps:$4 sm:$0xff]  }
   0xe   :  { %546 = vmatpush1.bf16.msra.mxu0 %v2171_v4  ;;  %2158 = vmatpush1.bf16.msra.mxu1 %v2171_v4  ;;  %v2243_v39 = vld [vmem:[%s4091_s0 + $0x174] ss:$8 sps:$4 sm:$0xff]   ;;  %v2245_v41 = vld [vmem:[%s4091_s0 + $0x170] ss:$8 sps:$4 sm:$0xff]   ;;  %v2204_v42 = vld [vmem:[%s4091_s0 + $0x84] ss:$8 sps:$4 sm:$0xff]  }
   0xf   :  { %547 = vmatprep.subr.bf16.mxu0 %v2275_v0  ;;  %2150 = vmatprep.subr.bf16.mxu1 %v2275_v0  ;;  %v2249_v43 = vld [vmem:[%s4091_s0 + $0x184] ss:$8 sps:$4 sm:$0xff]   ;;  %v2206_v44 = vld [vmem:[%s4091_s0 + $0x80] ss:$8 sps:$4 sm:$0xff]   ;;  %v2210_v46 = vld [vmem:[%s4091_s0 + $0x94] ss:$8 sps:$4 sm:$0xff]  }
  0x10   :  { %v2251_v45 = vld [vmem:[%s4091_s0 + $0x180] ss:$8 sps:$4 sm:$0xff]   ;;  %v2252_v47 = vld [vmem:[%s4091_s0 + $0x194] ss:$8 sps:$4 sm:$0xff]   ;;  %v2212_v48 = vld [vmem:[%s4091_s0 + $0x90] ss:$8 sps:$4 sm:$0xff]  }
  0x11   :  { %v2254_v49 = vld [vmem:[%s4091_s0 + $0x190] ss:$8 sps:$4 sm:$0xff]   ;;  %v2216_v50 = vld [vmem:[%s4091_s0 + $0xa4] ss:$8 sps:$4 sm:$0xff]   ;;  %v2218_v52 = vld [vmem:[%s4091_s0 + $0xa0] ss:$8 sps:$4 sm:$0xff]  }
  0x12   :  { %548 = vmatpush1.bf16.msra.mxu0 %v2172_v6  ;;  %2159 = vmatpush1.bf16.msra.mxu1 %v2172_v6  ;;  %v2255_v51 = vld [vmem:[%s4091_s0 + $0x1a4] ss:$8 sps:$4 sm:$0xff]   ;;  %v2257_v53 = vld [vmem:[%s4091_s0 + $0x1a0] ss:$8 sps:$4 sm:$0xff]   ;;  %v2222_v54 = vld [vmem:[%s4091_s0 + $0xb4] ss:$8 sps:$4 sm:$0xff]  }
  0x13   :  { %549 = vmatprep.subr.bf16.mxu0 %v2275_v0  ;;  %2151 = vmatprep.subr.bf16.mxu1 %v2275_v0  ;;  %v2258_v55 = vld [vmem:[%s4091_s0 + $0x1b4] ss:$8 sps:$4 sm:$0xff]   ;;  %v2224_v56 = vld [vmem:[%s4091_s0 + $0xb0] ss:$8 sps:$4 sm:$0xff]   ;;  %v2228_v58 = vld [vmem:[%s4091_s0 + $0xc4] ss:$8 sps:$4 sm:$0xff]  }
  0x14   :  { %v2260_v57 = vld [vmem:[%s4091_s0 + $0x1b0] ss:$8 sps:$4 sm:$0xff]   ;;  %v2261_v59 = vld [vmem:[%s4091_s0 + $0x1c4] ss:$8 sps:$4 sm:$0xff]   ;;  %v2230_v60 = vld [vmem:[%s4091_s0 + $0xc0] ss:$8 sps:$4 sm:$0xff]  }
  0x15   :  { %v2263_v61 = vld [vmem:[%s4091_s0 + $0x1c0] ss:$8 sps:$4 sm:$0xff]   ;;  %v2234_v62 = vld [vmem:[%s4091_s0 + $0xd4] ss:$8 sps:$4 sm:$0xff]   ;;  %v2266_v1 = vld [vmem:[%s4091_s0 + $0x1d0] ss:$8 sps:$4 sm:$0xff]  }
  0x16   :  { %550 = vmatpush1.bf16.msra.mxu0 %v2173_v7  ;;  %2160 = vmatpush1.bf16.msra.mxu1 %v2173_v7  ;;  %v2264_v63 = vld [vmem:[%s4091_s0 + $0x1d4] ss:$8 sps:$4 sm:$0xff]   ;;  %v2240_v2 = vld [vmem:[%s4091_s0 + $0xe4] ss:$8 sps:$4 sm:$0xff]   ;;  %v2242_v4 = vld [vmem:[%s4091_s0 + $0xe0] ss:$8 sps:$4 sm:$0xff]  }
  0x17   :  { %551 = vmatprep.subr.bf16.mxu0 %v2275_v0  ;;  %2152 = vmatprep.subr.bf16.mxu1 %v2275_v0  ;;  %v2267_v3 = vld [vmem:[%s4091_s0 + $0x1e4] ss:$8 sps:$4 sm:$0xff]   ;;  %v2269_v5 = vld [vmem:[%s4091_s0 + $0x1e0] ss:$8 sps:$4 sm:$0xff]   ;;  %v2246_v6 = vld [vmem:[%s4091_s0 + $0xf4] ss:$8 sps:$4 sm:$0xff]  }
  0x18   :  { %v2270_v7 = vld [vmem:[%s4091_s0 + $0x1f4] ss:$8 sps:$4 sm:$0xff]   ;;  %v2248_v8 = vld [vmem:[%s4091_s0 + $0xf0] ss:$8 sps:$4 sm:$0xff]  }
  0x1a   :  { %552 = vmatpush1.bf16.msra.mxu0 %v2174_v9  ;;  %2161 = vmatpush1.bf16.msra.mxu1 %v2174_v9  ;;  %v2272_v9 = vld [vmem:[%s4091_s0 + $0x1f0] ss:$8 sps:$4 sm:$0xff]  }
  0x1b   :  { %553 = vmatprep.subr.bf16.mxu0 %v2275_v0  ;;  %2153 = vmatprep.subr.bf16.mxu1 %v2275_v0 }
  0x1e   :  { %554 = vmatpush1.bf16.msra.mxu0 %v2175_v10  ;;  %2162 = vmatpush1.bf16.msra.mxu1 %v2175_v10 }
  0x1f   :  { %555 = vmatprep.subr.bf16.mxu0 %v2275_v0  ;;  %2154 = vmatprep.subr.bf16.mxu1 %v2275_v0  ;;  %v2236_v0 = vld [vmem:[%s4091_s0 + $0xd0] ss:$8 sps:$4 sm:$0xff]   ;;  %s2276_s0 = smov 64  }
  0x22   :  { %556 = vmatpush1.bf16.msra.mxu0 %v2176_v11  ;;  %2163 = vmatpush1.bf16.msra.mxu1 %v2176_v11 }
  0x25   :  { %572 = vmatmul.mubr.bf16.vlgmr.msra.gmra.mrb[0].mxu0 %v2177_v12  ;;  %700 = vmatmul.mubr.bf16.vlgmr.msra.gmra.mrb[0].mxu1 %v2201_v14 }
  0x26   :  { %1794 = vmatprep.mubr.msk.bf16.mxu0 %vm442_vm0, %v2180_v13  ;;  %1810 = vmatprep.mubr.msk.bf16.mxu1 %vm442_vm0, %v2207_v15 }
  0x2d   :  { %580 = vmatmul.mubr.bf16.gmra.mrb[4].mxu0 %v2182_v16  ;;  %708 = vmatmul.mubr.bf16.gmra.mrb[4].mxu1 %v2209_v18 }
  0x2e   :  { %1795 = vmatprep.mubr.msk.bf16.mxu0 %vm442_vm0, %v2183_v17  ;;  %1811 = vmatprep.mubr.msk.bf16.mxu1 %vm442_vm0, %v2213_v19 }
  0x35   :  { %588 = vmatmul.mubr.bf16.gmra.mrb[8].mxu0 %v2185_v20  ;;  %716 = vmatmul.mubr.bf16.gmra.mrb[8].mxu1 %v2215_v22 }
  0x36   :  { %1796 = vmatprep.mubr.msk.bf16.mxu0 %vm442_vm0, %v2186_v21  ;;  %1812 = vmatprep.mubr.msk.bf16.mxu1 %vm442_vm0, %v2219_v23 }
  0x3d   :  { %596 = vmatmul.mubr.bf16.gmra.mrb[12].mxu0 %v2188_v24  ;;  %724 = vmatmul.mubr.bf16.gmra.mrb[12].mxu1 %v2221_v25 }
  0x3e   :  { %1797 = vmatprep.mubr.msk.bf16.mxu0 %vm442_vm0, %v2189_v26  ;;  %1813 = vmatprep.mubr.msk.bf16.mxu1 %vm442_vm0, %v2225_v27 }
  0x45   :  { %604 = vmatmul.mubr.bf16.gmra.mrb[16].mxu0 %v2191_v28  ;;  %732 = vmatmul.mubr.bf16.gmra.mrb[16].mxu1 %v2227_v29 }
  0x46   :  { %1798 = vmatprep.mubr.msk.bf16.mxu0 %vm442_vm0, %v2192_v30  ;;  %1814 = vmatprep.mubr.msk.bf16.mxu1 %vm442_vm0, %v2231_v31 }
  0x4d   :  { %612 = vmatmul.mubr.bf16.gmra.mrb[20].mxu0 %v2194_v32  ;;  %740 = vmatmul.mubr.bf16.gmra.mrb[20].mxu1 %v2233_v33 }
  0x4e   :  { %1799 = vmatprep.mubr.msk.bf16.mxu0 %vm442_vm0, %v2195_v34  ;;  %1815 = vmatprep.mubr.msk.bf16.mxu1 %vm442_vm0, %v2237_v35 }
  0x55   :  { %620 = vmatmul.mubr.bf16.gmra.mrb[24].mxu0 %v2197_v36  ;;  %748 = vmatmul.mubr.bf16.gmra.mrb[24].mxu1 %v2239_v37 }
  0x56   :  { %1800 = vmatprep.mubr.msk.bf16.mxu0 %vm442_vm0, %v2198_v38  ;;  %1816 = vmatprep.mubr.msk.bf16.mxu1 %vm442_vm0, %v2243_v39 }
  0x5d   :  { %628 = vmatmul.mubr.bf16.gmra.mrb[28].mxu0 %v2200_v40  ;;  %756 = vmatmul.mubr.bf16.gmra.mrb[28].mxu1 %v2245_v41 }
  0x5e   :  { %1801 = vmatprep.mubr.msk.bf16.mxu0 %vm442_vm0, %v2204_v42  ;;  %1817 = vmatprep.mubr.msk.bf16.mxu1 %vm442_vm0, %v2249_v43 }
  0x65   :  { %636 = vmatmul.mubr.bf16.gmra.mrb[32].mxu0 %v2206_v44  ;;  %764 = vmatmul.mubr.bf16.gmra.mrb[32].mxu1 %v2251_v45 }
  0x66   :  { %1802 = vmatprep.mubr.msk.bf16.mxu0 %vm442_vm0, %v2210_v46  ;;  %1818 = vmatprep.mubr.msk.bf16.mxu1 %vm442_vm0, %v2252_v47 }
  0x6d   :  { %644 = vmatmul.mubr.bf16.gmra.mrb[36].mxu0 %v2212_v48  ;;  %772 = vmatmul.mubr.bf16.gmra.mrb[36].mxu1 %v2254_v49 }
  0x6e   :  { %1803 = vmatprep.mubr.msk.bf16.mxu0 %vm442_vm0, %v2216_v50  ;;  %1819 = vmatprep.mubr.msk.bf16.mxu1 %vm442_vm0, %v2255_v51 }
  0x75   :  { %652 = vmatmul.mubr.bf16.gmra.mrb[40].mxu0 %v2218_v52  ;;  %780 = vmatmul.mubr.bf16.gmra.mrb[40].mxu1 %v2257_v53 }
  0x76   :  { %1804 = vmatprep.mubr.msk.bf16.mxu0 %vm442_vm0, %v2222_v54  ;;  %1820 = vmatprep.mubr.msk.bf16.mxu1 %vm442_vm0, %v2258_v55 }
  0x7d   :  { %660 = vmatmul.mubr.bf16.gmra.mrb[44].mxu0 %v2224_v56  ;;  %788 = vmatmul.mubr.bf16.gmra.mrb[44].mxu1 %v2260_v57 }
  0x7e   :  { %1805 = vmatprep.mubr.msk.bf16.mxu0 %vm442_vm0, %v2228_v58  ;;  %1821 = vmatprep.mubr.msk.bf16.mxu1 %vm442_vm0, %v2261_v59 }
  0x85   :  { %668 = vmatmul.mubr.bf16.gmra.mrb[48].mxu0 %v2230_v60  ;;  %796 = vmatmul.mubr.bf16.gmra.mrb[48].mxu1 %v2263_v61 }
  0x86   :  { %1806 = vmatprep.mubr.msk.bf16.mxu0 %vm442_vm0, %v2234_v62  ;;  %1822 = vmatprep.mubr.msk.bf16.mxu1 %vm442_vm0, %v2264_v63 }
  0x8d   :  { %676 = vmatmul.mubr.bf16.gmra.mrb[52].mxu0 %v2236_v0  ;;  %804 = vmatmul.mubr.bf16.gmra.mrb[52].mxu1 %v2266_v1 }
  0x8e   :  { %1807 = vmatprep.mubr.msk.bf16.mxu0 %vm442_vm0, %v2240_v2  ;;  %1823 = vmatprep.mubr.msk.bf16.mxu1 %vm442_vm0, %v2267_v3 }
  0x95   :  { %684 = vmatmul.mubr.bf16.gmra.mrb[56].mxu0 %v2242_v4  ;;  %812 = vmatmul.mubr.bf16.gmra.mrb[56].mxu1 %v2269_v5 }
  0x96   :  { %1808 = vmatprep.mubr.msk.bf16.mxu0 %vm442_vm0, %v2246_v6  ;;  %1824 = vmatprep.mubr.msk.bf16.mxu1 %vm442_vm0, %v2270_v7 }
  0x9d   :  { %692 = vmatmul.mubr.bf16.gmra.mrb[60].mxu0 %v2248_v8  ;;  %820 = vmatmul.mubr.bf16.gmra.mrb[60].mxu1 %v2272_v9 }
  0xf8   :  { %v2555_v10 = vpop.f32.mrb[0].mxu0  ;;  %v2557_v11 = vpop.f32.mrb[0].mxu1 }
  0xf9   :  { %v575_v12 = vpop.f32.mrb[1].mxu0  ;;  %v703_v13 = vpop.f32.mrb[1].mxu1  ;;  %v897_v16 = vmul.f32 %v2555_v10, %v2555_v10 }
  0xfa   :  { %v2559_v14 = vpop.f32.mrb[2].mxu0  ;;  %v2561_v15 = vpop.f32.mrb[2].mxu1 }
  0xfb   :  { %v828_v17 = vadd.f32 %v2559_v14, %v2555_v10  ;;  %v898_v18 = vmul.f32 %v2559_v14, %v2559_v14  ;;  %v578_v19 = vpop.f32.mrb[3].mxu0  ;;  %v706_v20 = vpop.f32.mrb[3].mxu1 }
  0xfd   :  { %v961_v21 = vadd.f32 %v898_v18, %v897_v16 }
 0x100   :  { %v2569_v22 = vpop.f32.mrb[4].mxu0  ;;  %v2571_v23 = vpop.f32.mrb[4].mxu1 }
 0x101   :  { %v829_v24 = vadd.f32 %v828_v17, %v2569_v22  ;;  %v899_v25 = vmul.f32 %v2569_v22, %v2569_v22  ;;  %v583_v26 = vpop.f32.mrb[5].mxu0  ;;  %v711_v27 = vpop.f32.mrb[5].mxu1 }
 0x102   :  { %v2576_v28 = vpop.f32.mrb[6].mxu0  ;;  %v2578_v29 = vpop.f32.mrb[6].mxu1 }
 0x103   :  { %v962_v30 = vadd.f32 %v961_v21, %v899_v25  ;;  %v830_v31 = vadd.f32 %v829_v24, %v2576_v28  ;;  %v900_v32 = vmul.f32 %v2576_v28, %v2576_v28  ;;  %v586_v33 = vpop.f32.mrb[7].mxu0  ;;  %v714_v34 = vpop.f32.mrb[7].mxu1 }
 0x105   :  { %v963_v35 = vadd.f32 %v962_v30, %v900_v32 }
 0x108   :  { %v2583_v36 = vpop.f32.mrb[8].mxu0  ;;  %v2585_v37 = vpop.f32.mrb[8].mxu1 }
 0x109   :  { %v831_v38 = vadd.f32 %v830_v31, %v2583_v36  ;;  %v901_v39 = vmul.f32 %v2583_v36, %v2583_v36  ;;  %v591_v40 = vpop.f32.mrb[9].mxu0  ;;  %v719_v41 = vpop.f32.mrb[9].mxu1 }
 0x10a   :  { %v2590_v42 = vpop.f32.mrb[10].mxu0  ;;  %v2592_v43 = vpop.f32.mrb[10].mxu1 }
 0x10b   :  { %v964_v44 = vadd.f32 %v963_v35, %v901_v39  ;;  %v832_v45 = vadd.f32 %v831_v38, %v2590_v42  ;;  %v902_v46 = vmul.f32 %v2590_v42, %v2590_v42  ;;  %v594_v47 = vpop.f32.mrb[11].mxu0  ;;  %v722_v48 = vpop.f32.mrb[11].mxu1 }
 0x10d   :  { %v965_v49 = vadd.f32 %v964_v44, %v902_v46 }
 0x110   :  { %v2597_v50 = vpop.f32.mrb[12].mxu0  ;;  %v2599_v51 = vpop.f32.mrb[12].mxu1 }
 0x111   :  { %v833_v52 = vadd.f32 %v832_v45, %v2597_v50  ;;  %v903_v53 = vmul.f32 %v2597_v50, %v2597_v50  ;;  %v599_v54 = vpop.f32.mrb[13].mxu0  ;;  %v727_v55 = vpop.f32.mrb[13].mxu1 }
 0x112   :  { %v2604_v56 = vpop.f32.mrb[14].mxu0  ;;  %v2606_v57 = vpop.f32.mrb[14].mxu1 }
 0x113   :  { %v966_v58 = vadd.f32 %v965_v49, %v903_v53  ;;  %v834_v59 = vadd.f32 %v833_v52, %v2604_v56  ;;  %v904_v60 = vmul.f32 %v2604_v56, %v2604_v56  ;;  %v602_v61 = vpop.f32.mrb[15].mxu0  ;;  %v730_v62 = vpop.f32.mrb[15].mxu1 }
 0x115   :  { %v967_v63 = vadd.f32 %v966_v58, %v904_v60 }
 0x118   :  { %v2611_v0 = vpop.f32.mrb[16].mxu0  ;;  %v2613_v1 = vpop.f32.mrb[16].mxu1 }
 0x119   :  { %v835_v2 = vadd.f32 %v834_v59, %v2611_v0  ;;  %v905_v3 = vmul.f32 %v2611_v0, %v2611_v0  ;;  %v607_v4 = vpop.f32.mrb[17].mxu0  ;;  %v735_v5 = vpop.f32.mrb[17].mxu1 }
 0x11a   :  { %v2618_v6 = vpop.f32.mrb[18].mxu0  ;;  %v2620_v7 = vpop.f32.mrb[18].mxu1 }
 0x11b   :  { %v968_v8 = vadd.f32 %v967_v63, %v905_v3  ;;  %v836_v9 = vadd.f32 %v835_v2, %v2618_v6  ;;  %v906_v12 = vmul.f32 %v2618_v6, %v2618_v6  ;;  %v610_v13 = vpop.f32.mrb[19].mxu0  ;;  %v738_v16 = vpop.f32.mrb[19].mxu1 }
 0x11d   :  { %v969_v17 = vadd.f32 %v968_v8, %v906_v12 }
 0x120   :  { %v2625_v18 = vpop.f32.mrb[20].mxu0  ;;  %v2627_v19 = vpop.f32.mrb[20].mxu1 }
 0x121   :  { %v837_v20 = vadd.f32 %v836_v9, %v2625_v18  ;;  %v907_v21 = vmul.f32 %v2625_v18, %v2625_v18  ;;  %v615_v24 = vpop.f32.mrb[21].mxu0  ;;  %v743_v25 = vpop.f32.mrb[21].mxu1 }
 0x122   :  { %v2632_v26 = vpop.f32.mrb[22].mxu0  ;;  %v2634_v27 = vpop.f32.mrb[22].mxu1 }
 0x123   :  { %v970_v30 = vadd.f32 %v969_v17, %v907_v21  ;;  %v838_v31 = vadd.f32 %v837_v20, %v2632_v26  ;;  %v908_v32 = vmul.f32 %v2632_v26, %v2632_v26  ;;  %v618_v33 = vpop.f32.mrb[23].mxu0  ;;  %v746_v34 = vpop.f32.mrb[23].mxu1 }
 0x125   :  { %v971_v35 = vadd.f32 %v970_v30, %v908_v32 }
 0x128   :  { %v2639_v38 = vpop.f32.mrb[24].mxu0  ;;  %v2641_v39 = vpop.f32.mrb[24].mxu1 }
 0x129   :  { %v839_v40 = vadd.f32 %v838_v31, %v2639_v38  ;;  %v909_v41 = vmul.f32 %v2639_v38, %v2639_v38  ;;  %v623_v44 = vpop.f32.mrb[25].mxu0  ;;  %v751_v45 = vpop.f32.mrb[25].mxu1 }
 0x12a   :  { %v2646_v46 = vpop.f32.mrb[26].mxu0  ;;  %v2648_v47 = vpop.f32.mrb[26].mxu1 }
 0x12b   :  { %4150 = vst [vmem:[#allocation2_spill] sm:$0xff] %v2648_v47  ;;  %v972_v48 = vadd.f32 %v971_v35, %v909_v41  ;;  %v840_v49 = vadd.f32 %v839_v40, %v2646_v46  ;;  %v910_v52 = vmul.f32 %v2646_v46, %v2646_v46  ;;  %v626_v53 = vpop.f32.mrb[27].mxu0  ;;  %v754_v54 = vpop.f32.mrb[27].mxu1 }
 0x12d   :  { %v973_v55 = vadd.f32 %v972_v48, %v910_v52 }
 0x130   :  { %v2653_v58 = vpop.f32.mrb[28].mxu0  ;;  %v2655_v59 = vpop.f32.mrb[28].mxu1 }
 0x131   :  { %v841_v60 = vadd.f32 %v840_v49, %v2653_v58  ;;  %v911_v61 = vmul.f32 %v2653_v58, %v2653_v58  ;;  %v631_v62 = vpop.f32.mrb[29].mxu0  ;;  %v759_v63 = vpop.f32.mrb[29].mxu1 }
 0x132   :  { %v2660_v2 = vpop.f32.mrb[30].mxu0  ;;  %v2662_v3 = vpop.f32.mrb[30].mxu1 }
 0x133   :  { %v974_v4 = vadd.f32 %v973_v55, %v911_v61  ;;  %v842_v5 = vadd.f32 %v841_v60, %v2660_v2  ;;  %v912_v8 = vmul.f32 %v2660_v2, %v2660_v2  ;;  %v634_v9 = vpop.f32.mrb[31].mxu0  ;;  %v762_v12 = vpop.f32.mrb[31].mxu1 }
 0x135   :  { %v975_v13 = vadd.f32 %v974_v4, %v912_v8 }
 0x138   :  { %v2667_v16 = vpop.f32.mrb[32].mxu0  ;;  %v2669_v17 = vpop.f32.mrb[32].mxu1 }
 0x139   :  { %v843_v20 = vadd.f32 %v842_v5, %v2667_v16  ;;  %v913_v21 = vmul.f32 %v2667_v16, %v2667_v16  ;;  %v639_v24 = vpop.f32.mrb[33].mxu0  ;;  %v767_v25 = vpop.f32.mrb[33].mxu1 }
 0x13a   :  { %v2674_v30 = vpop.f32.mrb[34].mxu0  ;;  %v2676_v31 = vpop.f32.mrb[34].mxu1 }
 0x13b   :  { %4151 = vst [vmem:[#allocation3_spill] sm:$0xff] %v2674_v30  ;;  %v976_v32 = vadd.f32 %v975_v13, %v913_v21  ;;  %v844_v33 = vadd.f32 %v843_v20, %v2674_v30  ;;  %v914_v34 = vmul.f32 %v2674_v30, %v2674_v30  ;;  %v642_v35 = vpop.f32.mrb[35].mxu0  ;;  %v770_v40 = vpop.f32.mrb[35].mxu1 }
 0x13d   :  { %v977_v41 = vadd.f32 %v976_v32, %v914_v34 }
 0x140   :  { %v2681_v44 = vpop.f32.mrb[36].mxu0  ;;  %v2683_v45 = vpop.f32.mrb[36].mxu1 }
 0x141   :  { %4152 = vst [vmem:[#allocation4_spill] sm:$0xff] %v2681_v44  ;;  %4153 = vst [vmem:[#allocation5_spill] sm:$0xff] %v2683_v45  ;;  %v845_v48 = vadd.f32 %v844_v33, %v2681_v44  ;;  %v915_v49 = vmul.f32 %v2681_v44, %v2681_v44  ;;  %v647_v52 = vpop.f32.mrb[37].mxu0  ;;  %v775_v53 = vpop.f32.mrb[37].mxu1 }
 0x142   :  { %v2688_v54 = vpop.f32.mrb[38].mxu0  ;;  %v2690_v55 = vpop.f32.mrb[38].mxu1 }
 0x143   :  { %4154 = vst [vmem:[#allocation6_spill] sm:$0xff] %v2688_v54  ;;  %4155 = vst [vmem:[#allocation7_spill] sm:$0xff] %v2690_v55  ;;  %v978_v60 = vadd.f32 %v977_v41, %v915_v49  ;;  %v846_v61 = vadd.f32 %v845_v48, %v2688_v54  ;;  %v916_v62 = vmul.f32 %v2688_v54, %v2688_v54  ;;  %v650_v63 = vpop.f32.mrb[39].mxu0  ;;  %v778_v4 = vpop.f32.mrb[39].mxu1 }
 0x145   :  { %v979_v5 = vadd.f32 %v978_v60, %v916_v62 }
 0x148   :  { %v2695_v8 = vpop.f32.mrb[40].mxu0  ;;  %v2697_v9 = vpop.f32.mrb[40].mxu1 }
 0x149   :  { %4156 = vst [vmem:[#allocation8_spill] sm:$0xff] %v2695_v8  ;;  %4157 = vst [vmem:[#allocation9_spill] sm:$0xff] %v2697_v9  ;;  %v847_v12 = vadd.f32 %v846_v61, %v2695_v8  ;;  %v917_v13 = vmul.f32 %v2695_v8, %v2695_v8  ;;  %v655_v20 = vpop.f32.mrb[41].mxu0  ;;  %v783_v21 = vpop.f32.mrb[41].mxu1 }
 0x14a   :  { %v2702_v24 = vpop.f32.mrb[42].mxu0  ;;  %v2704_v25 = vpop.f32.mrb[42].mxu1 }
 0x14b   :  { %4158 = vst [vmem:[#allocation10_spill] sm:$0xff] %v2702_v24  ;;  %4159 = vst [vmem:[#allocation11_spill] sm:$0xff] %v2704_v25  ;;  %v980_v32 = vadd.f32 %v979_v5, %v917_v13  ;;  %v848_v33 = vadd.f32 %v847_v12, %v2702_v24  ;;  %v918_v34 = vmul.f32 %v2702_v24, %v2702_v24  ;;  %v658_v35 = vpop.f32.mrb[43].mxu0  ;;  %v786_v40 = vpop.f32.mrb[43].mxu1 }
 0x14d   :  { %v981_v41 = vadd.f32 %v980_v32, %v918_v34 }
 0x150   :  { %v2709_v48 = vpop.f32.mrb[44].mxu0  ;;  %v2711_v49 = vpop.f32.mrb[44].mxu1 }
 0x151   :  { %4160 = vst [vmem:[#allocation12_spill] sm:$0xff] %v2709_v48  ;;  %4161 = vst [vmem:[#allocation13_spill] sm:$0xff] %v2711_v49  ;;  %v849_v52 = vadd.f32 %v848_v33, %v2709_v48  ;;  %v919_v53 = vmul.f32 %v2709_v48, %v2709_v48  ;;  %v663_v60 = vpop.f32.mrb[45].mxu0  ;;  %v791_v61 = vpop.f32.mrb[45].mxu1 }
 0x152   :  { %v2716_v62 = vpop.f32.mrb[46].mxu0  ;;  %v2718_v63 = vpop.f32.mrb[46].mxu1 }
 0x153   :  { %4162 = vst [vmem:[#allocation14_spill] sm:$0xff] %v2716_v62  ;;  %4163 = vst [vmem:[#allocation15_spill] sm:$0xff] %v2718_v63  ;;  %v982_v4 = vadd.f32 %v981_v41, %v919_v53  ;;  %v850_v5 = vadd.f32 %v849_v52, %v2716_v62  ;;  %v920_v12 = vmul.f32 %v2716_v62, %v2716_v62  ;;  %v666_v13 = vpop.f32.mrb[47].mxu0  ;;  %v794_v20 = vpop.f32.mrb[47].mxu1 }
 0x155   :  { %v983_v21 = vadd.f32 %v982_v4, %v920_v12 }
 0x158   :  { %v2723_v32 = vpop.f32.mrb[48].mxu0  ;;  %v2725_v33 = vpop.f32.mrb[48].mxu1 }
 0x159   :  { %4164 = vst [vmem:[#allocation16_spill] sm:$0xff] %v2723_v32  ;;  %v851_v34 = vadd.f32 %v850_v5, %v2723_v32  ;;  %v921_v35 = vmul.f32 %v2723_v32, %v2723_v32  ;;  %v671_v40 = vpop.f32.mrb[49].mxu0  ;;  %v799_v60 = vpop.f32.mrb[49].mxu1 }
 0x15a   :  { %v2730_v41 = vpop.f32.mrb[50].mxu0  ;;  %v2732_v52 = vpop.f32.mrb[50].mxu1 }
 0x15b   :  { %4165 = vst [vmem:[#allocation17_spill] sm:$0xff] %v2730_v41  ;;  %4166 = vst [vmem:[#allocation18_spill] sm:$0xff] %v2732_v52  ;;  %v984_v53 = vadd.f32 %v983_v21, %v921_v35  ;;  %v852_v61 = vadd.f32 %v851_v34, %v2730_v41  ;;  %v922_v4 = vmul.f32 %v2730_v41, %v2730_v41  ;;  %v674_v12 = vpop.f32.mrb[51].mxu0  ;;  %v802_v13 = vpop.f32.mrb[51].mxu1 }
 0x15d   :  { %v985_v20 = vadd.f32 %v984_v53, %v922_v4 }
 0x160   :  { %v2737_v62 = vpop.f32.mrb[52].mxu0  ;;  %v2739_v5 = vpop.f32.mrb[52].mxu1 }
 0x161   :  { %4167 = vst [vmem:[#allocation19_spill] sm:$0xff] %v2737_v62  ;;  %4168 = vst [vmem:[#allocation20_spill] sm:$0xff] %v2739_v5  ;;  %v853_v40 = vadd.f32 %v852_v61, %v2737_v62  ;;  %v923_v60 = vmul.f32 %v2737_v62, %v2737_v62  ;;  %v679_v32 = vpop.f32.mrb[53].mxu0  ;;  %v807_v48 = vpop.f32.mrb[53].mxu1 }
 0x162   :  { %v2744_v21 = vpop.f32.mrb[54].mxu0  ;;  %v2746_v34 = vpop.f32.mrb[54].mxu1 }
 0x163   :  { %4169 = vst [vmem:[#allocation21_spill] sm:$0xff] %v2744_v21  ;;  %4170 = vst [vmem:[#allocation22_spill] sm:$0xff] %v2746_v34  ;;  %v986_v35 = vadd.f32 %v985_v20, %v923_v60  ;;  %v854_v12 = vadd.f32 %v853_v40, %v2744_v21  ;;  %v924_v53 = vmul.f32 %v2744_v21, %v2744_v21  ;;  %v682_v4 = vpop.f32.mrb[55].mxu0  ;;  %v810_v13 = vpop.f32.mrb[55].mxu1 }
 0x165   :  { %v987_v41 = vadd.f32 %v986_v35, %v924_v53 }
 0x168   :  { %v2751_v24 = vpop.f32.mrb[56].mxu0  ;;  %v2753_v61 = vpop.f32.mrb[56].mxu1 }
 0x169   :  { %4171 = vst [vmem:[#allocation23_spill] sm:$0xff] %v2751_v24  ;;  %4172 = vst [vmem:[#allocation24_spill] sm:$0xff] %v2753_v61  ;;  %v855_v32 = vadd.f32 %v854_v12, %v2751_v24  ;;  %v925_v48 = vmul.f32 %v2751_v24, %v2751_v24  ;;  %v687_v62 = vpop.f32.mrb[57].mxu0  ;;  %v815_v8 = vpop.f32.mrb[57].mxu1 }
 0x16a   :  { %v2758_v20 = vpop.f32.mrb[58].mxu0  ;;  %v2760_v40 = vpop.f32.mrb[58].mxu1 }
 0x16b   :  { %4173 = vst [vmem:[#allocation25_spill] sm:$0xff] %v2758_v20  ;;  %4174 = vst [vmem:[#allocation26_spill] sm:$0xff] %v2760_v40  ;;  %v988_v60 = vadd.f32 %v987_v41, %v925_v48  ;;  %v856_v4 = vadd.f32 %v855_v32, %v2758_v20  ;;  %v926_v35 = vmul.f32 %v2758_v20, %v2758_v20  ;;  %v690_v53 = vpop.f32.mrb[59].mxu0  ;;  %v818_v13 = vpop.f32.mrb[59].mxu1 }
 0x16d   :  { %v989_v21 = vadd.f32 %v988_v60, %v926_v35 }
 0x170   :  { %v2765_v54 = vpop.f32.mrb[60].mxu0  ;;  %v2767_v12 = vpop.f32.mrb[60].mxu1 }
 0x171   :  { %4175 = vst [vmem:[#allocation27_spill] sm:$0xff] %v2765_v54  ;;  %v857_v62 = vadd.f32 %v856_v4, %v2765_v54  ;;  %v927_v8 = vmul.f32 %v2765_v54, %v2765_v54  ;;  %v695_v24 = vpop.f32.mrb[61].mxu0  ;;  %v823_v44 = vpop.f32.mrb[61].mxu1  ;;  %v929_v4 = vmul.f32 %v2557_v11, %v2557_v11 }
 0x172   :  { %v2772_v41 = vpop.f32.mrb[62].mxu0  ;;  %v2774_v32 = vpop.f32.mrb[62].mxu1  ;;  %v930_v44 = vmul.f32 %v2561_v15, %v2561_v15 }
 0x173   :  { %4176 = vst [vmem:[#allocation28_spill] sm:$0xff] %v2772_v41  ;;  %4177 = vst [vmem:[#allocation29_spill] sm:$0xff] %v2774_v32  ;;  %v990_v48 = vadd.f32 %v989_v21, %v927_v8  ;;  %v858_v53 = vadd.f32 %v857_v62, %v2772_v41  ;;  %v928_v60 = vmul.f32 %v2772_v41, %v2772_v41  ;;  %v698_v35 = vpop.f32.mrb[63].mxu0  ;;  %v826_v13 = vpop.f32.mrb[63].mxu1 }
 0x174   :  { %v931_v21 = vmul.f32 %v2571_v23, %v2571_v23  ;;  %v932_v35 = vmul.f32 %v2578_v29, %v2578_v29 }
 0x175   :  { %v859_v20 = vadd.f32 %v858_v53, %v2557_v11  ;;  %v991_v54 = vadd.f32 %v990_v48, %v928_v60  ;;  %v933_v48 = vmul.f32 %v2585_v37, %v2585_v37 }
 0x177   :  { %v860_v24 = vadd.f32 %v859_v20, %v2561_v15  ;;  %v992_v30 = vadd.f32 %v991_v54, %v929_v4  ;;  %v934_v54 = vmul.f32 %v2592_v43, %v2592_v43 }
 0x179   :  { %v861_v62 = vadd.f32 %v860_v24, %v2571_v23  ;;  %v993_v8 = vadd.f32 %v992_v30, %v930_v44  ;;  %v935_v30 = vmul.f32 %v2599_v51, %v2599_v51 }
 0x17b   :  { %v862_v13 = vadd.f32 %v861_v62, %v2578_v29  ;;  %v994_v41 = vadd.f32 %v993_v8, %v931_v21  ;;  %v936_v21 = vmul.f32 %v2606_v57, %v2606_v57 }
 0x17d   :  { %v863_v53 = vadd.f32 %v862_v13, %v2585_v37  ;;  %v995_v60 = vadd.f32 %v994_v41, %v932_v35  ;;  %v937_v41 = vmul.f32 %v2613_v1, %v2613_v1 }
 0x17f   :  { %v864_v20 = vadd.f32 %v863_v53, %v2592_v43  ;;  %v996_v4 = vadd.f32 %v995_v60, %v933_v48  ;;  %v938_v48 = vmul.f32 %v2620_v7, %v2620_v7 }
 0x181   :  { %v865_v44 = vadd.f32 %v864_v20, %v2599_v51  ;;  %v997_v24 = vadd.f32 %v996_v4, %v934_v54  ;;  %v939_v54 = vmul.f32 %v2627_v19, %v2627_v19 }
 0x183   :  { %v866_v62 = vadd.f32 %v865_v44, %v2606_v57  ;;  %v998_v8 = vadd.f32 %v997_v24, %v935_v30  ;;  %v940_v30 = vmul.f32 %v2634_v27, %v2634_v27 }
 0x185   :  { %v999_v35 = vadd.f32 %v998_v8, %v936_v21  ;;  %v867_v13 = vadd.f32 %v866_v62, %v2613_v1  ;;  %v941_v21 = vmul.f32 %v2641_v39, %v2641_v39 }
 0x187   :  { %v868_v53 = vadd.f32 %v867_v13, %v2620_v7  ;;  %v1000_v60 = vadd.f32 %v999_v35, %v937_v41  ;;  %v942_v41 = vmul.f32 %v2648_v47, %v2648_v47 }
 0x189   :  { %v869_v20 = vadd.f32 %v868_v53, %v2627_v19  ;;  %v1001_v4 = vadd.f32 %v1000_v60, %v938_v48  ;;  %v943_v48 = vmul.f32 %v2655_v59, %v2655_v59 }
 0x18b   :  { %v870_v44 = vadd.f32 %v869_v20, %v2634_v27  ;;  %v1002_v24 = vadd.f32 %v1001_v4, %v939_v54  ;;  %v944_v54 = vmul.f32 %v2662_v3, %v2662_v3 }
 0x18d   :  { %v871_v62 = vadd.f32 %v870_v44, %v2641_v39  ;;  %v1003_v8 = vadd.f32 %v1002_v24, %v940_v30  ;;  %v945_v44 = vmul.f32 %v2669_v17, %v2669_v17 }
 0x18f   :  { %v872_v35 = vadd.f32 %v871_v62, %v2648_v47  ;;  %v1004_v13 = vadd.f32 %v1003_v8, %v941_v21  ;;  %v946_v8 = vmul.f32 %v2676_v31, %v2676_v31 }
 0x191   :  { %v873_v53 = vadd.f32 %v872_v35, %v2655_v59  ;;  %v1005_v60 = vadd.f32 %v1004_v13, %v942_v41  ;;  %v947_v13 = vmul.f32 %v2683_v45, %v2683_v45 }
 0x193   :  { %v874_v20 = vadd.f32 %v873_v53, %v2662_v3  ;;  %v1006_v4 = vadd.f32 %v1005_v60, %v943_v48  ;;  %v948_v60 = vmul.f32 %v2690_v55, %v2690_v55 }
 0x195   :  { %v875_v30 = vadd.f32 %v874_v20, %v2669_v17  ;;  %v1007_v24 = vadd.f32 %v1006_v4, %v944_v54  ;;  %v949_v4 = vmul.f32 %v2697_v9, %v2697_v9 }
 0x197   :  { %v1008_v62 = vadd.f32 %v1007_v24, %v945_v44  ;;  %v876_v21 = vadd.f32 %v875_v30, %v2676_v31  ;;  %v950_v24 = vmul.f32 %v2704_v25, %v2704_v25 }
 0x199   :  { %v1009_v35 = vadd.f32 %v1008_v62, %v946_v8  ;;  %v877_v41 = vadd.f32 %v876_v21, %v2683_v45  ;;  %v951_v8 = vmul.f32 %v2711_v49, %v2711_v49  ;;  %v4199_v45 = vld [vmem:[#allocation29_spill] sm:$0xff] }
 0x19b   :  { %v1010_v53 = vadd.f32 %v1009_v35, %v947_v13  ;;  %v878_v48 = vadd.f32 %v877_v41, %v2690_v55  ;;  %v952_v13 = vmul.f32 %v2718_v63, %v2718_v63 }
 0x19d   :  { %v1011_v20 = vadd.f32 %v1010_v53, %v948_v60  ;;  %v879_v54 = vadd.f32 %v878_v48, %v2697_v9  ;;  %v953_v60 = vmul.f32 %v2725_v33, %v2725_v33 }
 0x19f   :  { %v1012_v30 = vadd.f32 %v1011_v20, %v949_v4  ;;  %v880_v44 = vadd.f32 %v879_v54, %v2704_v25  ;;  %v954_v4 = vmul.f32 %v2732_v52, %v2732_v52 }
 0x1a1   :  { %v1013_v62 = vadd.f32 %v1012_v30, %v950_v24  ;;  %v881_v21 = vadd.f32 %v880_v44, %v2711_v49  ;;  %v955_v24 = vmul.f32 %v2739_v5, %v2739_v5 }
 0x1a3   :  { %v1014_v35 = vadd.f32 %v1013_v62, %v951_v8  ;;  %v882_v41 = vadd.f32 %v881_v21, %v2718_v63  ;;  %v956_v8 = vmul.f32 %v2746_v34, %v2746_v34 }
 0x1a5   :  { %v1015_v53 = vadd.f32 %v1014_v35, %v952_v13  ;;  %v883_v48 = vadd.f32 %v882_v41, %v2725_v33  ;;  %v957_v13 = vmul.f32 %v2753_v61, %v2753_v61 }
 0x1a7   :  { %v1016_v20 = vadd.f32 %v1015_v53, %v953_v60  ;;  %v884_v54 = vadd.f32 %v883_v48, %v2732_v52  ;;  %v958_v60 = vmul.f32 %v2760_v40, %v2760_v40 }
 0x1a9   :  { %v1017_v30 = vadd.f32 %v1016_v20, %v954_v4  ;;  %v885_v44 = vadd.f32 %v884_v54, %v2739_v5  ;;  %v959_v20 = vmul.f32 %v2767_v12, %v2767_v12 }
 0x1ab   :  { %v1018_v62 = vadd.f32 %v1017_v30, %v955_v24  ;;  %v886_v21 = vadd.f32 %v885_v44, %v2746_v34  ;;  %v960_v24 = vmul.f32 %v2774_v32, %v2774_v32 }
 0x1ad   :  { %v1019_v35 = vadd.f32 %v1018_v62, %v956_v8  ;;  %v887_v41 = vadd.f32 %v886_v21, %v2753_v61 }
 0x1af   :  { %v1020_v53 = vadd.f32 %v1019_v35, %v957_v13  ;;  %v888_v48 = vadd.f32 %v887_v41, %v2760_v40 }
 0x1b1   :  { %v1021_v54 = vadd.f32 %v1020_v53, %v958_v60  ;;  %v889_v4 = vadd.f32 %v888_v48, %v2767_v12 }
 0x1b3   :  { %v1022_v30 = vadd.f32 %v1021_v54, %v959_v20  ;;  %v890_v44 = vadd.f32 %v889_v4, %v2774_v32 }
 0x1b5   :  { %v891_v62 = vrot.slane %v890_v44, 4  ;;  %v1023_v21 = vadd.f32 %v1022_v30, %v960_v24 }
 0x1b7   :  { %v892_v8 = vadd.f32 %v891_v62, %v890_v44  ;;  %v1024_v35 = vrot.slane %v1023_v21, 4 }
 0x1b9   :  { %v893_v41 = vrot.slane %v892_v8, 2  ;;  %v1025_v13 = vadd.f32 %v1024_v35, %v1023_v21 }
 0x1bb   :  { %v894_v61 = vadd.f32 %v893_v41, %v892_v8  ;;  %v1026_v40 = vrot.slane %v1025_v13, 2 }
 0x1bd   :  { %v895_v34 = vrot.slane %v894_v61, 1  ;;  %v1027_v5 = vadd.f32 %v1026_v40, %v1025_v13 }
 0x1bf   :  { %v896_v52 = vadd.f32 %v895_v34, %v894_v61  ;;  %v1028_v53 = vrot.slane %v1027_v5, 1  ;;  %v1052_v34 = vlaneseq }
 0x1c1   :  { %1036 = vrot.lane.b32.xlu1 %v896_v52, %s2276_s0  ;;  %1030 = vrot.lane.b32.xlu0 %v896_v52, %s2277_s26  ;;  %v1029_v48 = vadd.f32 %v1028_v53, %v1027_v5  ;;  %v2875_v21 = vshrl.u32 %v1052_v34, 7  ;;  %v4195_v34 = vld [vmem:[#allocation22_spill] sm:$0xff] }
 0x1c3   :  { %v4137_v41 = vsub.s32 0, %v2875_v21 }
 0x1c5   :  { %1039 = vrot.lane.b32.xlu1 %v1029_v48, %s2276_s0  ;;  %1033 = vrot.lane.b32.xlu0 %v1029_v48, %s2277_s26 }
 0x1c9   :  { %1045 = vrot.lane.b32.xlu1 %v1029_v48, %s2278_s27  ;;  %1042 = vrot.lane.b32.xlu0 %v896_v52, %s2278_s27 }
 0x233   :  { %v1031_v60 = vpop.permute.xlu0 %1030  ;;  %v1037_v20 = vpop.permute.xlu1 %1036 }
 0x234   :  { %v1032_v4 = vadd.f32 %v1031_v60, %v896_v52  ;;  %v4197_v60 = vld [vmem:[#allocation24_spill] sm:$0xff] }
 0x236   :  { %v1038_v40 = vadd.f32 %v1037_v20, %v1032_v4  ;;  %v4190_v4 = vld [vmem:[#allocation25_spill] sm:$0xff]  ;;  %v4196_v20 = vsub.s32 0, %v2875_v21 }
 0x237   :  { %v1034_v54 = vpop.permute.xlu0 %1033  ;;  %v1040_v30 = vpop.permute.xlu1 %1039 }
 0x238   :  { %v1035_v24 = vadd.f32 %v1034_v54, %v1029_v48  ;;  %v4192_v54 = vld [vmem:[#allocation28_spill] sm:$0xff]  ;;  %v4198_v48 = vld [vmem:[#allocation26_spill] sm:$0xff] }
 0x23a   :  { %v1041_v62 = vadd.f32 %v1040_v30, %v1035_v24  ;;  %v4187_v24 = vld [vmem:[#allocation19_spill] sm:$0xff] }
 0x23b   :  { %v1043_v44 = vpop.permute.xlu0 %1042  ;;  %v1046_v8 = vpop.permute.xlu1 %1045  ;;  %v4189_v30 = vld [vmem:[#allocation23_spill] sm:$0xff] }
 0x23c   :  { %v1044_v61 = vadd.f32 %v1043_v44, %v1038_v40  ;;  %v1047_v35 = vadd.f32 %v1046_v8, %v1041_v62  ;;  %v4178_v62 = vld [vmem:[#allocation3_spill] sm:$0xff]  ;;  %v4179_v8 = vld [vmem:[#allocation4_spill] sm:$0xff]  ;;  %v4186_v40 = vld [vmem:[#allocation17_spill] sm:$0xff] }
 0x23d   :  { %v4188_v44 = vld [vmem:[#allocation21_spill] sm:$0xff] }
 0x23e   :  { %v1048_v5 = vmul.f32 0.00048828125, %v1044_v61  ;;  %v1049_v53 = vmul.f32 0.00048828125, %v1047_v35  ;;  %v4181_v35 = vld [vmem:[#allocation8_spill] sm:$0xff] }
 0x240   :  { %v1050_v13 = vmul.f32 %v1048_v5, %v1048_v5  ;;  %v2880_v32 = vrot.slane %v1048_v5, %v4137_v41  ;;  %v4180_v5 = vld [vmem:[#allocation6_spill] sm:$0xff] }
 0x242   :  { %v1051_v52 = vsub.f32 %v1049_v53, %v1050_v13  ;;  %v4182_v13 = vld [vmem:[#allocation10_spill] sm:$0xff]  ;;  %v4200_v55 = vsub.f32 %v2555_v10, %v2880_v32  ;;  %v4203_v53 = vsub.f32 %v2576_v28, %v2880_v32 }
 0x244   :  { %v1120_v61 = vadd.f32 1e-05, %v1051_v52  ;;  %v4191_v52 = vld [vmem:[#allocation27_spill] sm:$0xff] }
 0x246   :  { %2273 = vrsqrt.f32 %v1120_v61  ;;  %v4194_v61 = vld [vmem:[#allocation20_spill] sm:$0xff] }
 0x250   :  { %v2274_v47 = vpop.eup %2273 }
 0x251   :  { %v3004_v25 = vrot.slane %v2274_v47, %v4196_v20  ;;  %v4201_v47 = vsub.f32 %v2559_v14, %v2880_v32  ;;  %v4202_v20 = vsub.f32 %v2569_v22, %v2880_v32 }
 0x253   :  { %v3018_v9 = vmul.f32 %v3004_v25, %v4200_v55  ;;  %v3024_v21 = vmul.f32 %v3004_v25, %v4201_v47  ;;  %v3030_v41 = vmul.f32 %v3004_v25, %v4202_v20  ;;  %v3036_v10 = vmul.f32 %v3004_v25, %v4203_v53 }
 0x254   :  { %v4204_v55 = vsub.f32 %v2583_v36, %v2880_v32  ;;  %v4205_v47 = vsub.f32 %v2590_v42, %v2880_v32  ;;  %v4206_v20 = vsub.f32 %v2597_v50, %v2880_v32  ;;  %v4207_v53 = vsub.f32 %v2604_v56, %v2880_v32 }
 0x256   :  { %v3042_v14 = vmul.f32 %v3004_v25, %v4204_v55  ;;  %v3048_v22 = vmul.f32 %v3004_v25, %v4205_v47  ;;  %v3054_v28 = vmul.f32 %v3004_v25, %v4206_v20  ;;  %v3060_v36 = vmul.f32 %v3004_v25, %v4207_v53 }
 0x257   :  { %v4208_v55 = vsub.f32 %v2611_v0, %v2880_v32  ;;  %v4209_v47 = vsub.f32 %v2618_v6, %v2880_v32  ;;  %v4210_v20 = vsub.f32 %v2625_v18, %v2880_v32  ;;  %v4211_v53 = vsub.f32 %v2632_v26, %v2880_v32 }
 0x259   :  { %v3066_v42 = vmul.f32 %v3004_v25, %v4208_v55  ;;  %v3072_v50 = vmul.f32 %v3004_v25, %v4209_v47  ;;  %v3078_v56 = vmul.f32 %v3004_v25, %v4210_v20  ;;  %v3084_v0 = vmul.f32 %v3004_v25, %v4211_v53 }
 0x25a   :  { %v4212_v55 = vsub.f32 %v2639_v38, %v2880_v32  ;;  %v4213_v47 = vsub.f32 %v2646_v46, %v2880_v32  ;;  %v4214_v20 = vsub.f32 %v2653_v58, %v2880_v32  ;;  %v4215_v53 = vsub.f32 %v2660_v2, %v2880_v32 }
 0x25c   :  { %v3090_v6 = vmul.f32 %v3004_v25, %v4212_v55  ;;  %v3096_v18 = vmul.f32 %v3004_v25, %v4213_v47  ;;  %v3102_v26 = vmul.f32 %v3004_v25, %v4214_v20  ;;  %v3108_v38 = vmul.f32 %v3004_v25, %v4215_v53 }
 0x25d   :  { %v4216_v55 = vsub.f32 %v2667_v16, %v2880_v32  ;;  %v4217_v47 = vsub.f32 %v4178_v62, %v2880_v32  ;;  %v4218_v20 = vsub.f32 %v4179_v8, %v2880_v32  ;;  %v4219_v53 = vsub.f32 %v4180_v5, %v2880_v32 }
 0x25f   :  { %v3114_v46 = vmul.f32 %v3004_v25, %v4216_v55  ;;  %v3120_v58 = vmul.f32 %v3004_v25, %v4217_v47  ;;  %v3126_v2 = vmul.f32 %v3004_v25, %v4218_v20  ;;  %v3132_v16 = vmul.f32 %v3004_v25, %v4219_v53  ;;  %v4223_v20 = vld [vmem:[#allocation12_spill] sm:$0xff]  ;;  %v4225_v53 = vld [vmem:[#allocation14_spill] sm:$0xff] }
 0x260   :  { %v4220_v55 = vsub.f32 %v4181_v35, %v2880_v32  ;;  %v4222_v47 = vsub.f32 %v4182_v13, %v2880_v32  ;;  %v4224_v63 = vsub.f32 %v4223_v20, %v2880_v32  ;;  %v4226_v49 = vsub.f32 %v4225_v53, %v2880_v32 }
 0x262   :  { %v3138_v62 = vmul.f32 %v3004_v25, %v4220_v55  ;;  %v3144_v8 = vmul.f32 %v3004_v25, %v4222_v47  ;;  %v3150_v5 = vmul.f32 %v3004_v25, %v4224_v63  ;;  %v3156_v35 = vmul.f32 %v3004_v25, %v4226_v49  ;;  %v4227_v55 = vld [vmem:[#allocation16_spill] sm:$0xff] }
 0x263   :  { %v4229_v47 = vsub.f32 %v4186_v40, %v2880_v32  ;;  %v4230_v63 = vsub.f32 %v4187_v24, %v2880_v32  ;;  %v4231_v49 = vsub.f32 %v4188_v44, %v2880_v32 }
 0x264   :  { %4221 = vst [vmem:[#allocation3_spill] sm:$0xff] %v3138_v62  ;;  %v4228_v62 = vsub.f32 %v4227_v55, %v2880_v32 }
 0x265   :  { %v3168_v20 = vmul.f32 %v3004_v25, %v4229_v47  ;;  %v3174_v53 = vmul.f32 %v3004_v25, %v4230_v63  ;;  %v3180_v55 = vmul.f32 %v3004_v25, %v4231_v49  ;;  %v4233_v47 = vsub.f32 %v4190_v4, %v2880_v32 }
 0x266   :  { %v3162_v13 = vmul.f32 %v3004_v25, %v4228_v62  ;;  %v4232_v62 = vsub.f32 %v4189_v30, %v2880_v32  ;;  %v4234_v63 = vsub.f32 %v4191_v52, %v2880_v32  ;;  %v4235_v49 = vsub.f32 %v4192_v54, %v2880_v32 }
 0x267   :  { %v3192_v24 = vmul.f32 %v3004_v25, %v4233_v47  ;;  %v4237_v47 = vsub.f32 %v2561_v15, %v2880_v32 }
 0x268   :  { %v3186_v40 = vmul.f32 %v3004_v25, %v4232_v62  ;;  %v3198_v44 = vmul.f32 %v3004_v25, %v4234_v63  ;;  %v3204_v30 = vmul.f32 %v3004_v25, %v4235_v49  ;;  %v4236_v62 = vsub.f32 %v2557_v11, %v2880_v32 }
 0x269   :  { %v3216_v52 = vmul.f32 %v3004_v25, %v4237_v47  ;;  %v4238_v63 = vsub.f32 %v2571_v23, %v2880_v32  ;;  %v4239_v49 = vsub.f32 %v2578_v29, %v2880_v32  ;;  %v4241_v47 = vsub.f32 %v2592_v43, %v2880_v32 }
 0x26a   :  { %v3210_v4 = vmul.f32 %v3004_v25, %v4236_v62  ;;  %v4240_v62 = vsub.f32 %v2585_v37, %v2880_v32 }
 0x26b   :  { %v3222_v54 = vmul.f32 %v3004_v25, %v4238_v63  ;;  %v3228_v11 = vmul.f32 %v3004_v25, %v4239_v49  ;;  %v3240_v23 = vmul.f32 %v3004_v25, %v4241_v47  ;;  %v4242_v63 = vsub.f32 %v2599_v51, %v2880_v32 }
 0x26c   :  { %v3234_v15 = vmul.f32 %v3004_v25, %v4240_v62  ;;  %v4243_v49 = vsub.f32 %v2606_v57, %v2880_v32  ;;  %v4244_v62 = vsub.f32 %v2613_v1, %v2880_v32  ;;  %v4245_v47 = vsub.f32 %v2620_v7, %v2880_v32 }
 0x26d   :  { %v3246_v29 = vmul.f32 %v3004_v25, %v4242_v63  ;;  %v4247_v63 = vsub.f32 %v2627_v19, %v2880_v32 }
 0x26e   :  { %v3252_v37 = vmul.f32 %v3004_v25, %v4243_v49  ;;  %v3258_v43 = vmul.f32 %v3004_v25, %v4244_v62  ;;  %v3264_v51 = vmul.f32 %v3004_v25, %v4245_v47  ;;  %v4248_v49 = vsub.f32 %v2634_v27, %v2880_v32  ;;  %v4250_v47 = vld [vmem:[#allocation2_spill] sm:$0xff] }
 0x26f   :  { %v3270_v57 = vmul.f32 %v3004_v25, %v4247_v63  ;;  %v4249_v62 = vsub.f32 %v2641_v39, %v2880_v32  ;;  %v4253_v63 = vsub.f32 %v2655_v59, %v2880_v32 }
 0x270   :  { %4246 = vst [vmem:[#allocation4_spill] sm:$0xff] %v3264_v51  ;;  %v3276_v1 = vmul.f32 %v3004_v25, %v4248_v49  ;;  %v4251_v51 = vsub.f32 %v4250_v47, %v2880_v32  ;;  %v4255_v49 = vsub.f32 %v2662_v3, %v2880_v32 }
 0x271   :  { %v3282_v7 = vmul.f32 %v3004_v25, %v4249_v62  ;;  %v3294_v27 = vmul.f32 %v3004_v25, %v4253_v63  ;;  %v4257_v62 = vsub.f32 %v2669_v17, %v2880_v32  ;;  %v4261_v63 = vld [vmem:[#allocation5_spill] sm:$0xff] }
 0x272   :  { %v3288_v19 = vmul.f32 %v3004_v25, %v4251_v51  ;;  %v3300_v39 = vmul.f32 %v3004_v25, %v4255_v49  ;;  %v4259_v51 = vsub.f32 %v2676_v31, %v2880_v32  ;;  %v4264_v49 = vld [vmem:[#allocation7_spill] sm:$0xff]  ;;  %v4267_v31 = vld [vmem:[#allocation9_spill] sm:$0xff] }
 0x273   :  { %4254 = vst [vmem:[#allocation8_spill] sm:$0xff] %v3294_v27  ;;  %v3306_v47 = vmul.f32 %v3004_v25, %v4257_v62  ;;  %v4262_v27 = vsub.f32 %v4261_v63, %v2880_v32  ;;  %v3329_v62 = vld [vmem:[%s4092_s2] ss:$0 sm:$0xff]  ;;  %v4269_v63 = vld [vmem:[#allocation11_spill] sm:$0xff] }
 0x274   :  { %4252 = vst [vmem:[#allocation6_spill] sm:$0xff] %v3288_v19  ;;  %4256 = vst [vmem:[#allocation10_spill] sm:$0xff] %v3300_v39  ;;  %v3312_v59 = vmul.f32 %v3004_v25, %v4259_v51  ;;  %v4265_v39 = vsub.f32 %v4264_v49, %v2880_v32  ;;  %v4268_v51 = vsub.f32 %v4267_v31, %v2880_v32  ;;  %v4272_v49 = vld [vmem:[#allocation13_spill] sm:$0xff] }
 0x275   :  { %4258 = vst [vmem:[#allocation17_spill] sm:$0xff] %v3306_v47  ;;  %v3318_v3 = vmul.f32 %v3004_v25, %v4262_v27  ;;  %v4270_v27 = vsub.f32 %v4269_v63, %v2880_v32  ;;  %v4274_v47 = vld [vmem:[#allocation15_spill] sm:$0xff] }
 0x276   :  { %4260 = vst [vmem:[#allocation19_spill] sm:$0xff] %v3312_v59  ;;  %v3324_v17 = vmul.f32 %v3004_v25, %v4265_v39  ;;  %v3335_v59 = vmul.f32 %v3004_v25, %v4268_v51  ;;  %v4273_v39 = vsub.f32 %v4272_v49, %v2880_v32  ;;  %v4275_v19 = vsub.f32 %v4274_v47, %v2880_v32 }
 0x277   :  { %4263 = vst [vmem:[#allocation21_spill] sm:$0xff] %v3318_v3  ;;  %v3341_v3 = vmul.f32 %v3004_v25, %v4270_v27  ;;  %v4276_v51 = vsub.f32 %v2725_v33, %v2880_v32  ;;  %v4277_v27 = vld [vmem:[#allocation18_spill] sm:$0xff] }
 0x278   :  { %4266 = vst [vmem:[#allocation23_spill] sm:$0xff] %v3324_v17  ;;  %v3347_v17 = vmul.f32 %v3004_v25, %v4273_v39  ;;  %v3353_v31 = vmul.f32 %v3004_v25, %v4275_v19  ;;  %v4279_v39 = vsub.f32 %v4194_v61, %v2880_v32  ;;  %v4280_v19 = vsub.f32 %v4195_v34, %v2880_v32 }
 0x279   :  { %4271 = vst [vmem:[#allocation25_spill] sm:$0xff] %v3341_v3  ;;  %v3359_v63 = vmul.f32 %v3004_v25, %v4276_v51  ;;  %v4278_v3 = vsub.f32 %v4277_v27, %v2880_v32  ;;  %v4281_v51 = vsub.f32 %v4197_v60, %v2880_v32 }
 0x27a   :  { %v3371_v47 = vmul.f32 %v3004_v25, %v4279_v39  ;;  %v3377_v33 = vmul.f32 %v3004_v25, %v4280_v19  ;;  %v4283_v39 = vsub.f32 %v2767_v12, %v2880_v32  ;;  %v4284_v19 = vsub.f32 %v4199_v45, %v2880_v32 }
 0x27b   :  { %v3365_v49 = vmul.f32 %v3004_v25, %v4278_v3  ;;  %v3383_v27 = vmul.f32 %v3004_v25, %v4281_v51  ;;  %v4282_v3 = vsub.f32 %v4198_v48, %v2880_v32  ;;  %v3405_v51 = vmul.f32 %v3329_v62, %v3018_v9 }
 0x27c   :  { %v3395_v34 = vmul.f32 %v3004_v25, %v4283_v39  ;;  %v3401_v60 = vmul.f32 %v3004_v25, %v4284_v19  ;;  %v3409_v48 = vmul.f32 %v3329_v62, %v3024_v21  ;;  %v3413_v12 = vmul.f32 %v3329_v62, %v3030_v41  ;;  %v4286_v39 = vld [vmem:[#allocation4_spill] sm:$0xff]  ;;  %v4291_v19 = vld [vmem:[#allocation6_spill] sm:$0xff] }
 0x27d   :  { %v3389_v61 = vmul.f32 %v3004_v25, %v4282_v3  ;;  %v3417_v3 = vmul.f32 %v3329_v62, %v3036_v10  ;;  %v3421_v45 = vmul.f32 %v3329_v62, %v3042_v14  ;;  %v3425_v9 = vmul.f32 %v3329_v62, %v3048_v22 }
 0x27e   :  { %v3429_v25 = vmul.f32 %v3329_v62, %v3054_v28  ;;  %v3433_v32 = vmul.f32 %v3329_v62, %v3060_v36  ;;  %v3437_v41 = vmul.f32 %v3329_v62, %v3066_v42  ;;  %v3441_v21 = vmul.f32 %v3329_v62, %v3072_v50 }
 0x27f   :  { %v3445_v10 = vmul.f32 %v3329_v62, %v3078_v56  ;;  %v3449_v14 = vmul.f32 %v3329_v62, %v3084_v0  ;;  %v3453_v22 = vmul.f32 %v3329_v62, %v3090_v6  ;;  %v3457_v28 = vmul.f32 %v3329_v62, %v3096_v18  ;;  %v4285_v18 = vld [vmem:[#allocation3_spill] sm:$0xff] }
 0x280   :  { %v3461_v36 = vmul.f32 %v3329_v62, %v3102_v26  ;;  %v3465_v42 = vmul.f32 %v3329_v62, %v3108_v38  ;;  %v3469_v50 = vmul.f32 %v3329_v62, %v3114_v46  ;;  %v3473_v56 = vmul.f32 %v3329_v62, %v3120_v58 }
 0x281   :  { %v3477_v0 = vmul.f32 %v3329_v62, %v3126_v2  ;;  %v3481_v6 = vmul.f32 %v3329_v62, %v3132_v16  ;;  %v3485_v26 = vmul.f32 %v3329_v62, %v4285_v18  ;;  %v3489_v38 = vmul.f32 %v3329_v62, %v3144_v8  ;;  %v4293_v18 = vld [vmem:[#allocation8_spill] sm:$0xff] }
 0x282   :  { %v3493_v46 = vmul.f32 %v3329_v62, %v3150_v5  ;;  %v3497_v58 = vmul.f32 %v3329_v62, %v3156_v35  ;;  %v3501_v2 = vmul.f32 %v3329_v62, %v3162_v13  ;;  %v3505_v16 = vmul.f32 %v3329_v62, %v3168_v20 }
 0x283   :  { %v3509_v8 = vmul.f32 %v3329_v62, %v3174_v53  ;;  %v3513_v5 = vmul.f32 %v3329_v62, %v3180_v55  ;;  %v3517_v35 = vmul.f32 %v3329_v62, %v3186_v40  ;;  %v3521_v13 = vmul.f32 %v3329_v62, %v3192_v24 }
 0x284   :  { %v3525_v20 = vmul.f32 %v3329_v62, %v3198_v44  ;;  %v3529_v53 = vmul.f32 %v3329_v62, %v3204_v30  ;;  %v3533_v55 = vmul.f32 %v3329_v62, %v3210_v4  ;;  %v3537_v40 = vmul.f32 %v3329_v62, %v3216_v52 }
 0x285   :  { %v3541_v24 = vmul.f32 %v3329_v62, %v3222_v54  ;;  %v3545_v44 = vmul.f32 %v3329_v62, %v3228_v11  ;;  %v3549_v30 = vmul.f32 %v3329_v62, %v3234_v15  ;;  %v3553_v4 = vmul.f32 %v3329_v62, %v3240_v23 }
 0x286   :  { %v3557_v52 = vmul.f32 %v3329_v62, %v3246_v29  ;;  %v3561_v54 = vmul.f32 %v3329_v62, %v3252_v37  ;;  %v3565_v11 = vmul.f32 %v3329_v62, %v3258_v43  ;;  %v3569_v15 = vmul.f32 %v3329_v62, %v4286_v39 }
 0x287   :  { %v3573_v23 = vmul.f32 %v3329_v62, %v3270_v57  ;;  %v3577_v29 = vmul.f32 %v3329_v62, %v3276_v1  ;;  %v3581_v37 = vmul.f32 %v3329_v62, %v3282_v7  ;;  %v3585_v43 = vmul.f32 %v3329_v62, %v4291_v19 }
 0x288   :  { %4287 = vst [vmem:[#allocation27_spill] sm:$0xff] %v3569_v15  ;;  %v3589_v39 = vmul.f32 %v3329_v62, %v4293_v18  ;;  %v4294_v15 = vld [vmem:[#allocation10_spill] sm:$0xff] }
 0x289   :  { %4288 = vst [vmem:[#allocation28_spill] sm:$0xff] %v3573_v23  ;;  %4289 = vst [vmem:[#allocation20_spill] sm:$0xff] %v3577_v29  ;;  %v3593_v57 = vmul.f32 %v3329_v62, %v4294_v15  ;;  %v4295_v23 = vld [vmem:[#allocation17_spill] sm:$0xff]  ;;  %v4297_v29 = vld [vmem:[#allocation19_spill] sm:$0xff] }
 0x28a   :  { %4290 = vst [vmem:[#allocation22_spill] sm:$0xff] %v3581_v37  ;;  %4292 = vst [vmem:[#allocation24_spill] sm:$0xff] %v3585_v43  ;;  %v3597_v1 = vmul.f32 %v3329_v62, %v4295_v23  ;;  %v3601_v7 = vmul.f32 %v3329_v62, %v4297_v29  ;;  %v4298_v37 = vld [vmem:[#allocation21_spill] sm:$0xff]  ;;  %v4299_v43 = vld [vmem:[#allocation23_spill] sm:$0xff]  ;;  %v3618_v23 = vmul.f32 %v3329_v62, %v3335_v59 }
 0x28b   :  { %v3605_v19 = vmul.f32 %v3329_v62, %v4298_v37  ;;  %v3609_v18 = vmul.f32 %v3329_v62, %v4299_v43  ;;  %v3614_v15 = vld [vmem:[%s4093_s3] ss:$0 sm:$0xff]  ;;  %v3626_v37 = vmul.f32 %v3329_v62, %v3347_v17  ;;  %v3630_v43 = vmul.f32 %v3329_v62, %v3353_v31 }
 0x28c   :  { %4296 = vst [vmem:[#allocation26_spill] sm:$0xff] %v3597_v1  ;;  %v4301_v1 = vld [vmem:[#allocation25_spill] sm:$0xff]  ;;  %v3638_v59 = vmul.f32 %v3329_v62, %v3365_v49  ;;  %v3646_v17 = vmul.f32 %v3329_v62, %v3377_v33  ;;  %v3650_v31 = vmul.f32 %v3329_v62, %v3383_v27  ;;  %v3658_v49 = vmul.f32 %v3329_v62, %v3395_v34 }
 0x28d   :  { %4300 = vst [vmem:[#allocation29_spill] sm:$0xff] %v3609_v18  ;;  %v3622_v29 = vmul.f32 %v3329_v62, %v4301_v1  ;;  %v3634_v18 = vmul.f32 %v3329_v62, %v3359_v63  ;;  %v3642_v1 = vmul.f32 %v3329_v62, %v3371_v47  ;;  %v3654_v63 = vmul.f32 %v3329_v62, %v3389_v61 }
 0x28e   :  { %v3662_v47 = vmul.f32 %v3329_v62, %v3401_v60  ;;  %v3666_v33 = vadd.f32 %v3614_v15, %v3405_v51  ;;  %v3670_v27 = vadd.f32 %v3614_v15, %v3409_v48  ;;  %v3674_v61 = vadd.f32 %v3614_v15, %v3413_v12 }
 0x28f   :  { %v3678_v34 = vadd.f32 %v3614_v15, %v3417_v3  ;;  %v3682_v62 = vadd.f32 %v3614_v15, %v3421_v45  ;;  %v3686_v60 = vadd.f32 %v3614_v15, %v3425_v9  ;;  %v3690_v51 = vadd.f32 %v3614_v15, %v3429_v25 }
 0x290   :  { %4302 = vst [vmem:[#allocation12_spill] sm:$0xff] %v3666_v33  ;;  %4303 = vst [vmem:[#allocation14_spill] sm:$0xff] %v3670_v27  ;;  %v3694_v48 = vadd.f32 %v3614_v15, %v3433_v32  ;;  %v3698_v12 = vadd.f32 %v3614_v15, %v3437_v41  ;;  %v3702_v3 = vadd.f32 %v3614_v15, %v3441_v21 }
 0x291   :  { %4304 = vst [vmem:[#allocation16_spill] sm:$0xff] %v3674_v61  ;;  %4305 = vst [vmem:[#allocation2_spill] sm:$0xff] %v3678_v34  ;;  %v3706_v45 = vadd.f32 %v3614_v15, %v3445_v10  ;;  %v3710_v9 = vadd.f32 %v3614_v15, %v3449_v14  ;;  %v3714_v25 = vadd.f32 %v3614_v15, %v3453_v22 }
 0x292   :  { %4306 = vst [vmem:[#allocation5_spill] sm:$0xff] %v3682_v62  ;;  %v3718_v32 = vadd.f32 %v3614_v15, %v3457_v28  ;;  %v3722_v41 = vadd.f32 %v3614_v15, %v3461_v36  ;;  %v3726_v21 = vadd.f32 %v3614_v15, %v3465_v42  ;;  %v3730_v10 = vadd.f32 %v3614_v15, %v3469_v50 }
 0x293   :  { %v3734_v14 = vadd.f32 %v3614_v15, %v3473_v56  ;;  %v3738_v22 = vadd.f32 %v3614_v15, %v3477_v0  ;;  %v3742_v28 = vadd.f32 %v3614_v15, %v3481_v6  ;;  %v3746_v36 = vadd.f32 %v3614_v15, %v3485_v26 }
 0x294   :  { %v3750_v42 = vadd.f32 %v3614_v15, %v3489_v38  ;;  %v3754_v50 = vadd.f32 %v3614_v15, %v3493_v46  ;;  %v3758_v56 = vadd.f32 %v3614_v15, %v3497_v58  ;;  %v3762_v0 = vadd.f32 %v3614_v15, %v3501_v2 }
 0x295   :  { %v3766_v6 = vadd.f32 %v3614_v15, %v3505_v16  ;;  %v3770_v26 = vadd.f32 %v3614_v15, %v3509_v8  ;;  %v3774_v38 = vadd.f32 %v3614_v15, %v3513_v5  ;;  %v3778_v46 = vadd.f32 %v3614_v15, %v3517_v35 }
 0x296   :  { %v3782_v58 = vadd.f32 %v3614_v15, %v3521_v13  ;;  %v3786_v2 = vadd.f32 %v3614_v15, %v3525_v20  ;;  %v3790_v16 = vadd.f32 %v3614_v15, %v3529_v53  ;;  %v3794_v8 = vadd.f32 %v3614_v15, %v3533_v55 }
 0x297   :  { %v3798_v5 = vadd.f32 %v3614_v15, %v3537_v40  ;;  %v3802_v35 = vadd.f32 %v3614_v15, %v3541_v24  ;;  %v3806_v13 = vadd.f32 %v3614_v15, %v3545_v44  ;;  %v3810_v20 = vadd.f32 %v3614_v15, %v3549_v30  ;;  %v4311_v44 = vld [vmem:[#allocation27_spill] sm:$0xff] }
 0x298   :  { %v3814_v53 = vadd.f32 %v3614_v15, %v3553_v4  ;;  %v3818_v55 = vadd.f32 %v3614_v15, %v3557_v52  ;;  %v3822_v40 = vadd.f32 %v3614_v15, %v3561_v54  ;;  %v3826_v24 = vadd.f32 %v3614_v15, %v3565_v11 }
 0x299   :  { %4307 = vst [vmem:[#allocation7_spill] sm:$0xff] %v3810_v20  ;;  %v3830_v30 = vadd.f32 %v3614_v15, %v4311_v44  ;;  %v4312_v20 = vld [vmem:[#allocation28_spill] sm:$0xff]  ;;  %v3850_v44 = vadd.f32 %v3614_v15, %v3589_v39 }
 0x29a   :  { %4308 = vst [vmem:[#allocation9_spill] sm:$0xff] %v3814_v53  ;;  %4309 = vst [vmem:[#allocation11_spill] sm:$0xff] %v3818_v55  ;;  %v3834_v4 = vadd.f32 %v3614_v15, %v4312_v20  ;;  %v4314_v53 = vld [vmem:[#allocation20_spill] sm:$0xff]  ;;  %v4315_v55 = vld [vmem:[#allocation22_spill] sm:$0xff]  ;;  %v3854_v20 = vadd.f32 %v3614_v15, %v3593_v57  ;;  %v3874_v57 = vadd.f32 %v3614_v15, %v3618_v23 }
 0x29b   :  { %4310 = vst [vmem:[#allocation13_spill] sm:$0xff] %v3822_v40  ;;  %v3838_v52 = vadd.f32 %v3614_v15, %v4314_v53  ;;  %v3842_v54 = vadd.f32 %v3614_v15, %v4315_v55  ;;  %v4316_v40 = vld [vmem:[#allocation24_spill] sm:$0xff]  ;;  %v3862_v55 = vadd.f32 %v3614_v15, %v3601_v7  ;;  %v3882_v7 = vadd.f32 %v3614_v15, %v3626_v37 }
 0x29c   :  { %4313 = vst [vmem:[#allocation15_spill] sm:$0xff] %v3834_v4  ;;  %v3846_v11 = vadd.f32 %v3614_v15, %v4316_v40  ;;  %v4318_v4 = vld [vmem:[#allocation26_spill] sm:$0xff]  ;;  %v3866_v40 = vadd.f32 %v3614_v15, %v3605_v19  ;;  %v3886_v19 = vadd.f32 %v3614_v15, %v3630_v43  ;;  %v3894_v23 = vadd.f32 %v3614_v15, %v3638_v59 }
 0x29d   :  { %v3858_v53 = vadd.f32 %v3614_v15, %v4318_v4  ;;  %v3878_v4 = vadd.f32 %v3614_v15, %v3622_v29  ;;  %v3898_v29 = vadd.f32 %v3614_v15, %v3642_v1  ;;  %v3902_v37 = vadd.f32 %v3614_v15, %v3646_v17 }
 0x29e   :  { %4317 = vst [vmem:[#allocation18_spill] sm:$0xff] %v3846_v11  ;;  %v4319_v11 = vld [vmem:[#allocation29_spill] sm:$0xff]  ;;  %v3906_v43 = vadd.f32 %v3614_v15, %v3650_v31  ;;  %v3914_v59 = vadd.f32 %v3614_v15, %v3658_v49  ;;  %v3918_v1 = vadd.f32 %v3614_v15, %v3662_v47  ;;  %v1339_v49 = vmax.f32 %v3694_v48, 0.0 }
 0x29f   :  { %v3870_v39 = vadd.f32 %v3614_v15, %v4319_v11  ;;  %v3890_v11 = vadd.f32 %v3614_v15, %v3634_v18  ;;  %4320 = vst [vmem:[#allocation3_spill] sm:$0xff] %v3898_v29  ;;  %4321 = vst [vmem:[#allocation4_spill] sm:$0xff] %v3902_v37  ;;  %v3910_v18 = vadd.f32 %v3614_v15, %v3654_v63  ;;  %v1337_v63 = vmax.f32 %v3686_v60, 0.0 }
 0x2a0   :  { %4322 = vst [vmem:[#allocation6_spill] sm:$0xff] %v3906_v43  ;;  %4324 = vst [vmem:[#allocation10_spill] sm:$0xff] %v3914_v59  ;;  %v1340_v59 = vmax.f32 %v3698_v12, 0.0  ;;  %v1341_v15 = vmax.f32 %v3702_v3, 0.0  ;;  %v1342_v47 = vmax.f32 %v3706_v45, 0.0  ;;  %v1343_v17 = vmax.f32 %v3710_v9, 0.0 }
 0x2a1   :  { %4323 = vst [vmem:[#allocation8_spill] sm:$0xff] %v3910_v18  ;;  %4325 = vst [vmem:[#allocation17_spill] sm:$0xff] %v3918_v1  ;;  %v1338_v18 = vmax.f32 %v3690_v51, 0.0  ;;  %v1344_v37 = vmax.f32 %v3714_v25, 0.0  ;;  %v1345_v31 = vmax.f32 %v3718_v32, 0.0  ;;  %v1346_v43 = vmax.f32 %v3722_v41, 0.0 }
 0x2a2   :  { %v1347_v60 = vmax.f32 %v3726_v21, 0.0  ;;  %v1348_v51 = vmax.f32 %v3730_v10, 0.0  ;;  %v1349_v48 = vmax.f32 %v3734_v14, 0.0  ;;  %v1350_v12 = vmax.f32 %v3738_v22, 0.0  ;;  %v4326_v29 = vld [vmem:[#allocation7_spill] sm:$0xff]  ;;  %v4327_v62 = vld [vmem:[#allocation9_spill] sm:$0xff] }
 0x2a3   :  { %v1351_v3 = vmax.f32 %v3742_v28, 0.0  ;;  %v1352_v45 = vmax.f32 %v3746_v36, 0.0  ;;  %v1353_v9 = vmax.f32 %v3750_v42, 0.0  ;;  %v1354_v25 = vmax.f32 %v3754_v50, 0.0  ;;  %v4328_v34 = vld [vmem:[#allocation11_spill] sm:$0xff]  ;;  %v4329_v61 = vld [vmem:[#allocation13_spill] sm:$0xff] }
 0x2a4   :  { %v1355_v32 = vmax.f32 %v3758_v56, 0.0  ;;  %v1356_v41 = vmax.f32 %v3762_v0, 0.0  ;;  %v1357_v21 = vmax.f32 %v3766_v6, 0.0  ;;  %v1358_v10 = vmax.f32 %v3770_v26, 0.0  ;;  %v4330_v27 = vld [vmem:[#allocation15_spill] sm:$0xff] }
 0x2a5   :  { %v1359_v14 = vmax.f32 %v3774_v38, 0.0  ;;  %v1360_v22 = vmax.f32 %v3778_v46, 0.0  ;;  %v1361_v28 = vmax.f32 %v3782_v58, 0.0  ;;  %v1362_v36 = vmax.f32 %v3786_v2, 0.0  ;;  %v4331_v33 = vld [vmem:[#allocation18_spill] sm:$0xff] }
 0x2a6   :  { %v1363_v42 = vmax.f32 %v3790_v16, 0.0  ;;  %v1364_v50 = vmax.f32 %v3794_v8, 0.0  ;;  %v1365_v56 = vmax.f32 %v3798_v5, 0.0  ;;  %v1366_v0 = vmax.f32 %v3802_v35, 0.0  ;;  %v4332_v1 = vld [vmem:[#allocation3_spill] sm:$0xff] }
 0x2a7   :  { %v1367_v6 = vmax.f32 %v3806_v13, 0.0  ;;  %v1368_v26 = vmax.f32 %v4326_v29, 0.0  ;;  %v1369_v38 = vmax.f32 %v4327_v62, 0.0  ;;  %v1370_v46 = vmax.f32 %v4328_v34, 0.0 }
 0x2a8   :  { %v1371_v58 = vmax.f32 %v4329_v61, 0.0  ;;  %v1372_v2 = vmax.f32 %v3826_v24, 0.0  ;;  %v1373_v16 = vmax.f32 %v3830_v30, 0.0  ;;  %v1374_v8 = vmax.f32 %v4330_v27, 0.0 }
 0x2a9   :  { %v1375_v5 = vmax.f32 %v3838_v52, 0.0  ;;  %v1376_v35 = vmax.f32 %v3842_v54, 0.0  ;;  %v1377_v13 = vmax.f32 %v4331_v33, 0.0  ;;  %v1378_v29 = vmax.f32 %v3850_v44, 0.0 }
 0x2aa   :  { %v1379_v62 = vmax.f32 %v3854_v20, 0.0  ;;  %v1380_v34 = vmax.f32 %v3858_v53, 0.0  ;;  %v1381_v61 = vmax.f32 %v3862_v55, 0.0  ;;  %v1382_v24 = vmax.f32 %v3866_v40, 0.0  ;;  %v4333_v55 = vld [vmem:[#allocation4_spill] sm:$0xff] }
 0x2ab   :  { %v1383_v30 = vmax.f32 %v3870_v39, 0.0  ;;  %v1384_v27 = vmax.f32 %v3874_v57, 0.0  ;;  %v1385_v52 = vmax.f32 %v3878_v4, 0.0  ;;  %v1386_v54 = vmax.f32 %v3882_v7, 0.0  ;;  %v4334_v39 = vld [vmem:[#allocation6_spill] sm:$0xff]  ;;  %v4335_v4 = vld [vmem:[#allocation8_spill] sm:$0xff] }
 0x2ac   :  { %v1387_v33 = vmax.f32 %v3886_v19, 0.0  ;;  %v1388_v44 = vmax.f32 %v3890_v11, 0.0  ;;  %v1389_v20 = vmax.f32 %v3894_v23, 0.0  ;;  %v1390_v53 = vmax.f32 %v4332_v1, 0.0  ;;  %v4336_v19 = vld [vmem:[#allocation10_spill] sm:$0xff]  ;;  %v4337_v23 = vld [vmem:[#allocation17_spill] sm:$0xff] }
 0x2ad   :  { %v1391_v40 = vmax.f32 %v4333_v55, 0.0  ;;  %v1392_v57 = vmax.f32 %v4334_v39, 0.0  ;;  %v1393_v7 = vmax.f32 %v4335_v4, 0.0  ;;  %v1394_v11 = vmax.f32 %v4336_v19, 0.0  ;;  %v4338_v55 = vld [vmem:[#allocation12_spill] sm:$0xff]  ;;  %v4340_v4 = vld [vmem:[#allocation14_spill] sm:$0xff] }
 0x2ae   :  { %v1395_v1 = vmax.f32 %v4337_v23, 0.0  ;;  %v4339_v39 = vmax.f32 %v4338_v55, 0.0  ;;  %v4341_v19 = vmax.f32 %v4340_v4, 0.0  ;;  %v4342_v55 = vld [vmem:[#allocation16_spill] sm:$0xff] }
 0x2af   :  { %v4343_v4 = vmax.f32 %v4342_v55, 0.0 }
 0x2b0   :  { %v1958_v23 = vpack.c.bf16 %v4341_v19, %v4339_v39  ;;  %v4344_v19 = vld [vmem:[#allocation2_spill] sm:$0xff] }
 0x2b1   :  { %v4345_v39 = vmax.f32 %v4344_v19, 0.0  ;;  %v4346_v19 = vld [vmem:[#allocation5_spill] sm:$0xff] }
 0x2b2   :  { %1959 = vst [vmem:[%s4094_s4] sm:$0xff] %v1958_v23  }
 0x2b3   :  { %v1963_v55 = vpack.c.bf16 %v4345_v39, %v4343_v4  ;;  %v4347_v4 = vmax.f32 %v4346_v19, 0.0  ;;  %v1973_v19 = vpack.c.bf16 %v1339_v49, %v1338_v18  ;;  %v1988_v18 = vpack.c.bf16 %v1345_v31, %v1344_v37 }
 0x2b4   :  { %v1993_v49 = vpack.c.bf16 %v1347_v60, %v1346_v43  ;;  %v2008_v37 = vpack.c.bf16 %v1353_v9, %v1352_v45  ;;  %v2013_v43 = vpack.c.bf16 %v1355_v32, %v1354_v25  ;;  %v2018_v31 = vpack.c.bf16 %v1357_v21, %v1356_v41 }
 0x2b5   :  { %v1968_v39 = vpack.c.bf16 %v1337_v63, %v4347_v4  ;;  %v1978_v4 = vpack.c.bf16 %v1341_v15, %v1340_v59  ;;  %v1983_v63 = vpack.c.bf16 %v1343_v17, %v1342_v47  ;;  %2115 = vst [vmem:[%s4094_s4 + $0x8] sm:$0xff] %v1963_v55   ;;  %2117 = vst [vmem:[%s4094_s4 + $0x18] sm:$0xff] %v1973_v19  }
 0x2b6   :  { %v1998_v59 = vpack.c.bf16 %v1349_v48, %v1348_v51  ;;  %v2003_v17 = vpack.c.bf16 %v1351_v3, %v1350_v12  ;;  %2120 = vst [vmem:[%s4094_s4 + $0x30] sm:$0xff] %v1988_v18   ;;  %2121 = vst [vmem:[%s4094_s4 + $0x38] sm:$0xff] %v1993_v49   ;;  %v2023_v15 = vpack.c.bf16 %v1359_v14, %v1358_v10 }
 0x2b7   :  { %2116 = vst [vmem:[%s4094_s4 + $0x10] sm:$0xff] %v1968_v39   ;;  %2118 = vst [vmem:[%s4094_s4 + $0x20] sm:$0xff] %v1978_v4   ;;  %v2028_v47 = vpack.c.bf16 %v1361_v28, %v1360_v22  ;;  %v2033_v60 = vpack.c.bf16 %v1363_v42, %v1362_v36  ;;  %v2038_v51 = vpack.c.bf16 %v1365_v56, %v1364_v50 }
 0x2b8   :  { %2119 = vst [vmem:[%s4094_s4 + $0x28] sm:$0xff] %v1983_v63   ;;  %2122 = vst [vmem:[%s4094_s4 + $0x40] sm:$0xff] %v1998_v59   ;;  %v2043_v48 = vpack.c.bf16 %v1367_v6, %v1366_v0  ;;  %v2048_v12 = vpack.c.bf16 %v1369_v38, %v1368_v26  ;;  %v2053_v3 = vpack.c.bf16 %v1371_v58, %v1370_v46 }
 0x2b9   :  { %2123 = vst [vmem:[%s4094_s4 + $0x48] sm:$0xff] %v2003_v17   ;;  %2124 = vst [vmem:[%s4094_s4 + $0x50] sm:$0xff] %v2008_v37   ;;  %v2058_v45 = vpack.c.bf16 %v1373_v16, %v1372_v2  ;;  %v2063_v9 = vpack.c.bf16 %v1375_v5, %v1374_v8  ;;  %v2068_v25 = vpack.c.bf16 %v1377_v13, %v1376_v35 }
 0x2ba   :  { %2125 = vst [vmem:[%s4094_s4 + $0x58] sm:$0xff] %v2013_v43   ;;  %2126 = vst [vmem:[%s4094_s4 + $0x60] sm:$0xff] %v2018_v31   ;;  %v2073_v32 = vpack.c.bf16 %v1379_v62, %v1378_v29  ;;  %v2078_v41 = vpack.c.bf16 %v1381_v61, %v1380_v34  ;;  %v2083_v21 = vpack.c.bf16 %v1383_v30, %v1382_v24 }
 0x2bb   :  { %2127 = vst [vmem:[%s4094_s4 + $0x68] sm:$0xff] %v2023_v15   ;;  %2128 = vst [vmem:[%s4094_s4 + $0x70] sm:$0xff] %v2028_v47   ;;  %v2088_v10 = vpack.c.bf16 %v1385_v52, %v1384_v27  ;;  %v2093_v14 = vpack.c.bf16 %v1387_v33, %v1386_v54  ;;  %v2098_v22 = vpack.c.bf16 %v1389_v20, %v1388_v44 }
 0x2bc   :  { %2129 = vst [vmem:[%s4094_s4 + $0x78] sm:$0xff] %v2033_v60   ;;  %2130 = vst [vmem:[%s4094_s4 + $0x80] sm:$0xff] %v2038_v51   ;;  %v2103_v28 = vpack.c.bf16 %v1391_v40, %v1390_v53  ;;  %v2108_v36 = vpack.c.bf16 %v1393_v7, %v1392_v57  ;;  %v2113_v42 = vpack.c.bf16 %v1395_v1, %v1394_v11 }
 0x2bd   :  { %2131 = vst [vmem:[%s4094_s4 + $0x88] sm:$0xff] %v2043_v48   ;;  %2132 = vst [vmem:[%s4094_s4 + $0x90] sm:$0xff] %v2048_v12  }
 0x2be   :  { %2133 = vst [vmem:[%s4094_s4 + $0x98] sm:$0xff] %v2053_v3   ;;  %2134 = vst [vmem:[%s4094_s4 + $0xa0] sm:$0xff] %v2058_v45  }
 0x2bf   :  { %2135 = vst [vmem:[%s4094_s4 + $0xa8] sm:$0xff] %v2063_v9   ;;  %2136 = vst [vmem:[%s4094_s4 + $0xb0] sm:$0xff] %v2068_v25  }
 0x2c0   :  { %2137 = vst [vmem:[%s4094_s4 + $0xb8] sm:$0xff] %v2073_v32   ;;  %2138 = vst [vmem:[%s4094_s4 + $0xc0] sm:$0xff] %v2078_v41  }
 0x2c1   :  { %2139 = vst [vmem:[%s4094_s4 + $0xc8] sm:$0xff] %v2083_v21   ;;  %2140 = vst [vmem:[%s4094_s4 + $0xd0] sm:$0xff] %v2088_v10  }
 0x2c2   :  { %2141 = vst [vmem:[%s4094_s4 + $0xd8] sm:$0xff] %v2093_v14   ;;  %2142 = vst [vmem:[%s4094_s4 + $0xe0] sm:$0xff] %v2098_v22  }
 0x2c3   :  { %2143 = vst [vmem:[%s4094_s4 + $0xe8] sm:$0xff] %v2103_v28   ;;  %2144 = vst [vmem:[%s4094_s4 + $0xf0] sm:$0xff] %v2108_v36  }
 0x2c4   :  { %2145 = vst [vmem:[%s4094_s4 + $0xf8] sm:$0xff] %v2113_v42  }

// kernel: poison_generator_forward.17
= control target key start
LH: loop header
LB: loop body
LE: loop exit
PB: predicated region body
PF: predicated region fallthrough
CT: control target
= control target key end

     0   :  { %vm958_vm0 = vcmask 654336   ;;  %s5820_s1 = inlined_call_operand.vmem [shape: bf16[80,128], index: 1, kind: input, shape index: {}]   ;;  %s5821_s0 = inlined_call_operand.vmem [shape: bf16[2048,80], index: 0, kind: input, shape index: {}]   ;;  %s5822_s2 = inlined_call_operand.vmem [shape: f32[1,128], index: 2, kind: input, shape index: {}]   ;;  %s5823_s3 = inlined_call_operand.vmem [shape: f32[2048,128], index: 3, kind: output, shape index: {}]  }
   0x1   :  { %v3587_v0 = vld [vmem:[%s5820_s1] sm:$0xff]   ;;  %v3588_v1 = vld [vmem:[%s5820_s1 + $0x8] sm:$0xff]   ;;  %v3589_v2 = vld [vmem:[%s5820_s1 + $0x10] sm:$0xff]  }
   0x2   :  { %3311 = vmatprep.subr.bf16.mxu0 %v3587_v0  ;;  %3577 = vmatprep.subr.bf16.mxu1 %v3587_v0  ;;  %v3592_v3 = vld [vmem:[%s5821_s0] sm:$0xff]   ;;  %v3590_v5 = vld [vmem:[%s5820_s1 + $0x18] sm:$0xff]   ;;  %v3594_v7 = vld [vmem:[%s5821_s0 + $0x8] sm:$0xff]  }
   0x3   :  { %3312 = vmatpush3.bf16.msra.mxu0 %v3587_v0  ;;  %3582 = vmatpush3.bf16.msra.mxu1 %v3587_v0  ;;  %v3593_v4 = vld [vmem:[%s5821_s0 + $0x200] sm:$0xff]   ;;  %v3595_v8 = vld [vmem:[%s5821_s0 + $0x208] sm:$0xff]   ;;  %v3596_v9 = vld [vmem:[%s5821_s0 + $0x10] sm:$0xff]  }
   0x4   :  { %3313 = vmatprep.subr.bf16.mxu0 %v3588_v1  ;;  %3578 = vmatprep.subr.bf16.mxu1 %v3588_v1  ;;  %v3591_v6 = vld [vmem:[%s5820_s1 + $0x20] sm:$0xff]   ;;  %v3597_v10 = vld [vmem:[%s5821_s0 + $0x210] sm:$0xff]   ;;  %v3598_v11 = vld [vmem:[%s5821_s0 + $0x18] sm:$0xff]  }
   0x5   :  { %3321 = vmatprep.mubr.msk.bf16.mxu0 %vm958_vm0, %v3592_v3  ;;  %3449 = vmatprep.mubr.msk.bf16.mxu1 %vm958_vm0, %v3593_v4  ;;  %v3599_v12 = vld [vmem:[%s5821_s0 + $0x218] sm:$0xff]   ;;  %v3600_v13 = vld [vmem:[%s5821_s0 + $0x20] sm:$0xff]   ;;  %v3602_v15 = vld [vmem:[%s5821_s0 + $0x28] sm:$0xff]  }
   0x6   :  { %v3601_v14 = vld [vmem:[%s5821_s0 + $0x220] sm:$0xff]   ;;  %v3603_v16 = vld [vmem:[%s5821_s0 + $0x228] sm:$0xff]   ;;  %v3604_v17 = vld [vmem:[%s5821_s0 + $0x30] sm:$0xff]  }
   0x7   :  { %3314 = vmatpush3.bf16.msra.mxu0 %v3588_v1  ;;  %3583 = vmatpush3.bf16.msra.mxu1 %v3588_v1  ;;  %v3605_v18 = vld [vmem:[%s5821_s0 + $0x230] sm:$0xff]   ;;  %v3606_v19 = vld [vmem:[%s5821_s0 + $0x38] sm:$0xff]   ;;  %v3608_v21 = vld [vmem:[%s5821_s0 + $0x40] sm:$0xff]  }
   0x8   :  { %3315 = vmatprep.subr.bf16.mxu0 %v3589_v2  ;;  %3579 = vmatprep.subr.bf16.mxu1 %v3589_v2  ;;  %v3607_v20 = vld [vmem:[%s5821_s0 + $0x238] sm:$0xff]   ;;  %v3609_v22 = vld [vmem:[%s5821_s0 + $0x240] sm:$0xff]   ;;  %v3610_v23 = vld [vmem:[%s5821_s0 + $0x48] sm:$0xff]  }
   0x9   :  { %v3611_v24 = vld [vmem:[%s5821_s0 + $0x248] sm:$0xff]   ;;  %v3612_v25 = vld [vmem:[%s5821_s0 + $0x50] sm:$0xff]   ;;  %v3614_v27 = vld [vmem:[%s5821_s0 + $0x58] sm:$0xff]  }
   0xa   :  { %v3613_v26 = vld [vmem:[%s5821_s0 + $0x250] sm:$0xff]   ;;  %v3615_v28 = vld [vmem:[%s5821_s0 + $0x258] sm:$0xff]   ;;  %v3616_v29 = vld [vmem:[%s5821_s0 + $0x60] sm:$0xff]  }
   0xb   :  { %3316 = vmatpush3.bf16.msra.mxu0 %v3589_v2  ;;  %3584 = vmatpush3.bf16.msra.mxu1 %v3589_v2  ;;  %v3617_v30 = vld [vmem:[%s5821_s0 + $0x260] sm:$0xff]   ;;  %v3618_v31 = vld [vmem:[%s5821_s0 + $0x68] sm:$0xff]   ;;  %v3620_v33 = vld [vmem:[%s5821_s0 + $0x70] sm:$0xff]  }
   0xc   :  { %3317 = vmatprep.subr.bf16.mxu0 %v3590_v5  ;;  %3580 = vmatprep.subr.bf16.mxu1 %v3590_v5  ;;  %v3619_v32 = vld [vmem:[%s5821_s0 + $0x268] sm:$0xff]   ;;  %v3621_v34 = vld [vmem:[%s5821_s0 + $0x270] sm:$0xff]   ;;  %v3622_v35 = vld [vmem:[%s5821_s0 + $0x78] sm:$0xff]  }
   0xd   :  { %v3623_v36 = vld [vmem:[%s5821_s0 + $0x278] sm:$0xff]   ;;  %v3624_v37 = vld [vmem:[%s5821_s0 + $0x80] sm:$0xff]   ;;  %v3626_v39 = vld [vmem:[%s5821_s0 + $0x88] sm:$0xff]  }
   0xe   :  { %v3625_v38 = vld [vmem:[%s5821_s0 + $0x280] sm:$0xff]   ;;  %v3627_v40 = vld [vmem:[%s5821_s0 + $0x288] sm:$0xff]   ;;  %v3628_v41 = vld [vmem:[%s5821_s0 + $0x90] sm:$0xff]  }
   0xf   :  { %3318 = vmatpush3.bf16.msra.mxu0 %v3590_v5  ;;  %3585 = vmatpush3.bf16.msra.mxu1 %v3590_v5  ;;  %v3629_v42 = vld [vmem:[%s5821_s0 + $0x290] sm:$0xff]   ;;  %v3630_v43 = vld [vmem:[%s5821_s0 + $0x98] sm:$0xff]   ;;  %v3632_v45 = vld [vmem:[%s5821_s0 + $0xa0] sm:$0xff]  }
  0x10   :  { %3319 = vmatprep.subr.bf16.mxu0 %v3591_v6  ;;  %3581 = vmatprep.subr.bf16.mxu1 %v3591_v6  ;;  %v3631_v44 = vld [vmem:[%s5821_s0 + $0x298] sm:$0xff]   ;;  %v3633_v46 = vld [vmem:[%s5821_s0 + $0x2a0] sm:$0xff]   ;;  %v3634_v47 = vld [vmem:[%s5821_s0 + $0xa8] sm:$0xff]  }
  0x11   :  { %v3635_v48 = vld [vmem:[%s5821_s0 + $0x2a8] sm:$0xff]   ;;  %v3636_v49 = vld [vmem:[%s5821_s0 + $0xb0] sm:$0xff]   ;;  %v3638_v51 = vld [vmem:[%s5821_s0 + $0xb8] sm:$0xff]  }
  0x12   :  { %v3637_v50 = vld [vmem:[%s5821_s0 + $0x2b0] sm:$0xff]   ;;  %v3639_v52 = vld [vmem:[%s5821_s0 + $0x2b8] sm:$0xff]   ;;  %v3640_v53 = vld [vmem:[%s5821_s0 + $0xc0] sm:$0xff]  }
  0x13   :  { %3320 = vmatpush3.bf16.msra.mxu0 %v3591_v6  ;;  %3586 = vmatpush3.bf16.msra.mxu1 %v3591_v6  ;;  %v3641_v54 = vld [vmem:[%s5821_s0 + $0x2c0] sm:$0xff]   ;;  %v3642_v55 = vld [vmem:[%s5821_s0 + $0xc8] sm:$0xff]   ;;  %v3644_v57 = vld [vmem:[%s5821_s0 + $0xd0] sm:$0xff]  }
  0x14   :  { %v3643_v56 = vld [vmem:[%s5821_s0 + $0x2c8] sm:$0xff]   ;;  %v3645_v58 = vld [vmem:[%s5821_s0 + $0x2d0] sm:$0xff]   ;;  %v3646_v59 = vld [vmem:[%s5821_s0 + $0xd8] sm:$0xff]  }
  0x15   :  { %v3647_v60 = vld [vmem:[%s5821_s0 + $0x2d8] sm:$0xff]   ;;  %v3648_v61 = vld [vmem:[%s5821_s0 + $0xe0] sm:$0xff]   ;;  %v3650_v63 = vld [vmem:[%s5821_s0 + $0xe8] sm:$0xff]  }
  0x16   :  { %3322 = vmatmul.mubr.msk.bf16.vlgmr.msra.gmra.mrb[0].mxu0 %vm958_vm0, %v3594_v7  ;;  %3450 = vmatmul.mubr.msk.bf16.vlgmr.msra.gmra.mrb[0].mxu1 %vm958_vm0, %v3595_v8  ;;  %v3649_v62 = vld [vmem:[%s5821_s0 + $0x2e0] sm:$0xff]   ;;  %v3651_v0 = vld [vmem:[%s5821_s0 + $0x2e8] sm:$0xff]   ;;  %v3652_v1 = vld [vmem:[%s5821_s0 + $0xf0] sm:$0xff]  }
  0x17   :  { %3325 = vmatprep.mubr.msk.bf16.mxu0 %vm958_vm0, %v3596_v9  ;;  %3453 = vmatprep.mubr.msk.bf16.mxu1 %vm958_vm0, %v3597_v10  ;;  %v3653_v2 = vld [vmem:[%s5821_s0 + $0x2f0] sm:$0xff]   ;;  %v3654_v3 = vld [vmem:[%s5821_s0 + $0xf8] sm:$0xff]   ;;  %v3656_v5 = vld [vmem:[%s5821_s0 + $0x100] sm:$0xff]  }
  0x18   :  { %v3655_v4 = vld [vmem:[%s5821_s0 + $0x2f8] sm:$0xff]   ;;  %v3657_v6 = vld [vmem:[%s5821_s0 + $0x300] sm:$0xff]   ;;  %v3658_v7 = vld [vmem:[%s5821_s0 + $0x108] sm:$0xff]  }
  0x19   :  { %v3659_v8 = vld [vmem:[%s5821_s0 + $0x308] sm:$0xff]   ;;  %v3660_v9 = vld [vmem:[%s5821_s0 + $0x110] sm:$0xff]  }
  0x1a   :  { %v3661_v10 = vld [vmem:[%s5821_s0 + $0x310] sm:$0xff]  }
  0x1e   :  { %3326 = vmatmul.mubr.msk.bf16.gmra.mrb[4].mxu0 %vm958_vm0, %v3598_v11  ;;  %3454 = vmatmul.mubr.msk.bf16.gmra.mrb[4].mxu1 %vm958_vm0, %v3599_v12  ;;  %v3662_v11 = vld [vmem:[%s5821_s0 + $0x118] sm:$0xff]  }
  0x1f   :  { %3329 = vmatprep.mubr.msk.bf16.mxu0 %vm958_vm0, %v3600_v13  ;;  %3457 = vmatprep.mubr.msk.bf16.mxu1 %vm958_vm0, %v3601_v14  ;;  %v3663_v12 = vld [vmem:[%s5821_s0 + $0x318] sm:$0xff]   ;;  %v3664_v13 = vld [vmem:[%s5821_s0 + $0x120] sm:$0xff]  }
  0x20   :  { %v3665_v14 = vld [vmem:[%s5821_s0 + $0x320] sm:$0xff]  }
  0x26   :  { %3330 = vmatmul.mubr.msk.bf16.gmra.mrb[8].mxu0 %vm958_vm0, %v3602_v15  ;;  %3458 = vmatmul.mubr.msk.bf16.gmra.mrb[8].mxu1 %vm958_vm0, %v3603_v16  ;;  %v3666_v15 = vld [vmem:[%s5821_s0 + $0x128] sm:$0xff]  }
  0x27   :  { %3333 = vmatprep.mubr.msk.bf16.mxu0 %vm958_vm0, %v3604_v17  ;;  %3461 = vmatprep.mubr.msk.bf16.mxu1 %vm958_vm0, %v3605_v18  ;;  %v3667_v16 = vld [vmem:[%s5821_s0 + $0x328] sm:$0xff]   ;;  %v3668_v17 = vld [vmem:[%s5821_s0 + $0x130] sm:$0xff]  }
  0x28   :  { %v3669_v18 = vld [vmem:[%s5821_s0 + $0x330] sm:$0xff]  }
  0x2e   :  { %3334 = vmatmul.mubr.msk.bf16.gmra.mrb[12].mxu0 %vm958_vm0, %v3606_v19  ;;  %3462 = vmatmul.mubr.msk.bf16.gmra.mrb[12].mxu1 %vm958_vm0, %v3607_v20  ;;  %v3670_v19 = vld [vmem:[%s5821_s0 + $0x138] sm:$0xff]  }
  0x2f   :  { %3337 = vmatprep.mubr.msk.bf16.mxu0 %vm958_vm0, %v3608_v21  ;;  %3465 = vmatprep.mubr.msk.bf16.mxu1 %vm958_vm0, %v3609_v22  ;;  %v3671_v20 = vld [vmem:[%s5821_s0 + $0x338] sm:$0xff]   ;;  %v3672_v21 = vld [vmem:[%s5821_s0 + $0x140] sm:$0xff]  }
  0x30   :  { %v3673_v22 = vld [vmem:[%s5821_s0 + $0x340] sm:$0xff]  }
  0x36   :  { %3338 = vmatmul.mubr.msk.bf16.gmra.mrb[16].mxu0 %vm958_vm0, %v3610_v23  ;;  %3466 = vmatmul.mubr.msk.bf16.gmra.mrb[16].mxu1 %vm958_vm0, %v3611_v24  ;;  %v3674_v23 = vld [vmem:[%s5821_s0 + $0x148] sm:$0xff]  }
  0x37   :  { %3341 = vmatprep.mubr.msk.bf16.mxu0 %vm958_vm0, %v3612_v25  ;;  %3469 = vmatprep.mubr.msk.bf16.mxu1 %vm958_vm0, %v3613_v26  ;;  %v3675_v24 = vld [vmem:[%s5821_s0 + $0x348] sm:$0xff]   ;;  %v3676_v25 = vld [vmem:[%s5821_s0 + $0x150] sm:$0xff]  }
  0x38   :  { %v3677_v26 = vld [vmem:[%s5821_s0 + $0x350] sm:$0xff]  }
  0x3e   :  { %3342 = vmatmul.mubr.msk.bf16.gmra.mrb[20].mxu0 %vm958_vm0, %v3614_v27  ;;  %3470 = vmatmul.mubr.msk.bf16.gmra.mrb[20].mxu1 %vm958_vm0, %v3615_v28  ;;  %v3678_v27 = vld [vmem:[%s5821_s0 + $0x158] sm:$0xff]  }
  0x3f   :  { %3345 = vmatprep.mubr.msk.bf16.mxu0 %vm958_vm0, %v3616_v29  ;;  %3473 = vmatprep.mubr.msk.bf16.mxu1 %vm958_vm0, %v3617_v30  ;;  %v3679_v28 = vld [vmem:[%s5821_s0 + $0x358] sm:$0xff]   ;;  %v3680_v29 = vld [vmem:[%s5821_s0 + $0x160] sm:$0xff]  }
  0x40   :  { %v3681_v30 = vld [vmem:[%s5821_s0 + $0x360] sm:$0xff]  }
  0x46   :  { %3346 = vmatmul.mubr.msk.bf16.gmra.mrb[24].mxu0 %vm958_vm0, %v3618_v31  ;;  %3474 = vmatmul.mubr.msk.bf16.gmra.mrb[24].mxu1 %vm958_vm0, %v3619_v32  ;;  %v3682_v31 = vld [vmem:[%s5821_s0 + $0x168] sm:$0xff]  }
  0x47   :  { %3349 = vmatprep.mubr.msk.bf16.mxu0 %vm958_vm0, %v3620_v33  ;;  %3477 = vmatprep.mubr.msk.bf16.mxu1 %vm958_vm0, %v3621_v34  ;;  %v3683_v32 = vld [vmem:[%s5821_s0 + $0x368] sm:$0xff]   ;;  %v3684_v33 = vld [vmem:[%s5821_s0 + $0x170] sm:$0xff]  }
  0x48   :  { %v3685_v34 = vld [vmem:[%s5821_s0 + $0x370] sm:$0xff]  }
  0x4e   :  { %3350 = vmatmul.mubr.msk.bf16.gmra.mrb[28].mxu0 %vm958_vm0, %v3622_v35  ;;  %3478 = vmatmul.mubr.msk.bf16.gmra.mrb[28].mxu1 %vm958_vm0, %v3623_v36  ;;  %v3686_v35 = vld [vmem:[%s5821_s0 + $0x178] sm:$0xff]  }
  0x4f   :  { %3353 = vmatprep.mubr.msk.bf16.mxu0 %vm958_vm0, %v3624_v37  ;;  %3481 = vmatprep.mubr.msk.bf16.mxu1 %vm958_vm0, %v3625_v38  ;;  %v3687_v36 = vld [vmem:[%s5821_s0 + $0x378] sm:$0xff]   ;;  %v3688_v37 = vld [vmem:[%s5821_s0 + $0x180] sm:$0xff]  }
  0x50   :  { %v3689_v38 = vld [vmem:[%s5821_s0 + $0x380] sm:$0xff]  }
  0x56   :  { %3354 = vmatmul.mubr.msk.bf16.gmra.mrb[32].mxu0 %vm958_vm0, %v3626_v39  ;;  %3482 = vmatmul.mubr.msk.bf16.gmra.mrb[32].mxu1 %vm958_vm0, %v3627_v40  ;;  %v3690_v39 = vld [vmem:[%s5821_s0 + $0x188] sm:$0xff]  }
  0x57   :  { %3357 = vmatprep.mubr.msk.bf16.mxu0 %vm958_vm0, %v3628_v41  ;;  %3485 = vmatprep.mubr.msk.bf16.mxu1 %vm958_vm0, %v3629_v42  ;;  %v3691_v40 = vld [vmem:[%s5821_s0 + $0x388] sm:$0xff]   ;;  %v3692_v41 = vld [vmem:[%s5821_s0 + $0x190] sm:$0xff]  }
  0x58   :  { %v3693_v42 = vld [vmem:[%s5821_s0 + $0x390] sm:$0xff]  }
  0x5e   :  { %3358 = vmatmul.mubr.msk.bf16.gmra.mrb[36].mxu0 %vm958_vm0, %v3630_v43  ;;  %3486 = vmatmul.mubr.msk.bf16.gmra.mrb[36].mxu1 %vm958_vm0, %v3631_v44  ;;  %v3694_v43 = vld [vmem:[%s5821_s0 + $0x198] sm:$0xff]  }
  0x5f   :  { %3361 = vmatprep.mubr.msk.bf16.mxu0 %vm958_vm0, %v3632_v45  ;;  %3489 = vmatprep.mubr.msk.bf16.mxu1 %vm958_vm0, %v3633_v46  ;;  %v3695_v44 = vld [vmem:[%s5821_s0 + $0x398] sm:$0xff]   ;;  %v3696_v45 = vld [vmem:[%s5821_s0 + $0x1a0] sm:$0xff]  }
  0x60   :  { %v3697_v46 = vld [vmem:[%s5821_s0 + $0x3a0] sm:$0xff]  }
  0x66   :  { %3362 = vmatmul.mubr.msk.bf16.gmra.mrb[40].mxu0 %vm958_vm0, %v3634_v47  ;;  %3490 = vmatmul.mubr.msk.bf16.gmra.mrb[40].mxu1 %vm958_vm0, %v3635_v48  ;;  %v3698_v47 = vld [vmem:[%s5821_s0 + $0x1a8] sm:$0xff]  }
  0x67   :  { %3365 = vmatprep.mubr.msk.bf16.mxu0 %vm958_vm0, %v3636_v49  ;;  %3493 = vmatprep.mubr.msk.bf16.mxu1 %vm958_vm0, %v3637_v50  ;;  %v3699_v48 = vld [vmem:[%s5821_s0 + $0x3a8] sm:$0xff]   ;;  %v3700_v49 = vld [vmem:[%s5821_s0 + $0x1b0] sm:$0xff]  }
  0x68   :  { %v3701_v50 = vld [vmem:[%s5821_s0 + $0x3b0] sm:$0xff]  }
  0x6e   :  { %3366 = vmatmul.mubr.msk.bf16.gmra.mrb[44].mxu0 %vm958_vm0, %v3638_v51  ;;  %3494 = vmatmul.mubr.msk.bf16.gmra.mrb[44].mxu1 %vm958_vm0, %v3639_v52  ;;  %v4710_v51 = vld [vmem:[%s5822_s2] ss:$0 sm:$0xff] }
  0x6f   :  { %3369 = vmatprep.mubr.msk.bf16.mxu0 %vm958_vm0, %v3640_v53  ;;  %3497 = vmatprep.mubr.msk.bf16.mxu1 %vm958_vm0, %v3641_v54 }
  0x76   :  { %3370 = vmatmul.mubr.msk.bf16.gmra.mrb[48].mxu0 %vm958_vm0, %v3642_v55  ;;  %3498 = vmatmul.mubr.msk.bf16.gmra.mrb[48].mxu1 %vm958_vm0, %v3643_v56 }
  0x77   :  { %3373 = vmatprep.mubr.msk.bf16.mxu0 %vm958_vm0, %v3644_v57  ;;  %3501 = vmatprep.mubr.msk.bf16.mxu1 %vm958_vm0, %v3645_v58  ;;  %v3702_v58 = vld [vmem:[%s5821_s0 + $0x1b8] sm:$0xff]  }
  0x7e   :  { %3374 = vmatmul.mubr.msk.bf16.gmra.mrb[52].mxu0 %vm958_vm0, %v3646_v59  ;;  %3502 = vmatmul.mubr.msk.bf16.gmra.mrb[52].mxu1 %vm958_vm0, %v3647_v60  ;;  %v3703_v59 = vld [vmem:[%s5821_s0 + $0x3b8] sm:$0xff]  }
  0x7f   :  { %3377 = vmatprep.mubr.msk.bf16.mxu0 %vm958_vm0, %v3648_v61  ;;  %3505 = vmatprep.mubr.msk.bf16.mxu1 %vm958_vm0, %v3649_v62 }
  0x86   :  { %3378 = vmatmul.mubr.msk.bf16.gmra.mrb[56].mxu0 %vm958_vm0, %v3650_v63  ;;  %3506 = vmatmul.mubr.msk.bf16.gmra.mrb[56].mxu1 %vm958_vm0, %v3651_v0  ;;  %v3704_v0 = vld [vmem:[%s5821_s0 + $0x1c0] sm:$0xff]  }
  0x87   :  { %3381 = vmatprep.mubr.msk.bf16.mxu0 %vm958_vm0, %v3652_v1  ;;  %3509 = vmatprep.mubr.msk.bf16.mxu1 %vm958_vm0, %v3653_v2  ;;  %v3705_v1 = vld [vmem:[%s5821_s0 + $0x3c0] sm:$0xff]  }
  0x8e   :  { %3382 = vmatmul.mubr.msk.bf16.gmra.mrb[60].mxu0 %vm958_vm0, %v3654_v3  ;;  %3510 = vmatmul.mubr.msk.bf16.gmra.mrb[60].mxu1 %vm958_vm0, %v3655_v4 }
  0x8f   :  { %3385 = vmatprep.mubr.msk.bf16.mxu0 %vm958_vm0, %v3656_v5  ;;  %3513 = vmatprep.mubr.msk.bf16.mxu1 %vm958_vm0, %v3657_v6 }
  0x96   :  { %3386 = vmatmul.mubr.msk.bf16.gmra.mrb[64].mxu0 %vm958_vm0, %v3658_v7  ;;  %3514 = vmatmul.mubr.msk.bf16.gmra.mrb[64].mxu1 %vm958_vm0, %v3659_v8 }
  0x97   :  { %3389 = vmatprep.mubr.msk.bf16.mxu0 %vm958_vm0, %v3660_v9  ;;  %3517 = vmatprep.mubr.msk.bf16.mxu1 %vm958_vm0, %v3661_v10 }
  0x9e   :  { %3390 = vmatmul.mubr.msk.bf16.gmra.mrb[68].mxu0 %vm958_vm0, %v3662_v11  ;;  %3518 = vmatmul.mubr.msk.bf16.gmra.mrb[68].mxu1 %vm958_vm0, %v3663_v12 }
  0x9f   :  { %3393 = vmatprep.mubr.msk.bf16.mxu0 %vm958_vm0, %v3664_v13  ;;  %3521 = vmatprep.mubr.msk.bf16.mxu1 %vm958_vm0, %v3665_v14  ;;  %v3706_v14 = vld [vmem:[%s5821_s0 + $0x1c8] sm:$0xff]  }
  0xa6   :  { %3394 = vmatmul.mubr.msk.bf16.gmra.mrb[72].mxu0 %vm958_vm0, %v3666_v15  ;;  %3522 = vmatmul.mubr.msk.bf16.gmra.mrb[72].mxu1 %vm958_vm0, %v3667_v16  ;;  %v3707_v15 = vld [vmem:[%s5821_s0 + $0x3c8] sm:$0xff]  }
  0xa7   :  { %3397 = vmatprep.mubr.msk.bf16.mxu0 %vm958_vm0, %v3668_v17  ;;  %3525 = vmatprep.mubr.msk.bf16.mxu1 %vm958_vm0, %v3669_v18 }
  0xae   :  { %3398 = vmatmul.mubr.msk.bf16.gmra.mrb[76].mxu0 %vm958_vm0, %v3670_v19  ;;  %3526 = vmatmul.mubr.msk.bf16.gmra.mrb[76].mxu1 %vm958_vm0, %v3671_v20  ;;  %v3708_v20 = vld [vmem:[%s5821_s0 + $0x1d0] sm:$0xff]  }
  0xaf   :  { %3401 = vmatprep.mubr.msk.bf16.mxu0 %vm958_vm0, %v3672_v21  ;;  %3529 = vmatprep.mubr.msk.bf16.mxu1 %vm958_vm0, %v3673_v22  ;;  %v3709_v21 = vld [vmem:[%s5821_s0 + $0x3d0] sm:$0xff]  }
  0xb6   :  { %3402 = vmatmul.mubr.msk.bf16.gmra.mrb[80].mxu0 %vm958_vm0, %v3674_v23  ;;  %3530 = vmatmul.mubr.msk.bf16.gmra.mrb[80].mxu1 %vm958_vm0, %v3675_v24 }
  0xb7   :  { %3405 = vmatprep.mubr.msk.bf16.mxu0 %vm958_vm0, %v3676_v25  ;;  %3533 = vmatprep.mubr.msk.bf16.mxu1 %vm958_vm0, %v3677_v26 }
  0xbe   :  { %3406 = vmatmul.mubr.msk.bf16.gmra.mrb[84].mxu0 %vm958_vm0, %v3678_v27  ;;  %3534 = vmatmul.mubr.msk.bf16.gmra.mrb[84].mxu1 %vm958_vm0, %v3679_v28 }
  0xbf   :  { %3409 = vmatprep.mubr.msk.bf16.mxu0 %vm958_vm0, %v3680_v29  ;;  %3537 = vmatprep.mubr.msk.bf16.mxu1 %vm958_vm0, %v3681_v30 }
  0xc6   :  { %3410 = vmatmul.mubr.msk.bf16.gmra.mrb[88].mxu0 %vm958_vm0, %v3682_v31  ;;  %3538 = vmatmul.mubr.msk.bf16.gmra.mrb[88].mxu1 %vm958_vm0, %v3683_v32 }
  0xc7   :  { %3413 = vmatprep.mubr.msk.bf16.mxu0 %vm958_vm0, %v3684_v33  ;;  %3541 = vmatprep.mubr.msk.bf16.mxu1 %vm958_vm0, %v3685_v34 }
  0xce   :  { %3414 = vmatmul.mubr.msk.bf16.gmra.mrb[92].mxu0 %vm958_vm0, %v3686_v35  ;;  %3542 = vmatmul.mubr.msk.bf16.gmra.mrb[92].mxu1 %vm958_vm0, %v3687_v36 }
  0xcf   :  { %3417 = vmatprep.mubr.msk.bf16.mxu0 %vm958_vm0, %v3688_v37  ;;  %3545 = vmatprep.mubr.msk.bf16.mxu1 %vm958_vm0, %v3689_v38 }
  0xd6   :  { %3418 = vmatmul.mubr.msk.bf16.gmra.mrb[96].mxu0 %vm958_vm0, %v3690_v39  ;;  %3546 = vmatmul.mubr.msk.bf16.gmra.mrb[96].mxu1 %vm958_vm0, %v3691_v40  ;;  %v3710_v39 = vld [vmem:[%s5821_s0 + $0x1d8] sm:$0xff]  }
  0xd7   :  { %3421 = vmatprep.mubr.msk.bf16.mxu0 %vm958_vm0, %v3692_v41  ;;  %3549 = vmatprep.mubr.msk.bf16.mxu1 %vm958_vm0, %v3693_v42  ;;  %v3711_v40 = vld [vmem:[%s5821_s0 + $0x3d8] sm:$0xff]  }
  0xde   :  { %3422 = vmatmul.mubr.msk.bf16.gmra.mrb[100].mxu0 %vm958_vm0, %v3694_v43  ;;  %3550 = vmatmul.mubr.msk.bf16.gmra.mrb[100].mxu1 %vm958_vm0, %v3695_v44 }
  0xdf   :  { %3425 = vmatprep.mubr.msk.bf16.mxu0 %vm958_vm0, %v3696_v45  ;;  %3553 = vmatprep.mubr.msk.bf16.mxu1 %vm958_vm0, %v3697_v46  ;;  %v3712_v46 = vld [vmem:[%s5821_s0 + $0x1e0] sm:$0xff]  }
  0xe6   :  { %3426 = vmatmul.mubr.msk.bf16.gmra.mrb[104].mxu0 %vm958_vm0, %v3698_v47  ;;  %3554 = vmatmul.mubr.msk.bf16.gmra.mrb[104].mxu1 %vm958_vm0, %v3699_v48  ;;  %v3713_v47 = vld [vmem:[%s5821_s0 + $0x3e0] sm:$0xff]  }
  0xe7   :  { %3429 = vmatprep.mubr.msk.bf16.mxu0 %vm958_vm0, %v3700_v49  ;;  %3557 = vmatprep.mubr.msk.bf16.mxu1 %vm958_vm0, %v3701_v50 }
  0xe9   :  { %v3323_v52 = vpop.f32.mrb[0].mxu0  ;;  %v3451_v53 = vpop.f32.mrb[0].mxu1 }
  0xea   :  { %v1386_v54 = vadd.f32 %v3323_v52, %v4710_v51  ;;  %v1898_v55 = vadd.f32 %v3451_v53, %v4710_v51  ;;  %v1377_v56 = vpop.f32.mrb[1].mxu0  ;;  %v1889_v57 = vpop.f32.mrb[1].mxu1 }
  0xeb   :  { %v1378_v60 = vadd.f32 %v4710_v51, %v1377_v56  ;;  %v1890_v61 = vadd.f32 %v4710_v51, %v1889_v57  ;;  %v3324_v62 = vpop.f32.mrb[2].mxu0  ;;  %v3452_v63 = vpop.f32.mrb[2].mxu1 }
  0xec   :  { %3720 = vtanh.f32 %v1386_v54  ;;  %v1389_v2 = vadd.f32 %v3324_v62, %v4710_v51  ;;  %v1380_v3 = vpop.f32.mrb[3].mxu0  ;;  %v1892_v4 = vpop.f32.mrb[3].mxu1  ;;  %v1901_v5 = vadd.f32 %v3452_v63, %v4710_v51 }
  0xed   :  { %3722 = vtanh.f32 %v1898_v55  ;;  %v1381_v6 = vadd.f32 %v4710_v51, %v1380_v3  ;;  %v1893_v7 = vadd.f32 %v4710_v51, %v1892_v4  ;;  %v3714_v4 = vld [vmem:[%s5821_s0 + $0x1e8] sm:$0xff]  }
  0xee   :  { %3724 = vtanh.f32 %v1378_v60  ;;  %3430 = vmatmul.mubr.msk.bf16.gmra.mrb[108].mxu0 %vm958_vm0, %v3702_v58  ;;  %3558 = vmatmul.mubr.msk.bf16.gmra.mrb[108].mxu1 %vm958_vm0, %v3703_v59 }
  0xef   :  { %3726 = vtanh.f32 %v1890_v61  ;;  %3433 = vmatprep.mubr.msk.bf16.mxu0 %vm958_vm0, %v3704_v0  ;;  %3561 = vmatprep.mubr.msk.bf16.mxu1 %vm958_vm0, %v3705_v1 }
  0xf0   :  { %3728 = vtanh.f32 %v1389_v2 }
  0xf1   :  { %3730 = vtanh.f32 %v1901_v5  ;;  %v3327_v8 = vpop.f32.mrb[4].mxu0  ;;  %v3455_v9 = vpop.f32.mrb[4].mxu1  ;;  %v3715_v5 = vld [vmem:[%s5821_s0 + $0x3e8] sm:$0xff]  }
  0xf2   :  { %3732 = vtanh.f32 %v1381_v6  ;;  %v1402_v10 = vadd.f32 %v3327_v8, %v4710_v51  ;;  %v1914_v11 = vadd.f32 %v3455_v9, %v4710_v51  ;;  %v1393_v12 = vpop.f32.mrb[5].mxu0  ;;  %v1905_v13 = vpop.f32.mrb[5].mxu1 }
  0xf3   :  { %3734 = vtanh.f32 %v1893_v7  ;;  %v1394_v16 = vadd.f32 %v4710_v51, %v1393_v12  ;;  %v1906_v17 = vadd.f32 %v4710_v51, %v1905_v13  ;;  %v3328_v18 = vpop.f32.mrb[6].mxu0  ;;  %v3456_v19 = vpop.f32.mrb[6].mxu1  ;;  %v3717_v12 = vld [vmem:[%s5821_s0 + $0x3f0] sm:$0xff]  }
  0xf4   :  { %3736 = vtanh.f32 %v1402_v10  ;;  %v1405_v22 = vadd.f32 %v3328_v18, %v4710_v51  ;;  %v1396_v23 = vpop.f32.mrb[7].mxu0  ;;  %v1908_v24 = vpop.f32.mrb[7].mxu1  ;;  %v1917_v25 = vadd.f32 %v3456_v19, %v4710_v51 }
  0xf5   :  { %3738 = vtanh.f32 %v1914_v11  ;;  %v1397_v27 = vadd.f32 %v4710_v51, %v1396_v23  ;;  %v1909_v29 = vadd.f32 %v4710_v51, %v1908_v24  ;;  %v3716_v11 = vld [vmem:[%s5821_s0 + $0x1f0] sm:$0xff]  }
  0xf6   :  { %v3721_v26 = vpop.eup %3720  ;;  %3740 = vtanh.f32 %v1394_v16  ;;  %3434 = vmatmul.mubr.msk.bf16.gmra.mrb[112].mxu0 %vm958_vm0, %v3706_v14  ;;  %3562 = vmatmul.mubr.msk.bf16.gmra.mrb[112].mxu1 %vm958_vm0, %v3707_v15 }
  0xf7   :  { %v3723_v28 = vpop.eup %3722  ;;  %2658 = vst [vmem:[%s5823_s3 + $0x10] sm:$0xff] %v3721_v26  ;;  %3742 = vtanh.f32 %v1906_v17  ;;  %3437 = vmatprep.mubr.msk.bf16.mxu0 %vm958_vm0, %v3708_v20  ;;  %3565 = vmatprep.mubr.msk.bf16.mxu1 %vm958_vm0, %v3709_v21 }
  0xf8   :  { %v3725_v30 = vpop.eup %3724  ;;  %2786 = vst [vmem:[%s5823_s3 + $0x410] sm:$0xff] %v3723_v28  ;;  %3744 = vtanh.f32 %v1405_v22 }
  0xf9   :  { %v3727_v31 = vpop.eup %3726  ;;  %2656 = vst [vmem:[%s5823_s3] sm:$0xff] %v3725_v30  ;;  %3746 = vtanh.f32 %v1917_v25  ;;  %v3331_v32 = vpop.f32.mrb[8].mxu0 }
  0xfa   :  { %v3459_v33 = vpop.f32.mrb[8].mxu1  ;;  %v3729_v34 = vpop.eup %3728  ;;  %2784 = vst [vmem:[%s5823_s3 + $0x400] sm:$0xff] %v3727_v31  ;;  %3748 = vtanh.f32 %v1397_v27  ;;  %v1418_v35 = vadd.f32 %v3331_v32, %v4710_v51  ;;  %v3718_v32 = vld [vmem:[%s5821_s0 + $0x1f8] sm:$0xff]  }
  0xfb   :  { %v1930_v36 = vadd.f32 %v3459_v33, %v4710_v51  ;;  %v1409_v37 = vpop.f32.mrb[9].mxu0  ;;  %v1921_v38 = vpop.f32.mrb[9].mxu1  ;;  %2659 = vst [vmem:[%s5823_s3 + $0x18] sm:$0xff] %v3729_v34  ;;  %3750 = vtanh.f32 %v1909_v29  ;;  %v3719_v33 = vld [vmem:[%s5821_s0 + $0x3f8] sm:$0xff]  }
  0xfc   :  { %v3731_v41 = vpop.eup %3730  ;;  %v1410_v42 = vadd.f32 %v4710_v51, %v1409_v37  ;;  %v1922_v43 = vadd.f32 %v4710_v51, %v1921_v38  ;;  %v3332_v44 = vpop.f32.mrb[10].mxu0  ;;  %3752 = vtanh.f32 %v1418_v35 }
  0xfd   :  { %v3460_v45 = vpop.f32.mrb[10].mxu1  ;;  %v3733_v48 = vpop.eup %3732  ;;  %2787 = vst [vmem:[%s5823_s3 + $0x418] sm:$0xff] %v3731_v41  ;;  %v1421_v49 = vadd.f32 %v3332_v44, %v4710_v51  ;;  %3754 = vtanh.f32 %v1930_v36 }
  0xfe   :  { %v1412_v50 = vpop.f32.mrb[11].mxu0  ;;  %v1924_v52 = vpop.f32.mrb[11].mxu1  ;;  %2657 = vst [vmem:[%s5823_s3 + $0x8] sm:$0xff] %v3733_v48  ;;  %v1933_v54 = vadd.f32 %v3460_v45, %v4710_v51  ;;  %3756 = vtanh.f32 %v1410_v42  ;;  %3438 = vmatmul.mubr.msk.bf16.gmra.mrb[116].mxu0 %vm958_vm0, %v3710_v39  ;;  %3566 = vmatmul.mubr.msk.bf16.gmra.mrb[116].mxu1 %vm958_vm0, %v3711_v40 }
  0xff   :  { %v3735_v53 = vpop.eup %3734  ;;  %v1413_v56 = vadd.f32 %v4710_v51, %v1412_v50  ;;  %3758 = vtanh.f32 %v1922_v43  ;;  %v1925_v58 = vadd.f32 %v4710_v51, %v1924_v52  ;;  %3441 = vmatprep.mubr.msk.bf16.mxu0 %vm958_vm0, %v3712_v46  ;;  %3569 = vmatprep.mubr.msk.bf16.mxu1 %vm958_vm0, %v3713_v47 }
 0x100   :  { %v3737_v55 = vpop.eup %3736  ;;  %2785 = vst [vmem:[%s5823_s3 + $0x408] sm:$0xff] %v3735_v53  ;;  %3760 = vtanh.f32 %v1421_v49 }
 0x101   :  { %v3739_v57 = vpop.eup %3738  ;;  %2662 = vst [vmem:[%s5823_s3 + $0x30] sm:$0xff] %v3737_v55  ;;  %3762 = vtanh.f32 %v1933_v54  ;;  %v3335_v61 = vpop.f32.mrb[12].mxu0 }
 0x102   :  { %v3741_v59 = vpop.eup %3740  ;;  %2790 = vst [vmem:[%s5823_s3 + $0x430] sm:$0xff] %v3739_v57  ;;  %v3463_v62 = vpop.f32.mrb[12].mxu1  ;;  %3764 = vtanh.f32 %v1413_v56  ;;  %v1434_v0 = vadd.f32 %v3335_v61, %v4710_v51 }
 0x103   :  { %v3743_v60 = vpop.eup %3742  ;;  %2660 = vst [vmem:[%s5823_s3 + $0x20] sm:$0xff] %v3741_v59  ;;  %v1946_v1 = vadd.f32 %v3463_v62, %v4710_v51  ;;  %v1425_v2 = vpop.f32.mrb[13].mxu0  ;;  %3766 = vtanh.f32 %v1925_v58 }
 0x104   :  { %v3745_v63 = vpop.eup %3744  ;;  %2788 = vst [vmem:[%s5823_s3 + $0x420] sm:$0xff] %v3743_v60  ;;  %v1937_v3 = vpop.f32.mrb[13].mxu1  ;;  %v1426_v7 = vadd.f32 %v4710_v51, %v1425_v2  ;;  %3768 = vtanh.f32 %v1434_v0 }
 0x105   :  { %v3747_v6 = vpop.eup %3746  ;;  %2663 = vst [vmem:[%s5823_s3 + $0x38] sm:$0xff] %v3745_v63  ;;  %v1938_v8 = vadd.f32 %v4710_v51, %v1937_v3  ;;  %v3336_v9 = vpop.f32.mrb[14].mxu0  ;;  %3770 = vtanh.f32 %v1946_v1 }
 0x106   :  { %v3464_v10 = vpop.f32.mrb[14].mxu1  ;;  %v3749_v13 = vpop.eup %3748  ;;  %2791 = vst [vmem:[%s5823_s3 + $0x438] sm:$0xff] %v3747_v6  ;;  %v1437_v14 = vadd.f32 %v3336_v9, %v4710_v51  ;;  %3772 = vtanh.f32 %v1426_v7  ;;  %3442 = vmatmul.mubr.msk.bf16.gmra.mrb[120].mxu0 %vm958_vm0, %v3714_v4  ;;  %3570 = vmatmul.mubr.msk.bf16.gmra.mrb[120].mxu1 %vm958_vm0, %v3715_v5 }
 0x107   :  { %v1428_v15 = vpop.f32.mrb[15].mxu0  ;;  %v1940_v16 = vpop.f32.mrb[15].mxu1  ;;  %2661 = vst [vmem:[%s5823_s3 + $0x28] sm:$0xff] %v3749_v13  ;;  %v1949_v18 = vadd.f32 %v3464_v10, %v4710_v51  ;;  %3774 = vtanh.f32 %v1938_v8  ;;  %3445 = vmatprep.mubr.msk.bf16.mxu0 %vm958_vm0, %v3716_v11  ;;  %3573 = vmatprep.mubr.msk.bf16.mxu1 %vm958_vm0, %v3717_v12 }
 0x108   :  { %v3751_v17 = vpop.eup %3750  ;;  %v1429_v20 = vadd.f32 %v4710_v51, %v1428_v15  ;;  %v1941_v22 = vadd.f32 %v4710_v51, %v1940_v16  ;;  %3776 = vtanh.f32 %v1437_v14 }
 0x109   :  { %v3753_v19 = vpop.eup %3752  ;;  %2789 = vst [vmem:[%s5823_s3 + $0x428] sm:$0xff] %v3751_v17  ;;  %3778 = vtanh.f32 %v1949_v18  ;;  %v3339_v25 = vpop.f32.mrb[16].mxu0 }
 0x10a   :  { %v3755_v21 = vpop.eup %3754  ;;  %2666 = vst [vmem:[%s5823_s3 + $0x50] sm:$0xff] %v3753_v19  ;;  %v3467_v26 = vpop.f32.mrb[16].mxu1  ;;  %3780 = vtanh.f32 %v1429_v20  ;;  %v1450_v28 = vadd.f32 %v3339_v25, %v4710_v51 }
 0x10b   :  { %v3757_v23 = vpop.eup %3756  ;;  %2794 = vst [vmem:[%s5823_s3 + $0x450] sm:$0xff] %v3755_v21  ;;  %v1962_v29 = vadd.f32 %v3467_v26, %v4710_v51  ;;  %v1441_v30 = vpop.f32.mrb[17].mxu0  ;;  %3782 = vtanh.f32 %v1941_v22 }
 0x10c   :  { %v3759_v24 = vpop.eup %3758  ;;  %2664 = vst [vmem:[%s5823_s3 + $0x40] sm:$0xff] %v3757_v23  ;;  %v1953_v31 = vpop.f32.mrb[17].mxu1  ;;  %v1442_v35 = vadd.f32 %v4710_v51, %v1441_v30  ;;  %3784 = vtanh.f32 %v1450_v28 }
 0x10d   :  { %v3761_v27 = vpop.eup %3760  ;;  %2792 = vst [vmem:[%s5823_s3 + $0x440] sm:$0xff] %v3759_v24  ;;  %v1954_v36 = vadd.f32 %v4710_v51, %v1953_v31  ;;  %v3340_v37 = vpop.f32.mrb[18].mxu0  ;;  %3786 = vtanh.f32 %v1962_v29 }
 0x10e   :  { %v3763_v34 = vpop.eup %3762  ;;  %2667 = vst [vmem:[%s5823_s3 + $0x58] sm:$0xff] %v3761_v27  ;;  %v3468_v38 = vpop.f32.mrb[18].mxu1  ;;  %v1453_v40 = vadd.f32 %v3340_v37, %v4710_v51  ;;  %3788 = vtanh.f32 %v1442_v35  ;;  %3446 = vmatmul.mubr.msk.bf16.gmra.mrb[124].mxu0 %vm958_vm0, %v3718_v32  ;;  %3574 = vmatmul.mubr.msk.bf16.gmra.mrb[124].mxu1 %vm958_vm0, %v3719_v33 }
 0x10f   :  { %v3765_v39 = vpop.eup %3764  ;;  %2795 = vst [vmem:[%s5823_s3 + $0x458] sm:$0xff] %v3763_v34  ;;  %v1444_v41 = vpop.f32.mrb[19].mxu0  ;;  %v1965_v44 = vadd.f32 %v3468_v38, %v4710_v51  ;;  %3790 = vtanh.f32 %v1954_v36 }
 0x110   :  { %v1956_v42 = vpop.f32.mrb[19].mxu1  ;;  %v3767_v43 = vpop.eup %3766  ;;  %2665 = vst [vmem:[%s5823_s3 + $0x48] sm:$0xff] %v3765_v39  ;;  %v1445_v46 = vadd.f32 %v4710_v51, %v1444_v41  ;;  %3792 = vtanh.f32 %v1453_v40 }
 0x111   :  { %v3769_v45 = vpop.eup %3768  ;;  %2793 = vst [vmem:[%s5823_s3 + $0x448] sm:$0xff] %v3767_v43  ;;  %v1957_v48 = vadd.f32 %v4710_v51, %v1956_v42  ;;  %3794 = vtanh.f32 %v1965_v44  ;;  %v3343_v52 = vpop.f32.mrb[20].mxu0 }
 0x112   :  { %v3771_v47 = vpop.eup %3770  ;;  %2670 = vst [vmem:[%s5823_s3 + $0x70] sm:$0xff] %v3769_v45  ;;  %v3471_v53 = vpop.f32.mrb[20].mxu1  ;;  %3796 = vtanh.f32 %v1445_v46  ;;  %v1466_v55 = vadd.f32 %v3343_v52, %v4710_v51 }
 0x113   :  { %v3773_v49 = vpop.eup %3772  ;;  %2798 = vst [vmem:[%s5823_s3 + $0x470] sm:$0xff] %v3771_v47  ;;  %v1978_v56 = vadd.f32 %v3471_v53, %v4710_v51  ;;  %v1457_v57 = vpop.f32.mrb[21].mxu0  ;;  %3798 = vtanh.f32 %v1957_v48 }
 0x114   :  { %v3775_v50 = vpop.eup %3774  ;;  %2668 = vst [vmem:[%s5823_s3 + $0x60] sm:$0xff] %v3773_v49  ;;  %v1969_v58 = vpop.f32.mrb[21].mxu1  ;;  %v1458_v60 = vadd.f32 %v4710_v51, %v1457_v57  ;;  %3800 = vtanh.f32 %v1466_v55 }
 0x115   :  { %v3777_v54 = vpop.eup %3776  ;;  %2796 = vst [vmem:[%s5823_s3 + $0x460] sm:$0xff] %v3775_v50  ;;  %v1970_v61 = vadd.f32 %v4710_v51, %v1969_v58  ;;  %v3344_v62 = vpop.f32.mrb[22].mxu0  ;;  %3802 = vtanh.f32 %v1978_v56 }
 0x116   :  { %v3779_v59 = vpop.eup %3778  ;;  %2671 = vst [vmem:[%s5823_s3 + $0x78] sm:$0xff] %v3777_v54  ;;  %v3472_v63 = vpop.f32.mrb[22].mxu1  ;;  %v1469_v1 = vadd.f32 %v3344_v62, %v4710_v51  ;;  %3804 = vtanh.f32 %v1458_v60 }
 0x117   :  { %v3781_v0 = vpop.eup %3780  ;;  %2799 = vst [vmem:[%s5823_s3 + $0x478] sm:$0xff] %v3779_v59  ;;  %v1460_v2 = vpop.f32.mrb[23].mxu0  ;;  %v1981_v5 = vadd.f32 %v3472_v63, %v4710_v51  ;;  %3806 = vtanh.f32 %v1970_v61 }
 0x118   :  { %v1972_v3 = vpop.f32.mrb[23].mxu1  ;;  %v3783_v4 = vpop.eup %3782  ;;  %2669 = vst [vmem:[%s5823_s3 + $0x68] sm:$0xff] %v3781_v0  ;;  %v1461_v7 = vadd.f32 %v4710_v51, %v1460_v2  ;;  %3808 = vtanh.f32 %v1469_v1 }
 0x119   :  { %v3785_v6 = vpop.eup %3784  ;;  %2797 = vst [vmem:[%s5823_s3 + $0x468] sm:$0xff] %v3783_v4  ;;  %v1973_v9 = vadd.f32 %v4710_v51, %v1972_v3  ;;  %3810 = vtanh.f32 %v1981_v5  ;;  %v3347_v12 = vpop.f32.mrb[24].mxu0 }
 0x11a   :  { %v3787_v8 = vpop.eup %3786  ;;  %2674 = vst [vmem:[%s5823_s3 + $0x90] sm:$0xff] %v3785_v6  ;;  %v3475_v13 = vpop.f32.mrb[24].mxu1  ;;  %3812 = vtanh.f32 %v1461_v7  ;;  %v1482_v15 = vadd.f32 %v3347_v12, %v4710_v51 }
 0x11b   :  { %v3789_v10 = vpop.eup %3788  ;;  %2802 = vst [vmem:[%s5823_s3 + $0x490] sm:$0xff] %v3787_v8  ;;  %v1994_v16 = vadd.f32 %v3475_v13, %v4710_v51  ;;  %v1473_v17 = vpop.f32.mrb[25].mxu0  ;;  %3814 = vtanh.f32 %v1973_v9 }
 0x11c   :  { %v3791_v11 = vpop.eup %3790  ;;  %2672 = vst [vmem:[%s5823_s3 + $0x80] sm:$0xff] %v3789_v10  ;;  %v1985_v18 = vpop.f32.mrb[25].mxu1  ;;  %v1474_v20 = vadd.f32 %v4710_v51, %v1473_v17  ;;  %3816 = vtanh.f32 %v1482_v15 }
 0x11d   :  { %v3793_v14 = vpop.eup %3792  ;;  %2800 = vst [vmem:[%s5823_s3 + $0x480] sm:$0xff] %v3791_v11  ;;  %v1986_v21 = vadd.f32 %v4710_v51, %v1985_v18  ;;  %v3348_v22 = vpop.f32.mrb[26].mxu0  ;;  %3818 = vtanh.f32 %v1994_v16 }
 0x11e   :  { %v3795_v19 = vpop.eup %3794  ;;  %2675 = vst [vmem:[%s5823_s3 + $0x98] sm:$0xff] %v3793_v14  ;;  %v3476_v23 = vpop.f32.mrb[26].mxu1  ;;  %v1485_v25 = vadd.f32 %v3348_v22, %v4710_v51  ;;  %3820 = vtanh.f32 %v1474_v20 }
 0x11f   :  { %v3797_v24 = vpop.eup %3796  ;;  %2803 = vst [vmem:[%s5823_s3 + $0x498] sm:$0xff] %v3795_v19  ;;  %v1476_v26 = vpop.f32.mrb[27].mxu0  ;;  %v1997_v29 = vadd.f32 %v3476_v23, %v4710_v51  ;;  %3822 = vtanh.f32 %v1986_v21 }
 0x120   :  { %v1988_v27 = vpop.f32.mrb[27].mxu1  ;;  %v3799_v28 = vpop.eup %3798  ;;  %2673 = vst [vmem:[%s5823_s3 + $0x88] sm:$0xff] %v3797_v24  ;;  %v1477_v31 = vadd.f32 %v4710_v51, %v1476_v26  ;;  %3824 = vtanh.f32 %v1485_v25 }
 0x121   :  { %v3801_v30 = vpop.eup %3800  ;;  %2801 = vst [vmem:[%s5823_s3 + $0x488] sm:$0xff] %v3799_v28  ;;  %v1989_v33 = vadd.f32 %v4710_v51, %v1988_v27  ;;  %3826 = vtanh.f32 %v1997_v29  ;;  %v3351_v36 = vpop.f32.mrb[28].mxu0 }
 0x122   :  { %v3803_v32 = vpop.eup %3802  ;;  %2678 = vst [vmem:[%s5823_s3 + $0xb0] sm:$0xff] %v3801_v30  ;;  %v3479_v37 = vpop.f32.mrb[28].mxu1  ;;  %3828 = vtanh.f32 %v1477_v31  ;;  %v1498_v39 = vadd.f32 %v3351_v36, %v4710_v51 }
 0x123   :  { %v3805_v34 = vpop.eup %3804  ;;  %2806 = vst [vmem:[%s5823_s3 + $0x4b0] sm:$0xff] %v3803_v32  ;;  %v2010_v40 = vadd.f32 %v3479_v37, %v4710_v51  ;;  %v1489_v41 = vpop.f32.mrb[29].mxu0  ;;  %3830 = vtanh.f32 %v1989_v33 }
 0x124   :  { %v3807_v35 = vpop.eup %3806  ;;  %2676 = vst [vmem:[%s5823_s3 + $0xa0] sm:$0xff] %v3805_v34  ;;  %v2001_v42 = vpop.f32.mrb[29].mxu1  ;;  %v1490_v44 = vadd.f32 %v4710_v51, %v1489_v41  ;;  %3832 = vtanh.f32 %v1498_v39 }
 0x125   :  { %v3809_v38 = vpop.eup %3808  ;;  %2804 = vst [vmem:[%s5823_s3 + $0x4a0] sm:$0xff] %v3807_v35  ;;  %v2002_v45 = vadd.f32 %v4710_v51, %v2001_v42  ;;  %v3352_v46 = vpop.f32.mrb[30].mxu0  ;;  %3834 = vtanh.f32 %v2010_v40 }
 0x126   :  { %v3811_v43 = vpop.eup %3810  ;;  %2679 = vst [vmem:[%s5823_s3 + $0xb8] sm:$0xff] %v3809_v38  ;;  %v3480_v47 = vpop.f32.mrb[30].mxu1  ;;  %v1501_v49 = vadd.f32 %v3352_v46, %v4710_v51  ;;  %3836 = vtanh.f32 %v1490_v44 }
 0x127   :  { %v3813_v48 = vpop.eup %3812  ;;  %2807 = vst [vmem:[%s5823_s3 + $0x4b8] sm:$0xff] %v3811_v43  ;;  %v1492_v50 = vpop.f32.mrb[31].mxu0  ;;  %v2013_v54 = vadd.f32 %v3480_v47, %v4710_v51  ;;  %3838 = vtanh.f32 %v2002_v45 }
 0x128   :  { %v2004_v52 = vpop.f32.mrb[31].mxu1  ;;  %v3815_v53 = vpop.eup %3814  ;;  %2677 = vst [vmem:[%s5823_s3 + $0xa8] sm:$0xff] %v3813_v48  ;;  %v1493_v56 = vadd.f32 %v4710_v51, %v1492_v50  ;;  %3840 = vtanh.f32 %v1501_v49 }
 0x129   :  { %v3817_v55 = vpop.eup %3816  ;;  %2805 = vst [vmem:[%s5823_s3 + $0x4a8] sm:$0xff] %v3815_v53  ;;  %v2005_v58 = vadd.f32 %v4710_v51, %v2004_v52  ;;  %3842 = vtanh.f32 %v2013_v54  ;;  %v3355_v61 = vpop.f32.mrb[32].mxu0 }
 0x12a   :  { %v3819_v57 = vpop.eup %3818  ;;  %2682 = vst [vmem:[%s5823_s3 + $0xd0] sm:$0xff] %v3817_v55  ;;  %v3483_v62 = vpop.f32.mrb[32].mxu1  ;;  %3844 = vtanh.f32 %v1493_v56  ;;  %v1514_v0 = vadd.f32 %v3355_v61, %v4710_v51 }
 0x12b   :  { %v3821_v59 = vpop.eup %3820  ;;  %2810 = vst [vmem:[%s5823_s3 + $0x4d0] sm:$0xff] %v3819_v57  ;;  %v2026_v1 = vadd.f32 %v3483_v62, %v4710_v51  ;;  %v1505_v2 = vpop.f32.mrb[33].mxu0  ;;  %3846 = vtanh.f32 %v2005_v58 }
 0x12c   :  { %v3823_v60 = vpop.eup %3822  ;;  %2680 = vst [vmem:[%s5823_s3 + $0xc0] sm:$0xff] %v3821_v59  ;;  %v2017_v3 = vpop.f32.mrb[33].mxu1  ;;  %v1506_v5 = vadd.f32 %v4710_v51, %v1505_v2  ;;  %3848 = vtanh.f32 %v1514_v0 }
 0x12d   :  { %v3825_v63 = vpop.eup %3824  ;;  %2808 = vst [vmem:[%s5823_s3 + $0x4c0] sm:$0xff] %v3823_v60  ;;  %v2018_v6 = vadd.f32 %v4710_v51, %v2017_v3  ;;  %v3356_v7 = vpop.f32.mrb[34].mxu0  ;;  %3850 = vtanh.f32 %v2026_v1 }
 0x12e   :  { %v3827_v4 = vpop.eup %3826  ;;  %2683 = vst [vmem:[%s5823_s3 + $0xd8] sm:$0xff] %v3825_v63  ;;  %v3484_v8 = vpop.f32.mrb[34].mxu1  ;;  %v1517_v10 = vadd.f32 %v3356_v7, %v4710_v51  ;;  %3852 = vtanh.f32 %v1506_v5 }
 0x12f   :  { %v3829_v9 = vpop.eup %3828  ;;  %2811 = vst [vmem:[%s5823_s3 + $0x4d8] sm:$0xff] %v3827_v4  ;;  %v1508_v11 = vpop.f32.mrb[35].mxu0  ;;  %v2029_v14 = vadd.f32 %v3484_v8, %v4710_v51  ;;  %3854 = vtanh.f32 %v2018_v6 }
 0x130   :  { %v2020_v12 = vpop.f32.mrb[35].mxu1  ;;  %v3831_v13 = vpop.eup %3830  ;;  %2681 = vst [vmem:[%s5823_s3 + $0xc8] sm:$0xff] %v3829_v9  ;;  %v1509_v16 = vadd.f32 %v4710_v51, %v1508_v11  ;;  %3856 = vtanh.f32 %v1517_v10 }
 0x131   :  { %v3833_v15 = vpop.eup %3832  ;;  %2809 = vst [vmem:[%s5823_s3 + $0x4c8] sm:$0xff] %v3831_v13  ;;  %v2021_v18 = vadd.f32 %v4710_v51, %v2020_v12  ;;  %3858 = vtanh.f32 %v2029_v14  ;;  %v3359_v21 = vpop.f32.mrb[36].mxu0 }
 0x132   :  { %v3835_v17 = vpop.eup %3834  ;;  %2686 = vst [vmem:[%s5823_s3 + $0xf0] sm:$0xff] %v3833_v15  ;;  %v3487_v22 = vpop.f32.mrb[36].mxu1  ;;  %3860 = vtanh.f32 %v1509_v16  ;;  %v1530_v24 = vadd.f32 %v3359_v21, %v4710_v51 }
 0x133   :  { %v3837_v19 = vpop.eup %3836  ;;  %2814 = vst [vmem:[%s5823_s3 + $0x4f0] sm:$0xff] %v3835_v17  ;;  %v2042_v25 = vadd.f32 %v3487_v22, %v4710_v51  ;;  %v1521_v26 = vpop.f32.mrb[37].mxu0  ;;  %3862 = vtanh.f32 %v2021_v18 }
 0x134   :  { %v3839_v20 = vpop.eup %3838  ;;  %2684 = vst [vmem:[%s5823_s3 + $0xe0] sm:$0xff] %v3837_v19  ;;  %v2033_v27 = vpop.f32.mrb[37].mxu1  ;;  %v1522_v29 = vadd.f32 %v4710_v51, %v1521_v26  ;;  %3864 = vtanh.f32 %v1530_v24 }
 0x135   :  { %v3841_v23 = vpop.eup %3840  ;;  %2812 = vst [vmem:[%s5823_s3 + $0x4e0] sm:$0xff] %v3839_v20  ;;  %v2034_v30 = vadd.f32 %v4710_v51, %v2033_v27  ;;  %v3360_v31 = vpop.f32.mrb[38].mxu0  ;;  %3866 = vtanh.f32 %v2042_v25 }
 0x136   :  { %v3843_v28 = vpop.eup %3842  ;;  %2687 = vst [vmem:[%s5823_s3 + $0xf8] sm:$0xff] %v3841_v23  ;;  %v3488_v32 = vpop.f32.mrb[38].mxu1  ;;  %v1533_v34 = vadd.f32 %v3360_v31, %v4710_v51  ;;  %3868 = vtanh.f32 %v1522_v29 }
 0x137   :  { %v3845_v33 = vpop.eup %3844  ;;  %2815 = vst [vmem:[%s5823_s3 + $0x4f8] sm:$0xff] %v3843_v28  ;;  %v1524_v35 = vpop.f32.mrb[39].mxu0  ;;  %v2045_v38 = vadd.f32 %v3488_v32, %v4710_v51  ;;  %3870 = vtanh.f32 %v2034_v30 }
 0x138   :  { %v2036_v36 = vpop.f32.mrb[39].mxu1  ;;  %v3847_v37 = vpop.eup %3846  ;;  %2685 = vst [vmem:[%s5823_s3 + $0xe8] sm:$0xff] %v3845_v33  ;;  %v1525_v40 = vadd.f32 %v4710_v51, %v1524_v35  ;;  %3872 = vtanh.f32 %v1533_v34 }
 0x139   :  { %v3849_v39 = vpop.eup %3848  ;;  %2813 = vst [vmem:[%s5823_s3 + $0x4e8] sm:$0xff] %v3847_v37  ;;  %v2037_v42 = vadd.f32 %v4710_v51, %v2036_v36  ;;  %3874 = vtanh.f32 %v2045_v38  ;;  %v3363_v45 = vpop.f32.mrb[40].mxu0 }
 0x13a   :  { %v3851_v41 = vpop.eup %3850  ;;  %2690 = vst [vmem:[%s5823_s3 + $0x110] sm:$0xff] %v3849_v39  ;;  %v3491_v46 = vpop.f32.mrb[40].mxu1  ;;  %3876 = vtanh.f32 %v1525_v40  ;;  %v1546_v48 = vadd.f32 %v3363_v45, %v4710_v51 }
 0x13b   :  { %v3853_v43 = vpop.eup %3852  ;;  %2818 = vst [vmem:[%s5823_s3 + $0x510] sm:$0xff] %v3851_v41  ;;  %v2058_v49 = vadd.f32 %v3491_v46, %v4710_v51  ;;  %v1537_v50 = vpop.f32.mrb[41].mxu0  ;;  %3878 = vtanh.f32 %v2037_v42 }
 0x13c   :  { %v3855_v44 = vpop.eup %3854  ;;  %2688 = vst [vmem:[%s5823_s3 + $0x100] sm:$0xff] %v3853_v43  ;;  %v2049_v52 = vpop.f32.mrb[41].mxu1  ;;  %v1538_v54 = vadd.f32 %v4710_v51, %v1537_v50  ;;  %3880 = vtanh.f32 %v1546_v48  ;;  %v5147_v43 = vld [vmem:[%s5822_s2] ss:$0 sm:$0xff] }
 0x13d   :  { %v3857_v47 = vpop.eup %3856  ;;  %2816 = vst [vmem:[%s5823_s3 + $0x500] sm:$0xff] %v3855_v44  ;;  %v2050_v55 = vadd.f32 %v4710_v51, %v2049_v52  ;;  %v3364_v56 = vpop.f32.mrb[42].mxu0  ;;  %3882 = vtanh.f32 %v2058_v49 }
 0x13e   :  { %v3859_v53 = vpop.eup %3858  ;;  %2691 = vst [vmem:[%s5823_s3 + $0x118] sm:$0xff] %v3857_v47  ;;  %v3492_v57 = vpop.f32.mrb[42].mxu1  ;;  %v1549_v59 = vadd.f32 %v3364_v56, %v4710_v51  ;;  %3884 = vtanh.f32 %v1538_v54 }
 0x13f   :  { %v3861_v58 = vpop.eup %3860  ;;  %2819 = vst [vmem:[%s5823_s3 + $0x518] sm:$0xff] %v3859_v53  ;;  %v1540_v60 = vpop.f32.mrb[43].mxu0  ;;  %v2061_v63 = vadd.f32 %v3492_v57, %v4710_v51  ;;  %3886 = vtanh.f32 %v2050_v55 }
 0x140   :  { %v2052_v61 = vpop.f32.mrb[43].mxu1  ;;  %v3863_v62 = vpop.eup %3862  ;;  %2689 = vst [vmem:[%s5823_s3 + $0x108] sm:$0xff] %v3861_v58  ;;  %v1541_v1 = vadd.f32 %v4710_v51, %v1540_v60  ;;  %3888 = vtanh.f32 %v1549_v59 }
 0x141   :  { %v3865_v0 = vpop.eup %3864  ;;  %2817 = vst [vmem:[%s5823_s3 + $0x508] sm:$0xff] %v3863_v62  ;;  %v2053_v3 = vadd.f32 %v4710_v51, %v2052_v61  ;;  %3890 = vtanh.f32 %v2061_v63  ;;  %v3367_v6 = vpop.f32.mrb[44].mxu0 }
 0x142   :  { %v3867_v2 = vpop.eup %3866  ;;  %2694 = vst [vmem:[%s5823_s3 + $0x130] sm:$0xff] %v3865_v0  ;;  %v3495_v7 = vpop.f32.mrb[44].mxu1  ;;  %3892 = vtanh.f32 %v1541_v1  ;;  %v1562_v9 = vadd.f32 %v3367_v6, %v4710_v51 }
 0x143   :  { %v3869_v4 = vpop.eup %3868  ;;  %2822 = vst [vmem:[%s5823_s3 + $0x530] sm:$0xff] %v3867_v2  ;;  %v2074_v10 = vadd.f32 %v3495_v7, %v4710_v51  ;;  %v1553_v11 = vpop.f32.mrb[45].mxu0  ;;  %3894 = vtanh.f32 %v2053_v3 }
 0x144   :  { %v3871_v5 = vpop.eup %3870  ;;  %2692 = vst [vmem:[%s5823_s3 + $0x120] sm:$0xff] %v3869_v4  ;;  %v2065_v12 = vpop.f32.mrb[45].mxu1  ;;  %v1554_v14 = vadd.f32 %v4710_v51, %v1553_v11  ;;  %3896 = vtanh.f32 %v1562_v9 }
 0x145   :  { %v3873_v8 = vpop.eup %3872  ;;  %2820 = vst [vmem:[%s5823_s3 + $0x520] sm:$0xff] %v3871_v5  ;;  %v2066_v15 = vadd.f32 %v4710_v51, %v2065_v12  ;;  %v3368_v16 = vpop.f32.mrb[46].mxu0  ;;  %3898 = vtanh.f32 %v2074_v10 }
 0x146   :  { %v3875_v13 = vpop.eup %3874  ;;  %2695 = vst [vmem:[%s5823_s3 + $0x138] sm:$0xff] %v3873_v8  ;;  %v3496_v17 = vpop.f32.mrb[46].mxu1  ;;  %v1565_v19 = vadd.f32 %v3368_v16, %v4710_v51  ;;  %3900 = vtanh.f32 %v1554_v14 }
 0x147   :  { %v3877_v18 = vpop.eup %3876  ;;  %2823 = vst [vmem:[%s5823_s3 + $0x538] sm:$0xff] %v3875_v13  ;;  %v1556_v20 = vpop.f32.mrb[47].mxu0  ;;  %v2077_v23 = vadd.f32 %v3496_v17, %v4710_v51  ;;  %3902 = vtanh.f32 %v2066_v15 }
 0x148   :  { %v2068_v21 = vpop.f32.mrb[47].mxu1  ;;  %v3879_v22 = vpop.eup %3878  ;;  %2693 = vst [vmem:[%s5823_s3 + $0x128] sm:$0xff] %v3877_v18  ;;  %v1557_v25 = vadd.f32 %v4710_v51, %v1556_v20  ;;  %3904 = vtanh.f32 %v1565_v19 }
 0x149   :  { %v3881_v24 = vpop.eup %3880  ;;  %2821 = vst [vmem:[%s5823_s3 + $0x528] sm:$0xff] %v3879_v22  ;;  %v2069_v27 = vadd.f32 %v4710_v51, %v2068_v21  ;;  %3906 = vtanh.f32 %v2077_v23  ;;  %v3371_v30 = vpop.f32.mrb[48].mxu0 }
 0x14a   :  { %v3883_v26 = vpop.eup %3882  ;;  %2698 = vst [vmem:[%s5823_s3 + $0x150] sm:$0xff] %v3881_v24  ;;  %v3499_v31 = vpop.f32.mrb[48].mxu1  ;;  %3908 = vtanh.f32 %v1557_v25  ;;  %v1578_v33 = vadd.f32 %v3371_v30, %v4710_v51 }
 0x14b   :  { %v3885_v28 = vpop.eup %3884  ;;  %2826 = vst [vmem:[%s5823_s3 + $0x550] sm:$0xff] %v3883_v26  ;;  %v2090_v34 = vadd.f32 %v3499_v31, %v4710_v51  ;;  %v1569_v35 = vpop.f32.mrb[49].mxu0  ;;  %3910 = vtanh.f32 %v2069_v27 }
 0x14c   :  { %v3887_v29 = vpop.eup %3886  ;;  %2696 = vst [vmem:[%s5823_s3 + $0x140] sm:$0xff] %v3885_v28  ;;  %v2081_v36 = vpop.f32.mrb[49].mxu1  ;;  %v1570_v38 = vadd.f32 %v4710_v51, %v1569_v35  ;;  %3912 = vtanh.f32 %v1578_v33 }
 0x14d   :  { %v3889_v32 = vpop.eup %3888  ;;  %2824 = vst [vmem:[%s5823_s3 + $0x540] sm:$0xff] %v3887_v29  ;;  %v2082_v39 = vadd.f32 %v4710_v51, %v2081_v36  ;;  %v3372_v40 = vpop.f32.mrb[50].mxu0  ;;  %3914 = vtanh.f32 %v2090_v34 }
 0x14e   :  { %v3891_v37 = vpop.eup %3890  ;;  %2699 = vst [vmem:[%s5823_s3 + $0x158] sm:$0xff] %v3889_v32  ;;  %v3500_v41 = vpop.f32.mrb[50].mxu1  ;;  %v1581_v44 = vadd.f32 %v5147_v43, %v3372_v40  ;;  %3916 = vtanh.f32 %v1570_v38 }
 0x14f   :  { %v3893_v42 = vpop.eup %3892  ;;  %2827 = vst [vmem:[%s5823_s3 + $0x558] sm:$0xff] %v3891_v37  ;;  %v1572_v45 = vpop.f32.mrb[51].mxu0  ;;  %v2093_v51 = vadd.f32 %v5147_v43, %v3500_v41  ;;  %3918 = vtanh.f32 %v2082_v39 }
 0x150   :  { %v2084_v46 = vpop.f32.mrb[51].mxu1  ;;  %v3895_v47 = vpop.eup %3894  ;;  %2697 = vst [vmem:[%s5823_s3 + $0x148] sm:$0xff] %v3893_v42  ;;  %v1573_v49 = vadd.f32 %v5147_v43, %v1572_v45  ;;  %3920 = vtanh.f32 %v1581_v44 }
 0x151   :  { %v3897_v48 = vpop.eup %3896  ;;  %2825 = vst [vmem:[%s5823_s3 + $0x548] sm:$0xff] %v3895_v47  ;;  %v2085_v52 = vadd.f32 %v5147_v43, %v2084_v46  ;;  %3922 = vtanh.f32 %v2093_v51  ;;  %v3375_v55 = vpop.f32.mrb[52].mxu0 }
 0x152   :  { %v3899_v50 = vpop.eup %3898  ;;  %2702 = vst [vmem:[%s5823_s3 + $0x170] sm:$0xff] %v3897_v48  ;;  %v3503_v56 = vpop.f32.mrb[52].mxu1  ;;  %3924 = vtanh.f32 %v1573_v49  ;;  %v1594_v58 = vadd.f32 %v5147_v43, %v3375_v55 }
 0x153   :  { %v3901_v53 = vpop.eup %3900  ;;  %2830 = vst [vmem:[%s5823_s3 + $0x570] sm:$0xff] %v3899_v50  ;;  %v2106_v59 = vadd.f32 %v5147_v43, %v3503_v56  ;;  %v1585_v60 = vpop.f32.mrb[53].mxu0  ;;  %3926 = vtanh.f32 %v2085_v52 }
 0x154   :  { %v3903_v54 = vpop.eup %3902  ;;  %2700 = vst [vmem:[%s5823_s3 + $0x160] sm:$0xff] %v3901_v53  ;;  %v2097_v61 = vpop.f32.mrb[53].mxu1  ;;  %v1586_v63 = vadd.f32 %v5147_v43, %v1585_v60  ;;  %3928 = vtanh.f32 %v1594_v58 }
 0x155   :  { %v3905_v57 = vpop.eup %3904  ;;  %2828 = vst [vmem:[%s5823_s3 + $0x560] sm:$0xff] %v3903_v54  ;;  %v2098_v0 = vadd.f32 %v5147_v43, %v2097_v61  ;;  %v3376_v1 = vpop.f32.mrb[54].mxu0  ;;  %3930 = vtanh.f32 %v2106_v59 }
 0x156   :  { %v3907_v62 = vpop.eup %3906  ;;  %2703 = vst [vmem:[%s5823_s3 + $0x178] sm:$0xff] %v3905_v57  ;;  %v3504_v2 = vpop.f32.mrb[54].mxu1  ;;  %v1597_v4 = vadd.f32 %v5147_v43, %v3376_v1  ;;  %3932 = vtanh.f32 %v1586_v63 }
 0x157   :  { %v3909_v3 = vpop.eup %3908  ;;  %2831 = vst [vmem:[%s5823_s3 + $0x578] sm:$0xff] %v3907_v62  ;;  %v1588_v5 = vpop.f32.mrb[55].mxu0  ;;  %v2109_v8 = vadd.f32 %v5147_v43, %v3504_v2  ;;  %3934 = vtanh.f32 %v2098_v0 }
 0x158   :  { %v2100_v6 = vpop.f32.mrb[55].mxu1  ;;  %v3911_v7 = vpop.eup %3910  ;;  %2701 = vst [vmem:[%s5823_s3 + $0x168] sm:$0xff] %v3909_v3  ;;  %v1589_v10 = vadd.f32 %v5147_v43, %v1588_v5  ;;  %3936 = vtanh.f32 %v1597_v4 }
 0x159   :  { %v3913_v9 = vpop.eup %3912  ;;  %2829 = vst [vmem:[%s5823_s3 + $0x568] sm:$0xff] %v3911_v7  ;;  %v2101_v12 = vadd.f32 %v5147_v43, %v2100_v6  ;;  %3938 = vtanh.f32 %v2109_v8  ;;  %v3379_v15 = vpop.f32.mrb[56].mxu0 }
 0x15a   :  { %v3915_v11 = vpop.eup %3914  ;;  %2706 = vst [vmem:[%s5823_s3 + $0x190] sm:$0xff] %v3913_v9  ;;  %v3507_v16 = vpop.f32.mrb[56].mxu1  ;;  %3940 = vtanh.f32 %v1589_v10  ;;  %v1610_v18 = vadd.f32 %v5147_v43, %v3379_v15 }
 0x15b   :  { %v3917_v13 = vpop.eup %3916  ;;  %2834 = vst [vmem:[%s5823_s3 + $0x590] sm:$0xff] %v3915_v11  ;;  %v2122_v19 = vadd.f32 %v5147_v43, %v3507_v16  ;;  %v1601_v20 = vpop.f32.mrb[57].mxu0  ;;  %3942 = vtanh.f32 %v2101_v12 }
 0x15c   :  { %v3919_v14 = vpop.eup %3918  ;;  %2704 = vst [vmem:[%s5823_s3 + $0x180] sm:$0xff] %v3917_v13  ;;  %v2113_v21 = vpop.f32.mrb[57].mxu1  ;;  %v1602_v23 = vadd.f32 %v5147_v43, %v1601_v20  ;;  %3944 = vtanh.f32 %v1610_v18 }
 0x15d   :  { %v3921_v17 = vpop.eup %3920  ;;  %2832 = vst [vmem:[%s5823_s3 + $0x580] sm:$0xff] %v3919_v14  ;;  %v2114_v24 = vadd.f32 %v5147_v43, %v2113_v21  ;;  %v3380_v25 = vpop.f32.mrb[58].mxu0  ;;  %3946 = vtanh.f32 %v2122_v19 }
 0x15e   :  { %v3923_v22 = vpop.eup %3922  ;;  %2707 = vst [vmem:[%s5823_s3 + $0x198] sm:$0xff] %v3921_v17  ;;  %v3508_v26 = vpop.f32.mrb[58].mxu1  ;;  %v1613_v28 = vadd.f32 %v5147_v43, %v3380_v25  ;;  %3948 = vtanh.f32 %v1602_v23 }
 0x15f   :  { %v3925_v27 = vpop.eup %3924  ;;  %2835 = vst [vmem:[%s5823_s3 + $0x598] sm:$0xff] %v3923_v22  ;;  %v1604_v29 = vpop.f32.mrb[59].mxu0  ;;  %v2125_v32 = vadd.f32 %v5147_v43, %v3508_v26  ;;  %3950 = vtanh.f32 %v2114_v24 }
 0x160   :  { %v2116_v30 = vpop.f32.mrb[59].mxu1  ;;  %v3927_v31 = vpop.eup %3926  ;;  %2705 = vst [vmem:[%s5823_s3 + $0x188] sm:$0xff] %v3925_v27  ;;  %v1605_v34 = vadd.f32 %v5147_v43, %v1604_v29  ;;  %3952 = vtanh.f32 %v1613_v28 }
 0x161   :  { %v3929_v33 = vpop.eup %3928  ;;  %2833 = vst [vmem:[%s5823_s3 + $0x588] sm:$0xff] %v3927_v31  ;;  %v2117_v36 = vadd.f32 %v5147_v43, %v2116_v30  ;;  %3954 = vtanh.f32 %v2125_v32  ;;  %v3383_v39 = vpop.f32.mrb[60].mxu0 }
 0x162   :  { %v3931_v35 = vpop.eup %3930  ;;  %2710 = vst [vmem:[%s5823_s3 + $0x1b0] sm:$0xff] %v3929_v33  ;;  %v3511_v40 = vpop.f32.mrb[60].mxu1  ;;  %3956 = vtanh.f32 %v1605_v34  ;;  %v1626_v42 = vadd.f32 %v5147_v43, %v3383_v39 }
 0x163   :  { %v3933_v37 = vpop.eup %3932  ;;  %2838 = vst [vmem:[%s5823_s3 + $0x5b0] sm:$0xff] %v3931_v35  ;;  %v2138_v44 = vadd.f32 %v5147_v43, %v3511_v40  ;;  %v1617_v45 = vpop.f32.mrb[61].mxu0  ;;  %3958 = vtanh.f32 %v2117_v36 }
 0x164   :  { %v3935_v38 = vpop.eup %3934  ;;  %2708 = vst [vmem:[%s5823_s3 + $0x1a0] sm:$0xff] %v3933_v37  ;;  %v2129_v46 = vpop.f32.mrb[61].mxu1  ;;  %v1618_v51 = vadd.f32 %v5147_v43, %v1617_v45  ;;  %3960 = vtanh.f32 %v1626_v42 }
 0x165   :  { %v3937_v41 = vpop.eup %3936  ;;  %2836 = vst [vmem:[%s5823_s3 + $0x5a0] sm:$0xff] %v3935_v38  ;;  %v2130_v48 = vadd.f32 %v5147_v43, %v2129_v46  ;;  %v3384_v49 = vpop.f32.mrb[62].mxu0  ;;  %3962 = vtanh.f32 %v2138_v44 }
 0x166   :  { %v3939_v47 = vpop.eup %3938  ;;  %2711 = vst [vmem:[%s5823_s3 + $0x1b8] sm:$0xff] %v3937_v41  ;;  %v3512_v50 = vpop.f32.mrb[62].mxu1  ;;  %v1629_v53 = vadd.f32 %v5147_v43, %v3384_v49  ;;  %3964 = vtanh.f32 %v1618_v51 }
 0x167   :  { %v3941_v52 = vpop.eup %3940  ;;  %2839 = vst [vmem:[%s5823_s3 + $0x5b8] sm:$0xff] %v3939_v47  ;;  %v1620_v54 = vpop.f32.mrb[63].mxu0  ;;  %v2141_v57 = vadd.f32 %v5147_v43, %v3512_v50  ;;  %3966 = vtanh.f32 %v2130_v48 }
 0x168   :  { %v2132_v55 = vpop.f32.mrb[63].mxu1  ;;  %v3943_v56 = vpop.eup %3942  ;;  %2709 = vst [vmem:[%s5823_s3 + $0x1a8] sm:$0xff] %v3941_v52  ;;  %v1621_v59 = vadd.f32 %v5147_v43, %v1620_v54  ;;  %3968 = vtanh.f32 %v1629_v53 }
 0x169   :  { %v3945_v58 = vpop.eup %3944  ;;  %2837 = vst [vmem:[%s5823_s3 + $0x5a8] sm:$0xff] %v3943_v56  ;;  %v2133_v61 = vadd.f32 %v5147_v43, %v2132_v55  ;;  %3970 = vtanh.f32 %v2141_v57  ;;  %v3387_v0 = vpop.f32.mrb[64].mxu0 }
 0x16a   :  { %v3947_v60 = vpop.eup %3946  ;;  %2714 = vst [vmem:[%s5823_s3 + $0x1d0] sm:$0xff] %v3945_v58  ;;  %v3515_v1 = vpop.f32.mrb[64].mxu1  ;;  %3972 = vtanh.f32 %v1621_v59  ;;  %v1642_v3 = vadd.f32 %v5147_v43, %v3387_v0 }
 0x16b   :  { %v3949_v62 = vpop.eup %3948  ;;  %2842 = vst [vmem:[%s5823_s3 + $0x5d0] sm:$0xff] %v3947_v60  ;;  %v2154_v4 = vadd.f32 %v5147_v43, %v3515_v1  ;;  %v1633_v5 = vpop.f32.mrb[65].mxu0  ;;  %3974 = vtanh.f32 %v2133_v61 }
 0x16c   :  { %v3951_v63 = vpop.eup %3950  ;;  %2712 = vst [vmem:[%s5823_s3 + $0x1c0] sm:$0xff] %v3949_v62  ;;  %v2145_v6 = vpop.f32.mrb[65].mxu1  ;;  %v1634_v8 = vadd.f32 %v5147_v43, %v1633_v5  ;;  %3976 = vtanh.f32 %v1642_v3 }
 0x16d   :  { %v3953_v2 = vpop.eup %3952  ;;  %2840 = vst [vmem:[%s5823_s3 + $0x5c0] sm:$0xff] %v3951_v63  ;;  %v2146_v9 = vadd.f32 %v5147_v43, %v2145_v6  ;;  %v3388_v10 = vpop.f32.mrb[66].mxu0  ;;  %3978 = vtanh.f32 %v2154_v4 }
 0x16e   :  { %v3955_v7 = vpop.eup %3954  ;;  %2715 = vst [vmem:[%s5823_s3 + $0x1d8] sm:$0xff] %v3953_v2  ;;  %v3516_v11 = vpop.f32.mrb[66].mxu1  ;;  %v1645_v13 = vadd.f32 %v5147_v43, %v3388_v10  ;;  %3980 = vtanh.f32 %v1634_v8 }
 0x16f   :  { %v3957_v12 = vpop.eup %3956  ;;  %2843 = vst [vmem:[%s5823_s3 + $0x5d8] sm:$0xff] %v3955_v7  ;;  %v1636_v14 = vpop.f32.mrb[67].mxu0  ;;  %v2157_v17 = vadd.f32 %v5147_v43, %v3516_v11  ;;  %3982 = vtanh.f32 %v2146_v9 }
 0x170   :  { %v2148_v15 = vpop.f32.mrb[67].mxu1  ;;  %v3959_v16 = vpop.eup %3958  ;;  %2713 = vst [vmem:[%s5823_s3 + $0x1c8] sm:$0xff] %v3957_v12  ;;  %v1637_v19 = vadd.f32 %v5147_v43, %v1636_v14  ;;  %3984 = vtanh.f32 %v1645_v13 }
 0x171   :  { %v3961_v18 = vpop.eup %3960  ;;  %2841 = vst [vmem:[%s5823_s3 + $0x5c8] sm:$0xff] %v3959_v16  ;;  %v2149_v21 = vadd.f32 %v5147_v43, %v2148_v15  ;;  %3986 = vtanh.f32 %v2157_v17  ;;  %v3391_v24 = vpop.f32.mrb[68].mxu0 }
 0x172   :  { %v3963_v20 = vpop.eup %3962  ;;  %2718 = vst [vmem:[%s5823_s3 + $0x1f0] sm:$0xff] %v3961_v18  ;;  %v3519_v25 = vpop.f32.mrb[68].mxu1  ;;  %3988 = vtanh.f32 %v1637_v19  ;;  %v1658_v27 = vadd.f32 %v5147_v43, %v3391_v24 }
 0x173   :  { %v3965_v22 = vpop.eup %3964  ;;  %2846 = vst [vmem:[%s5823_s3 + $0x5f0] sm:$0xff] %v3963_v20  ;;  %v2170_v28 = vadd.f32 %v5147_v43, %v3519_v25  ;;  %v1649_v29 = vpop.f32.mrb[69].mxu0  ;;  %3990 = vtanh.f32 %v2149_v21 }
 0x174   :  { %v3967_v23 = vpop.eup %3966  ;;  %2716 = vst [vmem:[%s5823_s3 + $0x1e0] sm:$0xff] %v3965_v22  ;;  %v2161_v30 = vpop.f32.mrb[69].mxu1  ;;  %v1650_v32 = vadd.f32 %v5147_v43, %v1649_v29  ;;  %3992 = vtanh.f32 %v1658_v27 }
 0x175   :  { %v3969_v26 = vpop.eup %3968  ;;  %2844 = vst [vmem:[%s5823_s3 + $0x5e0] sm:$0xff] %v3967_v23  ;;  %v2162_v33 = vadd.f32 %v5147_v43, %v2161_v30  ;;  %v3392_v34 = vpop.f32.mrb[70].mxu0  ;;  %3994 = vtanh.f32 %v2170_v28 }
 0x176   :  { %v3971_v31 = vpop.eup %3970  ;;  %2719 = vst [vmem:[%s5823_s3 + $0x1f8] sm:$0xff] %v3969_v26  ;;  %v3520_v35 = vpop.f32.mrb[70].mxu1  ;;  %v1661_v37 = vadd.f32 %v5147_v43, %v3392_v34  ;;  %3996 = vtanh.f32 %v1650_v32 }
 0x177   :  { %v3973_v36 = vpop.eup %3972  ;;  %2847 = vst [vmem:[%s5823_s3 + $0x5f8] sm:$0xff] %v3971_v31  ;;  %v1652_v38 = vpop.f32.mrb[71].mxu0  ;;  %v2173_v41 = vadd.f32 %v5147_v43, %v3520_v35  ;;  %3998 = vtanh.f32 %v2162_v33 }
 0x178   :  { %v2164_v39 = vpop.f32.mrb[71].mxu1  ;;  %v3975_v40 = vpop.eup %3974  ;;  %2717 = vst [vmem:[%s5823_s3 + $0x1e8] sm:$0xff] %v3973_v36  ;;  %v1653_v44 = vadd.f32 %v5147_v43, %v1652_v38  ;;  %4000 = vtanh.f32 %v1661_v37 }
 0x179   :  { %v3977_v42 = vpop.eup %3976  ;;  %2845 = vst [vmem:[%s5823_s3 + $0x5e8] sm:$0xff] %v3975_v40  ;;  %v2165_v46 = vadd.f32 %v5147_v43, %v2164_v39  ;;  %4002 = vtanh.f32 %v2173_v41  ;;  %v3395_v48 = vpop.f32.mrb[72].mxu0 }
 0x17a   :  { %v3979_v45 = vpop.eup %3978  ;;  %2722 = vst [vmem:[%s5823_s3 + $0x210] sm:$0xff] %v3977_v42  ;;  %v3523_v49 = vpop.f32.mrb[72].mxu1  ;;  %4004 = vtanh.f32 %v1653_v44  ;;  %v1674_v52 = vadd.f32 %v5147_v43, %v3395_v48 }
 0x17b   :  { %v3981_v47 = vpop.eup %3980  ;;  %2850 = vst [vmem:[%s5823_s3 + $0x610] sm:$0xff] %v3979_v45  ;;  %v2186_v53 = vadd.f32 %v5147_v43, %v3523_v49  ;;  %v1665_v54 = vpop.f32.mrb[73].mxu0  ;;  %4006 = vtanh.f32 %v2165_v46 }
 0x17c   :  { %v3983_v51 = vpop.eup %3982  ;;  %2720 = vst [vmem:[%s5823_s3 + $0x200] sm:$0xff] %v3981_v47  ;;  %v2177_v55 = vpop.f32.mrb[73].mxu1  ;;  %v1666_v57 = vadd.f32 %v5147_v43, %v1665_v54  ;;  %4008 = vtanh.f32 %v1674_v52 }
 0x17d   :  { %v3985_v50 = vpop.eup %3984  ;;  %2848 = vst [vmem:[%s5823_s3 + $0x600] sm:$0xff] %v3983_v51  ;;  %v2178_v58 = vadd.f32 %v5147_v43, %v2177_v55  ;;  %v3396_v59 = vpop.f32.mrb[74].mxu0  ;;  %4010 = vtanh.f32 %v2186_v53 }
 0x17e   :  { %v3987_v56 = vpop.eup %3986  ;;  %2723 = vst [vmem:[%s5823_s3 + $0x218] sm:$0xff] %v3985_v50  ;;  %v3524_v60 = vpop.f32.mrb[74].mxu1  ;;  %v1677_v62 = vadd.f32 %v5147_v43, %v3396_v59  ;;  %4012 = vtanh.f32 %v1666_v57 }
 0x17f   :  { %v3989_v61 = vpop.eup %3988  ;;  %2851 = vst [vmem:[%s5823_s3 + $0x618] sm:$0xff] %v3987_v56  ;;  %v1668_v63 = vpop.f32.mrb[75].mxu0  ;;  %v2189_v2 = vadd.f32 %v5147_v43, %v3524_v60  ;;  %4014 = vtanh.f32 %v2178_v58 }
 0x180   :  { %v2180_v0 = vpop.f32.mrb[75].mxu1  ;;  %v3991_v1 = vpop.eup %3990  ;;  %2721 = vst [vmem:[%s5823_s3 + $0x208] sm:$0xff] %v3989_v61  ;;  %v1669_v4 = vadd.f32 %v5147_v43, %v1668_v63  ;;  %4016 = vtanh.f32 %v1677_v62 }
 0x181   :  { %v3993_v3 = vpop.eup %3992  ;;  %2849 = vst [vmem:[%s5823_s3 + $0x608] sm:$0xff] %v3991_v1  ;;  %v2181_v6 = vadd.f32 %v5147_v43, %v2180_v0  ;;  %4018 = vtanh.f32 %v2189_v2  ;;  %v3399_v9 = vpop.f32.mrb[76].mxu0 }
 0x182   :  { %v3995_v5 = vpop.eup %3994  ;;  %2726 = vst [vmem:[%s5823_s3 + $0x230] sm:$0xff] %v3993_v3  ;;  %v3527_v10 = vpop.f32.mrb[76].mxu1  ;;  %4020 = vtanh.f32 %v1669_v4  ;;  %v1690_v12 = vadd.f32 %v5147_v43, %v3399_v9 }
 0x183   :  { %v3997_v7 = vpop.eup %3996  ;;  %2854 = vst [vmem:[%s5823_s3 + $0x630] sm:$0xff] %v3995_v5  ;;  %v2202_v13 = vadd.f32 %v5147_v43, %v3527_v10  ;;  %v1681_v14 = vpop.f32.mrb[77].mxu0  ;;  %4022 = vtanh.f32 %v2181_v6 }
 0x184   :  { %v3999_v8 = vpop.eup %3998  ;;  %2724 = vst [vmem:[%s5823_s3 + $0x220] sm:$0xff] %v3997_v7  ;;  %v2193_v15 = vpop.f32.mrb[77].mxu1  ;;  %v1682_v17 = vadd.f32 %v5147_v43, %v1681_v14  ;;  %4024 = vtanh.f32 %v1690_v12 }
 0x185   :  { %v4001_v11 = vpop.eup %4000  ;;  %2852 = vst [vmem:[%s5823_s3 + $0x620] sm:$0xff] %v3999_v8  ;;  %v2194_v18 = vadd.f32 %v5147_v43, %v2193_v15  ;;  %v3400_v19 = vpop.f32.mrb[78].mxu0  ;;  %4026 = vtanh.f32 %v2202_v13 }
 0x186   :  { %v4003_v16 = vpop.eup %4002  ;;  %2727 = vst [vmem:[%s5823_s3 + $0x238] sm:$0xff] %v4001_v11  ;;  %v3528_v20 = vpop.f32.mrb[78].mxu1  ;;  %v1693_v22 = vadd.f32 %v5147_v43, %v3400_v19  ;;  %4028 = vtanh.f32 %v1682_v17 }
 0x187   :  { %v4005_v21 = vpop.eup %4004  ;;  %2855 = vst [vmem:[%s5823_s3 + $0x638] sm:$0xff] %v4003_v16  ;;  %v1684_v23 = vpop.f32.mrb[79].mxu0  ;;  %v2205_v26 = vadd.f32 %v5147_v43, %v3528_v20  ;;  %4030 = vtanh.f32 %v2194_v18 }
 0x188   :  { %v2196_v24 = vpop.f32.mrb[79].mxu1  ;;  %v4007_v25 = vpop.eup %4006  ;;  %2725 = vst [vmem:[%s5823_s3 + $0x228] sm:$0xff] %v4005_v21  ;;  %v1685_v28 = vadd.f32 %v5147_v43, %v1684_v23  ;;  %4032 = vtanh.f32 %v1693_v22 }
 0x189   :  { %v4009_v27 = vpop.eup %4008  ;;  %2853 = vst [vmem:[%s5823_s3 + $0x628] sm:$0xff] %v4007_v25  ;;  %v2197_v30 = vadd.f32 %v5147_v43, %v2196_v24  ;;  %4034 = vtanh.f32 %v2205_v26  ;;  %v3403_v33 = vpop.f32.mrb[80].mxu0 }
 0x18a   :  { %v4011_v29 = vpop.eup %4010  ;;  %2730 = vst [vmem:[%s5823_s3 + $0x250] sm:$0xff] %v4009_v27  ;;  %v3531_v34 = vpop.f32.mrb[80].mxu1  ;;  %4036 = vtanh.f32 %v1685_v28  ;;  %v1706_v36 = vadd.f32 %v5147_v43, %v3403_v33 }
 0x18b   :  { %v4013_v31 = vpop.eup %4012  ;;  %2858 = vst [vmem:[%s5823_s3 + $0x650] sm:$0xff] %v4011_v29  ;;  %v2218_v37 = vadd.f32 %v5147_v43, %v3531_v34  ;;  %v1697_v38 = vpop.f32.mrb[81].mxu0  ;;  %4038 = vtanh.f32 %v2197_v30 }
 0x18c   :  { %v4015_v32 = vpop.eup %4014  ;;  %2728 = vst [vmem:[%s5823_s3 + $0x240] sm:$0xff] %v4013_v31  ;;  %v2209_v39 = vpop.f32.mrb[81].mxu1  ;;  %v1698_v41 = vadd.f32 %v5147_v43, %v1697_v38  ;;  %4040 = vtanh.f32 %v1706_v36 }
 0x18d   :  { %v4017_v35 = vpop.eup %4016  ;;  %2856 = vst [vmem:[%s5823_s3 + $0x640] sm:$0xff] %v4015_v32  ;;  %v2210_v42 = vadd.f32 %v5147_v43, %v2209_v39  ;;  %v3404_v44 = vpop.f32.mrb[82].mxu0  ;;  %4042 = vtanh.f32 %v2218_v37 }
 0x18e   :  { %v4019_v40 = vpop.eup %4018  ;;  %2731 = vst [vmem:[%s5823_s3 + $0x258] sm:$0xff] %v4017_v35  ;;  %v3532_v45 = vpop.f32.mrb[82].mxu1  ;;  %v1709_v47 = vadd.f32 %v5147_v43, %v3404_v44  ;;  %4044 = vtanh.f32 %v1698_v41 }
 0x18f   :  { %v4021_v46 = vpop.eup %4020  ;;  %2859 = vst [vmem:[%s5823_s3 + $0x658] sm:$0xff] %v4019_v40  ;;  %v1700_v51 = vpop.f32.mrb[83].mxu0  ;;  %v2221_v50 = vadd.f32 %v5147_v43, %v3532_v45  ;;  %4046 = vtanh.f32 %v2210_v42 }
 0x190   :  { %v2212_v48 = vpop.f32.mrb[83].mxu1  ;;  %v4023_v49 = vpop.eup %4022  ;;  %2729 = vst [vmem:[%s5823_s3 + $0x248] sm:$0xff] %v4021_v46  ;;  %v1701_v53 = vadd.f32 %v5147_v43, %v1700_v51  ;;  %4048 = vtanh.f32 %v1709_v47 }
 0x191   :  { %v4025_v52 = vpop.eup %4024  ;;  %2857 = vst [vmem:[%s5823_s3 + $0x648] sm:$0xff] %v4023_v49  ;;  %v2213_v55 = vadd.f32 %v5147_v43, %v2212_v48  ;;  %4050 = vtanh.f32 %v2221_v50  ;;  %v3407_v58 = vpop.f32.mrb[84].mxu0 }
 0x192   :  { %v4027_v54 = vpop.eup %4026  ;;  %2734 = vst [vmem:[%s5823_s3 + $0x270] sm:$0xff] %v4025_v52  ;;  %v3535_v59 = vpop.f32.mrb[84].mxu1  ;;  %4052 = vtanh.f32 %v1701_v53  ;;  %v1722_v61 = vadd.f32 %v5147_v43, %v3407_v58 }
 0x193   :  { %v4029_v56 = vpop.eup %4028  ;;  %2862 = vst [vmem:[%s5823_s3 + $0x670] sm:$0xff] %v4027_v54  ;;  %v2234_v62 = vadd.f32 %v5147_v43, %v3535_v59  ;;  %v1713_v63 = vpop.f32.mrb[85].mxu0  ;;  %4054 = vtanh.f32 %v2213_v55 }
 0x194   :  { %v4031_v57 = vpop.eup %4030  ;;  %2732 = vst [vmem:[%s5823_s3 + $0x260] sm:$0xff] %v4029_v56  ;;  %v2225_v0 = vpop.f32.mrb[85].mxu1  ;;  %v1714_v2 = vadd.f32 %v5147_v43, %v1713_v63  ;;  %4056 = vtanh.f32 %v1722_v61 }
 0x195   :  { %v4033_v60 = vpop.eup %4032  ;;  %2860 = vst [vmem:[%s5823_s3 + $0x660] sm:$0xff] %v4031_v57  ;;  %v2226_v3 = vadd.f32 %v5147_v43, %v2225_v0  ;;  %v3408_v4 = vpop.f32.mrb[86].mxu0  ;;  %4058 = vtanh.f32 %v2234_v62 }
 0x196   :  { %v4035_v1 = vpop.eup %4034  ;;  %2735 = vst [vmem:[%s5823_s3 + $0x278] sm:$0xff] %v4033_v60  ;;  %v3536_v5 = vpop.f32.mrb[86].mxu1  ;;  %v1725_v7 = vadd.f32 %v5147_v43, %v3408_v4  ;;  %4060 = vtanh.f32 %v1714_v2 }
 0x197   :  { %v4037_v6 = vpop.eup %4036  ;;  %2863 = vst [vmem:[%s5823_s3 + $0x678] sm:$0xff] %v4035_v1  ;;  %v1716_v8 = vpop.f32.mrb[87].mxu0  ;;  %v2237_v11 = vadd.f32 %v5147_v43, %v3536_v5  ;;  %4062 = vtanh.f32 %v2226_v3 }
 0x198   :  { %v2228_v9 = vpop.f32.mrb[87].mxu1  ;;  %v4039_v10 = vpop.eup %4038  ;;  %2733 = vst [vmem:[%s5823_s3 + $0x268] sm:$0xff] %v4037_v6  ;;  %v1717_v13 = vadd.f32 %v5147_v43, %v1716_v8  ;;  %4064 = vtanh.f32 %v1725_v7 }
 0x199   :  { %v4041_v12 = vpop.eup %4040  ;;  %2861 = vst [vmem:[%s5823_s3 + $0x668] sm:$0xff] %v4039_v10  ;;  %v2229_v15 = vadd.f32 %v5147_v43, %v2228_v9  ;;  %4066 = vtanh.f32 %v2237_v11  ;;  %v3411_v18 = vpop.f32.mrb[88].mxu0 }
 0x19a   :  { %v4043_v14 = vpop.eup %4042  ;;  %2738 = vst [vmem:[%s5823_s3 + $0x290] sm:$0xff] %v4041_v12  ;;  %v3539_v19 = vpop.f32.mrb[88].mxu1  ;;  %4068 = vtanh.f32 %v1717_v13  ;;  %v1738_v21 = vadd.f32 %v5147_v43, %v3411_v18 }
 0x19b   :  { %v4045_v16 = vpop.eup %4044  ;;  %2866 = vst [vmem:[%s5823_s3 + $0x690] sm:$0xff] %v4043_v14  ;;  %v2250_v22 = vadd.f32 %v5147_v43, %v3539_v19  ;;  %v1729_v23 = vpop.f32.mrb[89].mxu0  ;;  %4070 = vtanh.f32 %v2229_v15 }
 0x19c   :  { %v4047_v17 = vpop.eup %4046  ;;  %2736 = vst [vmem:[%s5823_s3 + $0x280] sm:$0xff] %v4045_v16  ;;  %v2241_v24 = vpop.f32.mrb[89].mxu1  ;;  %v1730_v26 = vadd.f32 %v5147_v43, %v1729_v23  ;;  %4072 = vtanh.f32 %v1738_v21 }
 0x19d   :  { %v4049_v20 = vpop.eup %4048  ;;  %2864 = vst [vmem:[%s5823_s3 + $0x680] sm:$0xff] %v4047_v17  ;;  %v2242_v27 = vadd.f32 %v5147_v43, %v2241_v24  ;;  %v3412_v28 = vpop.f32.mrb[90].mxu0  ;;  %4074 = vtanh.f32 %v2250_v22 }
 0x19e   :  { %v4051_v25 = vpop.eup %4050  ;;  %2739 = vst [vmem:[%s5823_s3 + $0x298] sm:$0xff] %v4049_v20  ;;  %v3540_v29 = vpop.f32.mrb[90].mxu1  ;;  %v1741_v31 = vadd.f32 %v5147_v43, %v3412_v28  ;;  %4076 = vtanh.f32 %v1730_v26 }
 0x19f   :  { %v4053_v30 = vpop.eup %4052  ;;  %2867 = vst [vmem:[%s5823_s3 + $0x698] sm:$0xff] %v4051_v25  ;;  %v1732_v32 = vpop.f32.mrb[91].mxu0  ;;  %v2253_v35 = vadd.f32 %v5147_v43, %v3540_v29  ;;  %4078 = vtanh.f32 %v2242_v27 }
 0x1a0   :  { %v2244_v33 = vpop.f32.mrb[91].mxu1  ;;  %v4055_v34 = vpop.eup %4054  ;;  %2737 = vst [vmem:[%s5823_s3 + $0x288] sm:$0xff] %v4053_v30  ;;  %v1733_v37 = vadd.f32 %v5147_v43, %v1732_v32  ;;  %4080 = vtanh.f32 %v1741_v31 }
 0x1a1   :  { %v4057_v36 = vpop.eup %4056  ;;  %2865 = vst [vmem:[%s5823_s3 + $0x688] sm:$0xff] %v4055_v34  ;;  %v2245_v39 = vadd.f32 %v5147_v43, %v2244_v33  ;;  %4082 = vtanh.f32 %v2253_v35  ;;  %v3415_v42 = vpop.f32.mrb[92].mxu0  ;;  %v5563_v35 = vld [vmem:[%s5822_s2] ss:$0 sm:$0xff] }
 0x1a2   :  { %v4059_v38 = vpop.eup %4058  ;;  %2742 = vst [vmem:[%s5823_s3 + $0x2b0] sm:$0xff] %v4057_v36  ;;  %v3543_v44 = vpop.f32.mrb[92].mxu1  ;;  %4084 = vtanh.f32 %v1733_v37  ;;  %v1754_v46 = vadd.f32 %v5147_v43, %v3415_v42 }
 0x1a3   :  { %v4061_v40 = vpop.eup %4060  ;;  %2870 = vst [vmem:[%s5823_s3 + $0x6b0] sm:$0xff] %v4059_v38  ;;  %v2266_v47 = vadd.f32 %v5147_v43, %v3543_v44  ;;  %v1745_v51 = vpop.f32.mrb[93].mxu0  ;;  %4086 = vtanh.f32 %v2245_v39 }
 0x1a4   :  { %v4063_v41 = vpop.eup %4062  ;;  %2740 = vst [vmem:[%s5823_s3 + $0x2a0] sm:$0xff] %v4061_v40  ;;  %v2257_v48 = vpop.f32.mrb[93].mxu1  ;;  %v1746_v50 = vadd.f32 %v5147_v43, %v1745_v51  ;;  %4088 = vtanh.f32 %v1754_v46 }
 0x1a5   :  { %v4065_v45 = vpop.eup %4064  ;;  %2868 = vst [vmem:[%s5823_s3 + $0x6a0] sm:$0xff] %v4063_v41  ;;  %v2258_v52 = vadd.f32 %v5147_v43, %v2257_v48  ;;  %v3416_v53 = vpop.f32.mrb[94].mxu0  ;;  %4090 = vtanh.f32 %v2266_v47 }
 0x1a6   :  { %v4067_v49 = vpop.eup %4066  ;;  %2743 = vst [vmem:[%s5823_s3 + $0x2b8] sm:$0xff] %v4065_v45  ;;  %v3544_v54 = vpop.f32.mrb[94].mxu1  ;;  %v1757_v56 = vadd.f32 %v5147_v43, %v3416_v53  ;;  %4092 = vtanh.f32 %v1746_v50 }
 0x1a7   :  { %v4069_v55 = vpop.eup %4068  ;;  %2871 = vst [vmem:[%s5823_s3 + $0x6b8] sm:$0xff] %v4067_v49  ;;  %v1748_v57 = vpop.f32.mrb[95].mxu0  ;;  %v2269_v60 = vadd.f32 %v5147_v43, %v3544_v54  ;;  %4094 = vtanh.f32 %v2258_v52 }
 0x1a8   :  { %v2260_v58 = vpop.f32.mrb[95].mxu1  ;;  %v4071_v59 = vpop.eup %4070  ;;  %2741 = vst [vmem:[%s5823_s3 + $0x2a8] sm:$0xff] %v4069_v55  ;;  %v1749_v62 = vadd.f32 %v5147_v43, %v1748_v57  ;;  %4096 = vtanh.f32 %v1757_v56 }
 0x1a9   :  { %v4073_v61 = vpop.eup %4072  ;;  %2869 = vst [vmem:[%s5823_s3 + $0x6a8] sm:$0xff] %v4071_v59  ;;  %v2261_v0 = vadd.f32 %v5147_v43, %v2260_v58  ;;  %4098 = vtanh.f32 %v2269_v60  ;;  %v3419_v3 = vpop.f32.mrb[96].mxu0 }
 0x1aa   :  { %v4075_v63 = vpop.eup %4074  ;;  %2746 = vst [vmem:[%s5823_s3 + $0x2d0] sm:$0xff] %v4073_v61  ;;  %v3547_v4 = vpop.f32.mrb[96].mxu1  ;;  %4100 = vtanh.f32 %v1749_v62  ;;  %v1770_v6 = vadd.f32 %v5147_v43, %v3419_v3 }
 0x1ab   :  { %v4077_v1 = vpop.eup %4076  ;;  %2874 = vst [vmem:[%s5823_s3 + $0x6d0] sm:$0xff] %v4075_v63  ;;  %v2282_v7 = vadd.f32 %v5147_v43, %v3547_v4  ;;  %v1761_v8 = vpop.f32.mrb[97].mxu0  ;;  %4102 = vtanh.f32 %v2261_v0 }
 0x1ac   :  { %v4079_v2 = vpop.eup %4078  ;;  %2744 = vst [vmem:[%s5823_s3 + $0x2c0] sm:$0xff] %v4077_v1  ;;  %v2273_v9 = vpop.f32.mrb[97].mxu1  ;;  %v1762_v11 = vadd.f32 %v5147_v43, %v1761_v8  ;;  %4104 = vtanh.f32 %v1770_v6 }
 0x1ad   :  { %v4081_v5 = vpop.eup %4080  ;;  %2872 = vst [vmem:[%s5823_s3 + $0x6c0] sm:$0xff] %v4079_v2  ;;  %v2274_v12 = vadd.f32 %v5147_v43, %v2273_v9  ;;  %v3420_v13 = vpop.f32.mrb[98].mxu0  ;;  %4106 = vtanh.f32 %v2282_v7 }
 0x1ae   :  { %v4083_v10 = vpop.eup %4082  ;;  %2747 = vst [vmem:[%s5823_s3 + $0x2d8] sm:$0xff] %v4081_v5  ;;  %v3548_v14 = vpop.f32.mrb[98].mxu1  ;;  %v1773_v16 = vadd.f32 %v5147_v43, %v3420_v13  ;;  %4108 = vtanh.f32 %v1762_v11 }
 0x1af   :  { %v4085_v15 = vpop.eup %4084  ;;  %2875 = vst [vmem:[%s5823_s3 + $0x6d8] sm:$0xff] %v4083_v10  ;;  %v1764_v17 = vpop.f32.mrb[99].mxu0  ;;  %v2285_v20 = vadd.f32 %v5147_v43, %v3548_v14  ;;  %4110 = vtanh.f32 %v2274_v12 }
 0x1b0   :  { %v2276_v18 = vpop.f32.mrb[99].mxu1  ;;  %v4087_v19 = vpop.eup %4086  ;;  %2745 = vst [vmem:[%s5823_s3 + $0x2c8] sm:$0xff] %v4085_v15  ;;  %v1765_v22 = vadd.f32 %v5147_v43, %v1764_v17  ;;  %4112 = vtanh.f32 %v1773_v16 }
 0x1b1   :  { %v4089_v21 = vpop.eup %4088  ;;  %2873 = vst [vmem:[%s5823_s3 + $0x6c8] sm:$0xff] %v4087_v19  ;;  %v2277_v24 = vadd.f32 %v5147_v43, %v2276_v18  ;;  %4114 = vtanh.f32 %v2285_v20  ;;  %v3423_v27 = vpop.f32.mrb[100].mxu0 }
 0x1b2   :  { %v4091_v23 = vpop.eup %4090  ;;  %2750 = vst [vmem:[%s5823_s3 + $0x2f0] sm:$0xff] %v4089_v21  ;;  %v3551_v28 = vpop.f32.mrb[100].mxu1  ;;  %4116 = vtanh.f32 %v1765_v22  ;;  %v1786_v30 = vadd.f32 %v5147_v43, %v3423_v27 }
 0x1b3   :  { %v4093_v25 = vpop.eup %4092  ;;  %2878 = vst [vmem:[%s5823_s3 + $0x6f0] sm:$0xff] %v4091_v23  ;;  %v2298_v31 = vadd.f32 %v5147_v43, %v3551_v28  ;;  %v1777_v32 = vpop.f32.mrb[101].mxu0  ;;  %4118 = vtanh.f32 %v2277_v24 }
 0x1b4   :  { %v4095_v26 = vpop.eup %4094  ;;  %2748 = vst [vmem:[%s5823_s3 + $0x2e0] sm:$0xff] %v4093_v25  ;;  %v2289_v33 = vpop.f32.mrb[101].mxu1  ;;  %v1778_v36 = vadd.f32 %v5563_v35, %v1777_v32  ;;  %4120 = vtanh.f32 %v1786_v30 }
 0x1b5   :  { %v4097_v29 = vpop.eup %4096  ;;  %2876 = vst [vmem:[%s5823_s3 + $0x6e0] sm:$0xff] %v4095_v26  ;;  %v2290_v37 = vadd.f32 %v5563_v35, %v2289_v33  ;;  %v3424_v38 = vpop.f32.mrb[102].mxu0  ;;  %4122 = vtanh.f32 %v2298_v31 }
 0x1b6   :  { %v4099_v34 = vpop.eup %4098  ;;  %2751 = vst [vmem:[%s5823_s3 + $0x2f8] sm:$0xff] %v4097_v29  ;;  %v3552_v39 = vpop.f32.mrb[102].mxu1  ;;  %v1789_v40 = vadd.f32 %v5563_v35, %v3424_v38  ;;  %4124 = vtanh.f32 %v1778_v36 }
 0x1b7   :  { %v4101_v43 = vpop.eup %4100  ;;  %2879 = vst [vmem:[%s5823_s3 + $0x6f8] sm:$0xff] %v4099_v34  ;;  %v1780_v41 = vpop.f32.mrb[103].mxu0  ;;  %v2301_v45 = vadd.f32 %v5563_v35, %v3552_v39  ;;  %4126 = vtanh.f32 %v2290_v37 }
 0x1b8   :  { %v2292_v42 = vpop.f32.mrb[103].mxu1  ;;  %v4103_v44 = vpop.eup %4102  ;;  %2749 = vst [vmem:[%s5823_s3 + $0x2e8] sm:$0xff] %v4101_v43  ;;  %v1781_v47 = vadd.f32 %v5563_v35, %v1780_v41  ;;  %4128 = vtanh.f32 %v1789_v40 }
 0x1b9   :  { %v4105_v46 = vpop.eup %4104  ;;  %2877 = vst [vmem:[%s5823_s3 + $0x6e8] sm:$0xff] %v4103_v44  ;;  %v2293_v48 = vadd.f32 %v5563_v35, %v2292_v42  ;;  %4130 = vtanh.f32 %v2301_v45  ;;  %v3427_v52 = vpop.f32.mrb[104].mxu0 }
 0x1ba   :  { %v4107_v51 = vpop.eup %4106  ;;  %2754 = vst [vmem:[%s5823_s3 + $0x310] sm:$0xff] %v4105_v46  ;;  %v3555_v53 = vpop.f32.mrb[104].mxu1  ;;  %4132 = vtanh.f32 %v1781_v47  ;;  %v1802_v55 = vadd.f32 %v5563_v35, %v3427_v52 }
 0x1bb   :  { %v4109_v49 = vpop.eup %4108  ;;  %2882 = vst [vmem:[%s5823_s3 + $0x710] sm:$0xff] %v4107_v51  ;;  %v2314_v56 = vadd.f32 %v5563_v35, %v3555_v53  ;;  %v1793_v57 = vpop.f32.mrb[105].mxu0  ;;  %4134 = vtanh.f32 %v2293_v48 }
 0x1bc   :  { %v4111_v50 = vpop.eup %4110  ;;  %2752 = vst [vmem:[%s5823_s3 + $0x300] sm:$0xff] %v4109_v49  ;;  %v2305_v58 = vpop.f32.mrb[105].mxu1  ;;  %v1794_v60 = vadd.f32 %v5563_v35, %v1793_v57  ;;  %4136 = vtanh.f32 %v1802_v55 }
 0x1bd   :  { %v4113_v54 = vpop.eup %4112  ;;  %2880 = vst [vmem:[%s5823_s3 + $0x700] sm:$0xff] %v4111_v50  ;;  %v2306_v61 = vadd.f32 %v5563_v35, %v2305_v58  ;;  %v3428_v62 = vpop.f32.mrb[106].mxu0  ;;  %4138 = vtanh.f32 %v2314_v56 }
 0x1be   :  { %v4115_v59 = vpop.eup %4114  ;;  %2755 = vst [vmem:[%s5823_s3 + $0x318] sm:$0xff] %v4113_v54  ;;  %v3556_v63 = vpop.f32.mrb[106].mxu1  ;;  %v1805_v1 = vadd.f32 %v5563_v35, %v3428_v62  ;;  %4140 = vtanh.f32 %v1794_v60 }
 0x1bf   :  { %v4117_v0 = vpop.eup %4116  ;;  %2883 = vst [vmem:[%s5823_s3 + $0x718] sm:$0xff] %v4115_v59  ;;  %v1796_v2 = vpop.f32.mrb[107].mxu0  ;;  %v2317_v5 = vadd.f32 %v5563_v35, %v3556_v63  ;;  %4142 = vtanh.f32 %v2306_v61 }
 0x1c0   :  { %v2308_v3 = vpop.f32.mrb[107].mxu1  ;;  %v4119_v4 = vpop.eup %4118  ;;  %2753 = vst [vmem:[%s5823_s3 + $0x308] sm:$0xff] %v4117_v0  ;;  %v1797_v7 = vadd.f32 %v5563_v35, %v1796_v2  ;;  %4144 = vtanh.f32 %v1805_v1 }
 0x1c1   :  { %v4121_v6 = vpop.eup %4120  ;;  %2881 = vst [vmem:[%s5823_s3 + $0x708] sm:$0xff] %v4119_v4  ;;  %v2309_v9 = vadd.f32 %v5563_v35, %v2308_v3  ;;  %4146 = vtanh.f32 %v2317_v5  ;;  %v3431_v12 = vpop.f32.mrb[108].mxu0 }
 0x1c2   :  { %v4123_v8 = vpop.eup %4122  ;;  %2758 = vst [vmem:[%s5823_s3 + $0x330] sm:$0xff] %v4121_v6  ;;  %v3559_v13 = vpop.f32.mrb[108].mxu1  ;;  %4148 = vtanh.f32 %v1797_v7  ;;  %v1818_v15 = vadd.f32 %v5563_v35, %v3431_v12 }
 0x1c3   :  { %v4125_v10 = vpop.eup %4124  ;;  %2886 = vst [vmem:[%s5823_s3 + $0x730] sm:$0xff] %v4123_v8  ;;  %v2330_v16 = vadd.f32 %v5563_v35, %v3559_v13  ;;  %v1809_v17 = vpop.f32.mrb[109].mxu0  ;;  %4150 = vtanh.f32 %v2309_v9 }
 0x1c4   :  { %v4127_v11 = vpop.eup %4126  ;;  %2756 = vst [vmem:[%s5823_s3 + $0x320] sm:$0xff] %v4125_v10  ;;  %v2321_v18 = vpop.f32.mrb[109].mxu1  ;;  %v1810_v20 = vadd.f32 %v5563_v35, %v1809_v17  ;;  %4152 = vtanh.f32 %v1818_v15 }
 0x1c5   :  { %v4129_v14 = vpop.eup %4128  ;;  %2884 = vst [vmem:[%s5823_s3 + $0x720] sm:$0xff] %v4127_v11  ;;  %v2322_v21 = vadd.f32 %v5563_v35, %v2321_v18  ;;  %v3432_v22 = vpop.f32.mrb[110].mxu0  ;;  %4154 = vtanh.f32 %v2330_v16 }
 0x1c6   :  { %v4131_v19 = vpop.eup %4130  ;;  %2759 = vst [vmem:[%s5823_s3 + $0x338] sm:$0xff] %v4129_v14  ;;  %v3560_v23 = vpop.f32.mrb[110].mxu1  ;;  %v1821_v25 = vadd.f32 %v5563_v35, %v3432_v22  ;;  %4156 = vtanh.f32 %v1810_v20 }
 0x1c7   :  { %v4133_v24 = vpop.eup %4132  ;;  %2887 = vst [vmem:[%s5823_s3 + $0x738] sm:$0xff] %v4131_v19  ;;  %v1812_v26 = vpop.f32.mrb[111].mxu0  ;;  %v2333_v29 = vadd.f32 %v5563_v35, %v3560_v23  ;;  %4158 = vtanh.f32 %v2322_v21 }
 0x1c8   :  { %v2324_v27 = vpop.f32.mrb[111].mxu1  ;;  %v4135_v28 = vpop.eup %4134  ;;  %2757 = vst [vmem:[%s5823_s3 + $0x328] sm:$0xff] %v4133_v24  ;;  %v1813_v31 = vadd.f32 %v5563_v35, %v1812_v26  ;;  %4160 = vtanh.f32 %v1821_v25 }
 0x1c9   :  { %v4137_v30 = vpop.eup %4136  ;;  %2885 = vst [vmem:[%s5823_s3 + $0x728] sm:$0xff] %v4135_v28  ;;  %v2325_v33 = vadd.f32 %v5563_v35, %v2324_v27  ;;  %4162 = vtanh.f32 %v2333_v29  ;;  %v3435_v37 = vpop.f32.mrb[112].mxu0 }
 0x1ca   :  { %v4139_v32 = vpop.eup %4138  ;;  %2762 = vst [vmem:[%s5823_s3 + $0x350] sm:$0xff] %v4137_v30  ;;  %v3563_v38 = vpop.f32.mrb[112].mxu1  ;;  %4164 = vtanh.f32 %v1813_v31  ;;  %v1834_v43 = vadd.f32 %v5563_v35, %v3435_v37 }
 0x1cb   :  { %v4141_v34 = vpop.eup %4140  ;;  %2890 = vst [vmem:[%s5823_s3 + $0x750] sm:$0xff] %v4139_v32  ;;  %v2346_v40 = vadd.f32 %v5563_v35, %v3563_v38  ;;  %v1825_v41 = vpop.f32.mrb[113].mxu0  ;;  %4166 = vtanh.f32 %v2325_v33 }
 0x1cc   :  { %v4143_v36 = vpop.eup %4142  ;;  %2760 = vst [vmem:[%s5823_s3 + $0x340] sm:$0xff] %v4141_v34  ;;  %v2337_v42 = vpop.f32.mrb[113].mxu1  ;;  %v1826_v45 = vadd.f32 %v5563_v35, %v1825_v41  ;;  %4168 = vtanh.f32 %v1834_v43 }
 0x1cd   :  { %v4145_v39 = vpop.eup %4144  ;;  %2888 = vst [vmem:[%s5823_s3 + $0x740] sm:$0xff] %v4143_v36  ;;  %v2338_v46 = vadd.f32 %v5563_v35, %v2337_v42  ;;  %v3436_v47 = vpop.f32.mrb[114].mxu0  ;;  %4170 = vtanh.f32 %v2346_v40 }
 0x1ce   :  { %v4147_v44 = vpop.eup %4146  ;;  %2763 = vst [vmem:[%s5823_s3 + $0x358] sm:$0xff] %v4145_v39  ;;  %v3564_v51 = vpop.f32.mrb[114].mxu1  ;;  %v1837_v49 = vadd.f32 %v5563_v35, %v3436_v47  ;;  %4172 = vtanh.f32 %v1826_v45 }
 0x1cf   :  { %v4149_v48 = vpop.eup %4148  ;;  %2891 = vst [vmem:[%s5823_s3 + $0x758] sm:$0xff] %v4147_v44  ;;  %v1828_v50 = vpop.f32.mrb[115].mxu0  ;;  %v2349_v54 = vadd.f32 %v5563_v35, %v3564_v51  ;;  %4174 = vtanh.f32 %v2338_v46 }
 0x1d0   :  { %v2340_v52 = vpop.f32.mrb[115].mxu1  ;;  %v4151_v53 = vpop.eup %4150  ;;  %2761 = vst [vmem:[%s5823_s3 + $0x348] sm:$0xff] %v4149_v48  ;;  %v1829_v56 = vadd.f32 %v5563_v35, %v1828_v50  ;;  %4176 = vtanh.f32 %v1837_v49 }
 0x1d1   :  { %v4153_v55 = vpop.eup %4152  ;;  %2889 = vst [vmem:[%s5823_s3 + $0x748] sm:$0xff] %v4151_v53  ;;  %v2341_v58 = vadd.f32 %v5563_v35, %v2340_v52  ;;  %4178 = vtanh.f32 %v2349_v54  ;;  %v3439_v61 = vpop.f32.mrb[116].mxu0 }
 0x1d2   :  { %v4155_v57 = vpop.eup %4154  ;;  %2766 = vst [vmem:[%s5823_s3 + $0x370] sm:$0xff] %v4153_v55  ;;  %v3567_v62 = vpop.f32.mrb[116].mxu1  ;;  %4180 = vtanh.f32 %v1829_v56  ;;  %v1850_v0 = vadd.f32 %v5563_v35, %v3439_v61 }
 0x1d3   :  { %v4157_v59 = vpop.eup %4156  ;;  %2894 = vst [vmem:[%s5823_s3 + $0x770] sm:$0xff] %v4155_v57  ;;  %v2362_v1 = vadd.f32 %v5563_v35, %v3567_v62  ;;  %v1841_v2 = vpop.f32.mrb[117].mxu0  ;;  %4182 = vtanh.f32 %v2341_v58 }
 0x1d4   :  { %v4159_v60 = vpop.eup %4158  ;;  %2764 = vst [vmem:[%s5823_s3 + $0x360] sm:$0xff] %v4157_v59  ;;  %v2353_v3 = vpop.f32.mrb[117].mxu1  ;;  %v1842_v5 = vadd.f32 %v5563_v35, %v1841_v2  ;;  %4184 = vtanh.f32 %v1850_v0 }
 0x1d5   :  { %v4161_v63 = vpop.eup %4160  ;;  %2892 = vst [vmem:[%s5823_s3 + $0x760] sm:$0xff] %v4159_v60  ;;  %v2354_v6 = vadd.f32 %v5563_v35, %v2353_v3  ;;  %v3440_v7 = vpop.f32.mrb[118].mxu0  ;;  %4186 = vtanh.f32 %v2362_v1 }
 0x1d6   :  { %v4163_v4 = vpop.eup %4162  ;;  %2767 = vst [vmem:[%s5823_s3 + $0x378] sm:$0xff] %v4161_v63  ;;  %v3568_v8 = vpop.f32.mrb[118].mxu1  ;;  %v1853_v10 = vadd.f32 %v5563_v35, %v3440_v7  ;;  %4188 = vtanh.f32 %v1842_v5 }
 0x1d7   :  { %v4165_v9 = vpop.eup %4164  ;;  %2895 = vst [vmem:[%s5823_s3 + $0x778] sm:$0xff] %v4163_v4  ;;  %v1844_v11 = vpop.f32.mrb[119].mxu0  ;;  %v2365_v14 = vadd.f32 %v5563_v35, %v3568_v8  ;;  %4190 = vtanh.f32 %v2354_v6 }
 0x1d8   :  { %v2356_v12 = vpop.f32.mrb[119].mxu1  ;;  %v4167_v13 = vpop.eup %4166  ;;  %2765 = vst [vmem:[%s5823_s3 + $0x368] sm:$0xff] %v4165_v9  ;;  %v1845_v16 = vadd.f32 %v5563_v35, %v1844_v11  ;;  %4192 = vtanh.f32 %v1853_v10 }
 0x1d9   :  { %v4169_v15 = vpop.eup %4168  ;;  %2893 = vst [vmem:[%s5823_s3 + $0x768] sm:$0xff] %v4167_v13  ;;  %v2357_v18 = vadd.f32 %v5563_v35, %v2356_v12  ;;  %4194 = vtanh.f32 %v2365_v14  ;;  %v3443_v21 = vpop.f32.mrb[120].mxu0 }
 0x1da   :  { %v4171_v17 = vpop.eup %4170  ;;  %2770 = vst [vmem:[%s5823_s3 + $0x390] sm:$0xff] %v4169_v15  ;;  %v3571_v22 = vpop.f32.mrb[120].mxu1  ;;  %4196 = vtanh.f32 %v1845_v16  ;;  %v1866_v24 = vadd.f32 %v5563_v35, %v3443_v21 }
 0x1db   :  { %v4173_v19 = vpop.eup %4172  ;;  %2898 = vst [vmem:[%s5823_s3 + $0x790] sm:$0xff] %v4171_v17  ;;  %v2378_v25 = vadd.f32 %v5563_v35, %v3571_v22  ;;  %v1857_v26 = vpop.f32.mrb[121].mxu0  ;;  %4198 = vtanh.f32 %v2357_v18 }
 0x1dc   :  { %v4175_v20 = vpop.eup %4174  ;;  %2768 = vst [vmem:[%s5823_s3 + $0x380] sm:$0xff] %v4173_v19  ;;  %v2369_v27 = vpop.f32.mrb[121].mxu1  ;;  %v1858_v29 = vadd.f32 %v5563_v35, %v1857_v26  ;;  %4200 = vtanh.f32 %v1866_v24 }
 0x1dd   :  { %v4177_v23 = vpop.eup %4176  ;;  %2896 = vst [vmem:[%s5823_s3 + $0x780] sm:$0xff] %v4175_v20  ;;  %v2370_v30 = vadd.f32 %v5563_v35, %v2369_v27  ;;  %v3444_v31 = vpop.f32.mrb[122].mxu0  ;;  %4202 = vtanh.f32 %v2378_v25 }
 0x1de   :  { %v4179_v28 = vpop.eup %4178  ;;  %2771 = vst [vmem:[%s5823_s3 + $0x398] sm:$0xff] %v4177_v23  ;;  %v3572_v32 = vpop.f32.mrb[122].mxu1  ;;  %v1869_v34 = vadd.f32 %v5563_v35, %v3444_v31  ;;  %4204 = vtanh.f32 %v1858_v29 }
 0x1df   :  { %v4181_v33 = vpop.eup %4180  ;;  %2899 = vst [vmem:[%s5823_s3 + $0x798] sm:$0xff] %v4179_v28  ;;  %v1860_v36 = vpop.f32.mrb[123].mxu0  ;;  %v2381_v39 = vadd.f32 %v5563_v35, %v3572_v32  ;;  %4206 = vtanh.f32 %v2370_v30 }
 0x1e0   :  { %v2372_v37 = vpop.f32.mrb[123].mxu1  ;;  %v4183_v38 = vpop.eup %4182  ;;  %2769 = vst [vmem:[%s5823_s3 + $0x388] sm:$0xff] %v4181_v33  ;;  %v1861_v40 = vadd.f32 %v5563_v35, %v1860_v36  ;;  %4208 = vtanh.f32 %v1869_v34 }
 0x1e1   :  { %v4185_v43 = vpop.eup %4184  ;;  %2897 = vst [vmem:[%s5823_s3 + $0x788] sm:$0xff] %v4183_v38  ;;  %v2373_v42 = vadd.f32 %v5563_v35, %v2372_v37  ;;  %4210 = vtanh.f32 %v2381_v39  ;;  %v3447_v46 = vpop.f32.mrb[124].mxu0 }
 0x1e2   :  { %v4187_v41 = vpop.eup %4186  ;;  %2774 = vst [vmem:[%s5823_s3 + $0x3b0] sm:$0xff] %v4185_v43  ;;  %v3575_v47 = vpop.f32.mrb[124].mxu1  ;;  %4212 = vtanh.f32 %v1861_v40  ;;  %v1882_v48 = vadd.f32 %v5563_v35, %v3447_v46 }
 0x1e3   :  { %v4189_v44 = vpop.eup %4188  ;;  %2902 = vst [vmem:[%s5823_s3 + $0x7b0] sm:$0xff] %v4187_v41  ;;  %v2394_v49 = vadd.f32 %v5563_v35, %v3575_v47  ;;  %v1873_v50 = vpop.f32.mrb[125].mxu0  ;;  %4214 = vtanh.f32 %v2373_v42 }
 0x1e4   :  { %v4191_v45 = vpop.eup %4190  ;;  %2772 = vst [vmem:[%s5823_s3 + $0x3a0] sm:$0xff] %v4189_v44  ;;  %v2385_v52 = vpop.f32.mrb[125].mxu1  ;;  %v1874_v54 = vadd.f32 %v5563_v35, %v1873_v50  ;;  %4216 = vtanh.f32 %v1882_v48 }
 0x1e5   :  { %v4193_v51 = vpop.eup %4192  ;;  %2900 = vst [vmem:[%s5823_s3 + $0x7a0] sm:$0xff] %v4191_v45  ;;  %v2386_v55 = vadd.f32 %v5563_v35, %v2385_v52  ;;  %v3448_v56 = vpop.f32.mrb[126].mxu0  ;;  %4218 = vtanh.f32 %v2394_v49 }
 0x1e6   :  { %v4195_v53 = vpop.eup %4194  ;;  %2775 = vst [vmem:[%s5823_s3 + $0x3b8] sm:$0xff] %v4193_v51  ;;  %v3576_v57 = vpop.f32.mrb[126].mxu1  ;;  %v1885_v59 = vadd.f32 %v5563_v35, %v3448_v56  ;;  %4220 = vtanh.f32 %v1874_v54 }
 0x1e7   :  { %v4197_v58 = vpop.eup %4196  ;;  %2903 = vst [vmem:[%s5823_s3 + $0x7b8] sm:$0xff] %v4195_v53  ;;  %v1876_v60 = vpop.f32.mrb[127].mxu0  ;;  %v2397_v63 = vadd.f32 %v5563_v35, %v3576_v57  ;;  %4222 = vtanh.f32 %v2386_v55 }
 0x1e8   :  { %v2388_v61 = vpop.f32.mrb[127].mxu1  ;;  %v4199_v62 = vpop.eup %4198  ;;  %2773 = vst [vmem:[%s5823_s3 + $0x3a8] sm:$0xff] %v4197_v58  ;;  %v1877_v1 = vadd.f32 %v5563_v35, %v1876_v60  ;;  %4224 = vtanh.f32 %v1885_v59 }
 0x1e9   :  { %v4201_v0 = vpop.eup %4200  ;;  %2901 = vst [vmem:[%s5823_s3 + $0x7a8] sm:$0xff] %v4199_v62  ;;  %v2389_v3 = vadd.f32 %v5563_v35, %v2388_v61  ;;  %4226 = vtanh.f32 %v2397_v63 }
 0x1ea   :  { %v4203_v2 = vpop.eup %4202  ;;  %2778 = vst [vmem:[%s5823_s3 + $0x3d0] sm:$0xff] %v4201_v0  ;;  %4228 = vtanh.f32 %v1877_v1 }
 0x1eb   :  { %v4205_v4 = vpop.eup %4204  ;;  %2906 = vst [vmem:[%s5823_s3 + $0x7d0] sm:$0xff] %v4203_v2  ;;  %4230 = vtanh.f32 %v2389_v3 }
 0x1ec   :  { %v4207_v5 = vpop.eup %4206  ;;  %2776 = vst [vmem:[%s5823_s3 + $0x3c0] sm:$0xff] %v4205_v4 }
 0x1ed   :  { %v4209_v6 = vpop.eup %4208  ;;  %2904 = vst [vmem:[%s5823_s3 + $0x7c0] sm:$0xff] %v4207_v5 }
 0x1ee   :  { %v4211_v7 = vpop.eup %4210  ;;  %2779 = vst [vmem:[%s5823_s3 + $0x3d8] sm:$0xff] %v4209_v6 }
 0x1ef   :  { %v4213_v35 = vpop.eup %4212  ;;  %2907 = vst [vmem:[%s5823_s3 + $0x7d8] sm:$0xff] %v4211_v7 }
 0x1f0   :  { %v4215_v8 = vpop.eup %4214  ;;  %2777 = vst [vmem:[%s5823_s3 + $0x3c8] sm:$0xff] %v4213_v35 }
 0x1f1   :  { %v4217_v9 = vpop.eup %4216  ;;  %2905 = vst [vmem:[%s5823_s3 + $0x7c8] sm:$0xff] %v4215_v8 }
 0x1f2   :  { %v4219_v10 = vpop.eup %4218  ;;  %2782 = vst [vmem:[%s5823_s3 + $0x3f0] sm:$0xff] %v4217_v9 }
 0x1f3   :  { %v4221_v11 = vpop.eup %4220  ;;  %2910 = vst [vmem:[%s5823_s3 + $0x7f0] sm:$0xff] %v4219_v10 }
 0x1f4   :  { %v4223_v12 = vpop.eup %4222  ;;  %2780 = vst [vmem:[%s5823_s3 + $0x3e0] sm:$0xff] %v4221_v11 }
 0x1f5   :  { %v4225_v13 = vpop.eup %4224  ;;  %2908 = vst [vmem:[%s5823_s3 + $0x7e0] sm:$0xff] %v4223_v12 }
 0x1f6   :  { %v4227_v14 = vpop.eup %4226  ;;  %2783 = vst [vmem:[%s5823_s3 + $0x3f8] sm:$0xff] %v4225_v13 }
 0x1f7   :  { %v4229_v15 = vpop.eup %4228  ;;  %2911 = vst [vmem:[%s5823_s3 + $0x7f8] sm:$0xff] %v4227_v14 }
 0x1f8   :  { %v4231_v16 = vpop.eup %4230  ;;  %2781 = vst [vmem:[%s5823_s3 + $0x3e8] sm:$0xff] %v4229_v15 }
 0x1f9   :  { %2909 = vst [vmem:[%s5823_s3 + $0x7e8] sm:$0xff] %v4231_v16 }

</bundles_post_ra>
